<compile_context>
chip_gen: v7x
topology: tpu7x:2x2x1
jax: 0.10.0
libtpu: 0.0.40
codegen_flags: <defaults>
</compile_context>

<pallas_src>
import functools

import jax
import jax.numpy as jnp
from jax.experimental import pallas as pl
from jax.experimental.pallas import tpu as pltpu

LANE = 128


def _round_up(x, m):
    return (x + m - 1) // m * m


def _pad_last(a, mult):
    n = a.shape[-1]
    npad = _round_up(n, mult)
    if npad == n:
        return a
    pad = [(0, 0)] * (a.ndim - 1) + [(0, npad - n)]
    return jnp.pad(a, pad)


# ---------------------------------------------------------------------------
# Pallas kernel: out = act(A @ W + b)   (N already padded to a multiple of 128)
# ---------------------------------------------------------------------------
def _mm_bias_act_kernel(a_ref, w_ref, b_ref, o_ref, *, relu):
    acc = jnp.dot(a_ref[...], w_ref[...], preferred_element_type=jnp.float32)
    acc = acc + b_ref[...]
    if relu:
        acc = jnp.maximum(acc, 0.0)
    o_ref[...] = acc.astype(o_ref.dtype)


def _choose_m_tiling(M):
    """Large M blocks (<= ~1024 rows) with an even block count (>=2) when there
    is enough work, so both v7x TensorCores stay busy; one block otherwise."""
    if M <= 8:
        return 8, 1
    nblk = max(2, 2 * ((M + 2047) // 2048))
    tm = _round_up(-(-M // nblk), 8)     # ceil(M/nblk) rounded to sublane mult
    nblk = -(-M // tm)                   # actual block count covering M
    return tm, nblk


def matmul_bias_act(a, w_pad, b_pad, *, relu, n_valid):
    """relu?(a @ w + b).  w_pad:(K,Np), b_pad:(1,Np) zero-padded so Np%128==0
    (lane-dense stores).  Returns only the first n_valid output columns."""
    M0, K = a.shape
    K2, Np = w_pad.shape
    assert K == K2 and Np % LANE == 0
    if M0 < 8:                           # safety for tiny M (not hit by convs)
        a = jnp.pad(a, ((0, 8 - M0), (0, 0)))
    M = a.shape[0]
    tm, nblk = _choose_m_tiling(M)

    out = pl.pallas_call(
        functools.partial(_mm_bias_act_kernel, relu=relu),
        out_shape=jax.ShapeDtypeStruct((M, Np), jnp.float32),
        grid_spec=pltpu.PrefetchScalarGridSpec(
            num_scalar_prefetch=0,
            grid=(nblk,),
            in_specs=[
                pl.BlockSpec((tm, K), lambda i: (i, 0)),
                pl.BlockSpec((K, Np), lambda i: (0, 0)),   # resident weight
                pl.BlockSpec((1, Np), lambda i: (0, 0)),   # resident bias
            ],
            out_specs=pl.BlockSpec((tm, Np), lambda i: (i, 0)),
        ),
        compiler_params=pltpu.CompilerParams(
            dimension_semantics=("parallel",)),
    )(a, w_pad, b_pad)
    out = out[:M0]
    return out if n_valid == Np else out[:, :n_valid]


# ---------------------------------------------------------------------------
# Fused head kernel: out = (feat @ Wl + bl) @ Wh + bh   (actor|critic packed)
# ---------------------------------------------------------------------------
def _head_kernel(f_ref, wl_ref, bl_ref, wh_ref, bh_ref, o_ref):
    h = jnp.dot(f_ref[...], wl_ref[...], preferred_element_type=jnp.float32)
    h = h + bl_ref[...]
    out = jnp.dot(h, wh_ref[...], preferred_element_type=jnp.float32)
    o_ref[...] = (out + bh_ref[...]).astype(o_ref.dtype)


def fused_head(feat, wl, bl, wh_pad, bh_pad, *, n_actor, n_critic):
    B, K = feat.shape
    Bp = _round_up(max(B, 8), 8)
    if Bp != B:
        feat = jnp.pad(feat, ((0, Bp - B), (0, 0)))
    hid = wl.shape[1]
    Np = wh_pad.shape[1]
    out = pl.pallas_call(
        _head_kernel,
        out_shape=jax.ShapeDtypeStruct((Bp, Np), jnp.float32),
        grid_spec=pltpu.PrefetchScalarGridSpec(
            num_scalar_prefetch=0,
            grid=(1,),
            in_specs=[
                pl.BlockSpec((Bp, K), lambda i: (0, 0)),
                pl.BlockSpec((K, hid), lambda i: (0, 0)),
                pl.BlockSpec((1, hid), lambda i: (0, 0)),
                pl.BlockSpec((hid, Np), lambda i: (0, 0)),
                pl.BlockSpec((1, Np), lambda i: (0, 0)),
            ],
            out_specs=pl.BlockSpec((Bp, Np), lambda i: (0, 0)),
        ),
        compiler_params=pltpu.CompilerParams(
            dimension_semantics=("arbitrary",)),
    )(feat, wl, bl, wh_pad, bh_pad)
    actor = out[:B, :n_actor]
    critic = out[:B, n_actor:n_actor + n_critic]
    return actor, critic


# ---------------------------------------------------------------------------
# Conv-as-GEMM glue (im2col), matching nn.Conv2d(k=3, stride=2, padding=1)
# ---------------------------------------------------------------------------
def _im2col(x, ksize=3, stride=2, pad=1):
    # x: (N, H, W, C) NHWC
    N, H, W, C = x.shape
    xp = jnp.pad(x, ((0, 0), (pad, pad), (pad, pad), (0, 0)))
    Hout = (H + 2 * pad - ksize) // stride + 1
    Wout = (W + 2 * pad - ksize) // stride + 1
    cols = []
    for kh in range(ksize):
        for kw in range(ksize):
            cols.append(
                xp[:, kh:kh + stride * Hout:stride, kw:kw + stride * Wout:stride, :])
    patches = jnp.concatenate(cols, axis=-1)          # (N, Hout, Wout, 9*C)
    return patches.reshape(N * Hout * Wout, ksize * ksize * C), (N, Hout, Wout)


# ---------------------------------------------------------------------------
# Deterministic parameter init (orthogonal with relu gain, zero bias),
# mirroring PPO._initialize_weights (relu gain on every Conv2d/Linear).
# Parameters are stored in PyTorch layouts; prepare_gemm_params converts once.
# ---------------------------------------------------------------------------
def _orthogonal(key, rows, cols, gain):
    big = jax.random.normal(key, (max(rows, cols), min(rows, cols)), jnp.float32)
    q, r = jnp.linalg.qr(big)
    q = q * jnp.sign(jnp.diagonal(r))
    if rows < cols:
        q = q.T
    return (gain * q[:rows, :cols]).astype(jnp.float32)


def init_ppo_params(key, num_inputs, num_actions):
    gain = 2.0 ** 0.5  # nn.init.calculate_gain('relu')
    ks = jax.random.split(key, 7)
    p = {}
    conv_shapes = [
        (32, num_inputs, 3, 3),
        (32, 32, 3, 3),
        (32, 32, 3, 3),
        (32, 32, 3, 3),
    ]
    for i, shp in enumerate(conv_shapes):
        cout, cin, kh, kw = shp
        w2d = _orthogonal(ks[i], cout, cin * kh * kw, gain)
        p[f"conv{i + 1}_w"] = w2d.reshape(shp)
        p[f"conv{i + 1}_b"] = jnp.zeros((cout,), jnp.float32)
    p["linear_w"] = _orthogonal(ks[4], 512, 32 * 6 * 6, gain)    # (out, in) NCHW-flat
    p["linear_b"] = jnp.zeros((512,), jnp.float32)
    p["critic_w"] = _orthogonal(ks[5], 1, 512, gain)
    p["critic_b"] = jnp.zeros((1,), jnp.float32)
    p["actor_w"] = _orthogonal(ks[6], num_actions, 512, gain)
    p["actor_b"] = jnp.zeros((num_actions,), jnp.float32)
    return p


def prepare_gemm_params(p):
    """One-time conversion to GEMM layout with lane-dense (128-padded) N.
    Also permutes the linear weight rows from PyTorch's NCHW flatten order
    (c,h,w) to NHWC flatten order (h,w,c) so the forward pass can flatten the
    conv4 activation with a free reshape (no per-forward transpose)."""
    gp = {}
    for i in range(1, 5):
        w = p[f"conv{i}_w"]                                   # (Cout,Cin,3,3)
        cout = w.shape[0]
        wmat = jnp.transpose(w, (2, 3, 1, 0)).reshape(-1, cout)   # [kh,kw,cin]
        gp[f"conv{i}_w"] = _pad_last(wmat, LANE)              # (9*Cin, 128)
        gp[f"conv{i}_b"] = _pad_last(p[f"conv{i}_b"].reshape(1, -1), LANE)
    # linear: (512, 1152) with inputs ordered (c, h, w) -> reorder to (h, w, c)
    wl = p["linear_w"].reshape(512, 32, 6, 6)                 # (out, c, h, w)
    wl = jnp.transpose(wl, (0, 2, 3, 1)).reshape(512, 32 * 6 * 6)
    gp["linear_w"] = wl.T                                     # (1152, 512) GEMM
    gp["linear_b"] = p["linear_b"].reshape(1, -1)             # (1, 512)
    head_w = jnp.concatenate([p["actor_w"].T, p["critic_w"].T], axis=1)
    head_b = jnp.concatenate([p["actor_b"], p["critic_b"]]).reshape(1, -1)
    gp["head_w"] = _pad_last(head_w, LANE)                    # (512, 128)
    gp["head_b"] = _pad_last(head_b, LANE)                    # (1, 128)
    return gp


# ---------------------------------------------------------------------------
# Forward pass (PPO.forward)
# ---------------------------------------------------------------------------
def ppo_forward(gp, x_nchw, num_actions):
    # Accept PyTorch NCHW, compute in NHWC.
    x = jnp.transpose(x_nchw, (0, 2, 3, 1)).astype(jnp.float32)
    for i in range(1, 5):
        patches, (n, ho, wo) = _im2col(x, ksize=3, stride=2, pad=1)
        y = matmul_bias_act(patches, gp[f"conv{i}_w"], gp[f"conv{i}_b"],
                            relu=True, n_valid=32)
        x = y.reshape(n, ho, wo, 32)
    # Linear weights were permuted to NHWC flatten order -> free reshape here.
    feat = x.reshape(x.shape[0], -1)
    actor, critic = fused_head(feat, gp["linear_w"], gp["linear_b"],
                               gp["head_w"], gp["head_b"],
                               n_actor=num_actions, n_critic=1)
    return actor, critic


if __name__ == "__main__":
    num_inputs, num_actions = 4, 6
    batch = 2
    # Spatial size must reduce to 6x6 after four stride-2 convs -> 84x84,
    # matching the module's 32*6*6 Linear input.
    H = W = 84

    key = jax.random.PRNGKey(0)
    k_params, k_x = jax.random.split(key)
    params = init_ppo_params(k_params, num_inputs, num_actions)
    gp = prepare_gemm_params(params)
    x = jax.random.normal(k_x, (batch, num_inputs, H, W), jnp.float32)

    fwd = jax.jit(functools.partial(ppo_forward, num_actions=num_actions))
    actor, critic = fwd(gp, x)
    jax.block_until_ready((actor, critic))

    assert actor.shape == (batch, num_actions), actor.shape
    assert critic.shape == (batch, 1), critic.shape
    assert bool(jnp.all(jnp.isfinite(actor))) and bool(jnp.all(jnp.isfinite(critic)))
    print("KERNEL_OK")
</pallas_src>

<mosaic_0001>
module attributes {stable_mosaic.version = 11 : i64} {
  func.func @_mm_bias_act_kernel(%arg0: i32, %arg1: memref<888x36xf32, #tpu.memory_space<vmem>>, %arg2: memref<36x128xf32, #tpu.memory_space<vmem>>, %arg3: memref<1x128xf32, #tpu.memory_space<vmem>>, %arg4: memref<888x128xf32, #tpu.memory_space<vmem>>) attributes {dimension_semantics = [#tpu.dimension_semantics<parallel>], iteration_bounds = array<i64: 4>, scalar_prefetch = 0 : i64, scratch_operands = 0 : i64, tpu.core_type = #tpu.core_type<tc>, window_params = [{transform_indices = @transform_0, window_bounds = array<i64: 888, 36>}, {pipeline_mode = #tpu.pipeline_mode<synchronous>, transform_indices = @transform_1, window_bounds = array<i64: 36, 128>}, {pipeline_mode = #tpu.pipeline_mode<synchronous>, transform_indices = @transform_2, window_bounds = array<i64: 1, 128>}, {transform_indices = @transform_3, window_bounds = array<i64: 888, 128>}]} {
    %c0 = arith.constant 0 : index
    %c0_0 = arith.constant 0 : index
    %0 = vector.load %arg1[%c0, %c0_0] : memref<888x36xf32, #tpu.memory_space<vmem>>, vector<888x36xf32>
    %c0_1 = arith.constant 0 : index
    %c0_2 = arith.constant 0 : index
    %1 = vector.load %arg2[%c0_1, %c0_2] : memref<36x128xf32, #tpu.memory_space<vmem>>, vector<36x128xf32>
    %cst = arith.constant dense<0.000000e+00> : vector<888x128xf32>
    %2 = tpu.matmul %0, %1, %cst {dimension_numbers = #tpu.dot_dimension_numbers<[1], [0], [0], [1], [0, 0, 1, 1], [], []>} : vector<888x36xf32>, vector<36x128xf32>, vector<888x128xf32> -> vector<888x128xf32>
    %c0_3 = arith.constant 0 : index
    %c0_4 = arith.constant 0 : index
    %3 = vector.load %arg3[%c0_3, %c0_4] : memref<1x128xf32, #tpu.memory_space<vmem>>, vector<1x128xf32>
    %4 = vector.broadcast %3 : vector<1x128xf32> to vector<888x128xf32>
    %5 = arith.addf %2, %4 : vector<888x128xf32>
    %cst_5 = arith.constant 0.000000e+00 : f32
    %6 = vector.broadcast %cst_5 : f32 to vector<888x128xf32>
    %7 = arith.maximumf %5, %6 : vector<888x128xf32>
    %c0_6 = arith.constant 0 : index
    %c0_7 = arith.constant 0 : index
    %8 = vector.load %arg4[%c0_6, %c0_7] : memref<888x128xf32, #tpu.memory_space<vmem>>, vector<888x128xf32>
    tpu.vector_store %arg4[%c0_6, %c0_7], %7 {strides = array<i32>} : memref<888x128xf32, #tpu.memory_space<vmem>>, vector<888x128xf32>,
    return
  }
  func.func @transform_0(%arg0: i32) -> (i32, i32) {
    %c0_i32 = arith.constant 0 : i32
    %c0_i32_0 = arith.constant 0 : i32
    return %arg0, %c0_i32 : i32, i32
  }
  func.func @transform_1(%arg0: i32) -> (i32, i32) {
    %c0_i32 = arith.constant 0 : i32
    %c0_i32_0 = arith.constant 0 : i32
    %c0_i32_1 = arith.constant 0 : i32
    return %c0_i32, %c0_i32_0 : i32, i32
  }
  func.func @transform_2(%arg0: i32) -> (i32, i32) {
    %c0_i32 = arith.constant 0 : i32
    %c0_i32_0 = arith.constant 0 : i32
    %c0_i32_1 = arith.constant 0 : i32
    return %c0_i32, %c0_i32_0 : i32, i32
  }
  func.func @transform_3(%arg0: i32) -> (i32, i32) {
    %c0_i32 = arith.constant 0 : i32
    %c0_i32_0 = arith.constant 0 : i32
    return %arg0, %c0_i32 : i32, i32
  }
}

module attributes {stable_mosaic.version = 11 : i64} {
  func.func @_mm_bias_act_kernel(%arg0: i32, %arg1: memref<448x288xf32, #tpu.memory_space<vmem>>, %arg2: memref<288x128xf32, #tpu.memory_space<vmem>>, %arg3: memref<1x128xf32, #tpu.memory_space<vmem>>, %arg4: memref<448x128xf32, #tpu.memory_space<vmem>>) attributes {dimension_semantics = [#tpu.dimension_semantics<parallel>], iteration_bounds = array<i64: 2>, scalar_prefetch = 0 : i64, scratch_operands = 0 : i64, tpu.core_type = #tpu.core_type<tc>, window_params = [{transform_indices = @transform_0, window_bounds = array<i64: 448, 288>}, {pipeline_mode = #tpu.pipeline_mode<synchronous>, transform_indices = @transform_1, window_bounds = array<i64: 288, 128>}, {pipeline_mode = #tpu.pipeline_mode<synchronous>, transform_indices = @transform_2, window_bounds = array<i64: 1, 128>}, {transform_indices = @transform_3, window_bounds = array<i64: 448, 128>}]} {
    %c0 = arith.constant 0 : index
    %c0_0 = arith.constant 0 : index
    %0 = vector.load %arg1[%c0, %c0_0] : memref<448x288xf32, #tpu.memory_space<vmem>>, vector<448x288xf32>
    %c0_1 = arith.constant 0 : index
    %c0_2 = arith.constant 0 : index
    %1 = vector.load %arg2[%c0_1, %c0_2] : memref<288x128xf32, #tpu.memory_space<vmem>>, vector<288x128xf32>
    %cst = arith.constant dense<0.000000e+00> : vector<448x128xf32>
    %2 = tpu.matmul %0, %1, %cst {dimension_numbers = #tpu.dot_dimension_numbers<[1], [0], [0], [1], [0, 0, 1, 1], [], []>} : vector<448x288xf32>, vector<288x128xf32>, vector<448x128xf32> -> vector<448x128xf32>
    %c0_3 = arith.constant 0 : index
    %c0_4 = arith.constant 0 : index
    %3 = vector.load %arg3[%c0_3, %c0_4] : memref<1x128xf32, #tpu.memory_space<vmem>>, vector<1x128xf32>
    %4 = vector.broadcast %3 : vector<1x128xf32> to vector<448x128xf32>
    %5 = arith.addf %2, %4 : vector<448x128xf32>
    %cst_5 = arith.constant 0.000000e+00 : f32
    %6 = vector.broadcast %cst_5 : f32 to vector<448x128xf32>
    %7 = arith.maximumf %5, %6 : vector<448x128xf32>
    %c0_6 = arith.constant 0 : index
    %c0_7 = arith.constant 0 : index
    %8 = vector.load %arg4[%c0_6, %c0_7] : memref<448x128xf32, #tpu.memory_space<vmem>>, vector<448x128xf32>
    tpu.vector_store %arg4[%c0_6, %c0_7], %7 {strides = array<i32>} : memref<448x128xf32, #tpu.memory_space<vmem>>, vector<448x128xf32>,
    return
  }
  func.func @transform_0(%arg0: i32) -> (i32, i32) {
    %c0_i32 = arith.constant 0 : i32
    %c0_i32_0 = arith.constant 0 : i32
    return %arg0, %c0_i32 : i32, i32
  }
  func.func @transform_1(%arg0: i32) -> (i32, i32) {
    %c0_i32 = arith.constant 0 : i32
    %c0_i32_0 = arith.constant 0 : i32
    %c0_i32_1 = arith.constant 0 : i32
    return %c0_i32, %c0_i32_0 : i32, i32
  }
  func.func @transform_2(%arg0: i32) -> (i32, i32) {
    %c0_i32 = arith.constant 0 : i32
    %c0_i32_0 = arith.constant 0 : i32
    %c0_i32_1 = arith.constant 0 : i32
    return %c0_i32, %c0_i32_0 : i32, i32
  }
  func.func @transform_3(%arg0: i32) -> (i32, i32) {
    %c0_i32 = arith.constant 0 : i32
    %c0_i32_0 = arith.constant 0 : i32
    return %arg0, %c0_i32 : i32, i32
  }
}

module attributes {stable_mosaic.version = 11 : i64} {
  func.func @_mm_bias_act_kernel(%arg0: i32, %arg1: memref<128x288xf32, #tpu.memory_space<vmem>>, %arg2: memref<288x128xf32, #tpu.memory_space<vmem>>, %arg3: memref<1x128xf32, #tpu.memory_space<vmem>>, %arg4: memref<128x128xf32, #tpu.memory_space<vmem>>) attributes {dimension_semantics = [#tpu.dimension_semantics<parallel>], iteration_bounds = array<i64: 2>, scalar_prefetch = 0 : i64, scratch_operands = 0 : i64, tpu.core_type = #tpu.core_type<tc>, window_params = [{transform_indices = @transform_0, window_bounds = array<i64: 128, 288>}, {pipeline_mode = #tpu.pipeline_mode<synchronous>, transform_indices = @transform_1, window_bounds = array<i64: 288, 128>}, {pipeline_mode = #tpu.pipeline_mode<synchronous>, transform_indices = @transform_2, window_bounds = array<i64: 1, 128>}, {transform_indices = @transform_3, window_bounds = array<i64: 128, 128>}]} {
    %c0 = arith.constant 0 : index
    %c0_0 = arith.constant 0 : index
    %0 = vector.load %arg1[%c0, %c0_0] : memref<128x288xf32, #tpu.memory_space<vmem>>, vector<128x288xf32>
    %c0_1 = arith.constant 0 : index
    %c0_2 = arith.constant 0 : index
    %1 = vector.load %arg2[%c0_1, %c0_2] : memref<288x128xf32, #tpu.memory_space<vmem>>, vector<288x128xf32>
    %cst = arith.constant dense<0.000000e+00> : vector<128x128xf32>
    %2 = tpu.matmul %0, %1, %cst {dimension_numbers = #tpu.dot_dimension_numbers<[1], [0], [0], [1], [0, 0, 1, 1], [], []>} : vector<128x288xf32>, vector<288x128xf32>, vector<128x128xf32> -> vector<128x128xf32>
    %c0_3 = arith.constant 0 : index
    %c0_4 = arith.constant 0 : index
    %3 = vector.load %arg3[%c0_3, %c0_4] : memref<1x128xf32, #tpu.memory_space<vmem>>, vector<1x128xf32>
    %4 = vector.broadcast %3 : vector<1x128xf32> to vector<128x128xf32>
    %5 = arith.addf %2, %4 : vector<128x128xf32>
    %cst_5 = arith.constant 0.000000e+00 : f32
    %6 = vector.broadcast %cst_5 : f32 to vector<128x128xf32>
    %7 = arith.maximumf %5, %6 : vector<128x128xf32>
    %c0_6 = arith.constant 0 : index
    %c0_7 = arith.constant 0 : index
    %8 = vector.load %arg4[%c0_6, %c0_7] : memref<128x128xf32, #tpu.memory_space<vmem>>, vector<128x128xf32>
    tpu.vector_store %arg4[%c0_6, %c0_7], %7 {strides = array<i32>} : memref<128x128xf32, #tpu.memory_space<vmem>>, vector<128x128xf32>,
    return
  }
  func.func @transform_0(%arg0: i32) -> (i32, i32) {
    %c0_i32 = arith.constant 0 : i32
    %c0_i32_0 = arith.constant 0 : i32
    return %arg0, %c0_i32 : i32, i32
  }
  func.func @transform_1(%arg0: i32) -> (i32, i32) {
    %c0_i32 = arith.constant 0 : i32
    %c0_i32_0 = arith.constant 0 : i32
    %c0_i32_1 = arith.constant 0 : i32
    return %c0_i32, %c0_i32_0 : i32, i32
  }
  func.func @transform_2(%arg0: i32) -> (i32, i32) {
    %c0_i32 = arith.constant 0 : i32
    %c0_i32_0 = arith.constant 0 : i32
    %c0_i32_1 = arith.constant 0 : i32
    return %c0_i32, %c0_i32_0 : i32, i32
  }
  func.func @transform_3(%arg0: i32) -> (i32, i32) {
    %c0_i32 = arith.constant 0 : i32
    %c0_i32_0 = arith.constant 0 : i32
    return %arg0, %c0_i32 : i32, i32
  }
}

module attributes {stable_mosaic.version = 11 : i64} {
  func.func @_mm_bias_act_kernel(%arg0: i32, %arg1: memref<40x288xf32, #tpu.memory_space<vmem>>, %arg2: memref<288x128xf32, #tpu.memory_space<vmem>>, %arg3: memref<1x128xf32, #tpu.memory_space<vmem>>, %arg4: memref<40x128xf32, #tpu.memory_space<vmem>>) attributes {dimension_semantics = [#tpu.dimension_semantics<parallel>], iteration_bounds = array<i64: 2>, scalar_prefetch = 0 : i64, scratch_operands = 0 : i64, tpu.core_type = #tpu.core_type<tc>, window_params = [{transform_indices = @transform_0, window_bounds = array<i64: 40, 288>}, {pipeline_mode = #tpu.pipeline_mode<synchronous>, transform_indices = @transform_1, window_bounds = array<i64: 288, 128>}, {pipeline_mode = #tpu.pipeline_mode<synchronous>, transform_indices = @transform_2, window_bounds = array<i64: 1, 128>}, {transform_indices = @transform_3, window_bounds = array<i64: 40, 128>}]} {
    %c0 = arith.constant 0 : index
    %c0_0 = arith.constant 0 : index
    %0 = vector.load %arg1[%c0, %c0_0] : memref<40x288xf32, #tpu.memory_space<vmem>>, vector<40x288xf32>
    %c0_1 = arith.constant 0 : index
    %c0_2 = arith.constant 0 : index
    %1 = vector.load %arg2[%c0_1, %c0_2] : memref<288x128xf32, #tpu.memory_space<vmem>>, vector<288x128xf32>
    %cst = arith.constant dense<0.000000e+00> : vector<40x128xf32>
    %2 = tpu.matmul %0, %1, %cst {dimension_numbers = #tpu.dot_dimension_numbers<[1], [0], [0], [1], [0, 0, 1, 1], [], []>} : vector<40x288xf32>, vector<288x128xf32>, vector<40x128xf32> -> vector<40x128xf32>
    %c0_3 = arith.constant 0 : index
    %c0_4 = arith.constant 0 : index
    %3 = vector.load %arg3[%c0_3, %c0_4] : memref<1x128xf32, #tpu.memory_space<vmem>>, vector<1x128xf32>
    %4 = vector.broadcast %3 : vector<1x128xf32> to vector<40x128xf32>
    %5 = arith.addf %2, %4 : vector<40x128xf32>
    %cst_5 = arith.constant 0.000000e+00 : f32
    %6 = vector.broadcast %cst_5 : f32 to vector<40x128xf32>
    %7 = arith.maximumf %5, %6 : vector<40x128xf32>
    %c0_6 = arith.constant 0 : index
    %c0_7 = arith.constant 0 : index
    %8 = vector.load %arg4[%c0_6, %c0_7] : memref<40x128xf32, #tpu.memory_space<vmem>>, vector<40x128xf32>
    tpu.vector_store %arg4[%c0_6, %c0_7], %7 {strides = array<i32>} : memref<40x128xf32, #tpu.memory_space<vmem>>, vector<40x128xf32>,
    return
  }
  func.func @transform_0(%arg0: i32) -> (i32, i32) {
    %c0_i32 = arith.constant 0 : i32
    %c0_i32_0 = arith.constant 0 : i32
    return %arg0, %c0_i32 : i32, i32
  }
  func.func @transform_1(%arg0: i32) -> (i32, i32) {
    %c0_i32 = arith.constant 0 : i32
    %c0_i32_0 = arith.constant 0 : i32
    %c0_i32_1 = arith.constant 0 : i32
    return %c0_i32, %c0_i32_0 : i32, i32
  }
  func.func @transform_2(%arg0: i32) -> (i32, i32) {
    %c0_i32 = arith.constant 0 : i32
    %c0_i32_0 = arith.constant 0 : i32
    %c0_i32_1 = arith.constant 0 : i32
    return %c0_i32, %c0_i32_0 : i32, i32
  }
  func.func @transform_3(%arg0: i32) -> (i32, i32) {
    %c0_i32 = arith.constant 0 : i32
    %c0_i32_0 = arith.constant 0 : i32
    return %arg0, %c0_i32 : i32, i32
  }
}

module attributes {stable_mosaic.version = 11 : i64} {
  func.func @_head_kernel(%arg0: i32, %arg1: memref<8x1152xf32, #tpu.memory_space<vmem>>, %arg2: memref<1152x512xf32, #tpu.memory_space<vmem>>, %arg3: memref<1x512xf32, #tpu.memory_space<vmem>>, %arg4: memref<512x128xf32, #tpu.memory_space<vmem>>, %arg5: memref<1x128xf32, #tpu.memory_space<vmem>>, %arg6: memref<8x128xf32, #tpu.memory_space<vmem>>) attributes {dimension_semantics = [#tpu.dimension_semantics<arbitrary>], iteration_bounds = array<i64: 1>, scalar_prefetch = 0 : i64, scratch_operands = 0 : i64, tpu.core_type = #tpu.core_type<tc>, window_params = [{pipeline_mode = #tpu.pipeline_mode<synchronous>, transform_indices = @transform_0, window_bounds = array<i64: 8, 1152>}, {pipeline_mode = #tpu.pipeline_mode<synchronous>, transform_indices = @transform_1, window_bounds = array<i64: 1152, 512>}, {pipeline_mode = #tpu.pipeline_mode<synchronous>, transform_indices = @transform_2, window_bounds = array<i64: 1, 512>}, {pipeline_mode = #tpu.pipeline_mode<synchronous>, transform_indices = @transform_3, window_bounds = array<i64: 512, 128>}, {pipeline_mode = #tpu.pipeline_mode<synchronous>, transform_indices = @transform_4, window_bounds = array<i64: 1, 128>}, {pipeline_mode = #tpu.pipeline_mode<synchronous>, transform_indices = @transform_5, window_bounds = array<i64: 8, 128>}]} {
    %c0 = arith.constant 0 : index
    %c0_0 = arith.constant 0 : index
    %0 = vector.load %arg1[%c0, %c0_0] : memref<8x1152xf32, #tpu.memory_space<vmem>>, vector<8x1152xf32>
    %c0_1 = arith.constant 0 : index
    %c0_2 = arith.constant 0 : index
    %1 = vector.load %arg2[%c0_1, %c0_2] : memref<1152x512xf32, #tpu.memory_space<vmem>>, vector<1152x512xf32>
    %cst = arith.constant dense<0.000000e+00> : vector<8x512xf32>
    %2 = tpu.matmul %0, %1, %cst {dimension_numbers = #tpu.dot_dimension_numbers<[1], [0], [0], [1], [0, 0, 1, 1], [], []>} : vector<8x1152xf32>, vector<1152x512xf32>, vector<8x512xf32> -> vector<8x512xf32>
    %c0_3 = arith.constant 0 : index
    %c0_4 = arith.constant 0 : index
    %3 = vector.load %arg3[%c0_3, %c0_4] : memref<1x512xf32, #tpu.memory_space<vmem>>, vector<1x512xf32>
    %4 = vector.broadcast %3 : vector<1x512xf32> to vector<8x512xf32>
    %5 = arith.addf %2, %4 : vector<8x512xf32>
    %c0_5 = arith.constant 0 : index
    %c0_6 = arith.constant 0 : index
    %6 = vector.load %arg4[%c0_5, %c0_6] : memref<512x128xf32, #tpu.memory_space<vmem>>, vector<512x128xf32>
    %cst_7 = arith.constant dense<0.000000e+00> : vector<8x128xf32>
    %7 = tpu.matmul %5, %6, %cst_7 {dimension_numbers = #tpu.dot_dimension_numbers<[1], [0], [0], [1], [0, 0, 1, 1], [], []>} : vector<8x512xf32>, vector<512x128xf32>, vector<8x128xf32> -> vector<8x128xf32>
    %c0_8 = arith.constant 0 : index
    %c0_9 = arith.constant 0 : index
    %8 = vector.load %arg5[%c0_8, %c0_9] : memref<1x128xf32, #tpu.memory_space<vmem>>, vector<1x128xf32>
    %9 = vector.broadcast %8 : vector<1x128xf32> to vector<8x128xf32>
    %10 = arith.addf %7, %9 : vector<8x128xf32>
    %c0_10 = arith.constant 0 : index
    %c0_11 = arith.constant 0 : index
    %11 = vector.load %arg6[%c0_10, %c0_11] : memref<8x128xf32, #tpu.memory_space<vmem>>, vector<8x128xf32>
    tpu.vector_store %arg6[%c0_10, %c0_11], %10 {strides = array<i32>} : memref<8x128xf32, #tpu.memory_space<vmem>>, vector<8x128xf32>,
    return
  }
  func.func @transform_0(%arg0: i32) -> (i32, i32) {
    %c0_i32 = arith.constant 0 : i32
    %c0_i32_0 = arith.constant 0 : i32
    %c0_i32_1 = arith.constant 0 : i32
    return %c0_i32, %c0_i32_0 : i32, i32
  }
  func.func @transform_1(%arg0: i32) -> (i32, i32) {
    %c0_i32 = arith.constant 0 : i32
    %c0_i32_0 = arith.constant 0 : i32
    %c0_i32_1 = arith.constant 0 : i32
    return %c0_i32, %c0_i32_0 : i32, i32
  }
  func.func @transform_2(%arg0: i32) -> (i32, i32) {
    %c0_i32 = arith.constant 0 : i32
    %c0_i32_0 = arith.constant 0 : i32
    %c0_i32_1 = arith.constant 0 : i32
    return %c0_i32, %c0_i32_0 : i32, i32
  }
  func.func @transform_3(%arg0: i32) -> (i32, i32) {
    %c0_i32 = arith.constant 0 : i32
    %c0_i32_0 = arith.constant 0 : i32
    %c0_i32_1 = arith.constant 0 : i32
    return %c0_i32, %c0_i32_0 : i32, i32
  }
  func.func @transform_4(%arg0: i32) -> (i32, i32) {
    %c0_i32 = arith.constant 0 : i32
    %c0_i32_0 = arith.constant 0 : i32
    %c0_i32_1 = arith.constant 0 : i32
    return %c0_i32, %c0_i32_0 : i32, i32
  }
  func.func @transform_5(%arg0: i32) -> (i32, i32) {
    %c0_i32 = arith.constant 0 : i32
    %c0_i32_0 = arith.constant 0 : i32
    %c0_i32_1 = arith.constant 0 : i32
    return %c0_i32, %c0_i32_0 : i32, i32
  }
}

</mosaic_0001>

<bundles_post_ra>
// kernel: ppo_forward.5
= control target key start
LH: loop header
LB: loop body
LE: loop exit
PB: predicated region body
PF: predicated region fallthrough
CT: control target
= control target key end

     0   :  { %s2773_s12 = smov 0   ;;  %s2775_s13 = smov 0   ;;  %s3701_s0 = inlined_call_operand.vmem [shape: f32[3528,36], index: 0, kind: input, shape index: {}]   ;;  %s3702_s1 = inlined_call_operand.vmem [shape: f32[36,128], index: 1, kind: input, shape index: {}]   ;;  %s3703_s2 = inlined_call_operand.vmem [shape: f32[1,128], index: 2, kind: input, shape index: {}]   ;;  %s3704_s3 = inlined_call_operand.vmem [shape: f32[3528,128], index: 3, kind: output, shape index: {}]  }
   0x1   :  { %s2777_s14 = smov 0  }
   0x2 LB: > { %s2786_s15 = sadd.s32 4294967295, %s2716_s14   ;;  %s2788_s16 = sadd.s32 1, %s2716_s14   ;;  %s2716_s14 = sphi %s2777_s14, %s3713_s14   ;;  %s2712_s13 = sphi %s2775_s13, %s3712_s13   ;;  %s2708_s12 = sphi %s2773_s12, %s3711_s12  }
   0x3   : > { %s85_s17 = ssub.s32 %s2716_s14, %s2788_s16  ;;  %s88_s18 = sadd.s32 1, %s2712_s13 }
   0x4   : > { %p86_p0 = scmp.eq.s32.totalorder %s85_s17, 0  ;;  %p98_p1 = scmp.ne.s32.totalorder %s2712_s13, %s2708_s12 }
   0x5   : > { %p99_p2 = scmp.eq.s32.totalorder %s2786_s15, 3  ;;  %p1965_p3 = scmp.ge.s32.totalorder %s2716_s14, 1 }
   0x6   : > { %s2796_s19 = scalar_select %p86_p0, %s2712_s13, %s88_s18  }
   0x7   : > { %p2798_p4 = por %p99_p2, %p98_p1  ;;  %p146_p5 = scmp.lt.s32.totalorder %s2716_s14, 5 }
   0x9   : > { %p147_p6 = pnand %p1965_p3, %p146_p5 }
   0xa   : > { %v303_v0 = vld [vmem:[%s3702_s1] sm:$0xff] (!%p147_p6)  ;;  %v304_v1 = vld [vmem:[%s3702_s1 + $0x8] sm:$0xff] (!%p147_p6)  ;;  %v305_v2 = vld [vmem:[%s3702_s1 + $0x10] sm:$0xff] (!%p147_p6)  ;;  %v2750_v3 = vmov (!%p147_p6), 0.0|0.0   ;;  %s2815_s29 = smul.u32 (!%p147_p6), 111, %s2786_s15  ;;  %vm2751_vm0 = vmmov (!%p147_p6), 0  }
   0xb   : > { %150 = sbr.rel (%p147_p6) target bundleno = 532 (0x214), region = 32  ;;  %2557 = vmatprep.subr.bf16.mxu0 (!%p147_p6), %v2750_v3  ;;  %v2558_v4 = vpack.c.bf16 (!%p147_p6), %v304_v1, %v303_v0  ;;  %2563 = vmatprep.subr.bf16.mxu1 (!%p147_p6), %v2750_v3  ;;  %v306_v5 = vld [vmem:[%s3702_s1 + $0x18] sm:$0xff] (!%p147_p6)  ;;  %v2752_v6 = vmov (!%p147_p6), 0.0   ;;  %v307_v8 = vld [vmem:[%s3702_s1 + $0x20] sm:$0xf] (!%p147_p6)  ;;  %vm649_vm1 = vcmask (!%p147_p6), 1043456  }
   0xc   : > { %2224 = vmatprep.mubr.msk.f32.mxu0 (!%p147_p6), %vm2751_vm0, %v2752_v6  ;;  %2392 = vmatprep.mubr.msk.f32.mxu1 (!%p147_p6), %vm2751_vm0, %v2752_v6  ;;  %v2561_v7 = vpack.c.bf16 (!%p147_p6), %v306_v5, %v305_v2  ;;  %p178_p7 = scmp.lt.s32.totalorder (!%p147_p6), %s2815_s29, 440  ;;  %vm315_vm2 = vcmask (!%p147_p6), 293888   ;;  %s170_s10 = sand.u32 (!%p147_p6), 1, %s2708_s12  }
   0xd   : > { %2559 = vmatpush3.bf16.msra.mxu0 (!%p147_p6), %v2558_v4  ;;  %2566 = vmatpush3.bf16.msra.mxu1 (!%p147_p6), %v2558_v4  ;;  %s2569_s11 = smul.u32 (!%p147_p6), 888, %s170_s10 }
   0xe   : > { %2560 = vmatprep.subr.bf16.mxu0 (!%p147_p6), %v2750_v3  ;;  %2564 = vmatprep.subr.bf16.mxu1 (!%p147_p6), %v2750_v3 }
   0xf   : > { %s3275_s12 = scalar_lea.vmem (!%p147_p6), [#allocation2], %s2569_s11  }
  0x11   : > { %2562 = vmatpush3.bf16.msra.mxu0 (!%p147_p6), %v2561_v7  ;;  %2567 = vmatpush3.bf16.msra.mxu1 (!%p147_p6), %v2561_v7 }
  0x12   : > { %s179_s30 = scalar_select %p178_p7, %s2815_s29, 440  ;;  %2222 = vmatprep.subr.mxu0 %v2752_v6  ;;  %2565 = vmatprep.subr.mxu1 %v2752_v6 }
  0x13   : > { %s1503_s22 = ssub.s32 (%p2798_p4), 441, %s2815_s29  ;;  %s2095_s23 = smul.u32 (%p2798_p4), 888, %s2786_s15 }
  0x14   : > { %s1966_s4 = sshll.u32 %s179_s30, 3  ;;  %p1504_p8 = scmp.lt.s32.totalorder (%p2798_p4), %s1503_s22, 111 }
  0x15   : > { %s2830_s9 = scalar_lea.vmem %s3701_s0, %s1966_s4  ;;  %2223 = vmatpush3.msk.msra.mxu0 %vm649_vm1, %v307_v8  ;;  %2568 = vmatpush3.msk.msra.mxu1 %vm649_vm1, %v307_v8  ;;  %s3502_s26 = scalar_lea.vmem (%p2798_p4), %s3704_s3, %s2095_s23  }
  0x16   : > { %v192_v9 = vld [vmem:[%s2830_s9] sm:$0xff]  ;;  %v193_v11 = vld [vmem:[%s2830_s9 + $0x8] sm:$0xff]  ;;  %v194_v13 = vld [vmem:[%s2830_s9 + $0x10] sm:$0xff] }
  0x17   : > { %v248_v10 = vld [vmem:[%s2830_s9 + $0x1c0] sm:$0xff]  ;;  %2225 = vmatmul.mubr.msk.f32.vlgmr.msra.gmra.mrb[0].mxu0 %vm315_vm2, %v192_v9  ;;  %v249_v12 = vld [vmem:[%s2830_s9 + $0x1c8] sm:$0xff]  ;;  %v250_v14 = vld [vmem:[%s2830_s9 + $0x1d0] sm:$0xff] }
  0x18   : > { %2393 = vmatmul.mubr.msk.f32.vlgmr.msra.gmra.mrb[0].mxu1 %vm315_vm2, %v248_v10  ;;  %2227 = vmatprep.mubr.msk.f32.mxu0 %vm2751_vm0, %v2752_v6  ;;  %v195_v15 = vld [vmem:[%s2830_s9 + $0x18] sm:$0xff]  ;;  %v196_v17 = vld [vmem:[%s2830_s9 + $0x20] sm:$0xff]  ;;  %v197_v19 = vld [vmem:[%s2830_s9 + $0x28] sm:$0xff] }
  0x19   : > { %2395 = vmatprep.mubr.msk.f32.mxu1 %vm2751_vm0, %v2752_v6  ;;  %v251_v16 = vld [vmem:[%s2830_s9 + $0x1d8] sm:$0xff]  ;;  %v252_v18 = vld [vmem:[%s2830_s9 + $0x1e0] sm:$0xff]  ;;  %v253_v20 = vld [vmem:[%s2830_s9 + $0x1e8] sm:$0xff] }
  0x1a   : > { %v198_v21 = vld [vmem:[%s2830_s9 + $0x30] sm:$0xff]  ;;  %v199_v23 = vld [vmem:[%s2830_s9 + $0x38] sm:$0xff]  ;;  %v200_v25 = vld [vmem:[%s2830_s9 + $0x40] sm:$0xff] }
  0x1b   : > { %2228 = vmatmul.mubr.msk.f32.gmra.mrb[2].mxu0 %vm315_vm2, %v193_v11  ;;  %v254_v22 = vld [vmem:[%s2830_s9 + $0x1f0] sm:$0xff]  ;;  %v255_v24 = vld [vmem:[%s2830_s9 + $0x1f8] sm:$0xff]  ;;  %v256_v26 = vld [vmem:[%s2830_s9 + $0x200] sm:$0xff] }
  0x1c   : > { %2396 = vmatmul.mubr.msk.f32.gmra.mrb[2].mxu1 %vm315_vm2, %v249_v12  ;;  %2230 = vmatprep.mubr.msk.f32.mxu0 %vm2751_vm0, %v2752_v6  ;;  %v201_v27 = vld [vmem:[%s2830_s9 + $0x48] sm:$0xff]  ;;  %v202_v29 = vld [vmem:[%s2830_s9 + $0x50] sm:$0xff]  ;;  %v203_v31 = vld [vmem:[%s2830_s9 + $0x58] sm:$0xff] }
  0x1d   : > { %2398 = vmatprep.mubr.msk.f32.mxu1 %vm2751_vm0, %v2752_v6  ;;  %v257_v28 = vld [vmem:[%s2830_s9 + $0x208] sm:$0xff]  ;;  %v258_v30 = vld [vmem:[%s2830_s9 + $0x210] sm:$0xff]  ;;  %v259_v32 = vld [vmem:[%s2830_s9 + $0x218] sm:$0xff] }
  0x1e   : > { %v204_v33 = vld [vmem:[%s2830_s9 + $0x60] sm:$0xff]  ;;  %v205_v35 = vld [vmem:[%s2830_s9 + $0x68] sm:$0xff]  ;;  %v206_v37 = vld [vmem:[%s2830_s9 + $0x70] sm:$0xff] }
  0x1f   : > { %2231 = vmatmul.mubr.msk.f32.gmra.mrb[4].mxu0 %vm315_vm2, %v194_v13  ;;  %v260_v34 = vld [vmem:[%s2830_s9 + $0x220] sm:$0xff]  ;;  %v261_v36 = vld [vmem:[%s2830_s9 + $0x228] sm:$0xff]  ;;  %v262_v38 = vld [vmem:[%s2830_s9 + $0x230] sm:$0xff] }
  0x20   : > { %2399 = vmatmul.mubr.msk.f32.gmra.mrb[4].mxu1 %vm315_vm2, %v250_v14  ;;  %2233 = vmatprep.mubr.msk.f32.mxu0 %vm2751_vm0, %v2752_v6  ;;  %v207_v39 = vld [vmem:[%s2830_s9 + $0x78] sm:$0xff]  ;;  %v208_v41 = vld [vmem:[%s2830_s9 + $0x80] sm:$0xff]  ;;  %v209_v43 = vld [vmem:[%s2830_s9 + $0x88] sm:$0xff] }
  0x21   : > { %2401 = vmatprep.mubr.msk.f32.mxu1 %vm2751_vm0, %v2752_v6  ;;  %v263_v40 = vld [vmem:[%s2830_s9 + $0x238] sm:$0xff]  ;;  %v264_v42 = vld [vmem:[%s2830_s9 + $0x240] sm:$0xff]  ;;  %v265_v44 = vld [vmem:[%s2830_s9 + $0x248] sm:$0xff] }
  0x22   : > { %v210_v45 = vld [vmem:[%s2830_s9 + $0x90] sm:$0xff]  ;;  %v211_v47 = vld [vmem:[%s2830_s9 + $0x98] sm:$0xff]  ;;  %v212_v49 = vld [vmem:[%s2830_s9 + $0xa0] sm:$0xff] }
  0x23   : > { %2234 = vmatmul.mubr.msk.f32.gmra.mrb[6].mxu0 %vm315_vm2, %v195_v15  ;;  %v266_v46 = vld [vmem:[%s2830_s9 + $0x250] sm:$0xff]  ;;  %v267_v48 = vld [vmem:[%s2830_s9 + $0x258] sm:$0xff]  ;;  %v268_v50 = vld [vmem:[%s2830_s9 + $0x260] sm:$0xff] }
  0x24   : > { %2402 = vmatmul.mubr.msk.f32.gmra.mrb[6].mxu1 %vm315_vm2, %v251_v16  ;;  %2236 = vmatprep.mubr.msk.f32.mxu0 %vm2751_vm0, %v2752_v6  ;;  %v213_v51 = vld [vmem:[%s2830_s9 + $0xa8] sm:$0xff]  ;;  %v214_v53 = vld [vmem:[%s2830_s9 + $0xb0] sm:$0xff]  ;;  %v215_v55 = vld [vmem:[%s2830_s9 + $0xb8] sm:$0xff] }
  0x25   : > { %2404 = vmatprep.mubr.msk.f32.mxu1 %vm2751_vm0, %v2752_v6  ;;  %v269_v52 = vld [vmem:[%s2830_s9 + $0x268] sm:$0xff]  ;;  %v270_v54 = vld [vmem:[%s2830_s9 + $0x270] sm:$0xff]  ;;  %v271_v56 = vld [vmem:[%s2830_s9 + $0x278] sm:$0xff] }
  0x26   : > { %v216_v57 = vld [vmem:[%s2830_s9 + $0xc0] sm:$0xff]  ;;  %v217_v59 = vld [vmem:[%s2830_s9 + $0xc8] sm:$0xff]  ;;  %v218_v61 = vld [vmem:[%s2830_s9 + $0xd0] sm:$0xff] }
  0x27   : > { %2237 = vmatmul.mubr.msk.f32.gmra.mrb[8].mxu0 %vm315_vm2, %v196_v17  ;;  %v272_v58 = vld [vmem:[%s2830_s9 + $0x280] sm:$0xff]  ;;  %v273_v60 = vld [vmem:[%s2830_s9 + $0x288] sm:$0xff]  ;;  %v274_v62 = vld [vmem:[%s2830_s9 + $0x290] sm:$0xff] }
  0x28   : > { %2405 = vmatmul.mubr.msk.f32.gmra.mrb[8].mxu1 %vm315_vm2, %v252_v18  ;;  %2239 = vmatprep.mubr.msk.f32.mxu0 %vm2751_vm0, %v2752_v6  ;;  %v219_v63 = vld [vmem:[%s2830_s9 + $0xd8] sm:$0xff]  ;;  %v220_v1 = vld [vmem:[%s2830_s9 + $0xe0] sm:$0xff]  ;;  %v221_v3 = vld [vmem:[%s2830_s9 + $0xe8] sm:$0xff] }
  0x29   : > { %2407 = vmatprep.mubr.msk.f32.mxu1 %vm2751_vm0, %v2752_v6  ;;  %v275_v0 = vld [vmem:[%s2830_s9 + $0x298] sm:$0xff]  ;;  %v276_v2 = vld [vmem:[%s2830_s9 + $0x2a0] sm:$0xff]  ;;  %v277_v4 = vld [vmem:[%s2830_s9 + $0x2a8] sm:$0xff] }
  0x2a   : > { %v222_v5 = vld [vmem:[%s2830_s9 + $0xf0] sm:$0xff]  ;;  %v223_v8 = vld [vmem:[%s2830_s9 + $0xf8] sm:$0xff]  ;;  %v224_v10 = vld [vmem:[%s2830_s9 + $0x100] sm:$0xff] }
  0x2b   : > { %2240 = vmatmul.mubr.msk.f32.gmra.mrb[10].mxu0 %vm315_vm2, %v197_v19  ;;  %v278_v7 = vld [vmem:[%s2830_s9 + $0x2b0] sm:$0xff]  ;;  %v279_v9 = vld [vmem:[%s2830_s9 + $0x2b8] sm:$0xff]  ;;  %v280_v11 = vld [vmem:[%s2830_s9 + $0x2c0] sm:$0xff] }
  0x2c   : > { %2408 = vmatmul.mubr.msk.f32.gmra.mrb[10].mxu1 %vm315_vm2, %v253_v20  ;;  %2242 = vmatprep.mubr.msk.f32.mxu0 %vm2751_vm0, %v2752_v6  ;;  %v225_v12 = vld [vmem:[%s2830_s9 + $0x108] sm:$0xff]  ;;  %v226_v14 = vld [vmem:[%s2830_s9 + $0x110] sm:$0xff]  ;;  %v227_v16 = vld [vmem:[%s2830_s9 + $0x118] sm:$0xff] }
  0x2d   : > { %2410 = vmatprep.mubr.msk.f32.mxu1 %vm2751_vm0, %v2752_v6  ;;  %v281_v13 = vld [vmem:[%s2830_s9 + $0x2c8] sm:$0xff]  ;;  %v282_v15 = vld [vmem:[%s2830_s9 + $0x2d0] sm:$0xff]  ;;  %v283_v17 = vld [vmem:[%s2830_s9 + $0x2d8] sm:$0xff] }
  0x2e   : > { %v228_v18 = vld [vmem:[%s2830_s9 + $0x120] sm:$0xff]  ;;  %v229_v20 = vld [vmem:[%s2830_s9 + $0x128] sm:$0xff] }
  0x2f   : > { %2243 = vmatmul.mubr.msk.f32.gmra.mrb[12].mxu0 %vm315_vm2, %v198_v21  ;;  %v284_v19 = vld [vmem:[%s2830_s9 + $0x2e0] sm:$0xff]  ;;  %v285_v21 = vld [vmem:[%s2830_s9 + $0x2e8] sm:$0xff] }
  0x30   : > { %2411 = vmatmul.mubr.msk.f32.gmra.mrb[12].mxu1 %vm315_vm2, %v254_v22  ;;  %2245 = vmatprep.mubr.msk.f32.mxu0 %vm2751_vm0, %v2752_v6  ;;  %v230_v22 = vld [vmem:[%s2830_s9 + $0x130] sm:$0xff] }
  0x31   : > { %2413 = vmatprep.mubr.msk.f32.mxu1 %vm2751_vm0, %v2752_v6 }
  0x33   : > { %2246 = vmatmul.mubr.msk.f32.gmra.mrb[14].mxu0 %vm315_vm2, %v199_v23  ;;  %v286_v23 = vld [vmem:[%s2830_s9 + $0x2f0] sm:$0xff] }
  0x34   : > { %2414 = vmatmul.mubr.msk.f32.gmra.mrb[14].mxu1 %vm315_vm2, %v255_v24  ;;  %2248 = vmatprep.mubr.msk.f32.mxu0 %vm2751_vm0, %v2752_v6  ;;  %v231_v24 = vld [vmem:[%s2830_s9 + $0x138] sm:$0xff] }
  0x35   : > { %2416 = vmatprep.mubr.msk.f32.mxu1 %vm2751_vm0, %v2752_v6 }
  0x37   : > { %2249 = vmatmul.mubr.msk.f32.gmra.mrb[16].mxu0 %vm315_vm2, %v200_v25  ;;  %v287_v25 = vld [vmem:[%s2830_s9 + $0x2f8] sm:$0xff] }
  0x38   : > { %2417 = vmatmul.mubr.msk.f32.gmra.mrb[16].mxu1 %vm315_vm2, %v256_v26  ;;  %2251 = vmatprep.mubr.msk.f32.mxu0 %vm2751_vm0, %v2752_v6  ;;  %v232_v26 = vld [vmem:[%s2830_s9 + $0x140] sm:$0xff] }
  0x39   : > { %2419 = vmatprep.mubr.msk.f32.mxu1 %vm2751_vm0, %v2752_v6 }
  0x3b   : > { %2252 = vmatmul.mubr.msk.f32.gmra.mrb[18].mxu0 %vm315_vm2, %v201_v27  ;;  %v288_v27 = vld [vmem:[%s2830_s9 + $0x300] sm:$0xff] }
  0x3c   : > { %2420 = vmatmul.mubr.msk.f32.gmra.mrb[18].mxu1 %vm315_vm2, %v257_v28  ;;  %2254 = vmatprep.mubr.msk.f32.mxu0 %vm2751_vm0, %v2752_v6  ;;  %v233_v28 = vld [vmem:[%s2830_s9 + $0x148] sm:$0xff] }
  0x3d   : > { %2422 = vmatprep.mubr.msk.f32.mxu1 %vm2751_vm0, %v2752_v6 }
  0x3f   : > { %2255 = vmatmul.mubr.msk.f32.gmra.mrb[20].mxu0 %vm315_vm2, %v202_v29  ;;  %v289_v29 = vld [vmem:[%s2830_s9 + $0x308] sm:$0xff] }
  0x40   : > { %2423 = vmatmul.mubr.msk.f32.gmra.mrb[20].mxu1 %vm315_vm2, %v258_v30  ;;  %2257 = vmatprep.mubr.msk.f32.mxu0 %vm2751_vm0, %v2752_v6  ;;  %v234_v30 = vld [vmem:[%s2830_s9 + $0x150] sm:$0xff] }
  0x41   : > { %2425 = vmatprep.mubr.msk.f32.mxu1 %vm2751_vm0, %v2752_v6 }
  0x43   : > { %2258 = vmatmul.mubr.msk.f32.gmra.mrb[22].mxu0 %vm315_vm2, %v203_v31  ;;  %v290_v31 = vld [vmem:[%s2830_s9 + $0x310] sm:$0xff] }
  0x44   : > { %2426 = vmatmul.mubr.msk.f32.gmra.mrb[22].mxu1 %vm315_vm2, %v259_v32  ;;  %2260 = vmatprep.mubr.msk.f32.mxu0 %vm2751_vm0, %v2752_v6  ;;  %v235_v32 = vld [vmem:[%s2830_s9 + $0x158] sm:$0xff] }
  0x45   : > { %2428 = vmatprep.mubr.msk.f32.mxu1 %vm2751_vm0, %v2752_v6 }
  0x47   : > { %2261 = vmatmul.mubr.msk.f32.gmra.mrb[24].mxu0 %vm315_vm2, %v204_v33  ;;  %v291_v33 = vld [vmem:[%s2830_s9 + $0x318] sm:$0xff] }
  0x48   : > { %2429 = vmatmul.mubr.msk.f32.gmra.mrb[24].mxu1 %vm315_vm2, %v260_v34  ;;  %2263 = vmatprep.mubr.msk.f32.mxu0 %vm2751_vm0, %v2752_v6  ;;  %v236_v34 = vld [vmem:[%s2830_s9 + $0x160] sm:$0xff] }
  0x49   : > { %2431 = vmatprep.mubr.msk.f32.mxu1 %vm2751_vm0, %v2752_v6 }
  0x4b   : > { %2264 = vmatmul.mubr.msk.f32.gmra.mrb[26].mxu0 %vm315_vm2, %v205_v35  ;;  %v292_v35 = vld [vmem:[%s2830_s9 + $0x320] sm:$0xff] }
  0x4c   : > { %2432 = vmatmul.mubr.msk.f32.gmra.mrb[26].mxu1 %vm315_vm2, %v261_v36  ;;  %2266 = vmatprep.mubr.msk.f32.mxu0 %vm2751_vm0, %v2752_v6  ;;  %v237_v36 = vld [vmem:[%s2830_s9 + $0x168] sm:$0xff] }
  0x4d   : > { %2434 = vmatprep.mubr.msk.f32.mxu1 %vm2751_vm0, %v2752_v6 }
  0x4f   : > { %2267 = vmatmul.mubr.msk.f32.gmra.mrb[28].mxu0 %vm315_vm2, %v206_v37  ;;  %v293_v37 = vld [vmem:[%s2830_s9 + $0x328] sm:$0xff] }
  0x50   : > { %2435 = vmatmul.mubr.msk.f32.gmra.mrb[28].mxu1 %vm315_vm2, %v262_v38  ;;  %2269 = vmatprep.mubr.msk.f32.mxu0 %vm2751_vm0, %v2752_v6  ;;  %v238_v38 = vld [vmem:[%s2830_s9 + $0x170] sm:$0xff] }
  0x51   : > { %2437 = vmatprep.mubr.msk.f32.mxu1 %vm2751_vm0, %v2752_v6 }
  0x53   : > { %2270 = vmatmul.mubr.msk.f32.gmra.mrb[30].mxu0 %vm315_vm2, %v207_v39  ;;  %v294_v39 = vld [vmem:[%s2830_s9 + $0x330] sm:$0xff] }
  0x54   : > { %2438 = vmatmul.mubr.msk.f32.gmra.mrb[30].mxu1 %vm315_vm2, %v263_v40  ;;  %2272 = vmatprep.mubr.msk.f32.mxu0 %vm2751_vm0, %v2752_v6  ;;  %v239_v40 = vld [vmem:[%s2830_s9 + $0x178] sm:$0xff] }
  0x55   : > { %2440 = vmatprep.mubr.msk.f32.mxu1 %vm2751_vm0, %v2752_v6 }
  0x57   : > { %2273 = vmatmul.mubr.msk.f32.gmra.mrb[32].mxu0 %vm315_vm2, %v208_v41  ;;  %v295_v41 = vld [vmem:[%s2830_s9 + $0x338] sm:$0xff] }
  0x58   : > { %2441 = vmatmul.mubr.msk.f32.gmra.mrb[32].mxu1 %vm315_vm2, %v264_v42  ;;  %2275 = vmatprep.mubr.msk.f32.mxu0 %vm2751_vm0, %v2752_v6  ;;  %v240_v42 = vld [vmem:[%s2830_s9 + $0x180] sm:$0xff] }
  0x59   : > { %2443 = vmatprep.mubr.msk.f32.mxu1 %vm2751_vm0, %v2752_v6 }
  0x5b   : > { %2276 = vmatmul.mubr.msk.f32.gmra.mrb[34].mxu0 %vm315_vm2, %v209_v43  ;;  %v296_v43 = vld [vmem:[%s2830_s9 + $0x340] sm:$0xff] }
  0x5c   : > { %2444 = vmatmul.mubr.msk.f32.gmra.mrb[34].mxu1 %vm315_vm2, %v265_v44  ;;  %2278 = vmatprep.mubr.msk.f32.mxu0 %vm2751_vm0, %v2752_v6  ;;  %v241_v44 = vld [vmem:[%s2830_s9 + $0x188] sm:$0xff] }
  0x5d   : > { %2446 = vmatprep.mubr.msk.f32.mxu1 %vm2751_vm0, %v2752_v6 }
  0x5f   : > { %2279 = vmatmul.mubr.msk.f32.gmra.mrb[36].mxu0 %vm315_vm2, %v210_v45  ;;  %v297_v45 = vld [vmem:[%s2830_s9 + $0x348] sm:$0xff] }
  0x60   : > { %2447 = vmatmul.mubr.msk.f32.gmra.mrb[36].mxu1 %vm315_vm2, %v266_v46  ;;  %2281 = vmatprep.mubr.msk.f32.mxu0 %vm2751_vm0, %v2752_v6  ;;  %v242_v46 = vld [vmem:[%s2830_s9 + $0x190] sm:$0xff] }
  0x61   : > { %2449 = vmatprep.mubr.msk.f32.mxu1 %vm2751_vm0, %v2752_v6 }
  0x63   : > { %2282 = vmatmul.mubr.msk.f32.gmra.mrb[38].mxu0 %vm315_vm2, %v211_v47  ;;  %v298_v47 = vld [vmem:[%s2830_s9 + $0x350] sm:$0xff] }
  0x64   : > { %2450 = vmatmul.mubr.msk.f32.gmra.mrb[38].mxu1 %vm315_vm2, %v267_v48  ;;  %2284 = vmatprep.mubr.msk.f32.mxu0 %vm2751_vm0, %v2752_v6  ;;  %v243_v48 = vld [vmem:[%s2830_s9 + $0x198] sm:$0xff] }
  0x65   : > { %2452 = vmatprep.mubr.msk.f32.mxu1 %vm2751_vm0, %v2752_v6 }
  0x67   : > { %2285 = vmatmul.mubr.msk.f32.gmra.mrb[40].mxu0 %vm315_vm2, %v212_v49  ;;  %v299_v49 = vld [vmem:[%s2830_s9 + $0x358] sm:$0xff] }
  0x68   : > { %2453 = vmatmul.mubr.msk.f32.gmra.mrb[40].mxu1 %vm315_vm2, %v268_v50  ;;  %2287 = vmatprep.mubr.msk.f32.mxu0 %vm2751_vm0, %v2752_v6  ;;  %v244_v50 = vld [vmem:[%s2830_s9 + $0x1a0] sm:$0xff] }
  0x69   : > { %2455 = vmatprep.mubr.msk.f32.mxu1 %vm2751_vm0, %v2752_v6 }
  0x6b   : > { %2288 = vmatmul.mubr.msk.f32.gmra.mrb[42].mxu0 %vm315_vm2, %v213_v51  ;;  %v300_v51 = vld [vmem:[%s2830_s9 + $0x360] sm:$0xff] }
  0x6c   : > { %2456 = vmatmul.mubr.msk.f32.gmra.mrb[42].mxu1 %vm315_vm2, %v269_v52  ;;  %2290 = vmatprep.mubr.msk.f32.mxu0 %vm2751_vm0, %v2752_v6  ;;  %v3257_v52 = vld [vmem:[%s3703_s2] ss:$0 sm:$0xff] }
  0x6d   : > { %2458 = vmatprep.mubr.msk.f32.mxu1 %vm2751_vm0, %v2752_v6 }
  0x6f   : > { %2291 = vmatmul.mubr.msk.f32.gmra.mrb[44].mxu0 %vm315_vm2, %v214_v53  ;;  %v245_v53 = vld [vmem:[%s2830_s9 + $0x1a8] sm:$0xff] }
  0x70   : > { %2459 = vmatmul.mubr.msk.f32.gmra.mrb[44].mxu1 %vm315_vm2, %v270_v54  ;;  %2293 = vmatprep.mubr.msk.f32.mxu0 %vm2751_vm0, %v2752_v6  ;;  %v301_v54 = vld [vmem:[%s2830_s9 + $0x368] sm:$0xff] }
  0x71   : > { %2461 = vmatprep.mubr.msk.f32.mxu1 %vm2751_vm0, %v2752_v6 }
  0x73   : > { %2294 = vmatmul.mubr.msk.f32.gmra.mrb[46].mxu0 %vm315_vm2, %v215_v55 }
  0x74   : > { %2462 = vmatmul.mubr.msk.f32.gmra.mrb[46].mxu1 %vm315_vm2, %v271_v56  ;;  %2296 = vmatprep.mubr.msk.f32.mxu0 %vm2751_vm0, %v2752_v6 }
  0x75   : > { %2464 = vmatprep.mubr.msk.f32.mxu1 %vm2751_vm0, %v2752_v6 }
  0x77   : > { %2297 = vmatmul.mubr.msk.f32.gmra.mrb[48].mxu0 %vm315_vm2, %v216_v57 }
  0x78   : > { %2465 = vmatmul.mubr.msk.f32.gmra.mrb[48].mxu1 %vm315_vm2, %v272_v58  ;;  %2299 = vmatprep.mubr.msk.f32.mxu0 %vm2751_vm0, %v2752_v6 }
  0x79   : > { %2467 = vmatprep.mubr.msk.f32.mxu1 %vm2751_vm0, %v2752_v6 }
  0x7b   : > { %2300 = vmatmul.mubr.msk.f32.gmra.mrb[50].mxu0 %vm315_vm2, %v217_v59 }
  0x7c   : > { %2468 = vmatmul.mubr.msk.f32.gmra.mrb[50].mxu1 %vm315_vm2, %v273_v60  ;;  %2302 = vmatprep.mubr.msk.f32.mxu0 %vm2751_vm0, %v2752_v6 }
  0x7d   : > { %2470 = vmatprep.mubr.msk.f32.mxu1 %vm2751_vm0, %v2752_v6 }
  0x7f   : > { %2303 = vmatmul.mubr.msk.f32.gmra.mrb[52].mxu0 %vm315_vm2, %v218_v61  ;;  %v246_v61 = vld [vmem:[%s2830_s9 + $0x1b0] sm:$0xff] }
  0x80   : > { %2471 = vmatmul.mubr.msk.f32.gmra.mrb[52].mxu1 %vm315_vm2, %v274_v62  ;;  %2305 = vmatprep.mubr.msk.f32.mxu0 %vm2751_vm0, %v2752_v6  ;;  %v302_v62 = vld [vmem:[%s2830_s9 + $0x370] sm:$0xff] }
  0x81   : > { %2473 = vmatprep.mubr.msk.f32.mxu1 %vm2751_vm0, %v2752_v6 }
  0x83   : > { %2306 = vmatmul.mubr.msk.f32.gmra.mrb[54].mxu0 %vm315_vm2, %v219_v63 }
  0x84   : > { %2474 = vmatmul.mubr.msk.f32.gmra.mrb[54].mxu1 %vm315_vm2, %v275_v0  ;;  %2308 = vmatprep.mubr.msk.f32.mxu0 %vm2751_vm0, %v2752_v6 }
  0x85   : > { %2476 = vmatprep.mubr.msk.f32.mxu1 %vm2751_vm0, %v2752_v6 }
  0x87   : > { %2309 = vmatmul.mubr.msk.f32.gmra.mrb[56].mxu0 %vm315_vm2, %v220_v1 }
  0x88   : > { %2477 = vmatmul.mubr.msk.f32.gmra.mrb[56].mxu1 %vm315_vm2, %v276_v2  ;;  %2311 = vmatprep.mubr.msk.f32.mxu0 %vm2751_vm0, %v2752_v6 }
  0x89   : > { %2479 = vmatprep.mubr.msk.f32.mxu1 %vm2751_vm0, %v2752_v6 }
  0x8b   : > { %2312 = vmatmul.mubr.msk.f32.gmra.mrb[58].mxu0 %vm315_vm2, %v221_v3 }
  0x8c   : > { %2480 = vmatmul.mubr.msk.f32.gmra.mrb[58].mxu1 %vm315_vm2, %v277_v4  ;;  %2314 = vmatprep.mubr.msk.f32.mxu0 %vm2751_vm0, %v2752_v6 }
  0x8d   : > { %2482 = vmatprep.mubr.msk.f32.mxu1 %vm2751_vm0, %v2752_v6 }
  0x8f   : > { %2315 = vmatmul.mubr.msk.f32.gmra.mrb[60].mxu0 %vm315_vm2, %v222_v5 }
  0x90   : > { %2483 = vmatmul.mubr.msk.f32.gmra.mrb[60].mxu1 %vm315_vm2, %v278_v7  ;;  %2317 = vmatprep.mubr.msk.f32.mxu0 %vm2751_vm0, %v2752_v6 }
  0x91   : > { %2485 = vmatprep.mubr.msk.f32.mxu1 %vm2751_vm0, %v2752_v6 }
  0x93   : > { %2318 = vmatmul.mubr.msk.f32.gmra.mrb[62].mxu0 %vm315_vm2, %v223_v8  ;;  %v247_v8 = vld [vmem:[%s2830_s9 + $0x1b8] sm:$0xff] }
  0x94   : > { %2486 = vmatmul.mubr.msk.f32.gmra.mrb[62].mxu1 %vm315_vm2, %v279_v9  ;;  %2320 = vmatprep.mubr.msk.f32.mxu0 %vm2751_vm0, %v2752_v6 }
  0x95   : > { %2488 = vmatprep.mubr.msk.f32.mxu1 %vm2751_vm0, %v2752_v6 }
  0x97   : > { %2321 = vmatmul.mubr.msk.f32.gmra.mrb[64].mxu0 %vm315_vm2, %v224_v10 }
  0x98   : > { %2489 = vmatmul.mubr.msk.f32.gmra.mrb[64].mxu1 %vm315_vm2, %v280_v11  ;;  %2323 = vmatprep.mubr.msk.f32.mxu0 %vm2751_vm0, %v2752_v6 }
  0x99   : > { %2491 = vmatprep.mubr.msk.f32.mxu1 %vm2751_vm0, %v2752_v6 }
  0x9b   : > { %2324 = vmatmul.mubr.msk.f32.gmra.mrb[66].mxu0 %vm315_vm2, %v225_v12 }
  0x9c   : > { %2492 = vmatmul.mubr.msk.f32.gmra.mrb[66].mxu1 %vm315_vm2, %v281_v13  ;;  %2326 = vmatprep.mubr.msk.f32.mxu0 %vm2751_vm0, %v2752_v6 }
  0x9d   : > { %2494 = vmatprep.mubr.msk.f32.mxu1 %vm2751_vm0, %v2752_v6 }
  0x9f   : > { %2327 = vmatmul.mubr.msk.f32.gmra.mrb[68].mxu0 %vm315_vm2, %v226_v14 }
  0xa0   : > { %2495 = vmatmul.mubr.msk.f32.gmra.mrb[68].mxu1 %vm315_vm2, %v282_v15  ;;  %2329 = vmatprep.mubr.msk.f32.mxu0 %vm2751_vm0, %v2752_v6 }
  0xa1   : > { %2497 = vmatprep.mubr.msk.f32.mxu1 %vm2751_vm0, %v2752_v6 }
  0xa3   : > { %2330 = vmatmul.mubr.msk.f32.gmra.mrb[70].mxu0 %vm315_vm2, %v227_v16 }
  0xa4   : > { %2498 = vmatmul.mubr.msk.f32.gmra.mrb[70].mxu1 %vm315_vm2, %v283_v17  ;;  %2332 = vmatprep.mubr.msk.f32.mxu0 %vm2751_vm0, %v2752_v6 }
  0xa5   : > { %2500 = vmatprep.mubr.msk.f32.mxu1 %vm2751_vm0, %v2752_v6 }
  0xa7   : > { %2333 = vmatmul.mubr.msk.f32.gmra.mrb[72].mxu0 %vm315_vm2, %v228_v18 }
  0xa8   : > { %2501 = vmatmul.mubr.msk.f32.gmra.mrb[72].mxu1 %vm315_vm2, %v284_v19  ;;  %2335 = vmatprep.mubr.msk.f32.mxu0 %vm2751_vm0, %v2752_v6 }
  0xa9   : > { %2503 = vmatprep.mubr.msk.f32.mxu1 %vm2751_vm0, %v2752_v6 }
  0xab   : > { %2336 = vmatmul.mubr.msk.f32.gmra.mrb[74].mxu0 %vm315_vm2, %v229_v20 }
  0xac   : > { %2504 = vmatmul.mubr.msk.f32.gmra.mrb[74].mxu1 %vm315_vm2, %v285_v21  ;;  %2338 = vmatprep.mubr.msk.f32.mxu0 %vm2751_vm0, %v2752_v6 }
  0xad   : > { %2506 = vmatprep.mubr.msk.f32.mxu1 %vm2751_vm0, %v2752_v6 }
  0xaf   : > { %2339 = vmatmul.mubr.msk.f32.gmra.mrb[76].mxu0 %vm315_vm2, %v230_v22 }
  0xb0   : > { %2507 = vmatmul.mubr.msk.f32.gmra.mrb[76].mxu1 %vm315_vm2, %v286_v23  ;;  %2341 = vmatprep.mubr.msk.f32.mxu0 %vm2751_vm0, %v2752_v6 }
  0xb1   : > { %2509 = vmatprep.mubr.msk.f32.mxu1 %vm2751_vm0, %v2752_v6 }
  0xb3   : > { %2342 = vmatmul.mubr.msk.f32.gmra.mrb[78].mxu0 %vm315_vm2, %v231_v24 }
  0xb4   : > { %2510 = vmatmul.mubr.msk.f32.gmra.mrb[78].mxu1 %vm315_vm2, %v287_v25  ;;  %2344 = vmatprep.mubr.msk.f32.mxu0 %vm2751_vm0, %v2752_v6 }
  0xb5   : > { %2512 = vmatprep.mubr.msk.f32.mxu1 %vm2751_vm0, %v2752_v6 }
  0xb7   : > { %2345 = vmatmul.mubr.msk.f32.gmra.mrb[80].mxu0 %vm315_vm2, %v232_v26 }
  0xb8   : > { %2513 = vmatmul.mubr.msk.f32.gmra.mrb[80].mxu1 %vm315_vm2, %v288_v27  ;;  %2347 = vmatprep.mubr.msk.f32.mxu0 %vm2751_vm0, %v2752_v6 }
  0xb9   : > { %2515 = vmatprep.mubr.msk.f32.mxu1 %vm2751_vm0, %v2752_v6 }
  0xbb   : > { %2348 = vmatmul.mubr.msk.f32.gmra.mrb[82].mxu0 %vm315_vm2, %v233_v28 }
  0xbc   : > { %2516 = vmatmul.mubr.msk.f32.gmra.mrb[82].mxu1 %vm315_vm2, %v289_v29  ;;  %2350 = vmatprep.mubr.msk.f32.mxu0 %vm2751_vm0, %v2752_v6 }
  0xbd   : > { %2518 = vmatprep.mubr.msk.f32.mxu1 %vm2751_vm0, %v2752_v6 }
  0xbf   : > { %2351 = vmatmul.mubr.msk.f32.gmra.mrb[84].mxu0 %vm315_vm2, %v234_v30 }
  0xc0   : > { %2519 = vmatmul.mubr.msk.f32.gmra.mrb[84].mxu1 %vm315_vm2, %v290_v31  ;;  %2353 = vmatprep.mubr.msk.f32.mxu0 %vm2751_vm0, %v2752_v6 }
  0xc1   : > { %2521 = vmatprep.mubr.msk.f32.mxu1 %vm2751_vm0, %v2752_v6 }
  0xc3   : > { %2354 = vmatmul.mubr.msk.f32.gmra.mrb[86].mxu0 %vm315_vm2, %v235_v32 }
  0xc4   : > { %2522 = vmatmul.mubr.msk.f32.gmra.mrb[86].mxu1 %vm315_vm2, %v291_v33  ;;  %2356 = vmatprep.mubr.msk.f32.mxu0 %vm2751_vm0, %v2752_v6 }
  0xc5   : > { %2524 = vmatprep.mubr.msk.f32.mxu1 %vm2751_vm0, %v2752_v6 }
  0xc7   : > { %2357 = vmatmul.mubr.msk.f32.gmra.mrb[88].mxu0 %vm315_vm2, %v236_v34 }
  0xc8   : > { %2525 = vmatmul.mubr.msk.f32.gmra.mrb[88].mxu1 %vm315_vm2, %v292_v35  ;;  %2359 = vmatprep.mubr.msk.f32.mxu0 %vm2751_vm0, %v2752_v6 }
  0xc9   : > { %2527 = vmatprep.mubr.msk.f32.mxu1 %vm2751_vm0, %v2752_v6 }
  0xcb   : > { %2360 = vmatmul.mubr.msk.f32.gmra.mrb[90].mxu0 %vm315_vm2, %v237_v36 }
  0xcc   : > { %2528 = vmatmul.mubr.msk.f32.gmra.mrb[90].mxu1 %vm315_vm2, %v293_v37  ;;  %2362 = vmatprep.mubr.msk.f32.mxu0 %vm2751_vm0, %v2752_v6 }
  0xcd   : > { %2530 = vmatprep.mubr.msk.f32.mxu1 %vm2751_vm0, %v2752_v6 }
  0xcf   : > { %2363 = vmatmul.mubr.msk.f32.gmra.mrb[92].mxu0 %vm315_vm2, %v238_v38 }
  0xd0   : > { %2531 = vmatmul.mubr.msk.f32.gmra.mrb[92].mxu1 %vm315_vm2, %v294_v39  ;;  %2365 = vmatprep.mubr.msk.f32.mxu0 %vm2751_vm0, %v2752_v6 }
  0xd1   : > { %2533 = vmatprep.mubr.msk.f32.mxu1 %vm2751_vm0, %v2752_v6 }
  0xd3   : > { %2366 = vmatmul.mubr.msk.f32.gmra.mrb[94].mxu0 %vm315_vm2, %v239_v40 }
  0xd4   : > { %2534 = vmatmul.mubr.msk.f32.gmra.mrb[94].mxu1 %vm315_vm2, %v295_v41  ;;  %2368 = vmatprep.mubr.msk.f32.mxu0 %vm2751_vm0, %v2752_v6 }
  0xd5   : > { %2536 = vmatprep.mubr.msk.f32.mxu1 %vm2751_vm0, %v2752_v6 }
  0xd7   : > { %2369 = vmatmul.mubr.msk.f32.gmra.mrb[96].mxu0 %vm315_vm2, %v240_v42 }
  0xd8   : > { %2537 = vmatmul.mubr.msk.f32.gmra.mrb[96].mxu1 %vm315_vm2, %v296_v43  ;;  %2371 = vmatprep.mubr.msk.f32.mxu0 %vm2751_vm0, %v2752_v6 }
  0xd9   : > { %2539 = vmatprep.mubr.msk.f32.mxu1 %vm2751_vm0, %v2752_v6 }
  0xdb   : > { %2372 = vmatmul.mubr.msk.f32.gmra.mrb[98].mxu0 %vm315_vm2, %v241_v44 }
  0xdc   : > { %2540 = vmatmul.mubr.msk.f32.gmra.mrb[98].mxu1 %vm315_vm2, %v297_v45  ;;  %2374 = vmatprep.mubr.msk.f32.mxu0 %vm2751_vm0, %v2752_v6 }
  0xdd   : > { %2542 = vmatprep.mubr.msk.f32.mxu1 %vm2751_vm0, %v2752_v6 }
  0xdf   : > { %2375 = vmatmul.mubr.msk.f32.gmra.mrb[100].mxu0 %vm315_vm2, %v242_v46 }
  0xe0   : > { %2543 = vmatmul.mubr.msk.f32.gmra.mrb[100].mxu1 %vm315_vm2, %v298_v47  ;;  %2377 = vmatprep.mubr.msk.f32.mxu0 %vm2751_vm0, %v2752_v6 }
  0xe1   : > { %2545 = vmatprep.mubr.msk.f32.mxu1 %vm2751_vm0, %v2752_v6 }
  0xe3   : > { %2378 = vmatmul.mubr.msk.f32.gmra.mrb[102].mxu0 %vm315_vm2, %v243_v48 }
  0xe4   : > { %2546 = vmatmul.mubr.msk.f32.gmra.mrb[102].mxu1 %vm315_vm2, %v299_v49  ;;  %2380 = vmatprep.mubr.msk.f32.mxu0 %vm2751_vm0, %v2752_v6 }
  0xe5   : > { %2548 = vmatprep.mubr.msk.f32.mxu1 %vm2751_vm0, %v2752_v6 }
  0xe7   : > { %2381 = vmatmul.mubr.msk.f32.gmra.mrb[104].mxu0 %vm315_vm2, %v244_v50 }
  0xe8   : > { %2549 = vmatmul.mubr.msk.f32.gmra.mrb[104].mxu1 %vm315_vm2, %v300_v51  ;;  %2383 = vmatprep.mubr.msk.f32.mxu0 %vm2751_vm0, %v2752_v6 }
  0xe9   : > { %2551 = vmatprep.mubr.msk.f32.mxu1 %vm2751_vm0, %v2752_v6 }
  0xea   : > { %v719_v55 = vpop.f32.mrb[0].mxu0 }
  0xeb   : > { %v999_v56 = vpop.f32.mrb[0].mxu1  ;;  %v720_v57 = vadd.f32 %v3257_v52, %v719_v55  ;;  %v2226_v58 = vpop.f32.mrb[1].mxu0  ;;  %2384 = vmatmul.mubr.msk.f32.gmra.mrb[106].mxu0 %vm315_vm2, %v245_v53 }
  0xec   : > { %v1000_v59 = vadd.f32 %v3257_v52, %v999_v56  ;;  %v2394_v60 = vpop.f32.mrb[1].mxu1  ;;  %2552 = vmatmul.mubr.msk.f32.gmra.mrb[106].mxu1 %vm315_vm2, %v301_v54  ;;  %2386 = vmatprep.mubr.msk.f32.mxu0 %vm2751_vm0, %v2752_v6 }
  0xed   : > { %2554 = vmatprep.mubr.msk.f32.mxu1 %vm2751_vm0, %v2752_v6  ;;  %v1273_v63 = vmax.f32 %v720_v57, 0.0 }
  0xee   : > { %v1329_v0 = vmax.f32 %v1000_v59, 0.0  ;;  %v724_v1 = vpop.f32.mrb[2].mxu0 }
  0xef   : > { %v1004_v2 = vpop.f32.mrb[2].mxu1  ;;  %1384 = vst [vmem:[%s3275_s12] sm:$0xff] %v1273_v63  ;;  %v725_v3 = vadd.f32 %v3257_v52, %v724_v1  ;;  %v2229_v4 = vpop.f32.mrb[3].mxu0  ;;  %2387 = vmatmul.mubr.msk.f32.gmra.mrb[108].mxu0 %vm315_vm2, %v246_v61 }
  0xf0   : > { %1440 = vst [vmem:[%s3275_s12 + $0x1c0] sm:$0xff] %v1329_v0  ;;  %v1005_v5 = vadd.f32 %v3257_v52, %v1004_v2  ;;  %v2397_v7 = vpop.f32.mrb[3].mxu1  ;;  %2555 = vmatmul.mubr.msk.f32.gmra.mrb[108].mxu1 %vm315_vm2, %v302_v62  ;;  %2389 = vmatprep.mubr.msk.f32.mxu0 %vm2751_vm0, %v2752_v6 }
  0xf1   : > { %v1274_v9 = vmax.f32 %v725_v3, 0.0 }
  0xf2   : > { %v1330_v10 = vmax.f32 %v1005_v5, 0.0  ;;  %v729_v11 = vpop.f32.mrb[4].mxu0 }
  0xf3   : > { %v1009_v12 = vpop.f32.mrb[4].mxu1  ;;  %1385 = vst [vmem:[%s3275_s12 + $0x8] sm:$0xff] %v1274_v9  ;;  %v730_v13 = vadd.f32 %v3257_v52, %v729_v11  ;;  %v2232_v14 = vpop.f32.mrb[5].mxu0  ;;  %2390 = vmatmul.mubr.msk.f32.gmra.mrb[110].mxu0 %vm315_vm2, %v247_v8 }
  0xf4   : > { %1441 = vst [vmem:[%s3275_s12 + $0x1c8] sm:$0xff] %v1330_v10  ;;  %v1010_v15 = vadd.f32 %v3257_v52, %v1009_v12  ;;  %v2400_v16 = vpop.f32.mrb[5].mxu1 }
  0xf5   : > { %v1275_v6 = vmax.f32 %v730_v13, 0.0 }
  0xf6   : > { %v1331_v17 = vmax.f32 %v1010_v15, 0.0  ;;  %v734_v18 = vpop.f32.mrb[6].mxu0 }
  0xf7   : > { %v1014_v19 = vpop.f32.mrb[6].mxu1  ;;  %1386 = vst [vmem:[%s3275_s12 + $0x10] sm:$0xff] %v1275_v6  ;;  %v735_v20 = vadd.f32 %v3257_v52, %v734_v18  ;;  %v2235_v21 = vpop.f32.mrb[7].mxu0 }
  0xf8   : > { %1442 = vst [vmem:[%s3275_s12 + $0x1d0] sm:$0xff] %v1331_v17  ;;  %v1015_v22 = vadd.f32 %v3257_v52, %v1014_v19  ;;  %v2403_v23 = vpop.f32.mrb[7].mxu1 }
  0xf9   : > { %v1276_v24 = vmax.f32 %v735_v20, 0.0 }
  0xfa   : > { %v1332_v25 = vmax.f32 %v1015_v22, 0.0  ;;  %v739_v26 = vpop.f32.mrb[8].mxu0 }
  0xfb   : > { %v1019_v27 = vpop.f32.mrb[8].mxu1  ;;  %1387 = vst [vmem:[%s3275_s12 + $0x18] sm:$0xff] %v1276_v24  ;;  %v740_v28 = vadd.f32 %v3257_v52, %v739_v26  ;;  %v2238_v29 = vpop.f32.mrb[9].mxu0 }
  0xfc   : > { %1443 = vst [vmem:[%s3275_s12 + $0x1d8] sm:$0xff] %v1332_v25  ;;  %v1020_v30 = vadd.f32 %v3257_v52, %v1019_v27  ;;  %v2406_v31 = vpop.f32.mrb[9].mxu1 }
  0xfd   : > { %v1277_v32 = vmax.f32 %v740_v28, 0.0 }
  0xfe   : > { %v1333_v33 = vmax.f32 %v1020_v30, 0.0  ;;  %v744_v34 = vpop.f32.mrb[10].mxu0 }
  0xff   : > { %v1024_v35 = vpop.f32.mrb[10].mxu1  ;;  %1388 = vst [vmem:[%s3275_s12 + $0x20] sm:$0xff] %v1277_v32  ;;  %v745_v36 = vadd.f32 %v3257_v52, %v744_v34  ;;  %v2241_v37 = vpop.f32.mrb[11].mxu0 }
 0x100   : > { %1444 = vst [vmem:[%s3275_s12 + $0x1e0] sm:$0xff] %v1333_v33  ;;  %v1025_v38 = vadd.f32 %v3257_v52, %v1024_v35  ;;  %v2409_v39 = vpop.f32.mrb[11].mxu1 }
 0x101   : > { %v1278_v40 = vmax.f32 %v745_v36, 0.0 }
 0x102   : > { %v1334_v41 = vmax.f32 %v1025_v38, 0.0  ;;  %v749_v42 = vpop.f32.mrb[12].mxu0 }
 0x103   : > { %v1029_v43 = vpop.f32.mrb[12].mxu1  ;;  %1389 = vst [vmem:[%s3275_s12 + $0x28] sm:$0xff] %v1278_v40  ;;  %v750_v44 = vadd.f32 %v3257_v52, %v749_v42  ;;  %v2244_v45 = vpop.f32.mrb[13].mxu0 }
 0x104   : > { %1445 = vst [vmem:[%s3275_s12 + $0x1e8] sm:$0xff] %v1334_v41  ;;  %v1030_v46 = vadd.f32 %v3257_v52, %v1029_v43  ;;  %v2412_v47 = vpop.f32.mrb[13].mxu1 }
 0x105   : > { %v1279_v48 = vmax.f32 %v750_v44, 0.0 }
 0x106   : > { %v1335_v49 = vmax.f32 %v1030_v46, 0.0  ;;  %v754_v50 = vpop.f32.mrb[14].mxu0 }
 0x107   : > { %v1034_v51 = vpop.f32.mrb[14].mxu1  ;;  %1390 = vst [vmem:[%s3275_s12 + $0x30] sm:$0xff] %v1279_v48  ;;  %v755_v53 = vadd.f32 %v3257_v52, %v754_v50  ;;  %v2247_v54 = vpop.f32.mrb[15].mxu0 }
 0x108   : > { %1446 = vst [vmem:[%s3275_s12 + $0x1f0] sm:$0xff] %v1335_v49  ;;  %v1035_v55 = vadd.f32 %v3257_v52, %v1034_v51  ;;  %v2415_v56 = vpop.f32.mrb[15].mxu1 }
 0x109   : > { %v1280_v57 = vmax.f32 %v755_v53, 0.0 }
 0x10a   : > { %v1336_v58 = vmax.f32 %v1035_v55, 0.0  ;;  %v759_v59 = vpop.f32.mrb[16].mxu0 }
 0x10b   : > { %v1039_v60 = vpop.f32.mrb[16].mxu1  ;;  %1391 = vst [vmem:[%s3275_s12 + $0x38] sm:$0xff] %v1280_v57  ;;  %v760_v61 = vadd.f32 %v3257_v52, %v759_v59  ;;  %v2250_v62 = vpop.f32.mrb[17].mxu0 }
 0x10c   : > { %1447 = vst [vmem:[%s3275_s12 + $0x1f8] sm:$0xff] %v1336_v58  ;;  %v1040_v63 = vadd.f32 %v3257_v52, %v1039_v60  ;;  %v2418_v0 = vpop.f32.mrb[17].mxu1 }
 0x10d   : > { %v1281_v1 = vmax.f32 %v760_v61, 0.0 }
 0x10e   : > { %v1337_v2 = vmax.f32 %v1040_v63, 0.0  ;;  %v764_v3 = vpop.f32.mrb[18].mxu0 }
 0x10f   : > { %v1044_v4 = vpop.f32.mrb[18].mxu1  ;;  %1392 = vst [vmem:[%s3275_s12 + $0x40] sm:$0xff] %v1281_v1  ;;  %v765_v5 = vadd.f32 %v3257_v52, %v764_v3  ;;  %v2253_v7 = vpop.f32.mrb[19].mxu0 }
 0x110   : > { %1448 = vst [vmem:[%s3275_s12 + $0x200] sm:$0xff] %v1337_v2  ;;  %v1045_v8 = vadd.f32 %v3257_v52, %v1044_v4  ;;  %v2421_v9 = vpop.f32.mrb[19].mxu1 }
 0x111   : > { %v1282_v10 = vmax.f32 %v765_v5, 0.0 }
 0x112   : > { %v1338_v11 = vmax.f32 %v1045_v8, 0.0  ;;  %v769_v12 = vpop.f32.mrb[20].mxu0 }
 0x113   : > { %v1049_v13 = vpop.f32.mrb[20].mxu1  ;;  %1393 = vst [vmem:[%s3275_s12 + $0x48] sm:$0xff] %v1282_v10  ;;  %v770_v14 = vadd.f32 %v3257_v52, %v769_v12  ;;  %v2256_v15 = vpop.f32.mrb[21].mxu0 }
 0x114   : > { %1449 = vst [vmem:[%s3275_s12 + $0x208] sm:$0xff] %v1338_v11  ;;  %v1050_v16 = vadd.f32 %v3257_v52, %v1049_v13  ;;  %v2424_v6 = vpop.f32.mrb[21].mxu1 }
 0x115   : > { %v1283_v17 = vmax.f32 %v770_v14, 0.0 }
 0x116   : > { %v1339_v18 = vmax.f32 %v1050_v16, 0.0  ;;  %v774_v19 = vpop.f32.mrb[22].mxu0 }
 0x117   : > { %v1054_v20 = vpop.f32.mrb[22].mxu1  ;;  %1394 = vst [vmem:[%s3275_s12 + $0x50] sm:$0xff] %v1283_v17  ;;  %v775_v21 = vadd.f32 %v3257_v52, %v774_v19  ;;  %v2259_v22 = vpop.f32.mrb[23].mxu0 }
 0x118   : > { %1450 = vst [vmem:[%s3275_s12 + $0x210] sm:$0xff] %v1339_v18  ;;  %v1055_v23 = vadd.f32 %v3257_v52, %v1054_v20  ;;  %v2427_v24 = vpop.f32.mrb[23].mxu1 }
 0x119   : > { %v1284_v25 = vmax.f32 %v775_v21, 0.0 }
 0x11a   : > { %v1340_v26 = vmax.f32 %v1055_v23, 0.0  ;;  %v779_v27 = vpop.f32.mrb[24].mxu0 }
 0x11b   : > { %v1059_v28 = vpop.f32.mrb[24].mxu1  ;;  %1395 = vst [vmem:[%s3275_s12 + $0x58] sm:$0xff] %v1284_v25  ;;  %v780_v29 = vadd.f32 %v3257_v52, %v779_v27  ;;  %v2262_v30 = vpop.f32.mrb[25].mxu0 }
 0x11c   : > { %1451 = vst [vmem:[%s3275_s12 + $0x218] sm:$0xff] %v1340_v26  ;;  %v1060_v31 = vadd.f32 %v3257_v52, %v1059_v28  ;;  %v2430_v32 = vpop.f32.mrb[25].mxu1 }
 0x11d   : > { %v1285_v33 = vmax.f32 %v780_v29, 0.0 }
 0x11e   : > { %v1341_v34 = vmax.f32 %v1060_v31, 0.0  ;;  %v784_v35 = vpop.f32.mrb[26].mxu0 }
 0x11f   : > { %v1064_v36 = vpop.f32.mrb[26].mxu1  ;;  %1396 = vst [vmem:[%s3275_s12 + $0x60] sm:$0xff] %v1285_v33  ;;  %v785_v37 = vadd.f32 %v3257_v52, %v784_v35  ;;  %v2265_v38 = vpop.f32.mrb[27].mxu0 }
 0x120   : > { %1452 = vst [vmem:[%s3275_s12 + $0x220] sm:$0xff] %v1341_v34  ;;  %v1065_v39 = vadd.f32 %v3257_v52, %v1064_v36  ;;  %v2433_v40 = vpop.f32.mrb[27].mxu1 }
 0x121   : > { %v1286_v41 = vmax.f32 %v785_v37, 0.0 }
 0x122   : > { %v1342_v42 = vmax.f32 %v1065_v39, 0.0  ;;  %v789_v43 = vpop.f32.mrb[28].mxu0 }
 0x123   : > { %v1069_v44 = vpop.f32.mrb[28].mxu1  ;;  %1397 = vst [vmem:[%s3275_s12 + $0x68] sm:$0xff] %v1286_v41  ;;  %v790_v45 = vadd.f32 %v3257_v52, %v789_v43  ;;  %v2268_v46 = vpop.f32.mrb[29].mxu0 }
 0x124   : > { %1453 = vst [vmem:[%s3275_s12 + $0x228] sm:$0xff] %v1342_v42  ;;  %v1070_v47 = vadd.f32 %v3257_v52, %v1069_v44  ;;  %v2436_v48 = vpop.f32.mrb[29].mxu1 }
 0x125   : > { %v1287_v49 = vmax.f32 %v790_v45, 0.0 }
 0x126   : > { %v1343_v50 = vmax.f32 %v1070_v47, 0.0  ;;  %v794_v51 = vpop.f32.mrb[30].mxu0 }
 0x127   : > { %v1074_v53 = vpop.f32.mrb[30].mxu1  ;;  %1398 = vst [vmem:[%s3275_s12 + $0x70] sm:$0xff] %v1287_v49  ;;  %v795_v54 = vadd.f32 %v3257_v52, %v794_v51  ;;  %v2271_v55 = vpop.f32.mrb[31].mxu0 }
 0x128   : > { %1454 = vst [vmem:[%s3275_s12 + $0x230] sm:$0xff] %v1343_v50  ;;  %v1075_v56 = vadd.f32 %v3257_v52, %v1074_v53  ;;  %v2439_v57 = vpop.f32.mrb[31].mxu1 }
 0x129   : > { %v1288_v58 = vmax.f32 %v795_v54, 0.0 }
 0x12a   : > { %v1344_v59 = vmax.f32 %v1075_v56, 0.0  ;;  %v799_v60 = vpop.f32.mrb[32].mxu0 }
 0x12b   : > { %v1079_v61 = vpop.f32.mrb[32].mxu1  ;;  %1399 = vst [vmem:[%s3275_s12 + $0x78] sm:$0xff] %v1288_v58  ;;  %v800_v62 = vadd.f32 %v3257_v52, %v799_v60  ;;  %v2274_v63 = vpop.f32.mrb[33].mxu0 }
 0x12c   : > { %1455 = vst [vmem:[%s3275_s12 + $0x238] sm:$0xff] %v1344_v59  ;;  %v1080_v0 = vadd.f32 %v3257_v52, %v1079_v61  ;;  %v2442_v1 = vpop.f32.mrb[33].mxu1 }
 0x12d   : > { %v1289_v2 = vmax.f32 %v800_v62, 0.0 }
 0x12e   : > { %v1345_v3 = vmax.f32 %v1080_v0, 0.0  ;;  %v804_v4 = vpop.f32.mrb[34].mxu0 }
 0x12f   : > { %v1084_v5 = vpop.f32.mrb[34].mxu1  ;;  %1400 = vst [vmem:[%s3275_s12 + $0x80] sm:$0xff] %v1289_v2  ;;  %v805_v7 = vadd.f32 %v3257_v52, %v804_v4  ;;  %v2277_v8 = vpop.f32.mrb[35].mxu0 }
 0x130   : > { %1456 = vst [vmem:[%s3275_s12 + $0x240] sm:$0xff] %v1345_v3  ;;  %v1085_v9 = vadd.f32 %v3257_v52, %v1084_v5  ;;  %v2445_v10 = vpop.f32.mrb[35].mxu1 }
 0x131   : > { %v1290_v11 = vmax.f32 %v805_v7, 0.0 }
 0x132   : > { %v1346_v12 = vmax.f32 %v1085_v9, 0.0  ;;  %v809_v13 = vpop.f32.mrb[36].mxu0 }
 0x133   : > { %v1089_v14 = vpop.f32.mrb[36].mxu1  ;;  %1401 = vst [vmem:[%s3275_s12 + $0x88] sm:$0xff] %v1290_v11  ;;  %v810_v15 = vadd.f32 %v3257_v52, %v809_v13  ;;  %v2280_v16 = vpop.f32.mrb[37].mxu0 }
 0x134   : > { %1457 = vst [vmem:[%s3275_s12 + $0x248] sm:$0xff] %v1346_v12  ;;  %v1090_v6 = vadd.f32 %v3257_v52, %v1089_v14  ;;  %v2448_v17 = vpop.f32.mrb[37].mxu1 }
 0x135   : > { %v1291_v18 = vmax.f32 %v810_v15, 0.0 }
 0x136   : > { %v1347_v19 = vmax.f32 %v1090_v6, 0.0  ;;  %v814_v20 = vpop.f32.mrb[38].mxu0 }
 0x137   : > { %v1094_v21 = vpop.f32.mrb[38].mxu1  ;;  %1402 = vst [vmem:[%s3275_s12 + $0x90] sm:$0xff] %v1291_v18  ;;  %v815_v22 = vadd.f32 %v3257_v52, %v814_v20  ;;  %v2283_v23 = vpop.f32.mrb[39].mxu0 }
 0x138   : > { %1458 = vst [vmem:[%s3275_s12 + $0x250] sm:$0xff] %v1347_v19  ;;  %v1095_v24 = vadd.f32 %v3257_v52, %v1094_v21  ;;  %v2451_v25 = vpop.f32.mrb[39].mxu1 }
 0x139   : > { %v1292_v26 = vmax.f32 %v815_v22, 0.0 }
 0x13a   : > { %v1348_v27 = vmax.f32 %v1095_v24, 0.0  ;;  %v819_v28 = vpop.f32.mrb[40].mxu0 }
 0x13b   : > { %v1099_v29 = vpop.f32.mrb[40].mxu1  ;;  %1403 = vst [vmem:[%s3275_s12 + $0x98] sm:$0xff] %v1292_v26  ;;  %v820_v30 = vadd.f32 %v3257_v52, %v819_v28  ;;  %v2286_v31 = vpop.f32.mrb[41].mxu0 }
 0x13c   : > { %1459 = vst [vmem:[%s3275_s12 + $0x258] sm:$0xff] %v1348_v27  ;;  %v1100_v32 = vadd.f32 %v3257_v52, %v1099_v29  ;;  %v2454_v33 = vpop.f32.mrb[41].mxu1 }
 0x13d   : > { %v1293_v34 = vmax.f32 %v820_v30, 0.0 }
 0x13e   : > { %v1349_v35 = vmax.f32 %v1100_v32, 0.0  ;;  %v824_v36 = vpop.f32.mrb[42].mxu0 }
 0x13f   : > { %v1104_v37 = vpop.f32.mrb[42].mxu1  ;;  %1404 = vst [vmem:[%s3275_s12 + $0xa0] sm:$0xff] %v1293_v34  ;;  %v825_v38 = vadd.f32 %v3257_v52, %v824_v36  ;;  %v2289_v39 = vpop.f32.mrb[43].mxu0 }
 0x140   : > { %1460 = vst [vmem:[%s3275_s12 + $0x260] sm:$0xff] %v1349_v35  ;;  %v1105_v40 = vadd.f32 %v3257_v52, %v1104_v37  ;;  %v2457_v41 = vpop.f32.mrb[43].mxu1 }
 0x141   : > { %v1294_v42 = vmax.f32 %v825_v38, 0.0 }
 0x142   : > { %v1350_v43 = vmax.f32 %v1105_v40, 0.0  ;;  %v829_v44 = vpop.f32.mrb[44].mxu0 }
 0x143   : > { %v1109_v45 = vpop.f32.mrb[44].mxu1  ;;  %1405 = vst [vmem:[%s3275_s12 + $0xa8] sm:$0xff] %v1294_v42  ;;  %v830_v46 = vadd.f32 %v3257_v52, %v829_v44  ;;  %v2292_v47 = vpop.f32.mrb[45].mxu0 }
 0x144   : > { %1461 = vst [vmem:[%s3275_s12 + $0x268] sm:$0xff] %v1350_v43  ;;  %v1110_v48 = vadd.f32 %v3257_v52, %v1109_v45  ;;  %v2460_v49 = vpop.f32.mrb[45].mxu1 }
 0x145   : > { %v1295_v50 = vmax.f32 %v830_v46, 0.0 }
 0x146   : > { %v1351_v51 = vmax.f32 %v1110_v48, 0.0  ;;  %v834_v53 = vpop.f32.mrb[46].mxu0 }
 0x147   : > { %v1114_v54 = vpop.f32.mrb[46].mxu1  ;;  %1406 = vst [vmem:[%s3275_s12 + $0xb0] sm:$0xff] %v1295_v50  ;;  %v835_v55 = vadd.f32 %v3257_v52, %v834_v53  ;;  %v2295_v56 = vpop.f32.mrb[47].mxu0 }
 0x148   : > { %1462 = vst [vmem:[%s3275_s12 + $0x270] sm:$0xff] %v1351_v51  ;;  %v1115_v57 = vadd.f32 %v3257_v52, %v1114_v54  ;;  %v2463_v58 = vpop.f32.mrb[47].mxu1 }
 0x149   : > { %v1296_v59 = vmax.f32 %v835_v55, 0.0 }
 0x14a   : > { %v1352_v60 = vmax.f32 %v1115_v57, 0.0  ;;  %v839_v61 = vpop.f32.mrb[48].mxu0 }
 0x14b   : > { %v1119_v62 = vpop.f32.mrb[48].mxu1  ;;  %1407 = vst [vmem:[%s3275_s12 + $0xb8] sm:$0xff] %v1296_v59  ;;  %v840_v63 = vadd.f32 %v3257_v52, %v839_v61  ;;  %v2298_v0 = vpop.f32.mrb[49].mxu0 }
 0x14c   : > { %1463 = vst [vmem:[%s3275_s12 + $0x278] sm:$0xff] %v1352_v60  ;;  %v1120_v1 = vadd.f32 %v3257_v52, %v1119_v62  ;;  %v2466_v2 = vpop.f32.mrb[49].mxu1 }
 0x14d   : > { %v1297_v3 = vmax.f32 %v840_v63, 0.0 }
 0x14e   : > { %v1353_v4 = vmax.f32 %v1120_v1, 0.0  ;;  %v844_v5 = vpop.f32.mrb[50].mxu0 }
 0x14f   : > { %v1124_v7 = vpop.f32.mrb[50].mxu1  ;;  %1408 = vst [vmem:[%s3275_s12 + $0xc0] sm:$0xff] %v1297_v3  ;;  %v845_v8 = vadd.f32 %v3257_v52, %v844_v5  ;;  %v2301_v9 = vpop.f32.mrb[51].mxu0 }
 0x150   : > { %1464 = vst [vmem:[%s3275_s12 + $0x280] sm:$0xff] %v1353_v4  ;;  %v1125_v10 = vadd.f32 %v3257_v52, %v1124_v7  ;;  %v2469_v11 = vpop.f32.mrb[51].mxu1 }
 0x151   : > { %v1298_v12 = vmax.f32 %v845_v8, 0.0 }
 0x152   : > { %v1354_v13 = vmax.f32 %v1125_v10, 0.0  ;;  %v849_v14 = vpop.f32.mrb[52].mxu0 }
 0x153   : > { %v1129_v15 = vpop.f32.mrb[52].mxu1  ;;  %1409 = vst [vmem:[%s3275_s12 + $0xc8] sm:$0xff] %v1298_v12  ;;  %v850_v16 = vadd.f32 %v3257_v52, %v849_v14  ;;  %v2304_v6 = vpop.f32.mrb[53].mxu0 }
 0x154   : > { %1465 = vst [vmem:[%s3275_s12 + $0x288] sm:$0xff] %v1354_v13  ;;  %v1130_v17 = vadd.f32 %v3257_v52, %v1129_v15  ;;  %v2472_v18 = vpop.f32.mrb[53].mxu1 }
 0x155   : > { %v1299_v19 = vmax.f32 %v850_v16, 0.0 }
 0x156   : > { %v1355_v20 = vmax.f32 %v1130_v17, 0.0  ;;  %v854_v21 = vpop.f32.mrb[54].mxu0 }
 0x157   : > { %v1134_v22 = vpop.f32.mrb[54].mxu1  ;;  %1410 = vst [vmem:[%s3275_s12 + $0xd0] sm:$0xff] %v1299_v19  ;;  %v855_v23 = vadd.f32 %v3257_v52, %v854_v21  ;;  %v2307_v24 = vpop.f32.mrb[55].mxu0 }
 0x158   : > { %1466 = vst [vmem:[%s3275_s12 + $0x290] sm:$0xff] %v1355_v20  ;;  %v1135_v25 = vadd.f32 %v3257_v52, %v1134_v22  ;;  %v2475_v26 = vpop.f32.mrb[55].mxu1 }
 0x159   : > { %v1300_v27 = vmax.f32 %v855_v23, 0.0 }
 0x15a   : > { %v1356_v28 = vmax.f32 %v1135_v25, 0.0  ;;  %v859_v29 = vpop.f32.mrb[56].mxu0 }
 0x15b   : > { %v1139_v30 = vpop.f32.mrb[56].mxu1  ;;  %1411 = vst [vmem:[%s3275_s12 + $0xd8] sm:$0xff] %v1300_v27  ;;  %v860_v31 = vadd.f32 %v3257_v52, %v859_v29  ;;  %v2310_v32 = vpop.f32.mrb[57].mxu0 }
 0x15c   : > { %1467 = vst [vmem:[%s3275_s12 + $0x298] sm:$0xff] %v1356_v28  ;;  %v1140_v33 = vadd.f32 %v3257_v52, %v1139_v30  ;;  %v2478_v34 = vpop.f32.mrb[57].mxu1 }
 0x15d   : > { %v1301_v35 = vmax.f32 %v860_v31, 0.0 }
 0x15e   : > { %v1357_v36 = vmax.f32 %v1140_v33, 0.0  ;;  %v864_v37 = vpop.f32.mrb[58].mxu0 }
 0x15f   : > { %v1144_v38 = vpop.f32.mrb[58].mxu1  ;;  %1412 = vst [vmem:[%s3275_s12 + $0xe0] sm:$0xff] %v1301_v35  ;;  %v865_v39 = vadd.f32 %v3257_v52, %v864_v37  ;;  %v2313_v40 = vpop.f32.mrb[59].mxu0 }
 0x160   : > { %1468 = vst [vmem:[%s3275_s12 + $0x2a0] sm:$0xff] %v1357_v36  ;;  %v1145_v41 = vadd.f32 %v3257_v52, %v1144_v38  ;;  %v2481_v42 = vpop.f32.mrb[59].mxu1 }
 0x161   : > { %v1302_v43 = vmax.f32 %v865_v39, 0.0 }
 0x162   : > { %v1358_v44 = vmax.f32 %v1145_v41, 0.0  ;;  %v869_v45 = vpop.f32.mrb[60].mxu0 }
 0x163   : > { %v1149_v46 = vpop.f32.mrb[60].mxu1  ;;  %1413 = vst [vmem:[%s3275_s12 + $0xe8] sm:$0xff] %v1302_v43  ;;  %v870_v47 = vadd.f32 %v3257_v52, %v869_v45  ;;  %v2316_v48 = vpop.f32.mrb[61].mxu0 }
 0x164   : > { %1469 = vst [vmem:[%s3275_s12 + $0x2a8] sm:$0xff] %v1358_v44  ;;  %v1150_v49 = vadd.f32 %v3257_v52, %v1149_v46  ;;  %v2484_v50 = vpop.f32.mrb[61].mxu1 }
 0x165   : > { %v1303_v51 = vmax.f32 %v870_v47, 0.0 }
 0x166   : > { %v1359_v53 = vmax.f32 %v1150_v49, 0.0  ;;  %v874_v54 = vpop.f32.mrb[62].mxu0 }
 0x167   : > { %v1154_v55 = vpop.f32.mrb[62].mxu1  ;;  %1414 = vst [vmem:[%s3275_s12 + $0xf0] sm:$0xff] %v1303_v51  ;;  %v875_v56 = vadd.f32 %v3257_v52, %v874_v54  ;;  %v2319_v57 = vpop.f32.mrb[63].mxu0 }
 0x168   : > { %1470 = vst [vmem:[%s3275_s12 + $0x2b0] sm:$0xff] %v1359_v53  ;;  %v1155_v58 = vadd.f32 %v3257_v52, %v1154_v55  ;;  %v2487_v59 = vpop.f32.mrb[63].mxu1 }
 0x169   : > { %v1304_v60 = vmax.f32 %v875_v56, 0.0 }
 0x16a   : > { %v1360_v61 = vmax.f32 %v1155_v58, 0.0  ;;  %v879_v62 = vpop.f32.mrb[64].mxu0 }
 0x16b   : > { %v1159_v63 = vpop.f32.mrb[64].mxu1  ;;  %1415 = vst [vmem:[%s3275_s12 + $0xf8] sm:$0xff] %v1304_v60  ;;  %v880_v0 = vadd.f32 %v3257_v52, %v879_v62  ;;  %v2322_v1 = vpop.f32.mrb[65].mxu0 }
 0x16c   : > { %1471 = vst [vmem:[%s3275_s12 + $0x2b8] sm:$0xff] %v1360_v61  ;;  %v1160_v2 = vadd.f32 %v3257_v52, %v1159_v63  ;;  %v2490_v3 = vpop.f32.mrb[65].mxu1 }
 0x16d   : > { %v1305_v4 = vmax.f32 %v880_v0, 0.0 }
 0x16e   : > { %v1361_v5 = vmax.f32 %v1160_v2, 0.0  ;;  %v884_v7 = vpop.f32.mrb[66].mxu0 }
 0x16f   : > { %v1164_v8 = vpop.f32.mrb[66].mxu1  ;;  %1416 = vst [vmem:[%s3275_s12 + $0x100] sm:$0xff] %v1305_v4  ;;  %v885_v9 = vadd.f32 %v3257_v52, %v884_v7  ;;  %v2325_v10 = vpop.f32.mrb[67].mxu0 }
 0x170   : > { %1472 = vst [vmem:[%s3275_s12 + $0x2c0] sm:$0xff] %v1361_v5  ;;  %v1165_v11 = vadd.f32 %v3257_v52, %v1164_v8  ;;  %v2493_v12 = vpop.f32.mrb[67].mxu1 }
 0x171   : > { %v1306_v13 = vmax.f32 %v885_v9, 0.0 }
 0x172   : > { %v1362_v14 = vmax.f32 %v1165_v11, 0.0  ;;  %v889_v15 = vpop.f32.mrb[68].mxu0 }
 0x173   : > { %v1169_v16 = vpop.f32.mrb[68].mxu1  ;;  %1417 = vst [vmem:[%s3275_s12 + $0x108] sm:$0xff] %v1306_v13  ;;  %v890_v6 = vadd.f32 %v3257_v52, %v889_v15  ;;  %v2328_v17 = vpop.f32.mrb[69].mxu0 }
 0x174   : > { %1473 = vst [vmem:[%s3275_s12 + $0x2c8] sm:$0xff] %v1362_v14  ;;  %v1170_v18 = vadd.f32 %v3257_v52, %v1169_v16  ;;  %v2496_v19 = vpop.f32.mrb[69].mxu1 }
 0x175   : > { %v1307_v20 = vmax.f32 %v890_v6, 0.0 }
 0x176   : > { %v1363_v21 = vmax.f32 %v1170_v18, 0.0  ;;  %v894_v22 = vpop.f32.mrb[70].mxu0 }
 0x177   : > { %v1174_v23 = vpop.f32.mrb[70].mxu1  ;;  %1418 = vst [vmem:[%s3275_s12 + $0x110] sm:$0xff] %v1307_v20  ;;  %v895_v24 = vadd.f32 %v3257_v52, %v894_v22  ;;  %v2331_v25 = vpop.f32.mrb[71].mxu0 }
 0x178   : > { %1474 = vst [vmem:[%s3275_s12 + $0x2d0] sm:$0xff] %v1363_v21  ;;  %v1175_v26 = vadd.f32 %v3257_v52, %v1174_v23  ;;  %v2499_v27 = vpop.f32.mrb[71].mxu1 }
 0x179   : > { %v1308_v28 = vmax.f32 %v895_v24, 0.0 }
 0x17a   : > { %v1364_v29 = vmax.f32 %v1175_v26, 0.0  ;;  %v899_v30 = vpop.f32.mrb[72].mxu0 }
 0x17b   : > { %v1179_v31 = vpop.f32.mrb[72].mxu1  ;;  %1419 = vst [vmem:[%s3275_s12 + $0x118] sm:$0xff] %v1308_v28  ;;  %v900_v32 = vadd.f32 %v3257_v52, %v899_v30  ;;  %v2334_v33 = vpop.f32.mrb[73].mxu0 }
 0x17c   : > { %1475 = vst [vmem:[%s3275_s12 + $0x2d8] sm:$0xff] %v1364_v29  ;;  %v1180_v34 = vadd.f32 %v3257_v52, %v1179_v31  ;;  %v2502_v35 = vpop.f32.mrb[73].mxu1 }
 0x17d   : > { %v1309_v36 = vmax.f32 %v900_v32, 0.0 }
 0x17e   : > { %v1365_v37 = vmax.f32 %v1180_v34, 0.0  ;;  %v904_v38 = vpop.f32.mrb[74].mxu0 }
 0x17f   : > { %v1184_v39 = vpop.f32.mrb[74].mxu1  ;;  %1420 = vst [vmem:[%s3275_s12 + $0x120] sm:$0xff] %v1309_v36  ;;  %v905_v40 = vadd.f32 %v3257_v52, %v904_v38  ;;  %v2337_v41 = vpop.f32.mrb[75].mxu0 }
 0x180   : > { %1476 = vst [vmem:[%s3275_s12 + $0x2e0] sm:$0xff] %v1365_v37  ;;  %v1185_v42 = vadd.f32 %v3257_v52, %v1184_v39  ;;  %v2505_v43 = vpop.f32.mrb[75].mxu1 }
 0x181   : > { %v1310_v44 = vmax.f32 %v905_v40, 0.0 }
 0x182   : > { %v1366_v45 = vmax.f32 %v1185_v42, 0.0  ;;  %v909_v46 = vpop.f32.mrb[76].mxu0 }
 0x183   : > { %v1189_v47 = vpop.f32.mrb[76].mxu1  ;;  %1421 = vst [vmem:[%s3275_s12 + $0x128] sm:$0xff] %v1310_v44  ;;  %v910_v48 = vadd.f32 %v3257_v52, %v909_v46  ;;  %v2340_v49 = vpop.f32.mrb[77].mxu0 }
 0x184   : > { %1477 = vst [vmem:[%s3275_s12 + $0x2e8] sm:$0xff] %v1366_v45  ;;  %v1190_v50 = vadd.f32 %v3257_v52, %v1189_v47  ;;  %v2508_v51 = vpop.f32.mrb[77].mxu1 }
 0x185   : > { %v1311_v53 = vmax.f32 %v910_v48, 0.0 }
 0x186   : > { %v1367_v54 = vmax.f32 %v1190_v50, 0.0  ;;  %v914_v55 = vpop.f32.mrb[78].mxu0 }
 0x187   : > { %v1194_v56 = vpop.f32.mrb[78].mxu1  ;;  %1422 = vst [vmem:[%s3275_s12 + $0x130] sm:$0xff] %v1311_v53  ;;  %v915_v57 = vadd.f32 %v3257_v52, %v914_v55  ;;  %v2343_v58 = vpop.f32.mrb[79].mxu0 }
 0x188   : > { %1478 = vst [vmem:[%s3275_s12 + $0x2f0] sm:$0xff] %v1367_v54  ;;  %v1195_v59 = vadd.f32 %v3257_v52, %v1194_v56  ;;  %v2511_v60 = vpop.f32.mrb[79].mxu1 }
 0x189   : > { %v1312_v61 = vmax.f32 %v915_v57, 0.0 }
 0x18a   : > { %v1368_v62 = vmax.f32 %v1195_v59, 0.0  ;;  %v919_v63 = vpop.f32.mrb[80].mxu0 }
 0x18b   : > { %v1199_v0 = vpop.f32.mrb[80].mxu1  ;;  %1423 = vst [vmem:[%s3275_s12 + $0x138] sm:$0xff] %v1312_v61  ;;  %v920_v1 = vadd.f32 %v3257_v52, %v919_v63  ;;  %v2346_v2 = vpop.f32.mrb[81].mxu0 }
 0x18c   : > { %1479 = vst [vmem:[%s3275_s12 + $0x2f8] sm:$0xff] %v1368_v62  ;;  %v1200_v3 = vadd.f32 %v3257_v52, %v1199_v0  ;;  %v2514_v4 = vpop.f32.mrb[81].mxu1 }
 0x18d   : > { %v1313_v5 = vmax.f32 %v920_v1, 0.0 }
 0x18e   : > { %v1369_v7 = vmax.f32 %v1200_v3, 0.0  ;;  %v924_v8 = vpop.f32.mrb[82].mxu0 }
 0x18f   : > { %v1204_v9 = vpop.f32.mrb[82].mxu1  ;;  %1424 = vst [vmem:[%s3275_s12 + $0x140] sm:$0xff] %v1313_v5  ;;  %v925_v10 = vadd.f32 %v3257_v52, %v924_v8  ;;  %v2349_v11 = vpop.f32.mrb[83].mxu0 }
 0x190   : > { %1480 = vst [vmem:[%s3275_s12 + $0x300] sm:$0xff] %v1369_v7  ;;  %v1205_v12 = vadd.f32 %v3257_v52, %v1204_v9  ;;  %v2517_v13 = vpop.f32.mrb[83].mxu1 }
 0x191   : > { %v1314_v14 = vmax.f32 %v925_v10, 0.0 }
 0x192   : > { %v1370_v15 = vmax.f32 %v1205_v12, 0.0  ;;  %v929_v16 = vpop.f32.mrb[84].mxu0 }
 0x193   : > { %v1209_v6 = vpop.f32.mrb[84].mxu1  ;;  %1425 = vst [vmem:[%s3275_s12 + $0x148] sm:$0xff] %v1314_v14  ;;  %v930_v17 = vadd.f32 %v3257_v52, %v929_v16  ;;  %v2352_v18 = vpop.f32.mrb[85].mxu0 }
 0x194   : > { %1481 = vst [vmem:[%s3275_s12 + $0x308] sm:$0xff] %v1370_v15  ;;  %v1210_v19 = vadd.f32 %v3257_v52, %v1209_v6  ;;  %v2520_v20 = vpop.f32.mrb[85].mxu1  ;;  %v2661_v18 = vld [vmem:[%s3703_s2] ss:$0 sm:$0xff] }
 0x195   : > { %v1315_v21 = vmax.f32 %v930_v17, 0.0 }
 0x196   : > { %v1371_v22 = vmax.f32 %v1210_v19, 0.0  ;;  %v934_v23 = vpop.f32.mrb[86].mxu0 }
 0x197   : > { %v1214_v24 = vpop.f32.mrb[86].mxu1  ;;  %1426 = vst [vmem:[%s3275_s12 + $0x150] sm:$0xff] %v1315_v21  ;;  %v935_v25 = vadd.f32 %v3257_v52, %v934_v23  ;;  %v2355_v26 = vpop.f32.mrb[87].mxu0 }
 0x198   : > { %1482 = vst [vmem:[%s3275_s12 + $0x310] sm:$0xff] %v1371_v22  ;;  %v1215_v27 = vadd.f32 %v3257_v52, %v1214_v24  ;;  %v2523_v28 = vpop.f32.mrb[87].mxu1 }
 0x199   : > { %v1316_v29 = vmax.f32 %v935_v25, 0.0 }
 0x19a   : > { %v1372_v30 = vmax.f32 %v1215_v27, 0.0  ;;  %v939_v31 = vpop.f32.mrb[88].mxu0 }
 0x19b   : > { %v1219_v32 = vpop.f32.mrb[88].mxu1  ;;  %1427 = vst [vmem:[%s3275_s12 + $0x158] sm:$0xff] %v1316_v29  ;;  %v940_v33 = vadd.f32 %v3257_v52, %v939_v31  ;;  %v2358_v34 = vpop.f32.mrb[89].mxu0 }
 0x19c   : > { %1483 = vst [vmem:[%s3275_s12 + $0x318] sm:$0xff] %v1372_v30  ;;  %v1220_v35 = vadd.f32 %v3257_v52, %v1219_v32  ;;  %v2526_v36 = vpop.f32.mrb[89].mxu1 }
 0x19d   : > { %v1317_v37 = vmax.f32 %v940_v33, 0.0 }
 0x19e   : > { %v1373_v38 = vmax.f32 %v1220_v35, 0.0  ;;  %v944_v39 = vpop.f32.mrb[90].mxu0 }
 0x19f   : > { %v1224_v40 = vpop.f32.mrb[90].mxu1  ;;  %1428 = vst [vmem:[%s3275_s12 + $0x160] sm:$0xff] %v1317_v37  ;;  %v945_v41 = vadd.f32 %v3257_v52, %v944_v39  ;;  %v2361_v42 = vpop.f32.mrb[91].mxu0 }
 0x1a0   : > { %1484 = vst [vmem:[%s3275_s12 + $0x320] sm:$0xff] %v1373_v38  ;;  %v1225_v43 = vadd.f32 %v3257_v52, %v1224_v40  ;;  %v2529_v44 = vpop.f32.mrb[91].mxu1 }
 0x1a1   : > { %v1318_v45 = vmax.f32 %v945_v41, 0.0 }
 0x1a2   : > { %v1374_v46 = vmax.f32 %v1225_v43, 0.0  ;;  %v949_v47 = vpop.f32.mrb[92].mxu0 }
 0x1a3   : > { %v1229_v48 = vpop.f32.mrb[92].mxu1  ;;  %1429 = vst [vmem:[%s3275_s12 + $0x168] sm:$0xff] %v1318_v45  ;;  %v950_v49 = vadd.f32 %v3257_v52, %v949_v47  ;;  %v2364_v50 = vpop.f32.mrb[93].mxu0 }
 0x1a4   : > { %1485 = vst [vmem:[%s3275_s12 + $0x328] sm:$0xff] %v1374_v46  ;;  %v1230_v51 = vadd.f32 %v3257_v52, %v1229_v48  ;;  %v2532_v53 = vpop.f32.mrb[93].mxu1 }
 0x1a5   : > { %v1319_v54 = vmax.f32 %v950_v49, 0.0 }
 0x1a6   : > { %v1375_v55 = vmax.f32 %v1230_v51, 0.0  ;;  %v954_v56 = vpop.f32.mrb[94].mxu0 }
 0x1a7   : > { %v1234_v57 = vpop.f32.mrb[94].mxu1  ;;  %1430 = vst [vmem:[%s3275_s12 + $0x170] sm:$0xff] %v1319_v54  ;;  %v955_v58 = vadd.f32 %v3257_v52, %v954_v56  ;;  %v2367_v59 = vpop.f32.mrb[95].mxu0 }
 0x1a8   : > { %1486 = vst [vmem:[%s3275_s12 + $0x330] sm:$0xff] %v1375_v55  ;;  %v1235_v60 = vadd.f32 %v3257_v52, %v1234_v57  ;;  %v2535_v61 = vpop.f32.mrb[95].mxu1 }
 0x1a9   : > { %v1320_v62 = vmax.f32 %v955_v58, 0.0 }
 0x1aa   : > { %v1376_v63 = vmax.f32 %v1235_v60, 0.0  ;;  %v959_v0 = vpop.f32.mrb[96].mxu0 }
 0x1ab   : > { %v1239_v1 = vpop.f32.mrb[96].mxu1  ;;  %1431 = vst [vmem:[%s3275_s12 + $0x178] sm:$0xff] %v1320_v62  ;;  %v960_v2 = vadd.f32 %v3257_v52, %v959_v0  ;;  %v2370_v3 = vpop.f32.mrb[97].mxu0 }
 0x1ac   : > { %1487 = vst [vmem:[%s3275_s12 + $0x338] sm:$0xff] %v1376_v63  ;;  %v1240_v4 = vadd.f32 %v3257_v52, %v1239_v1  ;;  %v2538_v5 = vpop.f32.mrb[97].mxu1 }
 0x1ad   : > { %v1321_v7 = vmax.f32 %v960_v2, 0.0 }
 0x1ae   : > { %v1377_v8 = vmax.f32 %v1240_v4, 0.0  ;;  %v964_v9 = vpop.f32.mrb[98].mxu0 }
 0x1af   : > { %v1244_v10 = vpop.f32.mrb[98].mxu1  ;;  %1432 = vst [vmem:[%s3275_s12 + $0x180] sm:$0xff] %v1321_v7  ;;  %v965_v11 = vadd.f32 %v3257_v52, %v964_v9  ;;  %v2373_v12 = vpop.f32.mrb[99].mxu0 }
 0x1b0   : > { %1488 = vst [vmem:[%s3275_s12 + $0x340] sm:$0xff] %v1377_v8  ;;  %v1245_v13 = vadd.f32 %v3257_v52, %v1244_v10  ;;  %v2541_v14 = vpop.f32.mrb[99].mxu1 }
 0x1b1   : > { %v1322_v15 = vmax.f32 %v965_v11, 0.0 }
 0x1b2   : > { %v1378_v16 = vmax.f32 %v1245_v13, 0.0  ;;  %v969_v6 = vpop.f32.mrb[100].mxu0 }
 0x1b3   : > { %v1249_v17 = vpop.f32.mrb[100].mxu1  ;;  %1433 = vst [vmem:[%s3275_s12 + $0x188] sm:$0xff] %v1322_v15  ;;  %v970_v19 = vadd.f32 %v2661_v18, %v969_v6  ;;  %v2376_v20 = vpop.f32.mrb[101].mxu0 }
 0x1b4   : > { %1489 = vst [vmem:[%s3275_s12 + $0x348] sm:$0xff] %v1378_v16  ;;  %v1250_v21 = vadd.f32 %v2661_v18, %v1249_v17  ;;  %v2544_v22 = vpop.f32.mrb[101].mxu1 }
 0x1b5   : > { %v1323_v52 = vmax.f32 %v970_v19, 0.0 }
 0x1b6   : > { %v1379_v23 = vmax.f32 %v1250_v21, 0.0  ;;  %v974_v24 = vpop.f32.mrb[102].mxu0 }
 0x1b7   : > { %v1254_v25 = vpop.f32.mrb[102].mxu1  ;;  %1434 = vst [vmem:[%s3275_s12 + $0x190] sm:$0xff] %v1323_v52  ;;  %v975_v26 = vadd.f32 %v2661_v18, %v974_v24  ;;  %v2379_v27 = vpop.f32.mrb[103].mxu0 }
 0x1b8   : > { %1490 = vst [vmem:[%s3275_s12 + $0x350] sm:$0xff] %v1379_v23  ;;  %v1255_v28 = vadd.f32 %v2661_v18, %v1254_v25  ;;  %v2547_v29 = vpop.f32.mrb[103].mxu1 }
 0x1b9   : > { %v1324_v30 = vmax.f32 %v975_v26, 0.0 }
 0x1ba   : > { %v1380_v31 = vmax.f32 %v1255_v28, 0.0  ;;  %v979_v32 = vpop.f32.mrb[104].mxu0 }
 0x1bb   : > { %v1259_v33 = vpop.f32.mrb[104].mxu1  ;;  %1435 = vst [vmem:[%s3275_s12 + $0x198] sm:$0xff] %v1324_v30  ;;  %v980_v34 = vadd.f32 %v2661_v18, %v979_v32  ;;  %v2382_v35 = vpop.f32.mrb[105].mxu0 }
 0x1bc   : > { %1491 = vst [vmem:[%s3275_s12 + $0x358] sm:$0xff] %v1380_v31  ;;  %v1260_v36 = vadd.f32 %v2661_v18, %v1259_v33  ;;  %v2550_v37 = vpop.f32.mrb[105].mxu1 }
 0x1bd   : > { %v1325_v38 = vmax.f32 %v980_v34, 0.0 }
 0x1be   : > { %v1381_v39 = vmax.f32 %v1260_v36, 0.0  ;;  %v984_v40 = vpop.f32.mrb[106].mxu0 }
 0x1bf   : > { %v1264_v41 = vpop.f32.mrb[106].mxu1  ;;  %1436 = vst [vmem:[%s3275_s12 + $0x1a0] sm:$0xff] %v1325_v38  ;;  %v985_v42 = vadd.f32 %v2661_v18, %v984_v40  ;;  %v2385_v43 = vpop.f32.mrb[107].mxu0 }
 0x1c0   : > { %1492 = vst [vmem:[%s3275_s12 + $0x360] sm:$0xff] %v1381_v39  ;;  %v1265_v44 = vadd.f32 %v2661_v18, %v1264_v41  ;;  %v2553_v45 = vpop.f32.mrb[107].mxu1 }
 0x1c1   : > { %v1326_v46 = vmax.f32 %v985_v42, 0.0 }
 0x1c2   : > { %v1382_v47 = vmax.f32 %v1265_v44, 0.0  ;;  %v989_v48 = vpop.f32.mrb[108].mxu0 }
 0x1c3   : > { %v1269_v49 = vpop.f32.mrb[108].mxu1  ;;  %1437 = vst [vmem:[%s3275_s12 + $0x1a8] sm:$0xff] %v1326_v46  ;;  %v990_v50 = vadd.f32 %v2661_v18, %v989_v48  ;;  %v2388_v51 = vpop.f32.mrb[109].mxu0 }
 0x1c4   : > { %1493 = vst [vmem:[%s3275_s12 + $0x368] sm:$0xff] %v1382_v47  ;;  %v1270_v53 = vadd.f32 %v2661_v18, %v1269_v49  ;;  %v2556_v54 = vpop.f32.mrb[109].mxu1 }
 0x1c5   : > { %v1327_v55 = vmax.f32 %v990_v50, 0.0  ;;  %1501 = sbr.rel (!%p2798_p4) target bundleno = 532 (0x214), region = 36 }
 0x1c6   : > { %v1383_v56 = vmax.f32 %v1270_v53, 0.0  ;;  %v994_v57 = vpop.f32.mrb[110].mxu0 }
 0x1c7   : > { %1438 = vst [vmem:[%s3275_s12 + $0x1b0] sm:$0xff] %v1327_v55  ;;  %v995_v58 = vadd.f32 %v2661_v18, %v994_v57  ;;  %v2391_v59 = vpop.f32.mrb[111].mxu0 }
 0x1c8   : > { %1494 = vst [vmem:[%s3275_s12 + $0x370] sm:$0xff] %v1383_v56 }
 0x1c9   : > { %v1328_v60 = vmax.f32 %v995_v58, 0.0 }
 0x1cb   : > { %1439 = vst [vmem:[%s3275_s12 + $0x1b8] sm:$0xff] %v1328_v60 }
 0x1cc   : > { %s3715_s22 = smov (!%p1504_p8, %s1503_s22), 111 }
 0x1cd   : > { %s2080_s27 = sshll.u32 %s3715_s22, 7 }
 0x1ce   : > { %p2083_p9 = scmp.eq.s32.totalorder %s2080_s27, 0 }
 0x1cf   : > { %s3508_s28 = sshrl.u32 (!%p2083_p9), %s3715_s22, 6 }
 0x1d0   : > { %1512 = sbr.rel (%p2083_p9) target bundleno = 532 (0x214), region = 40  ;;  %p2084_p10 = scmp.le.s32.totalorder (!%p2083_p9), %s3508_s28, 0 }
 0x1d7   : > { %1918 = sbr.rel (%p2084_p10) target bundleno = 511 (0x1ff), region = 116  ;;  %s3706_s15 = smov (!%p2084_p10), %s3502_s26 }
 0x1d8   : > { %s3707_s20 = smov (!%p2084_p10), %s3275_s12  ;;  %s3517_s29 = smov (!%p2084_p10), 0  }
 0x1d9   : > { %s3519_s30 = smov (!%p2084_p10), 0  }
 0x1de LB: >> { %v1700_v61 = vld [vmem:[%s2724_s20] sm:$0xff]  ;;  %v1702_v62 = vld [vmem:[%s2724_s20 + $0x8] sm:$0xff]  ;;  %v1704_v63 = vld [vmem:[%s2724_s20 + $0x10] sm:$0xff]  ;;  %s1828_s4 = sadd.s32 1, %s2728_s29  ;;  %s1694_s30 = sadd.s32 1, %s2732_s30   ;;  %s2732_s30 = sphi %s3519_s30, %s1694_s30   ;;  %s2728_s29 = sphi %s3517_s29, %s3710_s29   ;;  %s2724_s20 = sphi %s3707_s20, %s3709_s20   ;;  %s2720_s15 = sphi %s3706_s15, %s3708_s15  }
 0x1df   : >> { %1701 = vst [vmem:[%s2720_s15] sm:$0xff] %v1700_v61  ;;  %1703 = vst [vmem:[%s2720_s15 + $0x8] sm:$0xff] %v1702_v62  ;;  %v1706_v0 = vld [vmem:[%s2724_s20 + $0x18] sm:$0xff]  ;;  %v1708_v1 = vld [vmem:[%s2724_s20 + $0x20] sm:$0xff]  ;;  %p1829_p11 = scmp.ge.s32.totalorder %s1828_s4, %s3508_s28  ;;  %p1693_p12 = scmp.ge.s32.totalorder %s1694_s30, %s3508_s28 }
 0x1e0   : >> { %1705 = vst [vmem:[%s2720_s15 + $0x10] sm:$0xff] %v1704_v63  ;;  %v1710_v2 = vld [vmem:[%s2724_s20 + $0x28] sm:$0xff]  ;;  %1707 = vst [vmem:[%s2720_s15 + $0x18] sm:$0xff] %v1706_v0  ;;  %v1712_v3 = vld [vmem:[%s2724_s20 + $0x30] sm:$0xff] }
 0x1e1   : >> { %1709 = vst [vmem:[%s2720_s15 + $0x20] sm:$0xff] %v1708_v1  ;;  %1711 = vst [vmem:[%s2720_s15 + $0x28] sm:$0xff] %v1710_v2  ;;  %v1714_v4 = vld [vmem:[%s2724_s20 + $0x38] sm:$0xff]  ;;  %v1716_v5 = vld [vmem:[%s2724_s20 + $0x40] sm:$0xff]  ;;  %s3717_s4 = smov (%p1829_p11, %s1828_s4), 0 }
 0x1e2   : >> { %1713 = vst [vmem:[%s2720_s15 + $0x30] sm:$0xff] %v1712_v3  ;;  %1715 = vst [vmem:[%s2720_s15 + $0x38] sm:$0xff] %v1714_v4  ;;  %v1718_v7 = vld [vmem:[%s2724_s20 + $0x48] sm:$0xff]  ;;  %v1720_v8 = vld [vmem:[%s2724_s20 + $0x50] sm:$0xff]  ;;  %s2085_s5 = sshll.u32 %s3717_s4, 9  ;;  %s3710_s29 = smov %s3717_s4 }
 0x1e3   : >> { %1717 = vst [vmem:[%s2720_s15 + $0x40] sm:$0xff] %v1716_v5  ;;  %v1722_v9 = vld [vmem:[%s2724_s20 + $0x58] sm:$0xff]  ;;  %1719 = vst [vmem:[%s2720_s15 + $0x48] sm:$0xff] %v1718_v7  ;;  %v1724_v10 = vld [vmem:[%s2724_s20 + $0x60] sm:$0xff]  ;;  %s3575_s6 = scalar_lea.vmem %s3275_s12, %s2085_s5 [#allocation2]   ;;  %s3578_s7 = scalar_lea.vmem %s3502_s26, %s2085_s5  }
 0x1e4   : >> { %1721 = vst [vmem:[%s2720_s15 + $0x50] sm:$0xff] %v1720_v8  ;;  %1723 = vst [vmem:[%s2720_s15 + $0x58] sm:$0xff] %v1722_v9  ;;  %v1726_v11 = vld [vmem:[%s2724_s20 + $0x68] sm:$0xff]  ;;  %v1728_v12 = vld [vmem:[%s2724_s20 + $0x70] sm:$0xff] }
 0x1e5   : >> { %1725 = vst [vmem:[%s2720_s15 + $0x60] sm:$0xff] %v1724_v10  ;;  %1727 = vst [vmem:[%s2720_s15 + $0x68] sm:$0xff] %v1726_v11  ;;  %v1730_v13 = vld [vmem:[%s2724_s20 + $0x78] sm:$0xff]  ;;  %v1732_v14 = vld [vmem:[%s2724_s20 + $0x80] sm:$0xff] }
 0x1e6   : >> { %1729 = vst [vmem:[%s2720_s15 + $0x70] sm:$0xff] %v1728_v12  ;;  %v1734_v15 = vld [vmem:[%s2724_s20 + $0x88] sm:$0xff]  ;;  %1731 = vst [vmem:[%s2720_s15 + $0x78] sm:$0xff] %v1730_v13  ;;  %v1736_v16 = vld [vmem:[%s2724_s20 + $0x90] sm:$0xff] }
 0x1e7   : >> { %1733 = vst [vmem:[%s2720_s15 + $0x80] sm:$0xff] %v1732_v14  ;;  %1735 = vst [vmem:[%s2720_s15 + $0x88] sm:$0xff] %v1734_v15  ;;  %v1738_v6 = vld [vmem:[%s2724_s20 + $0x98] sm:$0xff]  ;;  %v1740_v17 = vld [vmem:[%s2724_s20 + $0xa0] sm:$0xff] }
 0x1e8   : >> { %1737 = vst [vmem:[%s2720_s15 + $0x90] sm:$0xff] %v1736_v16  ;;  %1739 = vst [vmem:[%s2720_s15 + $0x98] sm:$0xff] %v1738_v6  ;;  %v1742_v18 = vld [vmem:[%s2724_s20 + $0xa8] sm:$0xff]  ;;  %v1744_v19 = vld [vmem:[%s2724_s20 + $0xb0] sm:$0xff] }
 0x1e9   : >> { %1741 = vst [vmem:[%s2720_s15 + $0xa0] sm:$0xff] %v1740_v17  ;;  %v1746_v20 = vld [vmem:[%s2724_s20 + $0xb8] sm:$0xff]  ;;  %1743 = vst [vmem:[%s2720_s15 + $0xa8] sm:$0xff] %v1742_v18  ;;  %v1748_v21 = vld [vmem:[%s2724_s20 + $0xc0] sm:$0xff] }
 0x1ea   : >> { %1745 = vst [vmem:[%s2720_s15 + $0xb0] sm:$0xff] %v1744_v19  ;;  %1747 = vst [vmem:[%s2720_s15 + $0xb8] sm:$0xff] %v1746_v20  ;;  %v1750_v22 = vld [vmem:[%s2724_s20 + $0xc8] sm:$0xff]  ;;  %v1752_v52 = vld [vmem:[%s2724_s20 + $0xd0] sm:$0xff] }
 0x1eb   : >> { %1749 = vst [vmem:[%s2720_s15 + $0xc0] sm:$0xff] %v1748_v21  ;;  %1751 = vst [vmem:[%s2720_s15 + $0xc8] sm:$0xff] %v1750_v22  ;;  %v1754_v23 = vld [vmem:[%s2724_s20 + $0xd8] sm:$0xff]  ;;  %v1756_v24 = vld [vmem:[%s2724_s20 + $0xe0] sm:$0xff] }
 0x1ec   : >> { %1753 = vst [vmem:[%s2720_s15 + $0xd0] sm:$0xff] %v1752_v52  ;;  %v1758_v25 = vld [vmem:[%s2724_s20 + $0xe8] sm:$0xff]  ;;  %1755 = vst [vmem:[%s2720_s15 + $0xd8] sm:$0xff] %v1754_v23  ;;  %v1760_v26 = vld [vmem:[%s2724_s20 + $0xf0] sm:$0xff] }
 0x1ed   : >> { %1757 = vst [vmem:[%s2720_s15 + $0xe0] sm:$0xff] %v1756_v24  ;;  %1759 = vst [vmem:[%s2720_s15 + $0xe8] sm:$0xff] %v1758_v25  ;;  %v1762_v27 = vld [vmem:[%s2724_s20 + $0xf8] sm:$0xff]  ;;  %v1764_v28 = vld [vmem:[%s2724_s20 + $0x100] sm:$0xff] }
 0x1ee   : >> { %1761 = vst [vmem:[%s2720_s15 + $0xf0] sm:$0xff] %v1760_v26  ;;  %1763 = vst [vmem:[%s2720_s15 + $0xf8] sm:$0xff] %v1762_v27  ;;  %v1766_v29 = vld [vmem:[%s2724_s20 + $0x108] sm:$0xff]  ;;  %v1768_v30 = vld [vmem:[%s2724_s20 + $0x110] sm:$0xff] }
 0x1ef   : >> { %1765 = vst [vmem:[%s2720_s15 + $0x100] sm:$0xff] %v1764_v28  ;;  %v1770_v31 = vld [vmem:[%s2724_s20 + $0x118] sm:$0xff]  ;;  %1767 = vst [vmem:[%s2720_s15 + $0x108] sm:$0xff] %v1766_v29  ;;  %v1772_v32 = vld [vmem:[%s2724_s20 + $0x120] sm:$0xff] }
 0x1f0   : >> { %1769 = vst [vmem:[%s2720_s15 + $0x110] sm:$0xff] %v1768_v30  ;;  %1771 = vst [vmem:[%s2720_s15 + $0x118] sm:$0xff] %v1770_v31  ;;  %v1774_v33 = vld [vmem:[%s2724_s20 + $0x128] sm:$0xff]  ;;  %v1776_v34 = vld [vmem:[%s2724_s20 + $0x130] sm:$0xff] }
 0x1f1   : >> { %1773 = vst [vmem:[%s2720_s15 + $0x120] sm:$0xff] %v1772_v32  ;;  %1775 = vst [vmem:[%s2720_s15 + $0x128] sm:$0xff] %v1774_v33  ;;  %v1778_v35 = vld [vmem:[%s2724_s20 + $0x138] sm:$0xff]  ;;  %v1780_v36 = vld [vmem:[%s2724_s20 + $0x140] sm:$0xff] }
 0x1f2   : >> { %1777 = vst [vmem:[%s2720_s15 + $0x130] sm:$0xff] %v1776_v34  ;;  %v1782_v37 = vld [vmem:[%s2724_s20 + $0x148] sm:$0xff]  ;;  %1779 = vst [vmem:[%s2720_s15 + $0x138] sm:$0xff] %v1778_v35  ;;  %v1784_v38 = vld [vmem:[%s2724_s20 + $0x150] sm:$0xff] }
 0x1f3   : >> { %1781 = vst [vmem:[%s2720_s15 + $0x140] sm:$0xff] %v1780_v36  ;;  %1783 = vst [vmem:[%s2720_s15 + $0x148] sm:$0xff] %v1782_v37  ;;  %v1786_v39 = vld [vmem:[%s2724_s20 + $0x158] sm:$0xff]  ;;  %v1788_v40 = vld [vmem:[%s2724_s20 + $0x160] sm:$0xff] }
 0x1f4   : >> { %1785 = vst [vmem:[%s2720_s15 + $0x150] sm:$0xff] %v1784_v38  ;;  %1787 = vst [vmem:[%s2720_s15 + $0x158] sm:$0xff] %v1786_v39  ;;  %v1790_v41 = vld [vmem:[%s2724_s20 + $0x168] sm:$0xff]  ;;  %v1792_v42 = vld [vmem:[%s2724_s20 + $0x170] sm:$0xff] }
 0x1f5   : >> { %1789 = vst [vmem:[%s2720_s15 + $0x160] sm:$0xff] %v1788_v40  ;;  %v1794_v43 = vld [vmem:[%s2724_s20 + $0x178] sm:$0xff]  ;;  %1791 = vst [vmem:[%s2720_s15 + $0x168] sm:$0xff] %v1790_v41  ;;  %v1796_v44 = vld [vmem:[%s2724_s20 + $0x180] sm:$0xff] }
 0x1f6   : >> { %1793 = vst [vmem:[%s2720_s15 + $0x170] sm:$0xff] %v1792_v42  ;;  %1795 = vst [vmem:[%s2720_s15 + $0x178] sm:$0xff] %v1794_v43  ;;  %v1798_v45 = vld [vmem:[%s2724_s20 + $0x188] sm:$0xff]  ;;  %v1800_v46 = vld [vmem:[%s2724_s20 + $0x190] sm:$0xff] }
 0x1f7   : >> { %1797 = vst [vmem:[%s2720_s15 + $0x180] sm:$0xff] %v1796_v44  ;;  %1799 = vst [vmem:[%s2720_s15 + $0x188] sm:$0xff] %v1798_v45  ;;  %v1802_v47 = vld [vmem:[%s2724_s20 + $0x198] sm:$0xff]  ;;  %v1804_v48 = vld [vmem:[%s2724_s20 + $0x1a0] sm:$0xff] }
 0x1f8   : >> { %1801 = vst [vmem:[%s2720_s15 + $0x190] sm:$0xff] %v1800_v46  ;;  %v1806_v49 = vld [vmem:[%s2724_s20 + $0x1a8] sm:$0xff]  ;;  %1803 = vst [vmem:[%s2720_s15 + $0x198] sm:$0xff] %v1802_v47  ;;  %v1808_v50 = vld [vmem:[%s2724_s20 + $0x1b0] sm:$0xff]  ;;  %1696 = sbr.rel (!%p1693_p12) target bundleno = 478 (0x1de), region = 122 }
 0x1f9   : >> { %1805 = vst [vmem:[%s2720_s15 + $0x1a0] sm:$0xff] %v1804_v48  ;;  %1807 = vst [vmem:[%s2720_s15 + $0x1a8] sm:$0xff] %v1806_v49  ;;  %v1810_v51 = vld [vmem:[%s2724_s20 + $0x1b8] sm:$0xff]  ;;  %v1812_v53 = vld [vmem:[%s2724_s20 + $0x1c0] sm:$0xff] }
 0x1fa   : >> { %1809 = vst [vmem:[%s2720_s15 + $0x1b0] sm:$0xff] %v1808_v50  ;;  %1811 = vst [vmem:[%s2720_s15 + $0x1b8] sm:$0xff] %v1810_v51  ;;  %v1814_v54 = vld [vmem:[%s2724_s20 + $0x1c8] sm:$0xff]  ;;  %v1816_v55 = vld [vmem:[%s2724_s20 + $0x1d0] sm:$0xff] }
 0x1fb   : >> { %1813 = vst [vmem:[%s2720_s15 + $0x1c0] sm:$0xff] %v1812_v53  ;;  %v1818_v56 = vld [vmem:[%s2724_s20 + $0x1d8] sm:$0xff]  ;;  %1815 = vst [vmem:[%s2720_s15 + $0x1c8] sm:$0xff] %v1814_v54  ;;  %v1820_v57 = vld [vmem:[%s2724_s20 + $0x1e0] sm:$0xff] }
 0x1fc   : >> { %1817 = vst [vmem:[%s2720_s15 + $0x1d0] sm:$0xff] %v1816_v55  ;;  %1819 = vst [vmem:[%s2720_s15 + $0x1d8] sm:$0xff] %v1818_v56  ;;  %v1822_v58 = vld [vmem:[%s2724_s20 + $0x1e8] sm:$0xff]  ;;  %v1824_v59 = vld [vmem:[%s2724_s20 + $0x1f0] sm:$0xff] }
 0x1fd   : >> { %1821 = vst [vmem:[%s2720_s15 + $0x1e0] sm:$0xff] %v1820_v57  ;;  %1823 = vst [vmem:[%s2720_s15 + $0x1e8] sm:$0xff] %v1822_v58  ;;  %v1826_v60 = vld [vmem:[%s2724_s20 + $0x1f8] sm:$0xff]  ;;  %s3709_s20 = smov %s3575_s6 }
 0x1fe   : >> { %1825 = vst [vmem:[%s2720_s15 + $0x1f0] sm:$0xff] %v1824_v59  ;;  %1827 = vst [vmem:[%s2720_s15 + $0x1f8] sm:$0xff] %v1826_v60  ;;  %s3708_s15 = smov %s3578_s7 }
 0x1ff PF: > { %s3683_s8 = sand.u32 63, %s3715_s22   ;;  %s2096_s9 = sshll.u32 %s3508_s28, 9 }
 0x200   : > { %s1839_s10 = scalar_lea.vmem %s3275_s12, %s2096_s9 [#allocation2]   ;;  %s1841_s11 = scalar_lea.vmem %s3502_s26, %s2096_s9  }
 0x201   : > { %p2090_p13 = scmp.le.s32.totalorder %s3683_s8, 0 }
 0x202   : > { %s2734_s14 = smov (!%p2090_p13), %s1841_s11   ;;  %s2738_s17 = smov (!%p2090_p13), %s1839_s10  }
 0x203   : > { %1932 = sbr.rel (%p2090_p13) target bundleno = 532 (0x214), region = 127  ;;  %s2742_s18 = smov (!%p2090_p13), 0  }
 0x204   : > { %s2746_s21 = smov (!%p2090_p13), 0  }
 0x20a LB: >> { %v1851_v61 = vld [vmem:[%s2740_s17] sm:$0xff]  ;;  %s1853_s22 = sadd.s32 1, %s2744_s18  ;;  %s1845_s21 = sadd.s32 1, %s2748_s21   ;;  %s2748_s21 = sphi %s2746_s21, %s1845_s21   ;;  %s2744_s18 = sphi %s2742_s18, %s2743_s18   ;;  %s2740_s17 = sphi %s2738_s17, %s1858_s17   ;;  %s2736_s14 = sphi %s2734_s14, %s1859_s14  }
 0x20b   : >> { %1852 = vst [vmem:[%s2736_s14] sm:$0xff] %v1851_v61  ;;  %p1854_p0 = scmp.ge.s32.totalorder %s1853_s22, %s3683_s8  ;;  %p1844_p1 = scmp.ge.s32.totalorder %s1845_s21, %s3683_s8 }
 0x20d   : >> { %s3719_s22 = smov (%p1854_p0, %s1853_s22), 0  ;;  %1847 = sbr.rel (!%p1844_p1) target bundleno = 522 (0x20a), region = 133 }
 0x20e   : >> { %s2091_s12 = sshll.u32 %s3719_s22, 3  ;;  %s2743_s18 = smov %s3719_s22  }
 0x20f   : >> { %s1858_s17 = scalar_lea.vmem %s1839_s10, %s2091_s12 [#allocation2]   ;;  %s1859_s14 = scalar_lea.vmem %s1841_s11, %s2091_s12  }
 0x214 PF: > { %p10_p2 = scmp.ge.s32.totalorder %s2788_s16, 6   ;;  %s3711_s12 = smov %s2712_s13 }
 0x215   : > { %s3712_s13 = smov %s2796_s19  ;;  %s3713_s14 = smov %s2788_s16 }
 0x216   :  { %12 = sbr.rel (!%p10_p2) target bundleno = 2 (0x2), region = 144 }

// kernel: ppo_forward.6
= control target key start
LH: loop header
LB: loop body
LE: loop exit
PB: predicated region body
PF: predicated region fallthrough
CT: control target
= control target key end

     0   :  { %s2339_s12 = smov 0   ;;  %s2341_s13 = smov 0   ;;  %s3140_s0 = inlined_call_operand.vmem [shape: f32[882,288], index: 0, kind: input, shape index: {}]   ;;  %s3141_s1 = inlined_call_operand.vmem [shape: f32[288,128], index: 1, kind: input, shape index: {}]   ;;  %s3142_s2 = inlined_call_operand.vmem [shape: f32[1,128], index: 2, kind: input, shape index: {}]   ;;  %s3143_s3 = inlined_call_operand.vmem [shape: f32[882,128], index: 3, kind: output, shape index: {}]  }
   0x1   :  { %s2343_s14 = smov 0  }
   0x2 LB: > { %s2352_s15 = sadd.s32 4294967295, %s2284_s14   ;;  %s2354_s16 = sadd.s32 1, %s2284_s14   ;;  %s2284_s14 = sphi %s2343_s14, %s3152_s14   ;;  %s2280_s13 = sphi %s2341_s13, %s3151_s13   ;;  %s2276_s12 = sphi %s2339_s12, %s3150_s12  }
   0x3   : > { %s85_s17 = ssub.s32 %s2284_s14, %s2354_s16  ;;  %s88_s18 = sadd.s32 1, %s2280_s13 }
   0x4   : > { %p86_p0 = scmp.eq.s32.totalorder %s85_s17, 0  ;;  %p98_p1 = scmp.ne.s32.totalorder %s2280_s13, %s2276_s12 }
   0x5   : > { %p99_p2 = scmp.eq.s32.totalorder %s2352_s15, 1  ;;  %p1822_p3 = scmp.ge.s32.totalorder %s2284_s14, 1 }
   0x6   : > { %s2362_s19 = scalar_select %p86_p0, %s2280_s13, %s88_s18  }
   0x7   : > { %p2364_p4 = por %p99_p2, %p98_p1  ;;  %p149_p5 = scmp.lt.s32.totalorder %s2284_s14, 3 }
   0x9   : > { %p150_p6 = pnand %p1822_p3, %p149_p5 }
   0xa   : > { %v368_v0 = vld [vmem:[%s3141_s1] sm:$0xff] (!%p150_p6)  ;;  %v369_v1 = vld [vmem:[%s3141_s1 + $0x8] sm:$0xff] (!%p150_p6)  ;;  %v370_v2 = vld [vmem:[%s3141_s1 + $0x10] sm:$0xff] (!%p150_p6)  ;;  %s2378_s27 = smul.u32 (!%p150_p6), 56, %s2352_s15  ;;  %v2318_v3 = vmov (!%p150_p6), 0.0|0.0   ;;  %vm411_vm0 = vcmask (!%p150_p6), 261120  }
   0xb   : > { %153 = sbr.rel (%p150_p6) target bundleno = 539 (0x21b), region = 32  ;;  %2046 = vmatprep.subr.bf16.mxu0 (!%p150_p6), %v2318_v3  ;;  %2102 = vmatprep.subr.bf16.mxu1 (!%p150_p6), %v2318_v3  ;;  %v2047_v4 = vpack.c.bf16 (!%p150_p6), %v369_v1, %v368_v0  ;;  %v371_v5 = vld [vmem:[%s3141_s1 + $0x18] sm:$0xff] (!%p150_p6)  ;;  %v372_v7 = vld [vmem:[%s3141_s1 + $0x20] sm:$0xff] (!%p150_p6)  ;;  %v373_v8 = vld [vmem:[%s3141_s1 + $0x28] sm:$0xff] (!%p150_p6) }
   0xc   : > { %p184_p7 = scmp.lt.s32.totalorder (!%p150_p6), %s2378_s27, 110  ;;  %v2050_v6 = vpack.c.bf16 (!%p150_p6), %v371_v5, %v370_v2  ;;  %v2053_v9 = vpack.c.bf16 (!%p150_p6), %v373_v8, %v372_v7  ;;  %v374_v10 = vld [vmem:[%s3141_s1 + $0x30] sm:$0xff] (!%p150_p6)  ;;  %v375_v11 = vld [vmem:[%s3141_s1 + $0x38] sm:$0xff] (!%p150_p6)  ;;  %v376_v15 = vld [vmem:[%s3141_s1 + $0x40] sm:$0xff] (!%p150_p6) }
   0xd   : > { %2048 = vmatpush1.bf16.msra.mxu0 (!%p150_p6), %v2047_v4  ;;  %2118 = vmatpush1.bf16.msra.mxu1 (!%p150_p6), %v2047_v4  ;;  %v2056_v13 = vpack.c.bf16 (!%p150_p6), %v375_v11, %v374_v10  ;;  %v377_v16 = vld [vmem:[%s3141_s1 + $0x48] sm:$0xff] (!%p150_p6)  ;;  %v378_v18 = vld [vmem:[%s3141_s1 + $0x50] sm:$0xff] (!%p150_p6)  ;;  %v379_v19 = vld [vmem:[%s3141_s1 + $0x58] sm:$0xff] (!%p150_p6) }
   0xe   : > { %2049 = vmatprep.subr.bf16.mxu0 (!%p150_p6), %v2318_v3  ;;  %2103 = vmatprep.subr.bf16.mxu1 (!%p150_p6), %v2318_v3  ;;  %v2059_v17 = vpack.c.bf16 (!%p150_p6), %v377_v16, %v376_v15  ;;  %v2062_v20 = vpack.c.bf16 (!%p150_p6), %v379_v19, %v378_v18  ;;  %v380_v21 = vld [vmem:[%s3141_s1 + $0x60] sm:$0xff] (!%p150_p6)  ;;  %v381_v22 = vld [vmem:[%s3141_s1 + $0x68] sm:$0xff] (!%p150_p6)  ;;  %v382_v24 = vld [vmem:[%s3141_s1 + $0x70] sm:$0xff] (!%p150_p6) }
   0xf   : > { %v2065_v23 = vpack.c.bf16 (!%p150_p6), %v381_v22, %v380_v21  ;;  %v383_v25 = vld [vmem:[%s3141_s1 + $0x78] sm:$0xff] (!%p150_p6)  ;;  %v384_v27 = vld [vmem:[%s3141_s1 + $0x80] sm:$0xff] (!%p150_p6)  ;;  %v385_v28 = vld [vmem:[%s3141_s1 + $0x88] sm:$0xff] (!%p150_p6) }
  0x10   : > { %v2068_v26 = vpack.c.bf16 (!%p150_p6), %v383_v25, %v382_v24  ;;  %v2071_v29 = vpack.c.bf16 (!%p150_p6), %v385_v28, %v384_v27  ;;  %v386_v30 = vld [vmem:[%s3141_s1 + $0x90] sm:$0xff] (!%p150_p6)  ;;  %v387_v31 = vld [vmem:[%s3141_s1 + $0x98] sm:$0xff] (!%p150_p6)  ;;  %v388_v33 = vld [vmem:[%s3141_s1 + $0xa0] sm:$0xff] (!%p150_p6) }
  0x11   : > { %2051 = vmatpush1.bf16.msra.mxu0 (!%p150_p6), %v2050_v6  ;;  %2119 = vmatpush1.bf16.msra.mxu1 (!%p150_p6), %v2050_v6  ;;  %v2074_v32 = vpack.c.bf16 (!%p150_p6), %v387_v31, %v386_v30  ;;  %v389_v34 = vld [vmem:[%s3141_s1 + $0xa8] sm:$0xff] (!%p150_p6)  ;;  %v390_v36 = vld [vmem:[%s3141_s1 + $0xb0] sm:$0xff] (!%p150_p6)  ;;  %v391_v37 = vld [vmem:[%s3141_s1 + $0xb8] sm:$0xff] (!%p150_p6) }
  0x12   : > { %s185_s7 = scalar_select %p184_p7, %s2378_s27, 110  ;;  %2052 = vmatprep.subr.bf16.mxu0 %v2318_v3  ;;  %2104 = vmatprep.subr.bf16.mxu1 %v2318_v3  ;;  %v2077_v35 = vpack.c.bf16 %v389_v34, %v388_v33  ;;  %v2080_v38 = vpack.c.bf16 %v391_v37, %v390_v36  ;;  %v392_v39 = vld [vmem:[%s3141_s1 + $0xc0] sm:$0xff]  ;;  %v393_v40 = vld [vmem:[%s3141_s1 + $0xc8] sm:$0xff]  ;;  %v394_v42 = vld [vmem:[%s3141_s1 + $0xd0] sm:$0xff] }
  0x13   : > { %v2083_v41 = vpack.c.bf16 %v393_v40, %v392_v39  ;;  %v395_v43 = vld [vmem:[%s3141_s1 + $0xd8] sm:$0xff]  ;;  %v396_v45 = vld [vmem:[%s3141_s1 + $0xe0] sm:$0xff]  ;;  %v397_v46 = vld [vmem:[%s3141_s1 + $0xe8] sm:$0xff]  ;;  %s1390_s24 = ssub.s32 (%p2364_p4), 111, %s2378_s27  ;;  %s1893_s25 = smul.u32 (%p2364_p4), 448, %s2352_s15 }
  0x14   : > { %s2135_s8 = smul.u32 24, %s185_s7  ;;  %v2086_v44 = vpack.c.bf16 %v395_v43, %v394_v42  ;;  %v2089_v47 = vpack.c.bf16 %v397_v46, %v396_v45  ;;  %v398_v48 = vld [vmem:[%s3141_s1 + $0xf0] sm:$0xff]  ;;  %v399_v49 = vld [vmem:[%s3141_s1 + $0xf8] sm:$0xff]  ;;  %v400_v50 = vld [vmem:[%s3141_s1 + $0x100] sm:$0xff]  ;;  %p1391_p8 = scmp.lt.s32.totalorder (%p2364_p4), %s1390_s24, 56 }
  0x15   : > { %2054 = vmatpush1.bf16.msra.mxu0 %v2053_v9  ;;  %2120 = vmatpush1.bf16.msra.mxu1 %v2053_v9  ;;  %v401_v51 = vld [vmem:[%s3141_s1 + $0x108] sm:$0xff]  ;;  %v2092_v52 = vpack.c.bf16 %v399_v49, %v398_v48  ;;  %v402_v54 = vld [vmem:[%s3141_s1 + $0x110] sm:$0xff]  ;;  %v403_v55 = vld [vmem:[%s3141_s1 + $0x118] sm:$0xff]  ;;  %s2962_s29 = scalar_lea.vmem (%p2364_p4), %s3143_s3, %s1893_s25  }
  0x16   : > { %s2406_s21 = scalar_lea.vmem %s3140_s0, %s2135_s8  ;;  %2055 = vmatprep.subr.bf16.mxu0 %v2318_v3  ;;  %2105 = vmatprep.subr.bf16.mxu1 %v2318_v3  ;;  %v2094_v53 = vpack.c.bf16 %v401_v51, %v400_v50  ;;  %v2098_v59 = vpack.c.bf16 %v403_v55, %v402_v54 }
  0x17   : > { %v201_v12 = vld [vmem:[%s2406_s21 + $0x8] sm:$0xff]  ;;  %v327_v14 = vld [vmem:[%s2406_s21 + $0x3f8] sm:$0xff]  ;;  %v200_v56 = vld [vmem:[%s2406_s21] sm:$0xff] }
  0x18   : > { %644 = vmatprep.mubr.f32.mxu0 %v201_v12  ;;  %854 = vmatprep.mubr.f32.mxu1 %v327_v14  ;;  %v326_v57 = vld [vmem:[%s2406_s21 + $0x3f0] sm:$0xff]  ;;  %v204_v58 = vld [vmem:[%s2406_s21 + $0x20] sm:$0xff]  ;;  %v203_v61 = vld [vmem:[%s2406_s21 + $0x18] sm:$0xff] }
  0x19   : > { %2057 = vmatpush1.bf16.msra.mxu0 %v2056_v13  ;;  %2121 = vmatpush1.bf16.msra.mxu1 %v2056_v13  ;;  %v330_v60 = vld [vmem:[%s2406_s21 + $0x410] sm:$0xff]  ;;  %v329_v62 = vld [vmem:[%s2406_s21 + $0x408] sm:$0xff]  ;;  %v207_v63 = vld [vmem:[%s2406_s21 + $0x38] sm:$0xff] }
  0x1a   : > { %2058 = vmatprep.subr.bf16.mxu0 %v2318_v3  ;;  %2106 = vmatprep.subr.bf16.mxu1 %v2318_v3  ;;  %v333_v0 = vld [vmem:[%s2406_s21 + $0x428] sm:$0xff]  ;;  %v206_v1 = vld [vmem:[%s2406_s21 + $0x30] sm:$0xff]  ;;  %v332_v2 = vld [vmem:[%s2406_s21 + $0x420] sm:$0xff] }
  0x1b   : > { %v336_v4 = vld [vmem:[%s2406_s21 + $0x440] sm:$0xff]  ;;  %v209_v5 = vld [vmem:[%s2406_s21 + $0x48] sm:$0xff]  ;;  %v335_v6 = vld [vmem:[%s2406_s21 + $0x438] sm:$0xff] }
  0x1c   : > { %v213_v7 = vld [vmem:[%s2406_s21 + $0x68] sm:$0xff]  ;;  %v339_v8 = vld [vmem:[%s2406_s21 + $0x458] sm:$0xff]  ;;  %v212_v9 = vld [vmem:[%s2406_s21 + $0x60] sm:$0xff] }
  0x1d   : > { %2060 = vmatpush1.bf16.msra.mxu0 %v2059_v17  ;;  %2122 = vmatpush1.bf16.msra.mxu1 %v2059_v17  ;;  %v338_v10 = vld [vmem:[%s2406_s21 + $0x450] sm:$0xff]  ;;  %v216_v11 = vld [vmem:[%s2406_s21 + $0x80] sm:$0xff]  ;;  %v215_v13 = vld [vmem:[%s2406_s21 + $0x78] sm:$0xff] }
  0x1e   : > { %2061 = vmatprep.subr.bf16.mxu0 %v2318_v3  ;;  %2107 = vmatprep.subr.bf16.mxu1 %v2318_v3  ;;  %v342_v12 = vld [vmem:[%s2406_s21 + $0x470] sm:$0xff]  ;;  %v341_v14 = vld [vmem:[%s2406_s21 + $0x468] sm:$0xff]  ;;  %v219_v15 = vld [vmem:[%s2406_s21 + $0x98] sm:$0xff] }
  0x1f   : > { %v345_v16 = vld [vmem:[%s2406_s21 + $0x488] sm:$0xff]  ;;  %v218_v17 = vld [vmem:[%s2406_s21 + $0x90] sm:$0xff]  ;;  %v344_v18 = vld [vmem:[%s2406_s21 + $0x480] sm:$0xff] }
  0x20   : > { %v222_v19 = vld [vmem:[%s2406_s21 + $0xb0] sm:$0xff]  ;;  %v221_v21 = vld [vmem:[%s2406_s21 + $0xa8] sm:$0xff]  ;;  %v347_v22 = vld [vmem:[%s2406_s21 + $0x498] sm:$0xff] }
  0x21   : > { %2063 = vmatpush1.bf16.msra.mxu0 %v2062_v20  ;;  %2123 = vmatpush1.bf16.msra.mxu1 %v2062_v20  ;;  %v348_v20 = vld [vmem:[%s2406_s21 + $0x4a0] sm:$0xff]  ;;  %v351_v24 = vld [vmem:[%s2406_s21 + $0x4b8] sm:$0xff]  ;;  %v354_v28 = vld [vmem:[%s2406_s21 + $0x4d0] sm:$0xff] }
  0x22   : > { %2064 = vmatprep.subr.bf16.mxu0 %v2318_v3  ;;  %2108 = vmatprep.subr.bf16.mxu1 %v2318_v3  ;;  %v224_v25 = vld [vmem:[%s2406_s21 + $0xc0] sm:$0xff]  ;;  %v353_v30 = vld [vmem:[%s2406_s21 + $0x4c8] sm:$0xff]  ;;  %v231_v31 = vld [vmem:[%s2406_s21 + $0xf8] sm:$0xff] }
  0x23   : > { %v228_v27 = vld [vmem:[%s2406_s21 + $0xe0] sm:$0xff]  ;;  %v230_v33 = vld [vmem:[%s2406_s21 + $0xf0] sm:$0xff]  ;;  %v233_v37 = vld [vmem:[%s2406_s21 + $0x108] sm:$0xff] }
  0x24   : > { %v356_v34 = vld [vmem:[%s2406_s21 + $0x4e0] sm:$0xff]  ;;  %v237_v39 = vld [vmem:[%s2406_s21 + $0x128] sm:$0xff]  ;;  %v363_v40 = vld [vmem:[%s2406_s21 + $0x518] sm:$0xff] }
  0x25   : > { %2066 = vmatpush1.bf16.msra.mxu0 %v2065_v23  ;;  %2124 = vmatpush1.bf16.msra.mxu1 %v2065_v23  ;;  %v225_v23 = vld [vmem:[%s2406_s21 + $0xc8] sm:$0xff]  ;;  %v360_v36 = vld [vmem:[%s2406_s21 + $0x500] sm:$0xff]  ;;  %v362_v42 = vld [vmem:[%s2406_s21 + $0x510] sm:$0xff] }
  0x26   : > { %2067 = vmatprep.subr.bf16.mxu0 %v2318_v3  ;;  %2109 = vmatprep.subr.bf16.mxu1 %v2318_v3  ;;  %v240_v43 = vld [vmem:[%s2406_s21 + $0x140] sm:$0xff]  ;;  %v239_v45 = vld [vmem:[%s2406_s21 + $0x138] sm:$0xff]  ;;  %v365_v46 = vld [vmem:[%s2406_s21 + $0x528] sm:$0xff] }
  0x27   : > { %v202_v48 = vld [vmem:[%s2406_s21 + $0x10] sm:$0xff]  ;;  %v205_v50 = vld [vmem:[%s2406_s21 + $0x28] sm:$0xff]  ;;  %v211_v54 = vld [vmem:[%s2406_s21 + $0x58] sm:$0xff] }
  0x28   : > { %v242_v49 = vld [vmem:[%s2406_s21 + $0x150] sm:$0xff]  ;;  %v249_v55 = vld [vmem:[%s2406_s21 + $0x188] sm:$0xff] }
  0x29   : > { %2069 = vmatpush1.bf16.msra.mxu0 %v2068_v26  ;;  %2125 = vmatpush1.bf16.msra.mxu1 %v2068_v26  ;;  %v350_v26 = vld [vmem:[%s2406_s21 + $0x4b0] sm:$0xff] }
  0x2a   : > { %2070 = vmatprep.subr.bf16.mxu0 %v2318_v3  ;;  %2110 = vmatprep.subr.bf16.mxu1 %v2318_v3  ;;  %v246_v51 = vld [vmem:[%s2406_s21 + $0x170] sm:$0xff] }
  0x2d   : > { %2072 = vmatpush1.bf16.msra.mxu0 %v2071_v29  ;;  %2126 = vmatpush1.bf16.msra.mxu1 %v2071_v29  ;;  %v227_v29 = vld [vmem:[%s2406_s21 + $0xd8] sm:$0xff] }
  0x2e   : > { %2073 = vmatprep.subr.bf16.mxu0 %v2318_v3  ;;  %2111 = vmatprep.subr.bf16.mxu1 %v2318_v3 }
  0x31   : > { %2075 = vmatpush1.bf16.msra.mxu0 %v2074_v32  ;;  %2127 = vmatpush1.bf16.msra.mxu1 %v2074_v32  ;;  %v357_v32 = vld [vmem:[%s2406_s21 + $0x4e8] sm:$0xff] }
  0x32   : > { %2076 = vmatprep.subr.bf16.mxu0 %v2318_v3  ;;  %2112 = vmatprep.subr.bf16.mxu1 %v2318_v3 }
  0x35   : > { %2078 = vmatpush1.bf16.msra.mxu0 %v2077_v35  ;;  %2128 = vmatpush1.bf16.msra.mxu1 %v2077_v35  ;;  %v234_v35 = vld [vmem:[%s2406_s21 + $0x110] sm:$0xff] }
  0x36   : > { %2079 = vmatprep.subr.bf16.mxu0 %v2318_v3  ;;  %2113 = vmatprep.subr.bf16.mxu1 %v2318_v3 }
  0x39   : > { %2081 = vmatpush1.bf16.msra.mxu0 %v2080_v38  ;;  %2129 = vmatpush1.bf16.msra.mxu1 %v2080_v38  ;;  %v359_v38 = vld [vmem:[%s2406_s21 + $0x4f8] sm:$0xff] }
  0x3a   : > { %2082 = vmatprep.subr.bf16.mxu0 %v2318_v3  ;;  %2114 = vmatprep.subr.bf16.mxu1 %v2318_v3 }
  0x3d   : > { %2084 = vmatpush1.bf16.msra.mxu0 %v2083_v41  ;;  %2130 = vmatpush1.bf16.msra.mxu1 %v2083_v41  ;;  %v236_v41 = vld [vmem:[%s2406_s21 + $0x120] sm:$0xff] }
  0x3e   : > { %2085 = vmatprep.subr.bf16.mxu0 %v2318_v3  ;;  %2115 = vmatprep.subr.bf16.mxu1 %v2318_v3 }
  0x41   : > { %2087 = vmatpush1.bf16.msra.mxu0 %v2086_v44  ;;  %2131 = vmatpush1.bf16.msra.mxu1 %v2086_v44  ;;  %v366_v44 = vld [vmem:[%s2406_s21 + $0x530] sm:$0xff] }
  0x42   : > { %2088 = vmatprep.subr.bf16.mxu0 %v2318_v3  ;;  %2116 = vmatprep.subr.bf16.mxu1 %v2318_v3 }
  0x45   : > { %2090 = vmatpush1.bf16.msra.mxu0 %v2089_v47  ;;  %2132 = vmatpush1.bf16.msra.mxu1 %v2089_v47  ;;  %v243_v47 = vld [vmem:[%s2406_s21 + $0x158] sm:$0xff] }
  0x46   : > { %2091 = vmatprep.subr.bf16.mxu0 %v2318_v3  ;;  %2117 = vmatprep.subr.bf16.mxu1 %v2318_v3  ;;  %v210_v3 = vld [vmem:[%s2406_s21 + $0x50] sm:$0xff] }
  0x49   : > { %2093 = vmatpush1.bf16.msra.mxu0 %v2092_v52  ;;  %2133 = vmatpush1.bf16.msra.mxu1 %v2092_v52  ;;  %v208_v52 = vld [vmem:[%s2406_s21 + $0x40] sm:$0xff] }
  0x4a   : > { %2095 = vmatprep.subr.bf16.mxu1 %v2094_v53 }
  0x4c   : > { %645 = vmatmul.mubr.f32.vlgmr.msra.gmra.mrb[0].mxu0 %v200_v56  ;;  %855 = vmatmul.mubr.f32.vlgmr.msra.gmra.mrb[0].mxu1 %v326_v57  ;;  %v214_v56 = vld [vmem:[%s2406_s21 + $0x70] sm:$0xff]  ;;  %v248_v57 = vld [vmem:[%s2406_s21 + $0x180] sm:$0xff] }
  0x4d   : > { %2097 = vmatpush3.bf16.msra.mxu1 %v2094_v53  ;;  %649 = vmatprep.mubr.f32.mxu0 %v204_v58  ;;  %v245_v53 = vld [vmem:[%s2406_s21 + $0x168] sm:$0xff] }
  0x4e   : > { %859 = vmatprep.mubr.f32.mxu1 %v330_v60  ;;  %2099 = vmatprep.subr.bf16.mxu1 %v2098_v59  ;;  %v217_v58 = vld [vmem:[%s2406_s21 + $0x88] sm:$0xff]  ;;  %v220_v60 = vld [vmem:[%s2406_s21 + $0xa0] sm:$0xff] }
  0x50   : > { %650 = vmatmul.mubr.f32.gmra.mrb[2].mxu0 %v203_v61  ;;  %860 = vmatmul.mubr.f32.gmra.mrb[2].mxu1 %v329_v62  ;;  %v251_v61 = vld [vmem:[%s2406_s21 + $0x198] sm:$0xff] }
  0x51   : > { %654 = vmatprep.mubr.f32.mxu0 %v207_v63  ;;  %864 = vmatprep.mubr.f32.mxu1 %v333_v0  ;;  %v223_v62 = vld [vmem:[%s2406_s21 + $0xb8] sm:$0xff]  ;;  %v226_v0 = vld [vmem:[%s2406_s21 + $0xd0] sm:$0xff] }
  0x52   : > { %2101 = vmatpush3.bf16.msra.mxu1 %v2098_v59  ;;  %v252_v59 = vld [vmem:[%s2406_s21 + $0x1a0] sm:$0xff]  ;;  %v255_v63 = vld [vmem:[%s2406_s21 + $0x1b8] sm:$0xff] }
  0x54   : > { %655 = vmatmul.mubr.f32.gmra.mrb[4].mxu0 %v206_v1  ;;  %865 = vmatmul.mubr.f32.gmra.mrb[4].mxu1 %v332_v2  ;;  %v254_v1 = vld [vmem:[%s2406_s21 + $0x1b0] sm:$0xff]  ;;  %v229_v2 = vld [vmem:[%s2406_s21 + $0xe8] sm:$0xff] }
  0x55   : > { %659 = vmatprep.mubr.f32.mxu0 %v210_v3  ;;  %869 = vmatprep.mubr.f32.mxu1 %v336_v4  ;;  %v258_v3 = vld [vmem:[%s2406_s21 + $0x1d0] sm:$0xff]  ;;  %v232_v4 = vld [vmem:[%s2406_s21 + $0x100] sm:$0xff] }
  0x58   : > { %660 = vmatmul.mubr.f32.gmra.mrb[6].mxu0 %v209_v5  ;;  %870 = vmatmul.mubr.f32.gmra.mrb[6].mxu1 %v335_v6  ;;  %v257_v5 = vld [vmem:[%s2406_s21 + $0x1c8] sm:$0xff]  ;;  %v235_v6 = vld [vmem:[%s2406_s21 + $0x118] sm:$0xff] }
  0x59   : > { %664 = vmatprep.mubr.f32.mxu0 %v213_v7  ;;  %874 = vmatprep.mubr.f32.mxu1 %v339_v8  ;;  %v261_v7 = vld [vmem:[%s2406_s21 + $0x1e8] sm:$0xff]  ;;  %v238_v8 = vld [vmem:[%s2406_s21 + $0x130] sm:$0xff] }
  0x5c   : > { %665 = vmatmul.mubr.f32.gmra.mrb[8].mxu0 %v212_v9  ;;  %875 = vmatmul.mubr.f32.gmra.mrb[8].mxu1 %v338_v10  ;;  %v260_v9 = vld [vmem:[%s2406_s21 + $0x1e0] sm:$0xff]  ;;  %v241_v10 = vld [vmem:[%s2406_s21 + $0x148] sm:$0xff] }
  0x5d   : > { %669 = vmatprep.mubr.f32.mxu0 %v216_v11  ;;  %879 = vmatprep.mubr.f32.mxu1 %v342_v12  ;;  %v264_v11 = vld [vmem:[%s2406_s21 + $0x200] sm:$0xff] }
  0x5e   : > { %v244_v12 = vld [vmem:[%s2406_s21 + $0x160] sm:$0xff] }
  0x60   : > { %670 = vmatmul.mubr.f32.gmra.mrb[10].mxu0 %v215_v13  ;;  %880 = vmatmul.mubr.f32.gmra.mrb[10].mxu1 %v341_v14  ;;  %v263_v13 = vld [vmem:[%s2406_s21 + $0x1f8] sm:$0xff] }
  0x61   : > { %674 = vmatprep.mubr.f32.mxu0 %v219_v15  ;;  %884 = vmatprep.mubr.f32.mxu1 %v345_v16  ;;  %v247_v14 = vld [vmem:[%s2406_s21 + $0x178] sm:$0xff]  ;;  %v250_v16 = vld [vmem:[%s2406_s21 + $0x190] sm:$0xff] }
  0x62   : > { %v267_v15 = vld [vmem:[%s2406_s21 + $0x218] sm:$0xff] }
  0x64   : > { %675 = vmatmul.mubr.f32.gmra.mrb[12].mxu0 %v218_v17  ;;  %885 = vmatmul.mubr.f32.gmra.mrb[12].mxu1 %v344_v18  ;;  %v266_v17 = vld [vmem:[%s2406_s21 + $0x210] sm:$0xff]  ;;  %v253_v18 = vld [vmem:[%s2406_s21 + $0x1a8] sm:$0xff] }
  0x65   : > { %679 = vmatprep.mubr.f32.mxu0 %v222_v19  ;;  %889 = vmatprep.mubr.f32.mxu1 %v348_v20  ;;  %v270_v19 = vld [vmem:[%s2406_s21 + $0x230] sm:$0xff]  ;;  %v256_v20 = vld [vmem:[%s2406_s21 + $0x1c0] sm:$0xff] }
  0x68   : > { %680 = vmatmul.mubr.f32.gmra.mrb[14].mxu0 %v221_v21  ;;  %890 = vmatmul.mubr.f32.gmra.mrb[14].mxu1 %v347_v22  ;;  %v269_v21 = vld [vmem:[%s2406_s21 + $0x228] sm:$0xff]  ;;  %v259_v22 = vld [vmem:[%s2406_s21 + $0x1d8] sm:$0xff] }
  0x69   : > { %684 = vmatprep.mubr.f32.mxu0 %v225_v23  ;;  %894 = vmatprep.mubr.f32.mxu1 %v351_v24  ;;  %v273_v23 = vld [vmem:[%s2406_s21 + $0x248] sm:$0xff]  ;;  %v262_v24 = vld [vmem:[%s2406_s21 + $0x1f0] sm:$0xff] }
  0x6c   : > { %685 = vmatmul.mubr.f32.gmra.mrb[16].mxu0 %v224_v25  ;;  %895 = vmatmul.mubr.f32.gmra.mrb[16].mxu1 %v350_v26  ;;  %v272_v25 = vld [vmem:[%s2406_s21 + $0x240] sm:$0xff]  ;;  %v265_v26 = vld [vmem:[%s2406_s21 + $0x208] sm:$0xff] }
  0x6d   : > { %689 = vmatprep.mubr.f32.mxu0 %v228_v27  ;;  %899 = vmatprep.mubr.f32.mxu1 %v354_v28  ;;  %v276_v27 = vld [vmem:[%s2406_s21 + $0x260] sm:$0xff] }
  0x6e   : > { %v268_v28 = vld [vmem:[%s2406_s21 + $0x220] sm:$0xff] }
  0x70   : > { %690 = vmatmul.mubr.f32.gmra.mrb[18].mxu0 %v227_v29  ;;  %900 = vmatmul.mubr.f32.gmra.mrb[18].mxu1 %v353_v30  ;;  %v275_v29 = vld [vmem:[%s2406_s21 + $0x258] sm:$0xff] }
  0x71   : > { %694 = vmatprep.mubr.f32.mxu0 %v231_v31  ;;  %904 = vmatprep.mubr.f32.mxu1 %v357_v32  ;;  %v271_v30 = vld [vmem:[%s2406_s21 + $0x238] sm:$0xff]  ;;  %v274_v32 = vld [vmem:[%s2406_s21 + $0x250] sm:$0xff] }
  0x72   : > { %v279_v31 = vld [vmem:[%s2406_s21 + $0x278] sm:$0xff] }
  0x74   : > { %695 = vmatmul.mubr.f32.gmra.mrb[20].mxu0 %v230_v33  ;;  %905 = vmatmul.mubr.f32.gmra.mrb[20].mxu1 %v356_v34  ;;  %v278_v33 = vld [vmem:[%s2406_s21 + $0x270] sm:$0xff]  ;;  %v277_v34 = vld [vmem:[%s2406_s21 + $0x268] sm:$0xff] }
  0x75   : > { %699 = vmatprep.mubr.f32.mxu0 %v234_v35  ;;  %909 = vmatprep.mubr.f32.mxu1 %v360_v36  ;;  %v282_v35 = vld [vmem:[%s2406_s21 + $0x290] sm:$0xff]  ;;  %v280_v36 = vld [vmem:[%s2406_s21 + $0x280] sm:$0xff] }
  0x78   : > { %700 = vmatmul.mubr.f32.gmra.mrb[22].mxu0 %v233_v37  ;;  %910 = vmatmul.mubr.f32.gmra.mrb[22].mxu1 %v359_v38  ;;  %v281_v37 = vld [vmem:[%s2406_s21 + $0x288] sm:$0xff]  ;;  %v283_v38 = vld [vmem:[%s2406_s21 + $0x298] sm:$0xff] }
  0x79   : > { %704 = vmatprep.mubr.f32.mxu0 %v237_v39  ;;  %914 = vmatprep.mubr.f32.mxu1 %v363_v40  ;;  %v285_v39 = vld [vmem:[%s2406_s21 + $0x2a8] sm:$0xff]  ;;  %v286_v40 = vld [vmem:[%s2406_s21 + $0x2b0] sm:$0xff] }
  0x7c   : > { %705 = vmatmul.mubr.f32.gmra.mrb[24].mxu0 %v236_v41  ;;  %915 = vmatmul.mubr.f32.gmra.mrb[24].mxu1 %v362_v42  ;;  %v284_v41 = vld [vmem:[%s2406_s21 + $0x2a0] sm:$0xff]  ;;  %v289_v42 = vld [vmem:[%s2406_s21 + $0x2c8] sm:$0xff] }
  0x7d   : > { %709 = vmatprep.mubr.f32.mxu0 %v240_v43  ;;  %919 = vmatprep.mubr.f32.mxu1 %v366_v44  ;;  %v288_v43 = vld [vmem:[%s2406_s21 + $0x2c0] sm:$0xff] }
  0x7e   : > { %v292_v44 = vld [vmem:[%s2406_s21 + $0x2e0] sm:$0xff] }
  0x80   : > { %710 = vmatmul.mubr.f32.gmra.mrb[26].mxu0 %v239_v45  ;;  %920 = vmatmul.mubr.f32.gmra.mrb[26].mxu1 %v365_v46  ;;  %v287_v45 = vld [vmem:[%s2406_s21 + $0x2b8] sm:$0xff] }
  0x81   : > { %714 = vmatprep.mubr.f32.mxu0 %v243_v47  ;;  %1962 = vmatprep.mubr.msk.f32.mxu1 %vm411_vm0, %v202_v48  ;;  %v295_v46 = vld [vmem:[%s2406_s21 + $0x2f8] sm:$0xff]  ;;  %v298_v48 = vld [vmem:[%s2406_s21 + $0x310] sm:$0xff] }
  0x82   : > { %v291_v47 = vld [vmem:[%s2406_s21 + $0x2d8] sm:$0xff] }
  0x84   : > { %715 = vmatmul.mubr.f32.gmra.mrb[28].mxu0 %v242_v49  ;;  %1963 = vmatmul.mubr.msk.f32.vlgmr.msra.gmra.mrb[28].mxu1 %vm411_vm0, %v205_v50  ;;  %v290_v49 = vld [vmem:[%s2406_s21 + $0x2d0] sm:$0xff]  ;;  %v301_v50 = vld [vmem:[%s2406_s21 + $0x328] sm:$0xff] }
  0x85   : > { %719 = vmatprep.mubr.f32.mxu0 %v246_v51  ;;  %1965 = vmatprep.mubr.msk.f32.mxu1 %vm411_vm0, %v208_v52  ;;  %v294_v51 = vld [vmem:[%s2406_s21 + $0x2f0] sm:$0xff]  ;;  %v304_v52 = vld [vmem:[%s2406_s21 + $0x340] sm:$0xff] }
  0x88   : > { %720 = vmatmul.mubr.f32.gmra.mrb[30].mxu0 %v245_v53  ;;  %1966 = vmatmul.mubr.msk.f32.gmra.mrb[30].mxu1 %vm411_vm0, %v211_v54  ;;  %v293_v53 = vld [vmem:[%s2406_s21 + $0x2e8] sm:$0xff]  ;;  %v307_v54 = vld [vmem:[%s2406_s21 + $0x358] sm:$0xff] }
  0x89   : > { %724 = vmatprep.mubr.f32.mxu0 %v249_v55  ;;  %1968 = vmatprep.mubr.msk.f32.mxu1 %vm411_vm0, %v214_v56  ;;  %v297_v55 = vld [vmem:[%s2406_s21 + $0x308] sm:$0xff]  ;;  %v310_v56 = vld [vmem:[%s2406_s21 + $0x370] sm:$0xff] }
  0x8c   : > { %725 = vmatmul.mubr.f32.gmra.mrb[32].mxu0 %v248_v57  ;;  %1969 = vmatmul.mubr.msk.f32.gmra.mrb[32].mxu1 %vm411_vm0, %v217_v58  ;;  %v296_v57 = vld [vmem:[%s2406_s21 + $0x300] sm:$0xff]  ;;  %v313_v58 = vld [vmem:[%s2406_s21 + $0x388] sm:$0xff] }
  0x8d   : > { %729 = vmatprep.mubr.f32.mxu0 %v252_v59  ;;  %1971 = vmatprep.mubr.msk.f32.mxu1 %vm411_vm0, %v220_v60  ;;  %v300_v59 = vld [vmem:[%s2406_s21 + $0x320] sm:$0xff] }
  0x8e   : > { %v316_v60 = vld [vmem:[%s2406_s21 + $0x3a0] sm:$0xff] }
  0x90   : > { %730 = vmatmul.mubr.f32.gmra.mrb[34].mxu0 %v251_v61  ;;  %1972 = vmatmul.mubr.msk.f32.gmra.mrb[34].mxu1 %vm411_vm0, %v223_v62  ;;  %v299_v61 = vld [vmem:[%s2406_s21 + $0x318] sm:$0xff] }
  0x91   : > { %734 = vmatprep.mubr.f32.mxu0 %v255_v63  ;;  %1974 = vmatprep.mubr.msk.f32.mxu1 %vm411_vm0, %v226_v0  ;;  %v319_v62 = vld [vmem:[%s2406_s21 + $0x3b8] sm:$0xff]  ;;  %v322_v0 = vld [vmem:[%s2406_s21 + $0x3d0] sm:$0xff] }
  0x92   : > { %v303_v63 = vld [vmem:[%s2406_s21 + $0x338] sm:$0xff] }
  0x94   : > { %735 = vmatmul.mubr.f32.gmra.mrb[36].mxu0 %v254_v1  ;;  %1975 = vmatmul.mubr.msk.f32.gmra.mrb[36].mxu1 %vm411_vm0, %v229_v2  ;;  %v302_v1 = vld [vmem:[%s2406_s21 + $0x330] sm:$0xff]  ;;  %v325_v2 = vld [vmem:[%s2406_s21 + $0x3e8] sm:$0xff] }
  0x95   : > { %739 = vmatprep.mubr.f32.mxu0 %v258_v3  ;;  %1977 = vmatprep.mubr.msk.f32.mxu1 %vm411_vm0, %v232_v4  ;;  %v306_v3 = vld [vmem:[%s2406_s21 + $0x350] sm:$0xff]  ;;  %v328_v4 = vld [vmem:[%s2406_s21 + $0x400] sm:$0xff] }
  0x98   : > { %740 = vmatmul.mubr.f32.gmra.mrb[38].mxu0 %v257_v5  ;;  %1978 = vmatmul.mubr.msk.f32.gmra.mrb[38].mxu1 %vm411_vm0, %v235_v6  ;;  %v305_v5 = vld [vmem:[%s2406_s21 + $0x348] sm:$0xff]  ;;  %v331_v6 = vld [vmem:[%s2406_s21 + $0x418] sm:$0xff] }
  0x99   : > { %744 = vmatprep.mubr.f32.mxu0 %v261_v7  ;;  %1980 = vmatprep.mubr.msk.f32.mxu1 %vm411_vm0, %v238_v8  ;;  %v309_v7 = vld [vmem:[%s2406_s21 + $0x368] sm:$0xff]  ;;  %v334_v8 = vld [vmem:[%s2406_s21 + $0x430] sm:$0xff] }
  0x9c   : > { %745 = vmatmul.mubr.f32.gmra.mrb[40].mxu0 %v260_v9  ;;  %1981 = vmatmul.mubr.msk.f32.gmra.mrb[40].mxu1 %vm411_vm0, %v241_v10  ;;  %v308_v9 = vld [vmem:[%s2406_s21 + $0x360] sm:$0xff]  ;;  %v337_v10 = vld [vmem:[%s2406_s21 + $0x448] sm:$0xff] }
  0x9d   : > { %749 = vmatprep.mubr.f32.mxu0 %v264_v11  ;;  %1983 = vmatprep.mubr.msk.f32.mxu1 %vm411_vm0, %v244_v12  ;;  %v312_v11 = vld [vmem:[%s2406_s21 + $0x380] sm:$0xff] }
  0x9e   : > { %v340_v12 = vld [vmem:[%s2406_s21 + $0x460] sm:$0xff] }
  0xa0   : > { %750 = vmatmul.mubr.f32.gmra.mrb[42].mxu0 %v263_v13  ;;  %1984 = vmatmul.mubr.msk.f32.gmra.mrb[42].mxu1 %vm411_vm0, %v247_v14  ;;  %v311_v13 = vld [vmem:[%s2406_s21 + $0x378] sm:$0xff] }
  0xa1   : > { %754 = vmatprep.mubr.f32.mxu0 %v267_v15  ;;  %1986 = vmatprep.mubr.msk.f32.mxu1 %vm411_vm0, %v250_v16  ;;  %v343_v14 = vld [vmem:[%s2406_s21 + $0x478] sm:$0xff]  ;;  %v346_v16 = vld [vmem:[%s2406_s21 + $0x490] sm:$0xff] }
  0xa2   : > { %v315_v15 = vld [vmem:[%s2406_s21 + $0x398] sm:$0xff] }
  0xa4   : > { %755 = vmatmul.mubr.f32.gmra.mrb[44].mxu0 %v266_v17  ;;  %1987 = vmatmul.mubr.msk.f32.gmra.mrb[44].mxu1 %vm411_vm0, %v253_v18  ;;  %v314_v17 = vld [vmem:[%s2406_s21 + $0x390] sm:$0xff]  ;;  %v349_v18 = vld [vmem:[%s2406_s21 + $0x4a8] sm:$0xff] }
  0xa5   : > { %759 = vmatprep.mubr.f32.mxu0 %v270_v19  ;;  %1989 = vmatprep.mubr.msk.f32.mxu1 %vm411_vm0, %v256_v20  ;;  %v318_v19 = vld [vmem:[%s2406_s21 + $0x3b0] sm:$0xff]  ;;  %v352_v20 = vld [vmem:[%s2406_s21 + $0x4c0] sm:$0xff] }
  0xa8   : > { %760 = vmatmul.mubr.f32.gmra.mrb[46].mxu0 %v269_v21  ;;  %1990 = vmatmul.mubr.msk.f32.gmra.mrb[46].mxu1 %vm411_vm0, %v259_v22  ;;  %v317_v21 = vld [vmem:[%s2406_s21 + $0x3a8] sm:$0xff]  ;;  %v355_v22 = vld [vmem:[%s2406_s21 + $0x4d8] sm:$0xff] }
  0xa9   : > { %764 = vmatprep.mubr.f32.mxu0 %v273_v23  ;;  %1992 = vmatprep.mubr.msk.f32.mxu1 %vm411_vm0, %v262_v24  ;;  %v321_v23 = vld [vmem:[%s2406_s21 + $0x3c8] sm:$0xff]  ;;  %v358_v24 = vld [vmem:[%s2406_s21 + $0x4f0] sm:$0xff] }
  0xac   : > { %765 = vmatmul.mubr.f32.gmra.mrb[48].mxu0 %v272_v25  ;;  %1993 = vmatmul.mubr.msk.f32.gmra.mrb[48].mxu1 %vm411_vm0, %v265_v26  ;;  %v320_v25 = vld [vmem:[%s2406_s21 + $0x3c0] sm:$0xff]  ;;  %v361_v26 = vld [vmem:[%s2406_s21 + $0x508] sm:$0xff] }
  0xad   : > { %769 = vmatprep.mubr.f32.mxu0 %v276_v27  ;;  %1995 = vmatprep.mubr.msk.f32.mxu1 %vm411_vm0, %v268_v28  ;;  %v324_v27 = vld [vmem:[%s2406_s21 + $0x3e0] sm:$0xff] }
  0xae   : > { %v364_v28 = vld [vmem:[%s2406_s21 + $0x520] sm:$0xff] }
  0xb0   : > { %770 = vmatmul.mubr.f32.gmra.mrb[50].mxu0 %v275_v29  ;;  %1996 = vmatmul.mubr.msk.f32.gmra.mrb[50].mxu1 %vm411_vm0, %v271_v30  ;;  %v323_v29 = vld [vmem:[%s2406_s21 + $0x3d8] sm:$0xff] }
  0xb1   : > { %774 = vmatprep.mubr.f32.mxu0 %v279_v31  ;;  %1998 = vmatprep.mubr.msk.f32.mxu1 %vm411_vm0, %v274_v32  ;;  %v367_v30 = vld [vmem:[%s2406_s21 + $0x538] sm:$0xff]  ;;  %s175_s21 = sand.u32 1, %s2276_s12  }
  0xb2   : > { %s2134_s23 = smul.u32 448, %s175_s21 }
  0xb4   : > { %775 = vmatmul.mubr.f32.gmra.mrb[52].mxu0 %v278_v33  ;;  %1999 = vmatmul.mubr.msk.f32.gmra.mrb[52].mxu1 %vm411_vm0, %v277_v34  ;;  %s2802_s12 = scalar_lea.vmem [#allocation2], %s2134_s23  }
  0xb5   : > { %779 = vmatprep.mubr.f32.mxu0 %v282_v35  ;;  %2001 = vmatprep.mubr.msk.f32.mxu1 %vm411_vm0, %v280_v36 }
  0xb8   : > { %780 = vmatmul.mubr.f32.gmra.mrb[54].mxu0 %v281_v37  ;;  %2002 = vmatmul.mubr.msk.f32.gmra.mrb[54].mxu1 %vm411_vm0, %v283_v38 }
  0xb9   : > { %784 = vmatprep.mubr.f32.mxu0 %v285_v39  ;;  %2004 = vmatprep.mubr.msk.f32.mxu1 %vm411_vm0, %v286_v40 }
  0xbc   : > { %785 = vmatmul.mubr.f32.gmra.mrb[56].mxu0 %v284_v41  ;;  %2005 = vmatmul.mubr.msk.f32.gmra.mrb[56].mxu1 %vm411_vm0, %v289_v42 }
  0xbd   : > { %789 = vmatprep.mubr.f32.mxu0 %v288_v43  ;;  %2007 = vmatprep.mubr.msk.f32.mxu1 %vm411_vm0, %v292_v44 }
  0xc0   : > { %790 = vmatmul.mubr.f32.gmra.mrb[58].mxu0 %v287_v45  ;;  %2008 = vmatmul.mubr.msk.f32.gmra.mrb[58].mxu1 %vm411_vm0, %v295_v46 }
  0xc1   : > { %794 = vmatprep.mubr.f32.mxu0 %v291_v47  ;;  %2010 = vmatprep.mubr.msk.f32.mxu1 %vm411_vm0, %v298_v48 }
  0xc4   : > { %795 = vmatmul.mubr.f32.gmra.mrb[60].mxu0 %v290_v49  ;;  %2011 = vmatmul.mubr.msk.f32.gmra.mrb[60].mxu1 %vm411_vm0, %v301_v50 }
  0xc5   : > { %799 = vmatprep.mubr.f32.mxu0 %v294_v51  ;;  %2013 = vmatprep.mubr.msk.f32.mxu1 %vm411_vm0, %v304_v52 }
  0xc8   : > { %800 = vmatmul.mubr.f32.gmra.mrb[62].mxu0 %v293_v53  ;;  %2014 = vmatmul.mubr.msk.f32.gmra.mrb[62].mxu1 %vm411_vm0, %v307_v54 }
  0xc9   : > { %804 = vmatprep.mubr.f32.mxu0 %v297_v55  ;;  %2016 = vmatprep.mubr.msk.f32.mxu1 %vm411_vm0, %v310_v56 }
  0xcc   : > { %805 = vmatmul.mubr.f32.gmra.mrb[64].mxu0 %v296_v57  ;;  %2017 = vmatmul.mubr.msk.f32.gmra.mrb[64].mxu1 %vm411_vm0, %v313_v58 }
  0xcd   : > { %809 = vmatprep.mubr.f32.mxu0 %v300_v59  ;;  %2019 = vmatprep.mubr.msk.f32.mxu1 %vm411_vm0, %v316_v60 }
  0xd0   : > { %810 = vmatmul.mubr.f32.gmra.mrb[66].mxu0 %v299_v61  ;;  %2020 = vmatmul.mubr.msk.f32.gmra.mrb[66].mxu1 %vm411_vm0, %v319_v62 }
  0xd1   : > { %814 = vmatprep.mubr.f32.mxu0 %v303_v63  ;;  %2022 = vmatprep.mubr.msk.f32.mxu1 %vm411_vm0, %v322_v0 }
  0xd4   : > { %815 = vmatmul.mubr.f32.gmra.mrb[68].mxu0 %v302_v1  ;;  %2023 = vmatmul.mubr.msk.f32.gmra.mrb[68].mxu1 %vm411_vm0, %v325_v2 }
  0xd5   : > { %819 = vmatprep.mubr.f32.mxu0 %v306_v3  ;;  %2025 = vmatprep.mubr.msk.f32.mxu1 %vm411_vm0, %v328_v4 }
  0xd8   : > { %820 = vmatmul.mubr.f32.gmra.mrb[70].mxu0 %v305_v5  ;;  %2026 = vmatmul.mubr.msk.f32.gmra.mrb[70].mxu1 %vm411_vm0, %v331_v6 }
  0xd9   : > { %824 = vmatprep.mubr.f32.mxu0 %v309_v7  ;;  %2028 = vmatprep.mubr.msk.f32.mxu1 %vm411_vm0, %v334_v8 }
  0xdc   : > { %825 = vmatmul.mubr.f32.gmra.mrb[72].mxu0 %v308_v9  ;;  %2029 = vmatmul.mubr.msk.f32.gmra.mrb[72].mxu1 %vm411_vm0, %v337_v10 }
  0xdd   : > { %829 = vmatprep.mubr.f32.mxu0 %v312_v11  ;;  %2031 = vmatprep.mubr.msk.f32.mxu1 %vm411_vm0, %v340_v12 }
  0xe0   : > { %830 = vmatmul.mubr.f32.gmra.mrb[74].mxu0 %v311_v13  ;;  %2032 = vmatmul.mubr.msk.f32.gmra.mrb[74].mxu1 %vm411_vm0, %v343_v14 }
  0xe1   : > { %834 = vmatprep.mubr.f32.mxu0 %v315_v15  ;;  %2034 = vmatprep.mubr.msk.f32.mxu1 %vm411_vm0, %v346_v16 }
  0xe4   : > { %835 = vmatmul.mubr.f32.gmra.mrb[76].mxu0 %v314_v17  ;;  %2035 = vmatmul.mubr.msk.f32.gmra.mrb[76].mxu1 %vm411_vm0, %v349_v18 }
  0xe5   : > { %839 = vmatprep.mubr.f32.mxu0 %v318_v19  ;;  %2037 = vmatprep.mubr.msk.f32.mxu1 %vm411_vm0, %v352_v20 }
  0xe8   : > { %840 = vmatmul.mubr.f32.gmra.mrb[78].mxu0 %v317_v21  ;;  %2038 = vmatmul.mubr.msk.f32.gmra.mrb[78].mxu1 %vm411_vm0, %v355_v22  ;;  %v2792_v21 = vld [vmem:[%s3142_s2] ss:$0 sm:$0xff] }
  0xe9   : > { %844 = vmatprep.mubr.f32.mxu0 %v321_v23  ;;  %2040 = vmatprep.mubr.msk.f32.mxu1 %vm411_vm0, %v358_v24 }
  0xec   : > { %845 = vmatmul.mubr.f32.gmra.mrb[80].mxu0 %v320_v25  ;;  %2041 = vmatmul.mubr.msk.f32.gmra.mrb[80].mxu1 %vm411_vm0, %v361_v26 }
  0xed   : > { %849 = vmatprep.mubr.f32.mxu0 %v324_v27  ;;  %2043 = vmatprep.mubr.msk.f32.mxu1 %vm411_vm0, %v364_v28 }
  0xf0   : > { %850 = vmatmul.mubr.f32.gmra.mrb[82].mxu0 %v323_v29  ;;  %2044 = vmatmul.mubr.msk.f32.gmra.mrb[82].mxu1 %vm411_vm0, %v367_v30 }
 0x11f   : > { %v646_v31 = vpop.f32.mrb[0].mxu0  ;;  %v2742_v32 = vpop.f32.mrb[0].mxu1 }
 0x120   : > { %v648_v33 = vpop.f32.mrb[1].mxu0  ;;  %v858_v34 = vpop.f32.mrb[1].mxu1  ;;  %v647_v25 = vadd.f32 %v2792_v21, %v646_v31 }
 0x123   : > { %v651_v35 = vpop.f32.mrb[2].mxu0  ;;  %v2744_v36 = vpop.f32.mrb[2].mxu1 }
 0x124   : > { %v653_v37 = vpop.f32.mrb[3].mxu0  ;;  %v863_v38 = vpop.f32.mrb[3].mxu1  ;;  %v652_v24 = vadd.f32 %v2792_v21, %v651_v35 }
 0x127   : > { %v656_v39 = vpop.f32.mrb[4].mxu0  ;;  %v2746_v40 = vpop.f32.mrb[4].mxu1 }
 0x128   : > { %v658_v41 = vpop.f32.mrb[5].mxu0  ;;  %v868_v42 = vpop.f32.mrb[5].mxu1  ;;  %v657_v38 = vadd.f32 %v2792_v21, %v656_v39 }
 0x12b   : > { %v661_v43 = vpop.f32.mrb[6].mxu0  ;;  %v2748_v44 = vpop.f32.mrb[6].mxu1 }
 0x12c   : > { %v663_v45 = vpop.f32.mrb[7].mxu0  ;;  %v873_v46 = vpop.f32.mrb[7].mxu1  ;;  %v662_v34 = vadd.f32 %v2792_v21, %v661_v43 }
 0x12f   : > { %v2750_v47 = vpop.f32.mrb[8].mxu0  ;;  %v2752_v48 = vpop.f32.mrb[8].mxu1 }
 0x130   : > { %v668_v49 = vpop.f32.mrb[9].mxu0  ;;  %v878_v50 = vpop.f32.mrb[9].mxu1  ;;  %v667_v39 = vadd.f32 %v2792_v21, %v2750_v47 }
 0x133   : > { %v671_v51 = vpop.f32.mrb[10].mxu0  ;;  %v2754_v52 = vpop.f32.mrb[10].mxu1 }
 0x134   : > { %v673_v53 = vpop.f32.mrb[11].mxu0  ;;  %v883_v54 = vpop.f32.mrb[11].mxu1  ;;  %v672_v43 = vadd.f32 %v2792_v21, %v671_v51 }
 0x137   : > { %v2756_v55 = vpop.f32.mrb[12].mxu0  ;;  %v2758_v56 = vpop.f32.mrb[12].mxu1 }
 0x138   : > { %v678_v57 = vpop.f32.mrb[13].mxu0  ;;  %v888_v58 = vpop.f32.mrb[13].mxu1 }
 0x13b   : > { %v2760_v59 = vpop.f32.mrb[14].mxu0  ;;  %v2762_v60 = vpop.f32.mrb[14].mxu1 }
 0x13c   : > { %v683_v61 = vpop.f32.mrb[15].mxu0  ;;  %v893_v62 = vpop.f32.mrb[15].mxu1 }
 0x13f   : > { %v2764_v63 = vpop.f32.mrb[16].mxu0  ;;  %v2766_v0 = vpop.f32.mrb[16].mxu1 }
 0x140   : > { %v688_v1 = vpop.f32.mrb[17].mxu0  ;;  %v898_v2 = vpop.f32.mrb[17].mxu1 }
 0x141   : > { %v682_v2 = vadd.f32 %v2792_v21, %v2760_v59  ;;  %v687_v59 = vadd.f32 %v2792_v21, %v2764_v63 }
 0x143   : > { %v2768_v3 = vpop.f32.mrb[18].mxu0  ;;  %v2770_v4 = vpop.f32.mrb[18].mxu1 }
 0x144   : > { %v693_v5 = vpop.f32.mrb[19].mxu0  ;;  %v903_v6 = vpop.f32.mrb[19].mxu1 }
 0x145   : > { %v677_v5 = vadd.f32 %v2792_v21, %v2756_v55 }
 0x147   : > { %v2772_v7 = vpop.f32.mrb[20].mxu0  ;;  %v2774_v8 = vpop.f32.mrb[20].mxu1 }
 0x148   : > { %v698_v9 = vpop.f32.mrb[21].mxu0  ;;  %v908_v10 = vpop.f32.mrb[21].mxu1 }
 0x14b   : > { %v2776_v11 = vpop.f32.mrb[22].mxu0  ;;  %v2778_v12 = vpop.f32.mrb[22].mxu1 }
 0x14c   : > { %v703_v13 = vpop.f32.mrb[23].mxu0  ;;  %v913_v14 = vpop.f32.mrb[23].mxu1 }
 0x14f   : > { %v2780_v15 = vpop.f32.mrb[24].mxu0  ;;  %v2782_v16 = vpop.f32.mrb[24].mxu1 }
 0x150   : > { %v708_v17 = vpop.f32.mrb[25].mxu0  ;;  %v918_v18 = vpop.f32.mrb[25].mxu1 }
 0x151   : > { %v692_v18 = vadd.f32 %v2792_v21, %v2768_v3  ;;  %v697_v3 = vadd.f32 %v2792_v21, %v2772_v7 }
 0x153   : > { %v2785_v19 = vpop.f32.mrb[26].mxu0  ;;  %v2787_v20 = vpop.f32.mrb[26].mxu1 }
 0x154   : > { %v713_v22 = vpop.f32.mrb[27].mxu0  ;;  %v923_v23 = vpop.f32.mrb[27].mxu1 }
 0x157   : > { %v2796_v26 = vpop.f32.mrb[28].mxu0  ;;  %v1964_v27 = vpop.f32.mrb[28].mxu1 }
 0x158   : > { %v997_v28 = vadd.f32 %v1964_v27, %v652_v24  ;;  %v718_v29 = vpop.f32.mrb[29].mxu0  ;;  %v991_v30 = vpop.f32.mrb[29].mxu1 }
 0x159   : > { %v992_v33 = vadd.f32 %v991_v30, %v647_v25  ;;  %v702_v30 = vadd.f32 %v2792_v21, %v2776_v11  ;;  %v707_v11 = vadd.f32 %v2792_v21, %v2780_v15 }
 0x15a   : > { %v1271_v37 = vmax.f32 %v997_v28, 0.0 }
 0x15b   : > { %v1270_v41 = vmax.f32 %v992_v33, 0.0  ;;  %v2800_v42 = vpop.f32.mrb[30].mxu0  ;;  %v1967_v45 = vpop.f32.mrb[30].mxu1 }
 0x15c   : > { %1327 = vst [vmem:[%s2802_s12 + $0x8] sm:$0xff] %v1271_v37  ;;  %v1007_v31 = vadd.f32 %v1967_v45, %v662_v34  ;;  %v723_v35 = vpop.f32.mrb[31].mxu0  ;;  %v1001_v46 = vpop.f32.mrb[31].mxu1 }
 0x15d   : > { %1326 = vst [vmem:[%s2802_s12] sm:$0xff] %v1270_v41  ;;  %v1002_v49 = vadd.f32 %v1001_v46, %v657_v38  ;;  %v712_v35 = vadd.f32 %v2792_v21, %v2785_v19  ;;  %v717_v19 = vadd.f32 %v2792_v21, %v2796_v26 }
 0x15e   : > { %v1273_v50 = vmax.f32 %v1007_v31, 0.0 }
 0x15f   : > { %v1272_v53 = vmax.f32 %v1002_v49, 0.0  ;;  %v2809_v54 = vpop.f32.mrb[32].mxu0  ;;  %v1970_v57 = vpop.f32.mrb[32].mxu1 }
 0x160   : > { %1329 = vst [vmem:[%s2802_s12 + $0x18] sm:$0xff] %v1273_v50  ;;  %v1017_v58 = vadd.f32 %v1970_v57, %v672_v43  ;;  %v728_v61 = vpop.f32.mrb[33].mxu0  ;;  %v1011_v62 = vpop.f32.mrb[33].mxu1 }
 0x161   : > { %1328 = vst [vmem:[%s2802_s12 + $0x10] sm:$0xff] %v1272_v53  ;;  %v1012_v1 = vadd.f32 %v1011_v62, %v667_v39 }
 0x162   : > { %v1275_v51 = vmax.f32 %v1017_v58, 0.0  ;;  %v722_v58 = vadd.f32 %v2792_v21, %v2800_v42  ;;  %v727_v42 = vadd.f32 %v2792_v21, %v2809_v54 }
 0x163   : > { %v1274_v47 = vmax.f32 %v1012_v1, 0.0  ;;  %v731_v6 = vpop.f32.mrb[34].mxu0  ;;  %v1973_v9 = vpop.f32.mrb[34].mxu1 }
 0x164   : > { %1331 = vst [vmem:[%s2802_s12 + $0x28] sm:$0xff] %v1275_v51  ;;  %v1027_v10 = vadd.f32 %v1973_v9, %v682_v2  ;;  %v733_v13 = vpop.f32.mrb[35].mxu0  ;;  %v1021_v14 = vpop.f32.mrb[35].mxu1  ;;  %v732_v9 = vadd.f32 %v2792_v21, %v731_v6 }
 0x165   : > { %1330 = vst [vmem:[%s2802_s12 + $0x20] sm:$0xff] %v1274_v47  ;;  %v1022_v17 = vadd.f32 %v1021_v14, %v677_v5 }
 0x166   : > { %v1277_v22 = vmax.f32 %v1027_v10, 0.0 }
 0x167   : > { %v1276_v55 = vmax.f32 %v1022_v17, 0.0  ;;  %v736_v23 = vpop.f32.mrb[36].mxu0  ;;  %v1976_v24 = vpop.f32.mrb[36].mxu1 }
 0x168   : > { %1333 = vst [vmem:[%s2802_s12 + $0x38] sm:$0xff] %v1277_v22  ;;  %v1037_v25 = vadd.f32 %v1976_v24, %v692_v18  ;;  %v738_v27 = vpop.f32.mrb[37].mxu0  ;;  %v1031_v28 = vpop.f32.mrb[37].mxu1  ;;  %v737_v6 = vadd.f32 %v2792_v21, %v736_v23 }
 0x169   : > { %1332 = vst [vmem:[%s2802_s12 + $0x30] sm:$0xff] %v1276_v55  ;;  %v1032_v29 = vadd.f32 %v1031_v28, %v687_v59 }
 0x16a   : > { %v1279_v33 = vmax.f32 %v1037_v25, 0.0 }
 0x16b   : > { %v1278_v63 = vmax.f32 %v1032_v29, 0.0  ;;  %v741_v34 = vpop.f32.mrb[38].mxu0  ;;  %v1979_v37 = vpop.f32.mrb[38].mxu1 }
 0x16c   : > { %1335 = vst [vmem:[%s2802_s12 + $0x48] sm:$0xff] %v1279_v33  ;;  %v1047_v38 = vadd.f32 %v1979_v37, %v702_v30  ;;  %v743_v41 = vpop.f32.mrb[39].mxu0  ;;  %v1041_v45 = vpop.f32.mrb[39].mxu1  ;;  %v742_v55 = vadd.f32 %v2792_v21, %v741_v34 }
 0x16d   : > { %1334 = vst [vmem:[%s2802_s12 + $0x40] sm:$0xff] %v1278_v63  ;;  %v1042_v31 = vadd.f32 %v1041_v45, %v697_v3 }
 0x16e   : > { %v1281_v46 = vmax.f32 %v1047_v38, 0.0 }
 0x16f   : > { %v1280_v7 = vmax.f32 %v1042_v31, 0.0  ;;  %v746_v49 = vpop.f32.mrb[40].mxu0  ;;  %v1982_v43 = vpop.f32.mrb[40].mxu1 }
 0x170   : > { %1337 = vst [vmem:[%s2802_s12 + $0x58] sm:$0xff] %v1281_v46  ;;  %v1057_v50 = vadd.f32 %v1982_v43, %v712_v35  ;;  %v748_v39 = vpop.f32.mrb[41].mxu0  ;;  %v1051_v53 = vpop.f32.mrb[41].mxu1  ;;  %v747_v37 = vadd.f32 %v2792_v21, %v746_v49 }
 0x171   : > { %1336 = vst [vmem:[%s2802_s12 + $0x50] sm:$0xff] %v1280_v7  ;;  %v1052_v57 = vadd.f32 %v1051_v53, %v707_v11 }
 0x172   : > { %v1283_v61 = vmax.f32 %v1057_v50, 0.0 }
 0x173   : > { %v1282_v15 = vmax.f32 %v1052_v57, 0.0  ;;  %v751_v62 = vpop.f32.mrb[42].mxu0  ;;  %v1985_v1 = vpop.f32.mrb[42].mxu1 }
 0x174   : > { %1339 = vst [vmem:[%s2802_s12 + $0x68] sm:$0xff] %v1283_v61  ;;  %v1067_v2 = vadd.f32 %v1985_v1, %v722_v58  ;;  %v753_v51 = vpop.f32.mrb[43].mxu0  ;;  %v1061_v5 = vpop.f32.mrb[43].mxu1  ;;  %v752_v3 = vadd.f32 %v2792_v21, %v751_v62 }
 0x175   : > { %1338 = vst [vmem:[%s2802_s12 + $0x60] sm:$0xff] %v1282_v15  ;;  %v1062_v47 = vadd.f32 %v1061_v5, %v717_v19 }
 0x176   : > { %v1285_v10 = vmax.f32 %v1067_v2, 0.0 }
 0x177   : > { %v1284_v13 = vmax.f32 %v1062_v47, 0.0  ;;  %v756_v26 = vpop.f32.mrb[44].mxu0  ;;  %v1988_v14 = vpop.f32.mrb[44].mxu1 }
 0x178   : > { %1341 = vst [vmem:[%s2802_s12 + $0x78] sm:$0xff] %v1285_v10  ;;  %v1077_v17 = vadd.f32 %v1988_v14, %v732_v9  ;;  %v758_v18 = vpop.f32.mrb[45].mxu0  ;;  %v1071_v22 = vpop.f32.mrb[45].mxu1  ;;  %v757_v7 = vadd.f32 %v2792_v21, %v756_v26 }
 0x179   : > { %1340 = vst [vmem:[%s2802_s12 + $0x70] sm:$0xff] %v1284_v13  ;;  %v1072_v59 = vadd.f32 %v1071_v22, %v727_v42 }
 0x17a   : > { %v1287_v24 = vmax.f32 %v1077_v17, 0.0 }
 0x17b   : > { %v1286_v25 = vmax.f32 %v1072_v59, 0.0  ;;  %v761_v27 = vpop.f32.mrb[46].mxu0  ;;  %v1991_v54 = vpop.f32.mrb[46].mxu1 }
 0x17c   : > { %1343 = vst [vmem:[%s2802_s12 + $0x88] sm:$0xff] %v1287_v24  ;;  %v1087_v28 = vadd.f32 %v1991_v54, %v742_v55  ;;  %v763_v29 = vpop.f32.mrb[47].mxu0  ;;  %v1081_v30 = vpop.f32.mrb[47].mxu1  ;;  %v762_v46 = vadd.f32 %v2792_v21, %v761_v27 }
 0x17d   : > { %1342 = vst [vmem:[%s2802_s12 + $0x80] sm:$0xff] %v1286_v25  ;;  %v1082_v33 = vadd.f32 %v1081_v30, %v737_v6 }
 0x17e   : > { %v1289_v63 = vmax.f32 %v1087_v28, 0.0 }
 0x17f   : > { %v1288_v34 = vmax.f32 %v1082_v33, 0.0  ;;  %v766_v38 = vpop.f32.mrb[48].mxu0  ;;  %v1994_v23 = vpop.f32.mrb[48].mxu1 }
 0x180   : > { %1345 = vst [vmem:[%s2802_s12 + $0x98] sm:$0xff] %v1289_v63  ;;  %v1097_v41 = vadd.f32 %v1994_v23, %v752_v3  ;;  %v768_v45 = vpop.f32.mrb[49].mxu0  ;;  %v1091_v31 = vpop.f32.mrb[49].mxu1  ;;  %v767_v15 = vadd.f32 %v2792_v21, %v766_v38 }
 0x181   : > { %1344 = vst [vmem:[%s2802_s12 + $0x90] sm:$0xff] %v1288_v34  ;;  %v1092_v35 = vadd.f32 %v1091_v31, %v747_v37 }
 0x182   : > { %v1291_v11 = vmax.f32 %v1097_v41, 0.0 }
 0x183   : > { %v1290_v43 = vmax.f32 %v1092_v35, 0.0  ;;  %v771_v50 = vpop.f32.mrb[50].mxu0  ;;  %v1997_v49 = vpop.f32.mrb[50].mxu1 }
 0x184   : > { %1347 = vst [vmem:[%s2802_s12 + $0xa8] sm:$0xff] %v1291_v11  ;;  %v1107_v39 = vadd.f32 %v1997_v49, %v762_v46  ;;  %v773_v53 = vpop.f32.mrb[51].mxu0  ;;  %v1101_v57 = vpop.f32.mrb[51].mxu1  ;;  %v772_v61 = vadd.f32 %v2792_v21, %v771_v50 }
 0x185   : > { %1346 = vst [vmem:[%s2802_s12 + $0xa0] sm:$0xff] %v1290_v43  ;;  %v1102_v58 = vadd.f32 %v1101_v57, %v757_v7 }
 0x186   : > { %v1293_v19 = vmax.f32 %v1107_v39, 0.0 }
 0x187   : > { %v1292_v62 = vmax.f32 %v1102_v58, 0.0  ;;  %v776_v1 = vpop.f32.mrb[52].mxu0  ;;  %v2000_v2 = vpop.f32.mrb[52].mxu1 }
 0x188   : > { %1349 = vst [vmem:[%s2802_s12 + $0xb8] sm:$0xff] %v1293_v19  ;;  %v1117_v51 = vadd.f32 %v2000_v2, %v772_v61  ;;  %v778_v5 = vpop.f32.mrb[53].mxu0  ;;  %v1111_v47 = vpop.f32.mrb[53].mxu1  ;;  %v777_v42 = vadd.f32 %v2792_v21, %v776_v1 }
 0x189   : > { %1348 = vst [vmem:[%s2802_s12 + $0xb0] sm:$0xff] %v1292_v62  ;;  %v1112_v9 = vadd.f32 %v1111_v47, %v767_v15 }
 0x18a   : > { %v1295_v10 = vmax.f32 %v1117_v51, 0.0 }
 0x18b   : > { %v1294_v13 = vmax.f32 %v1112_v9, 0.0  ;;  %v781_v26 = vpop.f32.mrb[54].mxu0  ;;  %v2003_v14 = vpop.f32.mrb[54].mxu1 }
 0x18c   : > { %1351 = vst [vmem:[%s2802_s12 + $0xc8] sm:$0xff] %v1295_v10  ;;  %v782_v17 = vadd.f32 %v2792_v21, %v781_v26  ;;  %v783_v18 = vpop.f32.mrb[55].mxu0  ;;  %v1121_v22 = vpop.f32.mrb[55].mxu1 }
 0x18d   : > { %1350 = vst [vmem:[%s2802_s12 + $0xc0] sm:$0xff] %v1294_v13  ;;  %v1122_v59 = vadd.f32 %v1121_v22, %v777_v42 }
 0x18e   : > { %v1127_v55 = vadd.f32 %v2003_v14, %v782_v17 }
 0x18f   : > { %v1296_v24 = vmax.f32 %v1122_v59, 0.0  ;;  %v786_v6 = vpop.f32.mrb[56].mxu0  ;;  %v2006_v25 = vpop.f32.mrb[56].mxu1 }
 0x190   : > { %v1297_v27 = vmax.f32 %v1127_v55, 0.0  ;;  %v787_v54 = vadd.f32 %v2792_v21, %v786_v6  ;;  %v788_v28 = vpop.f32.mrb[57].mxu0  ;;  %v1131_v29 = vpop.f32.mrb[57].mxu1 }
 0x191   : > { %1352 = vst [vmem:[%s2802_s12 + $0xd0] sm:$0xff] %v1296_v24  ;;  %v862_v24 = vadd.f32 %v2792_v21, %v2744_v36 }
 0x192   : > { %1353 = vst [vmem:[%s2802_s12 + $0xd8] sm:$0xff] %v1297_v27  ;;  %v1132_v30 = vadd.f32 %v1131_v29, %v787_v54 }
 0x193   : > { %v791_v33 = vpop.f32.mrb[58].mxu0  ;;  %v2009_v3 = vpop.f32.mrb[58].mxu1 }
 0x194   : > { %v1298_v63 = vmax.f32 %v1132_v30, 0.0  ;;  %v792_v37 = vadd.f32 %v2792_v21, %v791_v33  ;;  %v793_v34 = vpop.f32.mrb[59].mxu0  ;;  %v1141_v38 = vpop.f32.mrb[59].mxu1 }
 0x196   : > { %1354 = vst [vmem:[%s2802_s12 + $0xe0] sm:$0xff] %v1298_v63  ;;  %v1137_v23 = vadd.f32 %v2006_v25, %v792_v37  ;;  %v857_v25 = vadd.f32 %v2792_v21, %v2742_v32  ;;  %v872_v37 = vadd.f32 %v2792_v21, %v2748_v44  ;;  %v867_v32 = vadd.f32 %v2792_v21, %v2746_v40 }
 0x197   : > { %v796_v41 = vpop.f32.mrb[60].mxu0  ;;  %v2012_v45 = vpop.f32.mrb[60].mxu1 }
 0x198   : > { %v1299_v31 = vmax.f32 %v1137_v23, 0.0  ;;  %v797_v35 = vadd.f32 %v2792_v21, %v796_v41  ;;  %v798_v46 = vpop.f32.mrb[61].mxu0  ;;  %v1151_v11 = vpop.f32.mrb[61].mxu1 }
 0x19a   : > { %1355 = vst [vmem:[%s2802_s12 + $0xe8] sm:$0xff] %v1299_v31  ;;  %v1142_v7 = vadd.f32 %v1141_v38, %v797_v35 }
 0x19b   : > { %v801_v43 = vpop.f32.mrb[62].mxu0  ;;  %v2015_v50 = vpop.f32.mrb[62].mxu1 }
 0x19c   : > { %v1300_v49 = vmax.f32 %v1142_v7, 0.0  ;;  %v802_v39 = vadd.f32 %v2792_v21, %v801_v43  ;;  %v803_v53 = vpop.f32.mrb[63].mxu0  ;;  %v1161_v57 = vpop.f32.mrb[63].mxu1  ;;  %v882_v7 = vadd.f32 %v2792_v21, %v2754_v52 }
 0x19e   : > { %1356 = vst [vmem:[%s2802_s12 + $0xf0] sm:$0xff] %v1300_v49  ;;  %v1147_v58 = vadd.f32 %v2009_v3, %v802_v39 }
 0x19f   : > { %v806_v61 = vpop.f32.mrb[64].mxu0  ;;  %v2877_v19 = vpop.f32.mrb[64].mxu1 }
 0x1a0   : > { %v1301_v15 = vmax.f32 %v1147_v58, 0.0  ;;  %v807_v62 = vadd.f32 %v2792_v21, %v806_v61  ;;  %v808_v1 = vpop.f32.mrb[65].mxu0  ;;  %v1171_v2 = vpop.f32.mrb[65].mxu1 }
 0x1a1   : > { %v892_v1 = vadd.f32 %v2792_v21, %v2762_v60 }
 0x1a2   : > { %1357 = vst [vmem:[%s2802_s12 + $0xf8] sm:$0xff] %v1301_v15  ;;  %v1152_v51 = vadd.f32 %v1151_v11, %v807_v62 }
 0x1a3   : > { %v811_v5 = vpop.f32.mrb[66].mxu0  ;;  %v2881_v47 = vpop.f32.mrb[66].mxu1 }
 0x1a4   : > { %v1302_v9 = vmax.f32 %v1152_v51, 0.0  ;;  %v812_v10 = vadd.f32 %v2792_v21, %v811_v5  ;;  %v813_v42 = vpop.f32.mrb[67].mxu0  ;;  %v2884_v13 = vpop.f32.mrb[67].mxu1  ;;  %v887_v51 = vadd.f32 %v2792_v21, %v2758_v56 }
 0x1a6   : > { %1358 = vst [vmem:[%s2802_s12 + $0x100] sm:$0xff] %v1302_v9  ;;  %v1157_v26 = vadd.f32 %v2012_v45, %v812_v10 }
 0x1a7   : > { %v816_v14 = vpop.f32.mrb[68].mxu0  ;;  %v2887_v17 = vpop.f32.mrb[68].mxu1 }
 0x1a8   : > { %v1303_v18 = vmax.f32 %v1157_v26, 0.0  ;;  %v817_v22 = vadd.f32 %v2792_v21, %v816_v14  ;;  %v818_v59 = vpop.f32.mrb[69].mxu0  ;;  %v2890_v55 = vpop.f32.mrb[69].mxu1 }
 0x1aa   : > { %1359 = vst [vmem:[%s2802_s12 + $0x108] sm:$0xff] %v1303_v18  ;;  %v1162_v6 = vadd.f32 %v1161_v57, %v817_v22 }
 0x1ab   : > { %v821_v27 = vpop.f32.mrb[70].mxu0  ;;  %v2027_v54 = vpop.f32.mrb[70].mxu1 }
 0x1ac   : > { %v1304_v28 = vmax.f32 %v1162_v6, 0.0  ;;  %v822_v29 = vadd.f32 %v2792_v21, %v821_v27  ;;  %v1207_v30 = vadd.f32 %v2027_v54, %v862_v24  ;;  %v823_v33 = vpop.f32.mrb[71].mxu0  ;;  %v1201_v3 = vpop.f32.mrb[71].mxu1  ;;  %v897_v24 = vadd.f32 %v2792_v21, %v2766_v0 }
 0x1ad   : > { %v1202_v63 = vadd.f32 %v1201_v3, %v857_v25 }
 0x1ae   : > { %1360 = vst [vmem:[%s2802_s12 + $0x110] sm:$0xff] %v1304_v28  ;;  %v1167_v36 = vadd.f32 %v2015_v50, %v822_v29  ;;  %v1313_v34 = vmax.f32 %v1207_v30, 0.0  ;;  %v877_v50 = vadd.f32 %v2792_v21, %v2752_v48 }
 0x1af   : > { %v1312_v38 = vmax.f32 %v1202_v63, 0.0  ;;  %v826_v23 = vpop.f32.mrb[72].mxu0  ;;  %v2030_v41 = vpop.f32.mrb[72].mxu1  ;;  %v907_v63 = vadd.f32 %v2792_v21, %v2774_v8 }
 0x1b0   : > { %v1305_v45 = vmax.f32 %v1167_v36, 0.0  ;;  %1369 = vst [vmem:[%s2802_s12 + $0x158] sm:$0xff] %v1313_v34  ;;  %v827_v31 = vadd.f32 %v2792_v21, %v826_v23  ;;  %v1217_v35 = vadd.f32 %v2030_v41, %v872_v37  ;;  %v828_v46 = vpop.f32.mrb[73].mxu0  ;;  %v1211_v11 = vpop.f32.mrb[73].mxu1 }
 0x1b1   : > { %1368 = vst [vmem:[%s2802_s12 + $0x150] sm:$0xff] %v1312_v38  ;;  %v1212_v44 = vadd.f32 %v1211_v11, %v867_v32 }
 0x1b2   : > { %1361 = vst [vmem:[%s2802_s12 + $0x118] sm:$0xff] %v1305_v45  ;;  %v1172_v40 = vadd.f32 %v1171_v2, %v827_v31  ;;  %v1315_v43 = vmax.f32 %v1217_v35, 0.0  ;;  %v917_v35 = vadd.f32 %v2792_v21, %v2782_v16 }
 0x1b3   : > { %v1314_v49 = vmax.f32 %v1212_v44, 0.0  ;;  %v831_v39 = vpop.f32.mrb[74].mxu0  ;;  %v2033_v53 = vpop.f32.mrb[74].mxu1 }
 0x1b4   : > { %v1306_v57 = vmax.f32 %v1172_v40, 0.0  ;;  %1371 = vst [vmem:[%s2802_s12 + $0x168] sm:$0xff] %v1315_v43  ;;  %v832_v58 = vadd.f32 %v2792_v21, %v831_v39  ;;  %v1227_v61 = vadd.f32 %v2033_v53, %v882_v7  ;;  %v833_v15 = vpop.f32.mrb[75].mxu0  ;;  %v1221_v62 = vpop.f32.mrb[75].mxu1 }
 0x1b5   : > { %1370 = vst [vmem:[%s2802_s12 + $0x160] sm:$0xff] %v1314_v49  ;;  %v1222_v52 = vadd.f32 %v1221_v62, %v877_v50 }
 0x1b6   : > { %1362 = vst [vmem:[%s2802_s12 + $0x120] sm:$0xff] %v1306_v57  ;;  %v1177_v48 = vadd.f32 %v2877_v19, %v832_v58  ;;  %v1317_v2 = vmax.f32 %v1227_v61, 0.0  ;;  %v902_v19 = vadd.f32 %v2792_v21, %v2770_v4 }
 0x1b7   : > { %v1316_v5 = vmax.f32 %v1222_v52, 0.0  ;;  %v836_v9 = vpop.f32.mrb[76].mxu0  ;;  %v2036_v10 = vpop.f32.mrb[76].mxu1 }
 0x1b8   : > { %v1307_v42 = vmax.f32 %v1177_v48, 0.0  ;;  %1373 = vst [vmem:[%s2802_s12 + $0x178] sm:$0xff] %v1317_v2  ;;  %v837_v26 = vadd.f32 %v2792_v21, %v836_v9  ;;  %v1237_v14 = vadd.f32 %v2036_v10, %v892_v1  ;;  %v838_v18 = vpop.f32.mrb[77].mxu0  ;;  %v1231_v22 = vpop.f32.mrb[77].mxu1 }
 0x1b9   : > { %1372 = vst [vmem:[%s2802_s12 + $0x170] sm:$0xff] %v1316_v5  ;;  %v1232_v60 = vadd.f32 %v1231_v22, %v887_v51 }
 0x1ba   : > { %1363 = vst [vmem:[%s2802_s12 + $0x128] sm:$0xff] %v1307_v42  ;;  %v1182_v56 = vadd.f32 %v2884_v13, %v837_v26  ;;  %v1319_v59 = vmax.f32 %v1237_v14, 0.0  ;;  %v912_v13 = vadd.f32 %v2792_v21, %v2778_v12 }
 0x1bb   : > { %v1318_v6 = vmax.f32 %v1232_v60, 0.0  ;;  %v841_v25 = vpop.f32.mrb[78].mxu0  ;;  %v2039_v27 = vpop.f32.mrb[78].mxu1 }
 0x1bc   : > { %v1308_v54 = vmax.f32 %v1182_v56, 0.0  ;;  %1375 = vst [vmem:[%s2802_s12 + $0x188] sm:$0xff] %v1319_v59  ;;  %v842_v28 = vadd.f32 %v2792_v21, %v841_v25  ;;  %v1247_v29 = vadd.f32 %v2039_v27, %v902_v19  ;;  %v843_v30 = vpop.f32.mrb[79].mxu0  ;;  %v1241_v33 = vpop.f32.mrb[79].mxu1 }
 0x1bd   : > { %1374 = vst [vmem:[%s2802_s12 + $0x180] sm:$0xff] %v1318_v6  ;;  %v1242_v4 = vadd.f32 %v1241_v33, %v897_v24 }
 0x1be   : > { %1364 = vst [vmem:[%s2802_s12 + $0x130] sm:$0xff] %v1308_v54  ;;  %v1187_v0 = vadd.f32 %v2881_v47, %v842_v28  ;;  %v1321_v3 = vmax.f32 %v1247_v29, 0.0  ;;  %v922_v47 = vadd.f32 %v2792_v21, %v2787_v20 }
 0x1bf   : > { %v1320_v37 = vmax.f32 %v1242_v4, 0.0  ;;  %v846_v36 = vpop.f32.mrb[80].mxu0  ;;  %v2042_v34 = vpop.f32.mrb[80].mxu1 }
 0x1c0   : > { %v1309_v32 = vmax.f32 %v1187_v0, 0.0  ;;  %1377 = vst [vmem:[%s2802_s12 + $0x198] sm:$0xff] %v1321_v3  ;;  %v847_v38 = vadd.f32 %v2792_v21, %v846_v36  ;;  %v1257_v23 = vadd.f32 %v2042_v34, %v912_v13  ;;  %v848_v41 = vpop.f32.mrb[81].mxu0  ;;  %v1251_v45 = vpop.f32.mrb[81].mxu1 }
 0x1c1   : > { %1376 = vst [vmem:[%s2802_s12 + $0x190] sm:$0xff] %v1320_v37  ;;  %v1252_v12 = vadd.f32 %v1251_v45, %v907_v63 }
 0x1c2   : > { %1365 = vst [vmem:[%s2802_s12 + $0x138] sm:$0xff] %v1309_v32  ;;  %v1192_v8 = vadd.f32 %v2890_v55, %v847_v38  ;;  %v1323_v31 = vmax.f32 %v1257_v23, 0.0 }
 0x1c3   : > { %v1322_v46 = vmax.f32 %v1252_v12, 0.0  ;;  %v851_v11 = vpop.f32.mrb[82].mxu0  ;;  %v2045_v44 = vpop.f32.mrb[82].mxu1 }
 0x1c4   : > { %v1310_v7 = vmax.f32 %v1192_v8, 0.0  ;;  %1379 = vst [vmem:[%s2802_s12 + $0x1a8] sm:$0xff] %v1323_v31  ;;  %v852_v40 = vadd.f32 %v2792_v21, %v851_v11  ;;  %v1267_v43 = vadd.f32 %v2045_v44, %v922_v47  ;;  %v853_v20 = vpop.f32.mrb[83].mxu0  ;;  %v1261_v50 = vpop.f32.mrb[83].mxu1  ;;  %1388 = sbr.rel (!%p2364_p4) target bundleno = 539 (0x21b), region = 36 }
 0x1c5   : > { %1378 = vst [vmem:[%s2802_s12 + $0x1a0] sm:$0xff] %v1322_v46  ;;  %v1262_v49 = vadd.f32 %v1261_v50, %v917_v35 }
 0x1c6   : > { %1366 = vst [vmem:[%s2802_s12 + $0x140] sm:$0xff] %v1310_v7  ;;  %v1197_v55 = vadd.f32 %v2887_v17, %v852_v40  ;;  %v1325_v39 = vmax.f32 %v1267_v43, 0.0 }
 0x1c7   : > { %v1324_v16 = vmax.f32 %v1262_v49, 0.0 }
 0x1c8   : > { %v1311_v53 = vmax.f32 %v1197_v55, 0.0  ;;  %1381 = vst [vmem:[%s2802_s12 + $0x1b8] sm:$0xff] %v1325_v39 }
 0x1c9   : > { %1380 = vst [vmem:[%s2802_s12 + $0x1b0] sm:$0xff] %v1324_v16 }
 0x1ca   : > { %1367 = vst [vmem:[%s2802_s12 + $0x148] sm:$0xff] %v1311_v53 }
 0x1cb   : > { %s3154_s24 = smov (!%p1391_p8, %s1390_s24), 56 }
 0x1cc   : > { %s1881_s30 = sshll.u32 %s3154_s24, 7 }
 0x1cd   : > { %p1884_p9 = scmp.eq.s32.totalorder %s1881_s30, 0 }
 0x1ce   : > { %2226 = sdivrem.u32 (!%p1884_p9), %s3154_s24, 56 }
 0x1cf   : > { %1399 = sbr.rel (%p1884_p9) target bundleno = 539 (0x21b), region = 40 }
 0x1d7   : > { %s2968_s20 = spop.drf %2226 }
 0x1d8   : > { %p1885_p10 = scmp.le.s32.totalorder %s2968_s20, 0 }
 0x1d9   : > { %s3145_s15 = smov (!%p1885_p10), %s2962_s29  ;;  %s3146_s27 = smov (!%p1885_p10), %s2802_s12 }
 0x1da   : > { %1775 = sbr.rel (%p1885_p10) target bundleno = 510 (0x1fe), region = 116  ;;  %s2977_s4 = smov (!%p1885_p10), 0  }
 0x1db   : > { %s2979_s5 = smov (!%p1885_p10), 0  }
 0x1e1 LB: >> { %v1573_v21 = vld [vmem:[%s2292_s27] sm:$0xff]  ;;  %v1575_v17 = vld [vmem:[%s2292_s27 + $0x8] sm:$0xff]  ;;  %v1577_v57 = vld [vmem:[%s2292_s27 + $0x10] sm:$0xff]  ;;  %s1685_s6 = sadd.s32 1, %s2296_s4  ;;  %s1567_s5 = sadd.s32 1, %s2300_s5   ;;  %s2300_s5 = sphi %s2979_s5, %s1567_s5   ;;  %s2296_s4 = sphi %s2977_s4, %s3149_s4   ;;  %s2292_s27 = sphi %s3146_s27, %s3148_s27   ;;  %s2288_s15 = sphi %s3145_s15, %s3147_s15  }
 0x1e2   : >> { %1574 = vst [vmem:[%s2288_s15] sm:$0xff] %v1573_v21  ;;  %1576 = vst [vmem:[%s2288_s15 + $0x8] sm:$0xff] %v1575_v17  ;;  %v1579_v58 = vld [vmem:[%s2292_s27 + $0x18] sm:$0xff]  ;;  %v1581_v61 = vld [vmem:[%s2292_s27 + $0x20] sm:$0xff]  ;;  %p1686_p11 = scmp.ge.s32.totalorder %s1685_s6, %s2968_s20  ;;  %p1566_p12 = scmp.ge.s32.totalorder %s1567_s5, %s2968_s20 }
 0x1e3   : >> { %1578 = vst [vmem:[%s2288_s15 + $0x10] sm:$0xff] %v1577_v57  ;;  %v1583_v15 = vld [vmem:[%s2292_s27 + $0x28] sm:$0xff]  ;;  %1580 = vst [vmem:[%s2288_s15 + $0x18] sm:$0xff] %v1579_v58  ;;  %v1585_v62 = vld [vmem:[%s2292_s27 + $0x30] sm:$0xff] }
 0x1e4   : >> { %1582 = vst [vmem:[%s2288_s15 + $0x20] sm:$0xff] %v1581_v61  ;;  %1584 = vst [vmem:[%s2288_s15 + $0x28] sm:$0xff] %v1583_v15  ;;  %v1587_v52 = vld [vmem:[%s2292_s27 + $0x38] sm:$0xff]  ;;  %v1589_v1 = vld [vmem:[%s2292_s27 + $0x40] sm:$0xff]  ;;  %s3156_s6 = smov (%p1686_p11, %s1685_s6), 0 }
 0x1e5   : >> { %1586 = vst [vmem:[%s2288_s15 + $0x30] sm:$0xff] %v1585_v62  ;;  %1588 = vst [vmem:[%s2288_s15 + $0x38] sm:$0xff] %v1587_v52  ;;  %v1591_v48 = vld [vmem:[%s2292_s27 + $0x48] sm:$0xff]  ;;  %v1593_v2 = vld [vmem:[%s2292_s27 + $0x50] sm:$0xff]  ;;  %s1688_s7 = smul.u32 448, %s3156_s6  ;;  %s3149_s4 = smov %s3156_s6 }
 0x1e6   : >> { %1590 = vst [vmem:[%s2288_s15 + $0x40] sm:$0xff] %v1589_v1  ;;  %v1595_v51 = vld [vmem:[%s2292_s27 + $0x58] sm:$0xff]  ;;  %1592 = vst [vmem:[%s2288_s15 + $0x48] sm:$0xff] %v1591_v48  ;;  %v1597_v5 = vld [vmem:[%s2292_s27 + $0x60] sm:$0xff] }
 0x1e7   : >> { %1594 = vst [vmem:[%s2288_s15 + $0x50] sm:$0xff] %v1593_v2  ;;  %1596 = vst [vmem:[%s2288_s15 + $0x58] sm:$0xff] %v1595_v51  ;;  %v1599_v9 = vld [vmem:[%s2292_s27 + $0x68] sm:$0xff]  ;;  %v1601_v10 = vld [vmem:[%s2292_s27 + $0x70] sm:$0xff]  ;;  %s3041_s8 = scalar_lea.vmem %s2802_s12, %s1688_s7 [#allocation2]   ;;  %s3044_s9 = scalar_lea.vmem %s2962_s29, %s1688_s7  }
 0x1e8   : >> { %1598 = vst [vmem:[%s2288_s15 + $0x60] sm:$0xff] %v1597_v5  ;;  %1600 = vst [vmem:[%s2288_s15 + $0x68] sm:$0xff] %v1599_v9  ;;  %v1603_v42 = vld [vmem:[%s2292_s27 + $0x78] sm:$0xff]  ;;  %v1605_v26 = vld [vmem:[%s2292_s27 + $0x80] sm:$0xff] }
 0x1e9   : >> { %1602 = vst [vmem:[%s2288_s15 + $0x70] sm:$0xff] %v1601_v10  ;;  %v1607_v14 = vld [vmem:[%s2292_s27 + $0x88] sm:$0xff]  ;;  %1604 = vst [vmem:[%s2288_s15 + $0x78] sm:$0xff] %v1603_v42  ;;  %v1609_v18 = vld [vmem:[%s2292_s27 + $0x90] sm:$0xff] }
 0x1ea   : >> { %1606 = vst [vmem:[%s2288_s15 + $0x80] sm:$0xff] %v1605_v26  ;;  %1608 = vst [vmem:[%s2288_s15 + $0x88] sm:$0xff] %v1607_v14  ;;  %v1611_v22 = vld [vmem:[%s2292_s27 + $0x98] sm:$0xff]  ;;  %v1613_v60 = vld [vmem:[%s2292_s27 + $0xa0] sm:$0xff] }
 0x1eb   : >> { %1610 = vst [vmem:[%s2288_s15 + $0x90] sm:$0xff] %v1609_v18  ;;  %1612 = vst [vmem:[%s2288_s15 + $0x98] sm:$0xff] %v1611_v22  ;;  %v1615_v19 = vld [vmem:[%s2292_s27 + $0xa8] sm:$0xff]  ;;  %v1617_v56 = vld [vmem:[%s2292_s27 + $0xb0] sm:$0xff] }
 0x1ec   : >> { %1614 = vst [vmem:[%s2288_s15 + $0xa0] sm:$0xff] %v1613_v60  ;;  %v1619_v59 = vld [vmem:[%s2292_s27 + $0xb8] sm:$0xff]  ;;  %1616 = vst [vmem:[%s2288_s15 + $0xa8] sm:$0xff] %v1615_v19  ;;  %v1621_v24 = vld [vmem:[%s2292_s27 + $0xc0] sm:$0xff] }
 0x1ed   : >> { %1618 = vst [vmem:[%s2288_s15 + $0xb0] sm:$0xff] %v1617_v56  ;;  %1620 = vst [vmem:[%s2288_s15 + $0xb8] sm:$0xff] %v1619_v59  ;;  %v1623_v6 = vld [vmem:[%s2292_s27 + $0xc8] sm:$0xff]  ;;  %v1625_v25 = vld [vmem:[%s2292_s27 + $0xd0] sm:$0xff] }
 0x1ee   : >> { %1622 = vst [vmem:[%s2288_s15 + $0xc0] sm:$0xff] %v1621_v24  ;;  %1624 = vst [vmem:[%s2288_s15 + $0xc8] sm:$0xff] %v1623_v6  ;;  %v1627_v27 = vld [vmem:[%s2292_s27 + $0xd8] sm:$0xff]  ;;  %v1629_v54 = vld [vmem:[%s2292_s27 + $0xe0] sm:$0xff] }
 0x1ef   : >> { %1626 = vst [vmem:[%s2288_s15 + $0xd0] sm:$0xff] %v1625_v25  ;;  %v1631_v28 = vld [vmem:[%s2292_s27 + $0xe8] sm:$0xff]  ;;  %1628 = vst [vmem:[%s2288_s15 + $0xd8] sm:$0xff] %v1627_v27  ;;  %v1633_v29 = vld [vmem:[%s2292_s27 + $0xf0] sm:$0xff] }
 0x1f0   : >> { %1630 = vst [vmem:[%s2288_s15 + $0xe0] sm:$0xff] %v1629_v54  ;;  %1632 = vst [vmem:[%s2288_s15 + $0xe8] sm:$0xff] %v1631_v28  ;;  %v1635_v30 = vld [vmem:[%s2292_s27 + $0xf8] sm:$0xff]  ;;  %v1637_v33 = vld [vmem:[%s2292_s27 + $0x100] sm:$0xff] }
 0x1f1   : >> { %1634 = vst [vmem:[%s2288_s15 + $0xf0] sm:$0xff] %v1633_v29  ;;  %1636 = vst [vmem:[%s2288_s15 + $0xf8] sm:$0xff] %v1635_v30  ;;  %v1639_v4 = vld [vmem:[%s2292_s27 + $0x108] sm:$0xff]  ;;  %v1641_v13 = vld [vmem:[%s2292_s27 + $0x110] sm:$0xff] }
 0x1f2   : >> { %1638 = vst [vmem:[%s2288_s15 + $0x100] sm:$0xff] %v1637_v33  ;;  %v1643_v0 = vld [vmem:[%s2292_s27 + $0x118] sm:$0xff]  ;;  %1640 = vst [vmem:[%s2288_s15 + $0x108] sm:$0xff] %v1639_v4  ;;  %v1645_v3 = vld [vmem:[%s2292_s27 + $0x120] sm:$0xff] }
 0x1f3   : >> { %1642 = vst [vmem:[%s2288_s15 + $0x110] sm:$0xff] %v1641_v13  ;;  %1644 = vst [vmem:[%s2288_s15 + $0x118] sm:$0xff] %v1643_v0  ;;  %v1647_v63 = vld [vmem:[%s2292_s27 + $0x128] sm:$0xff]  ;;  %v1649_v37 = vld [vmem:[%s2292_s27 + $0x130] sm:$0xff] }
 0x1f4   : >> { %1646 = vst [vmem:[%s2288_s15 + $0x120] sm:$0xff] %v1645_v3  ;;  %1648 = vst [vmem:[%s2288_s15 + $0x128] sm:$0xff] %v1647_v63  ;;  %v1651_v36 = vld [vmem:[%s2292_s27 + $0x138] sm:$0xff]  ;;  %v1653_v34 = vld [vmem:[%s2292_s27 + $0x140] sm:$0xff] }
 0x1f5   : >> { %1650 = vst [vmem:[%s2288_s15 + $0x130] sm:$0xff] %v1649_v37  ;;  %v1655_v32 = vld [vmem:[%s2292_s27 + $0x148] sm:$0xff]  ;;  %1652 = vst [vmem:[%s2288_s15 + $0x138] sm:$0xff] %v1651_v36  ;;  %v1657_v38 = vld [vmem:[%s2292_s27 + $0x150] sm:$0xff] }
 0x1f6   : >> { %1654 = vst [vmem:[%s2288_s15 + $0x140] sm:$0xff] %v1653_v34  ;;  %1656 = vst [vmem:[%s2288_s15 + $0x148] sm:$0xff] %v1655_v32  ;;  %v1659_v23 = vld [vmem:[%s2292_s27 + $0x158] sm:$0xff]  ;;  %v1661_v41 = vld [vmem:[%s2292_s27 + $0x160] sm:$0xff] }
 0x1f7   : >> { %1658 = vst [vmem:[%s2288_s15 + $0x150] sm:$0xff] %v1657_v38  ;;  %1660 = vst [vmem:[%s2288_s15 + $0x158] sm:$0xff] %v1659_v23  ;;  %v1663_v45 = vld [vmem:[%s2292_s27 + $0x168] sm:$0xff]  ;;  %v1665_v12 = vld [vmem:[%s2292_s27 + $0x170] sm:$0xff]  ;;  %1569 = sbr.rel (!%p1566_p12) target bundleno = 481 (0x1e1), region = 122 }
 0x1f8   : >> { %1662 = vst [vmem:[%s2288_s15 + $0x160] sm:$0xff] %v1661_v41  ;;  %v1667_v47 = vld [vmem:[%s2292_s27 + $0x178] sm:$0xff]  ;;  %1664 = vst [vmem:[%s2288_s15 + $0x168] sm:$0xff] %v1663_v45  ;;  %v1669_v8 = vld [vmem:[%s2292_s27 + $0x180] sm:$0xff] }
 0x1f9   : >> { %1666 = vst [vmem:[%s2288_s15 + $0x170] sm:$0xff] %v1665_v12  ;;  %1668 = vst [vmem:[%s2288_s15 + $0x178] sm:$0xff] %v1667_v47  ;;  %v1671_v31 = vld [vmem:[%s2292_s27 + $0x188] sm:$0xff]  ;;  %v1673_v35 = vld [vmem:[%s2292_s27 + $0x190] sm:$0xff] }
 0x1fa   : >> { %1670 = vst [vmem:[%s2288_s15 + $0x180] sm:$0xff] %v1669_v8  ;;  %1672 = vst [vmem:[%s2288_s15 + $0x188] sm:$0xff] %v1671_v31  ;;  %v1675_v46 = vld [vmem:[%s2292_s27 + $0x198] sm:$0xff]  ;;  %v1677_v11 = vld [vmem:[%s2292_s27 + $0x1a0] sm:$0xff] }
 0x1fb   : >> { %1674 = vst [vmem:[%s2288_s15 + $0x190] sm:$0xff] %v1673_v35  ;;  %v1679_v44 = vld [vmem:[%s2292_s27 + $0x1a8] sm:$0xff]  ;;  %1676 = vst [vmem:[%s2288_s15 + $0x198] sm:$0xff] %v1675_v46  ;;  %v1681_v7 = vld [vmem:[%s2292_s27 + $0x1b0] sm:$0xff] }
 0x1fc   : >> { %1678 = vst [vmem:[%s2288_s15 + $0x1a0] sm:$0xff] %v1677_v11  ;;  %1680 = vst [vmem:[%s2288_s15 + $0x1a8] sm:$0xff] %v1679_v44  ;;  %v1683_v40 = vld [vmem:[%s2292_s27 + $0x1b8] sm:$0xff]  ;;  %s3148_s27 = smov %s3041_s8 }
 0x1fd   : >> { %1682 = vst [vmem:[%s2288_s15 + $0x1b0] sm:$0xff] %v1681_v7  ;;  %1684 = vst [vmem:[%s2288_s15 + $0x1b8] sm:$0xff] %v1683_v40  ;;  %s3147_s15 = smov %s3044_s9 }
 0x1fe PF: > { %2228 = sdivrem.u32 %s3154_s24, 56 }
 0x1ff   : > { %s1886_s10 = smul.u32 448, %s2968_s20 }
 0x201   : > { %s1696_s11 = scalar_lea.vmem %s2802_s12, %s1886_s10 [#allocation2]   ;;  %s1698_s14 = scalar_lea.vmem %s2962_s29, %s1886_s10  }
 0x207   : > { %s2229_s17 = spop.drf %2228 }
 0x208   : > { %p1888_p13 = scmp.le.s32.totalorder %s2229_s17, 0 }
 0x209   : > { %s2302_s21 = smov (!%p1888_p13), %s1698_s14   ;;  %s2306_s18 = smov (!%p1888_p13), %s1696_s11  }
 0x20a   : > { %1789 = sbr.rel (%p1888_p13) target bundleno = 539 (0x21b), region = 127  ;;  %s2310_s22 = smov (!%p1888_p13), 0  }
 0x20b   : > { %s2314_s23 = smov (!%p1888_p13), 0  }
 0x211 LB: >> { %v1708_v43 = vld [vmem:[%s2308_s18] sm:$0xff]  ;;  %s1710_s25 = sadd.s32 1, %s2312_s22  ;;  %s1702_s23 = sadd.s32 1, %s2316_s23   ;;  %s2316_s23 = sphi %s2314_s23, %s1702_s23   ;;  %s2312_s22 = sphi %s2310_s22, %s2311_s22   ;;  %s2308_s18 = sphi %s2306_s18, %s1715_s18   ;;  %s2304_s21 = sphi %s2302_s21, %s1716_s21  }
 0x212   : >> { %1709 = vst [vmem:[%s2304_s21] sm:$0xff] %v1708_v43  ;;  %p1711_p0 = scmp.ge.s32.totalorder %s1710_s25, %s2229_s17  ;;  %p1701_p1 = scmp.ge.s32.totalorder %s1702_s23, %s2229_s17 }
 0x214   : >> { %s3158_s25 = smov (%p1711_p0, %s1710_s25), 0  ;;  %1704 = sbr.rel (!%p1701_p1) target bundleno = 529 (0x211), region = 133 }
 0x215   : >> { %s1889_s12 = sshll.u32 %s3158_s25, 3  ;;  %s2311_s22 = smov %s3158_s25  }
 0x216   : >> { %s1715_s18 = scalar_lea.vmem %s1696_s11, %s1889_s12 [#allocation2]   ;;  %s1716_s21 = scalar_lea.vmem %s1698_s14, %s1889_s12  }
 0x21b PF: > { %p10_p2 = scmp.ge.s32.totalorder %s2354_s16, 4   ;;  %s3150_s12 = smov %s2280_s13 }
 0x21c   : > { %s3151_s13 = smov %s2362_s19  ;;  %s3152_s14 = smov %s2354_s16 }
 0x21d   :  { %12 = sbr.rel (!%p10_p2) target bundleno = 2 (0x2), region = 144 }

// kernel: ppo_forward.7
= control target key start
LH: loop header
LB: loop body
LE: loop exit
PB: predicated region body
PF: predicated region fallthrough
CT: control target
= control target key end

     0   :  { %s1366_s12 = smov 0   ;;  %s1368_s13 = smov 0   ;;  %s1729_s0 = inlined_call_operand.vmem [shape: f32[242,288], index: 0, kind: input, shape index: {}]   ;;  %s1730_s1 = inlined_call_operand.vmem [shape: f32[288,128], index: 1, kind: input, shape index: {}]   ;;  %s1731_s2 = inlined_call_operand.vmem [shape: f32[1,128], index: 2, kind: input, shape index: {}]   ;;  %s1732_s3 = inlined_call_operand.vmem [shape: f32[242,128], index: 3, kind: output, shape index: {}]  }
   0x1   :  { %s1370_s14 = smov 0  }
   0x2 LB: > { %s1379_s15 = sadd.s32 4294967295, %s1312_s14   ;;  %s1381_s16 = sadd.s32 1, %s1312_s14   ;;  %s1312_s14 = sphi %s1370_s14, %s1739_s14   ;;  %s1308_s13 = sphi %s1368_s13, %s1738_s13   ;;  %s1304_s12 = sphi %s1366_s12, %s1737_s12  }
   0x3   : > { %s85_s17 = ssub.s32 %s1312_s14, %s1381_s16  ;;  %s88_s18 = sadd.s32 1, %s1308_s13 }
   0x4   : > { %p86_p0 = scmp.eq.s32.totalorder %s85_s17, 0  ;;  %p98_p1 = scmp.ne.s32.totalorder %s1308_s13, %s1304_s12 }
   0x5   : > { %p99_p2 = scmp.eq.s32.totalorder %s1379_s15, 1  ;;  %p940_p3 = scmp.ge.s32.totalorder %s1312_s14, 1 }
   0x6   : > { %s1389_s19 = scalar_select %p86_p0, %s1308_s13, %s88_s18  }
   0x7   : > { %p1391_p4 = por %p99_p2, %p98_p1  ;;  %p149_p5 = scmp.lt.s32.totalorder %s1312_s14, 3 }
   0x9   : > { %p150_p6 = pnand %p940_p3, %p149_p5 }
   0xa   : > { %v264_v0 = vld [vmem:[%s1730_s1 + $0x80] sm:$0xff] (!%p150_p6)  ;;  %v265_v1 = vld [vmem:[%s1730_s1 + $0x88] sm:$0xff] (!%p150_p6)  ;;  %s1405_s27 = sshll.u32 (!%p150_p6), %s1379_s15, 4  ;;  %v266_v5 = vld [vmem:[%s1730_s1 + $0x90] sm:$0xff] (!%p150_p6)  ;;  %vm291_vm0 = vcmask (!%p150_p6), 261120  }
   0xb   : > { %153 = sbr.rel (%p150_p6) target bundleno = 360 (0x168), region = 32  ;;  %v248_v2 = vld [vmem:[%s1730_s1] sm:$0xff] (!%p150_p6)  ;;  %v1113_v3 = vpack.c.bf16 (!%p150_p6), %v265_v1, %v264_v0  ;;  %v249_v4 = vld [vmem:[%s1730_s1 + $0x8] sm:$0xff] (!%p150_p6)  ;;  %v267_v6 = vld [vmem:[%s1730_s1 + $0x98] sm:$0xff] (!%p150_p6)  ;;  %p184_p7 = scmp.lt.s32.totalorder (!%p150_p6), %s1405_s27, 30 }
   0xc   : > { %v1115_v7 = vpack.c.bf16 (!%p150_p6), %v249_v4, %v248_v2  ;;  %v1117_v8 = vpack.c.bf16 (!%p150_p6), %v267_v6, %v266_v5  ;;  %v250_v9 = vld [vmem:[%s1730_s1 + $0x10] sm:$0xff] (!%p150_p6)  ;;  %v251_v10 = vld [vmem:[%s1730_s1 + $0x18] sm:$0xff] (!%p150_p6)  ;;  %v268_v11 = vld [vmem:[%s1730_s1 + $0xa0] sm:$0xff] (!%p150_p6) }
   0xd   : > { %1114 = vmatprep.subr.bf16.mxu0 (!%p150_p6), %v1113_v3  ;;  %1153 = vmatprep.subr.bf16.mxu1 (!%p150_p6), %v1113_v3  ;;  %v269_v12 = vld [vmem:[%s1730_s1 + $0xa8] sm:$0xff] (!%p150_p6)  ;;  %v1119_v13 = vpack.c.bf16 (!%p150_p6), %v251_v10, %v250_v9  ;;  %v252_v15 = vld [vmem:[%s1730_s1 + $0x20] sm:$0xff] (!%p150_p6)  ;;  %v270_v17 = vld [vmem:[%s1730_s1 + $0xb0] sm:$0xff] (!%p150_p6) }
   0xe   : > { %1116 = vmatpush3.bf16.msra.mxu0 (!%p150_p6), %v1115_v7  ;;  %1161 = vmatpush3.bf16.msra.mxu1 (!%p150_p6), %v1115_v7  ;;  %v1121_v14 = vpack.c.bf16 (!%p150_p6), %v269_v12, %v268_v11  ;;  %v253_v16 = vld [vmem:[%s1730_s1 + $0x28] sm:$0xff] (!%p150_p6)  ;;  %v271_v18 = vld [vmem:[%s1730_s1 + $0xb8] sm:$0xff] (!%p150_p6)  ;;  %v254_v21 = vld [vmem:[%s1730_s1 + $0x30] sm:$0xff] (!%p150_p6) }
   0xf   : > { %1118 = vmatprep.subr.bf16.mxu0 (!%p150_p6), %v1117_v8  ;;  %1154 = vmatprep.subr.bf16.mxu1 (!%p150_p6), %v1117_v8  ;;  %v1123_v19 = vpack.c.bf16 (!%p150_p6), %v253_v16, %v252_v15  ;;  %v1125_v20 = vpack.c.bf16 (!%p150_p6), %v271_v18, %v270_v17  ;;  %v255_v22 = vld [vmem:[%s1730_s1 + $0x38] sm:$0xff] (!%p150_p6)  ;;  %v272_v23 = vld [vmem:[%s1730_s1 + $0xc0] sm:$0xff] (!%p150_p6)  ;;  %v273_v24 = vld [vmem:[%s1730_s1 + $0xc8] sm:$0xff] (!%p150_p6) }
  0x10   : > { %v1127_v27 = vpack.c.bf16 (!%p150_p6), %v255_v22, %v254_v21  ;;  %v1129_v28 = vpack.c.bf16 (!%p150_p6), %v273_v24, %v272_v23  ;;  %v256_v29 = vld [vmem:[%s1730_s1 + $0x40] sm:$0xff] (!%p150_p6)  ;;  %v257_v30 = vld [vmem:[%s1730_s1 + $0x48] sm:$0xff] (!%p150_p6)  ;;  %v274_v31 = vld [vmem:[%s1730_s1 + $0xd0] sm:$0xff] (!%p150_p6) }
  0x11   : > { %v275_v32 = vld [vmem:[%s1730_s1 + $0xd8] sm:$0xff] (!%p150_p6)  ;;  %v1131_v33 = vpack.c.bf16 (!%p150_p6), %v257_v30, %v256_v29  ;;  %v258_v35 = vld [vmem:[%s1730_s1 + $0x50] sm:$0xff] (!%p150_p6)  ;;  %v276_v37 = vld [vmem:[%s1730_s1 + $0xe0] sm:$0xff] (!%p150_p6) }
  0x12   : > { %s185_s21 = scalar_select %p184_p7, %s1405_s27, 30  ;;  %1120 = vmatpush3.bf16.msra.mxu0 %v1119_v13  ;;  %1162 = vmatpush3.bf16.msra.mxu1 %v1119_v13  ;;  %v1133_v34 = vpack.c.bf16 %v275_v32, %v274_v31  ;;  %v259_v36 = vld [vmem:[%s1730_s1 + $0x58] sm:$0xff]  ;;  %v277_v38 = vld [vmem:[%s1730_s1 + $0xe8] sm:$0xff]  ;;  %v260_v41 = vld [vmem:[%s1730_s1 + $0x60] sm:$0xff] }
  0x13   : > { %1122 = vmatprep.subr.bf16.mxu0 %v1121_v14  ;;  %1155 = vmatprep.subr.bf16.mxu1 %v1121_v14  ;;  %v1135_v39 = vpack.c.bf16 %v259_v36, %v258_v35  ;;  %v1137_v40 = vpack.c.bf16 %v277_v38, %v276_v37  ;;  %v261_v42 = vld [vmem:[%s1730_s1 + $0x68] sm:$0xff]  ;;  %v278_v43 = vld [vmem:[%s1730_s1 + $0xf0] sm:$0xff]  ;;  %v279_v44 = vld [vmem:[%s1730_s1 + $0xf8] sm:$0xff]  ;;  %s670_s23 = ssub.s32 (%p1391_p4), 31, %s1405_s27  ;;  %s978_s24 = sshll.u32 (%p1391_p4), %s1379_s15, 7 }
  0x14   : > { %s1169_s26 = smul.u32 24, %s185_s21  ;;  %v1139_v45 = vpack.c.bf16 %v261_v42, %v260_v41  ;;  %v1141_v46 = vpack.c.bf16 %v279_v44, %v278_v43  ;;  %v262_v47 = vld [vmem:[%s1730_s1 + $0x70] sm:$0xff]  ;;  %v263_v48 = vld [vmem:[%s1730_s1 + $0x78] sm:$0xff]  ;;  %v280_v49 = vld [vmem:[%s1730_s1 + $0x100] sm:$0xff]  ;;  %p671_p8 = scmp.lt.s32.totalorder (%p1391_p4), %s670_s23, 16 }
  0x15   : > { %v281_v50 = vld [vmem:[%s1730_s1 + $0x108] sm:$0xff]  ;;  %v1143_v51 = vpack.c.bf16 %v263_v48, %v262_v47  ;;  %v282_v53 = vld [vmem:[%s1730_s1 + $0x110] sm:$0xff]  ;;  %v283_v54 = vld [vmem:[%s1730_s1 + $0x118] sm:$0xff]  ;;  %s1636_s28 = scalar_lea.vmem (%p1391_p4), %s1732_s3, %s978_s24  }
  0x16   : > { %s1445_s7 = scalar_lea.vmem %s1729_s0, %s1169_s26  ;;  %1124 = vmatpush3.bf16.msra.mxu0 %v1123_v19  ;;  %1163 = vmatpush3.bf16.msra.mxu1 %v1123_v19  ;;  %v1145_v52 = vpack.c.bf16 %v281_v50, %v280_v49  ;;  %v1149_v59 = vpack.c.bf16 %v283_v54, %v282_v53 }
  0x17   : > { %v201_v25 = vld [vmem:[%s1445_s7 + $0x8] sm:$0xff]  ;;  %1126 = vmatprep.subr.bf16.mxu0 %v1125_v20  ;;  %1156 = vmatprep.subr.bf16.mxu1 %v1125_v20  ;;  %v200_v55 = vld [vmem:[%s1445_s7] sm:$0xff]  ;;  %v203_v60 = vld [vmem:[%s1445_s7 + $0x18] sm:$0xff] }
  0x18   : > { %404 = vmatprep.mubr.f32.mxu0 %v201_v25  ;;  %v237_v26 = vld [vmem:[%s1445_s7 + $0x128] sm:$0xff]  ;;  %v236_v56 = vld [vmem:[%s1445_s7 + $0x120] sm:$0xff]  ;;  %v239_v61 = vld [vmem:[%s1445_s7 + $0x138] sm:$0xff] }
  0x19   : > { %464 = vmatprep.mubr.f32.mxu1 %v237_v26  ;;  %v204_v57 = vld [vmem:[%s1445_s7 + $0x20] sm:$0xff]  ;;  %v207_v62 = vld [vmem:[%s1445_s7 + $0x38] sm:$0xff]  ;;  %v206_v0 = vld [vmem:[%s1445_s7 + $0x30] sm:$0xff] }
  0x1a   : > { %1128 = vmatpush3.bf16.msra.mxu0 %v1127_v27  ;;  %1164 = vmatpush3.bf16.msra.mxu1 %v1127_v27  ;;  %v240_v58 = vld [vmem:[%s1445_s7 + $0x140] sm:$0xff]  ;;  %v243_v63 = vld [vmem:[%s1445_s7 + $0x158] sm:$0xff]  ;;  %v242_v1 = vld [vmem:[%s1445_s7 + $0x150] sm:$0xff] }
  0x1b   : > { %1130 = vmatprep.subr.bf16.mxu0 %v1129_v28  ;;  %1157 = vmatprep.subr.bf16.mxu1 %v1129_v28  ;;  %v210_v2 = vld [vmem:[%s1445_s7 + $0x50] sm:$0xff]  ;;  %v209_v4 = vld [vmem:[%s1445_s7 + $0x48] sm:$0xff]  ;;  %v212_v8 = vld [vmem:[%s1445_s7 + $0x60] sm:$0xff] }
  0x1c   : > { %v246_v3 = vld [vmem:[%s1445_s7 + $0x170] sm:$0xff]  ;;  %v245_v5 = vld [vmem:[%s1445_s7 + $0x168] sm:$0xff]  ;;  %v216_v10 = vld [vmem:[%s1445_s7 + $0x80] sm:$0xff] }
  0x1d   : > { %v213_v6 = vld [vmem:[%s1445_s7 + $0x68] sm:$0xff]  ;;  %v202_v7 = vld [vmem:[%s1445_s7 + $0x10] sm:$0xff]  ;;  %v208_v11 = vld [vmem:[%s1445_s7 + $0x40] sm:$0xff] }
  0x1e   : > { %1132 = vmatpush3.bf16.msra.mxu0 %v1131_v33  ;;  %1165 = vmatpush3.bf16.msra.mxu1 %v1131_v33  ;;  %v205_v9 = vld [vmem:[%s1445_s7 + $0x28] sm:$0xff]  ;;  %v215_v12 = vld [vmem:[%s1445_s7 + $0x78] sm:$0xff]  ;;  %v214_v15 = vld [vmem:[%s1445_s7 + $0x70] sm:$0xff] }
  0x1f   : > { %1134 = vmatprep.subr.bf16.mxu0 %v1133_v34  ;;  %1158 = vmatprep.subr.bf16.mxu1 %v1133_v34  ;;  %v211_v13 = vld [vmem:[%s1445_s7 + $0x58] sm:$0xff]  ;;  %v218_v16 = vld [vmem:[%s1445_s7 + $0x90] sm:$0xff]  ;;  %v217_v17 = vld [vmem:[%s1445_s7 + $0x88] sm:$0xff] }
  0x20   : > { %v219_v14 = vld [vmem:[%s1445_s7 + $0x98] sm:$0xff]  ;;  %v222_v18 = vld [vmem:[%s1445_s7 + $0xb0] sm:$0xff]  ;;  %v220_v19 = vld [vmem:[%s1445_s7 + $0xa0] sm:$0xff] }
  0x21   : > { %v221_v20 = vld [vmem:[%s1445_s7 + $0xa8] sm:$0xff]  ;;  %v223_v21 = vld [vmem:[%s1445_s7 + $0xb8] sm:$0xff]  ;;  %v226_v23 = vld [vmem:[%s1445_s7 + $0xd0] sm:$0xff] }
  0x22   : > { %1136 = vmatpush3.bf16.msra.mxu0 %v1135_v39  ;;  %1166 = vmatpush3.bf16.msra.mxu1 %v1135_v39  ;;  %v225_v22 = vld [vmem:[%s1445_s7 + $0xc8] sm:$0xff]  ;;  %v224_v24 = vld [vmem:[%s1445_s7 + $0xc0] sm:$0xff]  ;;  %v227_v28 = vld [vmem:[%s1445_s7 + $0xd8] sm:$0xff] }
  0x23   : > { %1138 = vmatprep.subr.bf16.mxu0 %v1137_v40  ;;  %1159 = vmatprep.subr.bf16.mxu1 %v1137_v40  ;;  %v229_v25 = vld [vmem:[%s1445_s7 + $0xe8] sm:$0xff]  ;;  %v228_v26 = vld [vmem:[%s1445_s7 + $0xe0] sm:$0xff]  ;;  %v235_v29 = vld [vmem:[%s1445_s7 + $0x118] sm:$0xff] }
  0x24   : > { %v232_v27 = vld [vmem:[%s1445_s7 + $0x100] sm:$0xff]  ;;  %v231_v30 = vld [vmem:[%s1445_s7 + $0xf8] sm:$0xff]  ;;  %v238_v31 = vld [vmem:[%s1445_s7 + $0x130] sm:$0xff] }
  0x25   : > { %v230_v32 = vld [vmem:[%s1445_s7 + $0xf0] sm:$0xff]  ;;  %v241_v33 = vld [vmem:[%s1445_s7 + $0x148] sm:$0xff]  ;;  %v244_v35 = vld [vmem:[%s1445_s7 + $0x160] sm:$0xff] }
  0x26   : > { %1140 = vmatpush3.bf16.msra.mxu0 %v1139_v45  ;;  %1167 = vmatpush3.bf16.msra.mxu1 %v1139_v45  ;;  %v234_v34 = vld [vmem:[%s1445_s7 + $0x110] sm:$0xff]  ;;  %v233_v36 = vld [vmem:[%s1445_s7 + $0x108] sm:$0xff]  ;;  %v247_v37 = vld [vmem:[%s1445_s7 + $0x178] sm:$0xff]  ;;  %s175_s7 = sand.u32 1, %s1304_s12  }
  0x27   : > { %1142 = vmatprep.subr.bf16.mxu0 %v1141_v46  ;;  %1160 = vmatprep.subr.bf16.mxu1 %v1141_v46  ;;  %s941_s22 = sshll.u32 %s175_s7, 7 }
  0x28   : > { %s1595_s12 = scalar_lea.vmem [#allocation2], %s941_s22  }
  0x2a   : > { %1144 = vmatpush3.bf16.msra.mxu0 %v1143_v51  ;;  %1168 = vmatpush3.bf16.msra.mxu1 %v1143_v51 }
  0x2b   : > { %1146 = vmatprep.subr.bf16.mxu1 %v1145_v52 }
  0x2d   : > { %405 = vmatmul.mubr.f32.vlgmr.msra.gmra.mrb[0].mxu0 %v200_v55  ;;  %465 = vmatmul.mubr.f32.vlgmr.msra.gmra.mrb[0].mxu1 %v236_v56 }
  0x2e   : > { %409 = vmatprep.mubr.f32.mxu0 %v204_v57  ;;  %469 = vmatprep.mubr.f32.mxu1 %v240_v58 }
  0x2f   : > { %1148 = vmatpush3.bf16.msra.mxu1 %v1145_v52 }
  0x30   : > { %1150 = vmatprep.subr.bf16.mxu1 %v1149_v59 }
  0x31   : > { %410 = vmatmul.mubr.f32.gmra.mrb[2].mxu0 %v203_v60  ;;  %470 = vmatmul.mubr.f32.gmra.mrb[2].mxu1 %v239_v61  ;;  %v1587_v60 = vld [vmem:[%s1731_s2] ss:$0 sm:$0xff] }
  0x32   : > { %414 = vmatprep.mubr.f32.mxu0 %v207_v62  ;;  %474 = vmatprep.mubr.f32.mxu1 %v243_v63 }
  0x33   : > { %1152 = vmatpush3.bf16.msra.mxu1 %v1149_v59 }
  0x35   : > { %415 = vmatmul.mubr.f32.gmra.mrb[4].mxu0 %v206_v0  ;;  %475 = vmatmul.mubr.f32.gmra.mrb[4].mxu1 %v242_v1 }
  0x36   : > { %419 = vmatprep.mubr.f32.mxu0 %v210_v2  ;;  %479 = vmatprep.mubr.f32.mxu1 %v246_v3 }
  0x39   : > { %420 = vmatmul.mubr.f32.gmra.mrb[6].mxu0 %v209_v4  ;;  %480 = vmatmul.mubr.f32.gmra.mrb[6].mxu1 %v245_v5 }
  0x3a   : > { %424 = vmatprep.mubr.f32.mxu0 %v213_v6  ;;  %1089 = vmatprep.mubr.msk.f32.mxu1 %vm291_vm0, %v202_v7 }
  0x3d   : > { %425 = vmatmul.mubr.f32.gmra.mrb[8].mxu0 %v212_v8  ;;  %1090 = vmatmul.mubr.msk.f32.vlgmr.msra.gmra.mrb[8].mxu1 %vm291_vm0, %v205_v9 }
  0x3e   : > { %429 = vmatprep.mubr.f32.mxu0 %v216_v10  ;;  %1092 = vmatprep.mubr.msk.f32.mxu1 %vm291_vm0, %v208_v11 }
  0x41   : > { %430 = vmatmul.mubr.f32.gmra.mrb[10].mxu0 %v215_v12  ;;  %1093 = vmatmul.mubr.msk.f32.gmra.mrb[10].mxu1 %vm291_vm0, %v211_v13 }
  0x42   : > { %434 = vmatprep.mubr.f32.mxu0 %v219_v14  ;;  %1095 = vmatprep.mubr.msk.f32.mxu1 %vm291_vm0, %v214_v15 }
  0x45   : > { %435 = vmatmul.mubr.f32.gmra.mrb[12].mxu0 %v218_v16  ;;  %1096 = vmatmul.mubr.msk.f32.gmra.mrb[12].mxu1 %vm291_vm0, %v217_v17 }
  0x46   : > { %439 = vmatprep.mubr.f32.mxu0 %v222_v18  ;;  %1098 = vmatprep.mubr.msk.f32.mxu1 %vm291_vm0, %v220_v19 }
  0x49   : > { %440 = vmatmul.mubr.f32.gmra.mrb[14].mxu0 %v221_v20  ;;  %1099 = vmatmul.mubr.msk.f32.gmra.mrb[14].mxu1 %vm291_vm0, %v223_v21 }
  0x4a   : > { %444 = vmatprep.mubr.f32.mxu0 %v225_v22  ;;  %1101 = vmatprep.mubr.msk.f32.mxu1 %vm291_vm0, %v226_v23 }
  0x4d   : > { %445 = vmatmul.mubr.f32.gmra.mrb[16].mxu0 %v224_v24  ;;  %1102 = vmatmul.mubr.msk.f32.gmra.mrb[16].mxu1 %vm291_vm0, %v229_v25 }
  0x4e   : > { %449 = vmatprep.mubr.f32.mxu0 %v228_v26  ;;  %1104 = vmatprep.mubr.msk.f32.mxu1 %vm291_vm0, %v232_v27 }
  0x51   : > { %450 = vmatmul.mubr.f32.gmra.mrb[18].mxu0 %v227_v28  ;;  %1105 = vmatmul.mubr.msk.f32.gmra.mrb[18].mxu1 %vm291_vm0, %v235_v29 }
  0x52   : > { %454 = vmatprep.mubr.f32.mxu0 %v231_v30  ;;  %1107 = vmatprep.mubr.msk.f32.mxu1 %vm291_vm0, %v238_v31 }
  0x55   : > { %455 = vmatmul.mubr.f32.gmra.mrb[20].mxu0 %v230_v32  ;;  %1108 = vmatmul.mubr.msk.f32.gmra.mrb[20].mxu1 %vm291_vm0, %v241_v33 }
  0x56   : > { %459 = vmatprep.mubr.f32.mxu0 %v234_v34  ;;  %1110 = vmatprep.mubr.msk.f32.mxu1 %vm291_vm0, %v244_v35 }
  0x59   : > { %460 = vmatmul.mubr.f32.gmra.mrb[22].mxu0 %v233_v36  ;;  %1111 = vmatmul.mubr.msk.f32.gmra.mrb[22].mxu1 %vm291_vm0, %v247_v37 }
 0x100   : > { %v1013_v38 = vpop.f32.mrb[0].mxu0  ;;  %v1049_v39 = vpop.f32.mrb[0].mxu1 }
 0x101   : > { %v1014_v40 = vpop.f32.mrb[1].mxu0  ;;  %v1050_v41 = vpop.f32.mrb[1].mxu1 }
 0x102   : > { %v1015_v42 = vadd.f32 %v1014_v40, %v1013_v38  ;;  %v1577_v43 = vadd.f32 %v1050_v41, %v1049_v39 }
 0x104   : > { %v1016_v44 = vpop.f32.mrb[2].mxu0  ;;  %v1052_v45 = vpop.f32.mrb[2].mxu1  ;;  %v407_v2 = vadd.f32 %v1015_v42, %v1587_v60 }
 0x105   : > { %v1017_v46 = vpop.f32.mrb[3].mxu0  ;;  %v1053_v47 = vpop.f32.mrb[3].mxu1 }
 0x106   : > { %v1018_v48 = vadd.f32 %v1017_v46, %v1016_v44  ;;  %v1579_v49 = vadd.f32 %v1053_v47, %v1052_v45 }
 0x108   : > { %v1019_v50 = vpop.f32.mrb[4].mxu0  ;;  %v1055_v51 = vpop.f32.mrb[4].mxu1  ;;  %v412_v63 = vadd.f32 %v1018_v48, %v1587_v60 }
 0x109   : > { %v1020_v52 = vpop.f32.mrb[5].mxu0  ;;  %v1056_v53 = vpop.f32.mrb[5].mxu1 }
 0x10a   : > { %v1021_v54 = vadd.f32 %v1020_v52, %v1019_v50  ;;  %v1581_v55 = vadd.f32 %v1056_v53, %v1055_v51 }
 0x10c   : > { %v1022_v56 = vpop.f32.mrb[6].mxu0  ;;  %v1058_v57 = vpop.f32.mrb[6].mxu1  ;;  %v417_v13 = vadd.f32 %v1021_v54, %v1587_v60 }
 0x10d   : > { %v1023_v58 = vpop.f32.mrb[7].mxu0  ;;  %v1059_v59 = vpop.f32.mrb[7].mxu1 }
 0x10e   : > { %v1024_v61 = vadd.f32 %v1023_v58, %v1022_v56  ;;  %v1589_v62 = vadd.f32 %v1059_v59, %v1058_v57  ;;  %v472_v58 = vadd.f32 %v1579_v49, %v1587_v60 }
 0x110   : > { %v1025_v0 = vpop.f32.mrb[8].mxu0  ;;  %v1091_v1 = vpop.f32.mrb[8].mxu1  ;;  %v422_v9 = vadd.f32 %v1024_v61, %v1587_v60  ;;  %v482_v49 = vadd.f32 %v1589_v62, %v1587_v60 }
 0x111   : > { %v557_v3 = vadd.f32 %v1091_v1, %v412_v63  ;;  %v1026_v4 = vpop.f32.mrb[9].mxu0  ;;  %v551_v5 = vpop.f32.mrb[9].mxu1  ;;  %v467_v1 = vadd.f32 %v1577_v43, %v1587_v60 }
 0x112   : > { %v1027_v6 = vadd.f32 %v1026_v4, %v1025_v0  ;;  %v552_v7 = vadd.f32 %v551_v5, %v407_v2 }
 0x113   : > { %v631_v8 = vmax.f32 %v557_v3, 0.0 }
 0x114   : > { %v630_v10 = vmax.f32 %v552_v7, 0.0  ;;  %v1028_v11 = vpop.f32.mrb[10].mxu0  ;;  %v1094_v12 = vpop.f32.mrb[10].mxu1  ;;  %v427_v24 = vadd.f32 %v1027_v6, %v1587_v60 }
 0x115   : > { %647 = vst [vmem:[%s1595_s12 + $0x8] sm:$0xff] %v631_v8  ;;  %v567_v14 = vadd.f32 %v1094_v12, %v422_v9  ;;  %v1029_v15 = vpop.f32.mrb[11].mxu0  ;;  %v561_v16 = vpop.f32.mrb[11].mxu1 }
 0x116   : > { %646 = vst [vmem:[%s1595_s12] sm:$0xff] %v630_v10  ;;  %v1030_v17 = vadd.f32 %v1029_v15, %v1028_v11  ;;  %v562_v18 = vadd.f32 %v561_v16, %v417_v13  ;;  %v477_v13 = vadd.f32 %v1581_v55, %v1587_v60 }
 0x117   : > { %v633_v19 = vmax.f32 %v567_v14, 0.0 }
 0x118   : > { %v632_v20 = vmax.f32 %v562_v18, 0.0  ;;  %v1031_v21 = vpop.f32.mrb[12].mxu0  ;;  %v432_v22 = vadd.f32 %v1030_v17, %v1587_v60  ;;  %v1097_v23 = vpop.f32.mrb[12].mxu1 }
 0x119   : > { %649 = vst [vmem:[%s1595_s12 + $0x18] sm:$0xff] %v633_v19  ;;  %v1032_v25 = vpop.f32.mrb[13].mxu0  ;;  %v571_v26 = vpop.f32.mrb[13].mxu1 }
 0x11a   : > { %648 = vst [vmem:[%s1595_s12 + $0x10] sm:$0xff] %v632_v20  ;;  %v577_v27 = vadd.f32 %v1097_v23, %v432_v22  ;;  %v1033_v28 = vadd.f32 %v1032_v25, %v1031_v21  ;;  %v572_v29 = vadd.f32 %v571_v26, %v427_v24 }
 0x11c   : > { %v635_v30 = vmax.f32 %v577_v27, 0.0  ;;  %v634_v31 = vmax.f32 %v572_v29, 0.0  ;;  %v1034_v32 = vpop.f32.mrb[14].mxu0  ;;  %v1100_v33 = vpop.f32.mrb[14].mxu1  ;;  %v437_v34 = vadd.f32 %v1033_v28, %v1587_v60 }
 0x11d   : > { %v1035_v35 = vpop.f32.mrb[15].mxu0  ;;  %v581_v36 = vpop.f32.mrb[15].mxu1 }
 0x11e   : > { %651 = vst [vmem:[%s1595_s12 + $0x28] sm:$0xff] %v635_v30  ;;  %650 = vst [vmem:[%s1595_s12 + $0x20] sm:$0xff] %v634_v31  ;;  %v1036_v37 = vadd.f32 %v1035_v35, %v1034_v32  ;;  %v582_v38 = vadd.f32 %v581_v36, %v437_v34 }
 0x120   : > { %v442_v39 = vadd.f32 %v1036_v37, %v1587_v60  ;;  %v636_v40 = vmax.f32 %v582_v38, 0.0  ;;  %v1037_v41 = vpop.f32.mrb[16].mxu0  ;;  %v1103_v42 = vpop.f32.mrb[16].mxu1 }
 0x121   : > { %v1038_v44 = vpop.f32.mrb[17].mxu0  ;;  %v591_v45 = vpop.f32.mrb[17].mxu1 }
 0x122   : > { %v587_v46 = vadd.f32 %v1100_v33, %v442_v39  ;;  %652 = vst [vmem:[%s1595_s12 + $0x30] sm:$0xff] %v636_v40  ;;  %v1039_v47 = vadd.f32 %v1038_v44, %v1037_v41 }
 0x124   : > { %v637_v48 = vmax.f32 %v587_v46, 0.0  ;;  %v1040_v50 = vpop.f32.mrb[18].mxu0  ;;  %v447_v51 = vadd.f32 %v1039_v47, %v1587_v60  ;;  %v1106_v52 = vpop.f32.mrb[18].mxu1 }
 0x125   : > { %v1041_v53 = vpop.f32.mrb[19].mxu0  ;;  %v601_v54 = vpop.f32.mrb[19].mxu1 }
 0x126   : > { %653 = vst [vmem:[%s1595_s12 + $0x38] sm:$0xff] %v637_v48  ;;  %v592_v56 = vadd.f32 %v591_v45, %v447_v51  ;;  %v1042_v57 = vadd.f32 %v1041_v53, %v1040_v50 }
 0x128   : > { %v638_v59 = vmax.f32 %v592_v56, 0.0  ;;  %v452_v61 = vadd.f32 %v1042_v57, %v1587_v60  ;;  %v1043_v63 = vpop.f32.mrb[20].mxu0  ;;  %v1109_v0 = vpop.f32.mrb[20].mxu1 }
 0x129   : > { %v617_v2 = vadd.f32 %v1109_v0, %v472_v58  ;;  %v1044_v3 = vpop.f32.mrb[21].mxu0  ;;  %v611_v4 = vpop.f32.mrb[21].mxu1 }
 0x12a   : > { %654 = vst [vmem:[%s1595_s12 + $0x40] sm:$0xff] %v638_v59  ;;  %v597_v5 = vadd.f32 %v1103_v42, %v452_v61  ;;  %v1045_v6 = vadd.f32 %v1044_v3, %v1043_v63  ;;  %v612_v7 = vadd.f32 %v611_v4, %v467_v1 }
 0x12b   : > { %v643_v8 = vmax.f32 %v617_v2, 0.0 }
 0x12c   : > { %v639_v9 = vmax.f32 %v597_v5, 0.0  ;;  %v457_v10 = vadd.f32 %v1045_v6, %v1587_v60  ;;  %v642_v11 = vmax.f32 %v612_v7, 0.0  ;;  %v1046_v12 = vpop.f32.mrb[22].mxu0  ;;  %v1112_v43 = vpop.f32.mrb[22].mxu1 }
 0x12d   : > { %659 = vst [vmem:[%s1595_s12 + $0x68] sm:$0xff] %v643_v8  ;;  %v627_v14 = vadd.f32 %v1112_v43, %v482_v49  ;;  %v1047_v15 = vpop.f32.mrb[23].mxu0  ;;  %v621_v16 = vpop.f32.mrb[23].mxu1 }
 0x12e   : > { %655 = vst [vmem:[%s1595_s12 + $0x48] sm:$0xff] %v639_v9  ;;  %v602_v17 = vadd.f32 %v601_v54, %v457_v10  ;;  %658 = vst [vmem:[%s1595_s12 + $0x60] sm:$0xff] %v642_v11  ;;  %v1048_v62 = vadd.f32 %v1047_v15, %v1046_v12  ;;  %v622_v18 = vadd.f32 %v621_v16, %v477_v13 }
 0x12f   : > { %v645_v19 = vmax.f32 %v627_v14, 0.0 }
 0x130   : > { %v640_v20 = vmax.f32 %v602_v17, 0.0  ;;  %v462_v21 = vadd.f32 %v1048_v62, %v1587_v60  ;;  %v644_v22 = vmax.f32 %v622_v18, 0.0  ;;  %668 = sbr.rel (!%p1391_p4) target bundleno = 360 (0x168), region = 36 }
 0x131   : > { %661 = vst [vmem:[%s1595_s12 + $0x78] sm:$0xff] %v645_v19 }
 0x132   : > { %656 = vst [vmem:[%s1595_s12 + $0x50] sm:$0xff] %v640_v20  ;;  %v607_v23 = vadd.f32 %v1106_v52, %v462_v21  ;;  %660 = vst [vmem:[%s1595_s12 + $0x70] sm:$0xff] %v644_v22 }
 0x134   : > { %v641_v55 = vmax.f32 %v607_v23, 0.0 }
 0x136   : > { %657 = vst [vmem:[%s1595_s12 + $0x58] sm:$0xff] %v641_v55 }
 0x137   : > { %s1741_s23 = smov (!%p671_p8, %s670_s23), 16 }
 0x138   : > { %s963_s29 = sshll.u32 %s1741_s23, 7 }
 0x139   : > { %p966_p9 = scmp.eq.s32.totalorder %s963_s29, 0 }
 0x13a   : > { %s1642_s30 = sshrl.u32 (!%p966_p9), %s1741_s23, 4 }
 0x13b   : > { %679 = sbr.rel (%p966_p9) target bundleno = 360 (0x168), region = 40  ;;  %p967_p10 = scmp.le.s32.totalorder (!%p966_p9), %s1642_s30, 0 }
 0x142   : > { %893 = sbr.rel (%p967_p10) target bundleno = 339 (0x153), region = 116  ;;  %s1734_s15 = smov (!%p967_p10), %s1636_s28 }
 0x143   : > { %s1735_s20 = smov (!%p967_p10), %s1595_s12  ;;  %s1651_s27 = smov (!%p967_p10), 0  }
 0x144   : > { %s1653_s4 = smov (!%p967_p10), 0  }
 0x149 LB: >> { %v771_v60 = vld [vmem:[%s1320_s20] sm:$0xff]  ;;  %v773_v24 = vld [vmem:[%s1320_s20 + $0x8] sm:$0xff]  ;;  %v775_v25 = vld [vmem:[%s1320_s20 + $0x10] sm:$0xff]  ;;  %s803_s5 = sadd.s32 1, %s1324_s27  ;;  %s765_s4 = sadd.s32 1, %s1328_s4   ;;  %s1328_s4 = sphi %s1653_s4, %s765_s4   ;;  %s1324_s27 = sphi %s1651_s27, %s1736_s27   ;;  %s1320_s20 = sphi %s1735_s20, %s808_s20   ;;  %s1316_s15 = sphi %s1734_s15, %s809_s15  }
 0x14a   : >> { %772 = vst [vmem:[%s1316_s15] sm:$0xff] %v771_v60  ;;  %774 = vst [vmem:[%s1316_s15 + $0x8] sm:$0xff] %v773_v24  ;;  %v777_v26 = vld [vmem:[%s1320_s20 + $0x18] sm:$0xff]  ;;  %v779_v27 = vld [vmem:[%s1320_s20 + $0x20] sm:$0xff]  ;;  %p804_p11 = scmp.ge.s32.totalorder %s803_s5, %s1642_s30  ;;  %p764_p12 = scmp.ge.s32.totalorder %s765_s4, %s1642_s30 }
 0x14b   : >> { %776 = vst [vmem:[%s1316_s15 + $0x10] sm:$0xff] %v775_v25  ;;  %v781_v28 = vld [vmem:[%s1320_s20 + $0x28] sm:$0xff]  ;;  %778 = vst [vmem:[%s1316_s15 + $0x18] sm:$0xff] %v777_v26  ;;  %v783_v29 = vld [vmem:[%s1320_s20 + $0x30] sm:$0xff] }
 0x14c   : >> { %780 = vst [vmem:[%s1316_s15 + $0x20] sm:$0xff] %v779_v27  ;;  %782 = vst [vmem:[%s1316_s15 + $0x28] sm:$0xff] %v781_v28  ;;  %v785_v30 = vld [vmem:[%s1320_s20 + $0x38] sm:$0xff]  ;;  %v787_v31 = vld [vmem:[%s1320_s20 + $0x40] sm:$0xff]  ;;  %s1743_s5 = smov (%p804_p11, %s803_s5), 0  ;;  %767 = sbr.rel (!%p764_p12) target bundleno = 329 (0x149), region = 122 }
 0x14d   : >> { %784 = vst [vmem:[%s1316_s15 + $0x30] sm:$0xff] %v783_v29  ;;  %786 = vst [vmem:[%s1316_s15 + $0x38] sm:$0xff] %v785_v30  ;;  %v789_v32 = vld [vmem:[%s1320_s20 + $0x48] sm:$0xff]  ;;  %v791_v33 = vld [vmem:[%s1320_s20 + $0x50] sm:$0xff]  ;;  %s968_s6 = sshll.u32 %s1743_s5, 7  ;;  %s1736_s27 = smov %s1743_s5 }
 0x14e   : >> { %788 = vst [vmem:[%s1316_s15 + $0x40] sm:$0xff] %v787_v31  ;;  %v793_v34 = vld [vmem:[%s1320_s20 + $0x58] sm:$0xff]  ;;  %790 = vst [vmem:[%s1316_s15 + $0x48] sm:$0xff] %v789_v32  ;;  %v795_v35 = vld [vmem:[%s1320_s20 + $0x60] sm:$0xff] }
 0x14f   : >> { %792 = vst [vmem:[%s1316_s15 + $0x50] sm:$0xff] %v791_v33  ;;  %794 = vst [vmem:[%s1316_s15 + $0x58] sm:$0xff] %v793_v34  ;;  %v797_v36 = vld [vmem:[%s1320_s20 + $0x68] sm:$0xff]  ;;  %v799_v37 = vld [vmem:[%s1320_s20 + $0x70] sm:$0xff] }
 0x150   : >> { %796 = vst [vmem:[%s1316_s15 + $0x60] sm:$0xff] %v795_v35  ;;  %798 = vst [vmem:[%s1316_s15 + $0x68] sm:$0xff] %v797_v36  ;;  %v801_v38 = vld [vmem:[%s1320_s20 + $0x78] sm:$0xff]  ;;  %s808_s20 = scalar_lea.vmem %s1595_s12, %s968_s6 [#allocation2]  }
 0x151   : >> { %800 = vst [vmem:[%s1316_s15 + $0x70] sm:$0xff] %v799_v37  ;;  %802 = vst [vmem:[%s1316_s15 + $0x78] sm:$0xff] %v801_v38  ;;  %s809_s15 = scalar_lea.vmem %s1636_s28, %s968_s6  }
 0x153 PF: > { %s1711_s8 = sand.u32 15, %s1741_s23   ;;  %s979_s9 = sshll.u32 %s1642_s30, 7 }
 0x154   : > { %s814_s10 = scalar_lea.vmem %s1595_s12, %s979_s9 [#allocation2]   ;;  %s816_s11 = scalar_lea.vmem %s1636_s28, %s979_s9  }
 0x155   : > { %p973_p13 = scmp.le.s32.totalorder %s1711_s8, 0 }
 0x156   : > { %s1330_s14 = smov (!%p973_p13), %s816_s11   ;;  %s1334_s17 = smov (!%p973_p13), %s814_s10  }
 0x157   : > { %907 = sbr.rel (%p973_p13) target bundleno = 360 (0x168), region = 127  ;;  %s1338_s7 = smov (!%p973_p13), 0  }
 0x158   : > { %s1342_s18 = smov (!%p973_p13), 0  }
 0x15e LB: >> { %v826_v39 = vld [vmem:[%s1336_s17] sm:$0xff]  ;;  %s828_s21 = sadd.s32 1, %s1340_s7  ;;  %s820_s18 = sadd.s32 1, %s1344_s18   ;;  %s1344_s18 = sphi %s1342_s18, %s820_s18   ;;  %s1340_s7 = sphi %s1338_s7, %s1339_s7   ;;  %s1336_s17 = sphi %s1334_s17, %s833_s17   ;;  %s1332_s14 = sphi %s1330_s14, %s834_s14  }
 0x15f   : >> { %827 = vst [vmem:[%s1332_s14] sm:$0xff] %v826_v39  ;;  %p829_p0 = scmp.ge.s32.totalorder %s828_s21, %s1711_s8  ;;  %p819_p1 = scmp.ge.s32.totalorder %s820_s18, %s1711_s8 }
 0x161   : >> { %s1745_s21 = smov (%p829_p0, %s828_s21), 0  ;;  %822 = sbr.rel (!%p819_p1) target bundleno = 350 (0x15e), region = 133 }
 0x162   : >> { %s974_s22 = sshll.u32 %s1745_s21, 3  ;;  %s1339_s7 = smov %s1745_s21  }
 0x163   : >> { %s833_s17 = scalar_lea.vmem %s814_s10, %s974_s22 [#allocation2]   ;;  %s834_s14 = scalar_lea.vmem %s816_s11, %s974_s22  }
 0x168 PF: > { %p10_p2 = scmp.ge.s32.totalorder %s1381_s16, 4   ;;  %s1737_s12 = smov %s1308_s13 }
 0x169   : > { %s1738_s13 = smov %s1389_s19  ;;  %s1739_s14 = smov %s1381_s16 }
 0x16a   :  { %12 = sbr.rel (!%p10_p2) target bundleno = 2 (0x2), region = 144 }

// kernel: ppo_forward.8
= control target key start
LH: loop header
LB: loop body
LE: loop exit
PB: predicated region body
PF: predicated region fallthrough
CT: control target
= control target key end

     0   :  { %s1047_s12 = smov 0   ;;  %s1049_s13 = smov 0   ;;  %s1291_s0 = inlined_call_operand.vmem [shape: f32[72,288], index: 0, kind: input, shape index: {}]   ;;  %s1292_s1 = inlined_call_operand.vmem [shape: f32[288,128], index: 1, kind: input, shape index: {}]   ;;  %s1293_s2 = inlined_call_operand.vmem [shape: f32[1,128], index: 2, kind: input, shape index: {}]   ;;  %s1294_s3 = inlined_call_operand.vmem [shape: f32[72,128], index: 3, kind: output, shape index: {}]  }
   0x1   :  { %s1051_s14 = smov 0  }
   0x2 LB: > { %s1060_s15 = sadd.s32 4294967295, %s990_s14   ;;  %s1062_s16 = sadd.s32 1, %s990_s14   ;;  %s990_s14 = sphi %s1051_s14, %s1301_s14   ;;  %s986_s13 = sphi %s1049_s13, %s1300_s13   ;;  %s982_s12 = sphi %s1047_s12, %s1299_s12  }
   0x3   : > { %s85_s17 = ssub.s32 %s990_s14, %s1062_s16  ;;  %s88_s18 = sadd.s32 1, %s986_s13 }
   0x4   : > { %p86_p0 = scmp.eq.s32.totalorder %s85_s17, 0  ;;  %p98_p1 = scmp.ne.s32.totalorder %s986_s13, %s982_s12 }
   0x5   : > { %p99_p2 = scmp.eq.s32.totalorder %s1060_s15, 1  ;;  %p700_p3 = scmp.ge.s32.totalorder %s990_s14, 1 }
   0x6   : > { %s1070_s19 = scalar_select %p86_p0, %s986_s13, %s88_s18  }
   0x7   : > { %p1072_p4 = por %p99_p2, %p98_p1  ;;  %p149_p5 = scmp.lt.s32.totalorder %s990_s14, 3 }
   0x9   : > { %p150_p6 = pnand %p700_p3, %p149_p5 }
   0xa   : > { %v231_v0 = vld [vmem:[%s1292_s1 + $0x80] sm:$0xff] (!%p150_p6)  ;;  %v232_v1 = vld [vmem:[%s1292_s1 + $0x88] sm:$0xff] (!%p150_p6)  ;;  %s1086_s27 = smul.u32 (!%p150_p6), 5, %s1060_s15  ;;  %v233_v5 = vld [vmem:[%s1292_s1 + $0x90] sm:$0xff] (!%p150_p6)  ;;  %v1024_v7 = vmov (!%p150_p6), 0.0|0.0   ;;  %vm1025_vm0 = vmmov (!%p150_p6), 0  }
   0xb   : > { %153 = sbr.rel (%p150_p6) target bundleno = 344 (0x158), region = 32  ;;  %v215_v2 = vld [vmem:[%s1292_s1] sm:$0xff] (!%p150_p6)  ;;  %v800_v3 = vpack.c.bf16 (!%p150_p6), %v232_v1, %v231_v0  ;;  %v216_v4 = vld [vmem:[%s1292_s1 + $0x8] sm:$0xff] (!%p150_p6)  ;;  %v234_v6 = vld [vmem:[%s1292_s1 + $0x98] sm:$0xff] (!%p150_p6)  ;;  %832 = vmatprep.subr.bf16.mxu1 (!%p150_p6), %v1024_v7  ;;  %v1026_v13 = vmov (!%p150_p6), 0.0   ;;  %vm258_vm1 = vcmask (!%p150_p6), 261120  }
   0xc   : > { %v802_v8 = vpack.c.bf16 (!%p150_p6), %v216_v4, %v215_v2  ;;  %v804_v9 = vpack.c.bf16 (!%p150_p6), %v234_v6, %v233_v5  ;;  %v217_v10 = vld [vmem:[%s1292_s1 + $0x10] sm:$0xff] (!%p150_p6)  ;;  %v218_v11 = vld [vmem:[%s1292_s1 + $0x18] sm:$0xff] (!%p150_p6)  ;;  %v235_v12 = vld [vmem:[%s1292_s1 + $0xa0] sm:$0xff] (!%p150_p6)  ;;  %p184_p7 = scmp.lt.s32.totalorder (!%p150_p6), %s1086_s27, 8  ;;  %785 = vmatprep.mubr.msk.f32.mxu1 (!%p150_p6), %vm1025_vm0, %v1026_v13  ;;  %s175_s18 = sand.u32 (!%p150_p6), 1, %s982_s12  }
   0xd   : > { %801 = vmatprep.subr.bf16.mxu0 (!%p150_p6), %v800_v3  ;;  %v236_v14 = vld [vmem:[%s1292_s1 + $0xa8] sm:$0xff] (!%p150_p6)  ;;  %v806_v15 = vpack.c.bf16 (!%p150_p6), %v218_v11, %v217_v10  ;;  %v219_v17 = vld [vmem:[%s1292_s1 + $0x20] sm:$0xff] (!%p150_p6)  ;;  %v237_v19 = vld [vmem:[%s1292_s1 + $0xb0] sm:$0xff] (!%p150_p6)  ;;  %s838_s23 = smul.u32 (!%p150_p6), 40, %s175_s18 }
   0xe   : > { %803 = vmatpush3.bf16.msra.mxu0 (!%p150_p6), %v802_v8  ;;  %v808_v16 = vpack.c.bf16 (!%p150_p6), %v236_v14, %v235_v12  ;;  %v220_v18 = vld [vmem:[%s1292_s1 + $0x28] sm:$0xff] (!%p150_p6)  ;;  %v238_v20 = vld [vmem:[%s1292_s1 + $0xb8] sm:$0xff] (!%p150_p6)  ;;  %v221_v23 = vld [vmem:[%s1292_s1 + $0x30] sm:$0xff] (!%p150_p6) }
   0xf   : > { %805 = vmatprep.subr.bf16.mxu0 (!%p150_p6), %v804_v9  ;;  %v810_v21 = vpack.c.bf16 (!%p150_p6), %v220_v18, %v219_v17  ;;  %v812_v22 = vpack.c.bf16 (!%p150_p6), %v238_v20, %v237_v19  ;;  %v222_v24 = vld [vmem:[%s1292_s1 + $0x38] sm:$0xff] (!%p150_p6)  ;;  %v239_v25 = vld [vmem:[%s1292_s1 + $0xc0] sm:$0xff] (!%p150_p6)  ;;  %v240_v26 = vld [vmem:[%s1292_s1 + $0xc8] sm:$0xff] (!%p150_p6) }
  0x10   : > { %v247_v27 = vld [vmem:[%s1292_s1 + $0x100] sm:$0xff] (!%p150_p6)  ;;  %v248_v28 = vld [vmem:[%s1292_s1 + $0x108] sm:$0xff] (!%p150_p6)  ;;  %v814_v30 = vpack.c.bf16 (!%p150_p6), %v222_v24, %v221_v23  ;;  %v249_v32 = vld [vmem:[%s1292_s1 + $0x110] sm:$0xff] (!%p150_p6)  ;;  %v816_v34 = vpack.c.bf16 (!%p150_p6), %v240_v26, %v239_v25 }
  0x11   : > { %v833_v31 = vpack.c.bf16 (!%p150_p6), %v248_v28, %v247_v27  ;;  %v250_v33 = vld [vmem:[%s1292_s1 + $0x118] sm:$0xff] (!%p150_p6)  ;;  %v223_v35 = vld [vmem:[%s1292_s1 + $0x40] sm:$0xff] (!%p150_p6)  ;;  %v224_v36 = vld [vmem:[%s1292_s1 + $0x48] sm:$0xff] (!%p150_p6) }
  0x12   : > { %s185_s21 = scalar_select %p184_p7, %s1086_s27, 8  ;;  %807 = vmatpush3.bf16.msra.mxu0 %v806_v15  ;;  %v241_v37 = vld [vmem:[%s1292_s1 + $0xd0] sm:$0xff]  ;;  %v242_v38 = vld [vmem:[%s1292_s1 + $0xd8] sm:$0xff]  ;;  %v836_v39 = vpack.c.bf16 %v250_v33, %v249_v32  ;;  %v818_v40 = vpack.c.bf16 %v224_v36, %v223_v35  ;;  %v243_v44 = vld [vmem:[%s1292_s1 + $0xe0] sm:$0xff] }
  0x13   : > { %809 = vmatprep.subr.bf16.mxu0 %v808_v16  ;;  %834 = vmatpush3.bf16.msra.mxu1 %v833_v31  ;;  %v820_v41 = vpack.c.bf16 %v242_v38, %v241_v37  ;;  %v225_v42 = vld [vmem:[%s1292_s1 + $0x50] sm:$0xff]  ;;  %v226_v43 = vld [vmem:[%s1292_s1 + $0x58] sm:$0xff]  ;;  %v244_v45 = vld [vmem:[%s1292_s1 + $0xe8] sm:$0xff]  ;;  %s472_s12 = ssub.s32 (%p1072_p4), 9, %s1086_s27  ;;  %s720_s24 = smul.u32 (%p1072_p4), 40, %s1060_s15 }
  0x14   : > { %s839_s4 = smul.u32 24, %s185_s21  ;;  %835 = vmatprep.subr.bf16.mxu1 %v1024_v7  ;;  %v822_v47 = vpack.c.bf16 %v226_v43, %v225_v42  ;;  %v824_v48 = vpack.c.bf16 %v244_v45, %v243_v44  ;;  %v227_v49 = vld [vmem:[%s1292_s1 + $0x60] sm:$0xff]  ;;  %v228_v50 = vld [vmem:[%s1292_s1 + $0x68] sm:$0xff]  ;;  %v245_v51 = vld [vmem:[%s1292_s1 + $0xf0] sm:$0xff]  ;;  %p473_p8 = scmp.lt.s32.totalorder (%p1072_p4), %s472_s12, 5 }
  0x15   : > { %v246_v52 = vld [vmem:[%s1292_s1 + $0xf8] sm:$0xff]  ;;  %v826_v54 = vpack.c.bf16 %v228_v50, %v227_v49  ;;  %v229_v56 = vld [vmem:[%s1292_s1 + $0x70] sm:$0xff]  ;;  %v702_v17 = vld [vmem:[%s1293_s2] ss:$0 sm:$0xff]  ;;  %s1242_s28 = scalar_lea.vmem (%p1072_p4), %s1294_s3, %s720_s24  }
  0x16   : > { %s1128_s7 = scalar_lea.vmem %s1291_s0, %s839_s4  ;;  %811 = vmatpush3.bf16.msra.mxu0 %v810_v21  ;;  %v828_v55 = vpack.c.bf16 %v246_v52, %v245_v51  ;;  %v230_v57 = vld [vmem:[%s1292_s1 + $0x78] sm:$0xff] }
  0x17   : > { %v201_v29 = vld [vmem:[%s1128_s7 + $0x8] sm:$0xff]  ;;  %813 = vmatprep.subr.bf16.mxu0 %v812_v22  ;;  %837 = vmatpush3.bf16.msra.mxu1 %v836_v39  ;;  %v202_v46 = vld [vmem:[%s1128_s7 + $0x10] sm:$0xff]  ;;  %v208_v58 = vld [vmem:[%s1128_s7 + $0x40] sm:$0xff]  ;;  %v830_v59 = vpack.c.bf16 %v230_v57, %v229_v56 }
  0x18   : > { %338 = vmatprep.mubr.f32.mxu0 %v201_v29  ;;  %v205_v53 = vld [vmem:[%s1128_s7 + $0x28] sm:$0xff]  ;;  %v211_v60 = vld [vmem:[%s1128_s7 + $0x58] sm:$0xff]  ;;  %v200_v61 = vld [vmem:[%s1128_s7] sm:$0xff] }
  0x19   : > { %v204_v62 = vld [vmem:[%s1128_s7 + $0x20] sm:$0xff]  ;;  %v214_v63 = vld [vmem:[%s1128_s7 + $0x70] sm:$0xff]  ;;  %v203_v0 = vld [vmem:[%s1128_s7 + $0x18] sm:$0xff] }
  0x1a   : > { %815 = vmatpush3.bf16.msra.mxu0 %v814_v30  ;;  %786 = vmatmul.mubr.msk.f32.vlgmr.msra.gmra.mrb[0].mxu1 %vm258_vm1, %v202_v46  ;;  %v207_v1 = vld [vmem:[%s1128_s7 + $0x38] sm:$0xff]  ;;  %v206_v2 = vld [vmem:[%s1128_s7 + $0x30] sm:$0xff]  ;;  %v209_v4 = vld [vmem:[%s1128_s7 + $0x48] sm:$0xff] }
  0x1b   : > { %817 = vmatprep.subr.bf16.mxu0 %v816_v34  ;;  %788 = vmatprep.mubr.msk.f32.mxu1 %vm1025_vm0, %v1026_v13  ;;  %v210_v3 = vld [vmem:[%s1128_s7 + $0x50] sm:$0xff]  ;;  %v213_v5 = vld [vmem:[%s1128_s7 + $0x68] sm:$0xff]  ;;  %v212_v6 = vld [vmem:[%s1128_s7 + $0x60] sm:$0xff]  ;;  %s1228_s7 = scalar_lea.vmem [#allocation2], %s838_s23  }
  0x1e   : > { %819 = vmatpush3.bf16.msra.mxu0 %v818_v40  ;;  %789 = vmatmul.mubr.msk.f32.gmra.mrb[2].mxu1 %vm258_vm1, %v205_v53 }
  0x1f   : > { %821 = vmatprep.subr.bf16.mxu0 %v820_v41  ;;  %791 = vmatprep.mubr.msk.f32.mxu1 %vm1025_vm0, %v1026_v13 }
  0x22   : > { %823 = vmatpush3.bf16.msra.mxu0 %v822_v47  ;;  %792 = vmatmul.mubr.msk.f32.gmra.mrb[4].mxu1 %vm258_vm1, %v208_v58 }
  0x23   : > { %825 = vmatprep.subr.bf16.mxu0 %v824_v48  ;;  %794 = vmatprep.mubr.msk.f32.mxu1 %vm1025_vm0, %v1026_v13 }
  0x26   : > { %827 = vmatpush3.bf16.msra.mxu0 %v826_v54  ;;  %795 = vmatmul.mubr.msk.f32.gmra.mrb[6].mxu1 %vm258_vm1, %v211_v60 }
  0x27   : > { %829 = vmatprep.subr.bf16.mxu0 %v828_v55  ;;  %797 = vmatprep.mubr.msk.f32.mxu1 %vm1025_vm0, %v1026_v13 }
  0x2a   : > { %831 = vmatpush3.bf16.msra.mxu0 %v830_v59  ;;  %798 = vmatmul.mubr.msk.f32.gmra.mrb[8].mxu1 %vm258_vm1, %v214_v63 }
  0x2d   : > { %339 = vmatmul.mubr.f32.vlgmr.msra.gmra.mrb[0].mxu0 %v200_v61 }
  0x2e   : > { %343 = vmatprep.mubr.f32.mxu0 %v204_v62 }
  0x31   : > { %344 = vmatmul.mubr.f32.gmra.mrb[2].mxu0 %v203_v0 }
  0x32   : > { %348 = vmatprep.mubr.f32.mxu0 %v207_v1 }
  0x35   : > { %349 = vmatmul.mubr.f32.gmra.mrb[4].mxu0 %v206_v2 }
  0x36   : > { %353 = vmatprep.mubr.f32.mxu0 %v210_v3 }
  0x39   : > { %354 = vmatmul.mubr.f32.gmra.mrb[6].mxu0 %v209_v4 }
  0x3a   : > { %358 = vmatprep.mubr.f32.mxu0 %v213_v5 }
  0x3d   : > { %359 = vmatmul.mubr.f32.gmra.mrb[8].mxu0 %v212_v6 }
  0xed   : > { %v430_v7 = vpop.f32.mrb[0].mxu1 }
  0xee   : > { %v787_v8 = vpop.f32.mrb[1].mxu1 }
  0xf1   : > { %v435_v9 = vpop.f32.mrb[2].mxu1 }
  0xf2   : > { %v790_v10 = vpop.f32.mrb[3].mxu1 }
  0xf5   : > { %v440_v11 = vpop.f32.mrb[4].mxu1 }
  0xf6   : > { %v793_v12 = vpop.f32.mrb[5].mxu1 }
  0xf9   : > { %v445_v13 = vpop.f32.mrb[6].mxu1 }
  0xfa   : > { %v796_v14 = vpop.f32.mrb[7].mxu1 }
  0xfd   : > { %v450_v19 = vpop.f32.mrb[8].mxu1 }
  0xfe   : > { %v799_v20 = vpop.f32.mrb[9].mxu1 }
 0x100   : > { %v753_v15 = vpop.f32.mrb[0].mxu0 }
 0x101   : > { %v754_v16 = vpop.f32.mrb[1].mxu0 }
 0x102   : > { %v755_v18 = vadd.f32 %v754_v16, %v753_v15 }
 0x104   : > { %v756_v21 = vpop.f32.mrb[2].mxu0  ;;  %v341_v22 = vadd.f32 %v755_v18, %v702_v17 }
 0x105   : > { %v757_v23 = vpop.f32.mrb[3].mxu0 }
 0x106   : > { %v431_v24 = vadd.f32 %v430_v7, %v341_v22  ;;  %v758_v25 = vadd.f32 %v757_v23, %v756_v21 }
 0x108   : > { %v454_v26 = vmax.f32 %v431_v24, 0.0  ;;  %v759_v27 = vpop.f32.mrb[4].mxu0  ;;  %v346_v28 = vadd.f32 %v758_v25, %v702_v17 }
 0x109   : > { %v760_v29 = vpop.f32.mrb[5].mxu0 }
 0x10a   : > { %459 = vst [vmem:[%s1228_s7] sm:$0xff] %v454_v26  ;;  %v436_v30 = vadd.f32 %v435_v9, %v346_v28  ;;  %v761_v31 = vadd.f32 %v760_v29, %v759_v27 }
 0x10c   : > { %v455_v32 = vmax.f32 %v436_v30, 0.0  ;;  %v762_v33 = vpop.f32.mrb[6].mxu0  ;;  %v351_v34 = vadd.f32 %v761_v31, %v702_v17 }
 0x10d   : > { %v763_v35 = vpop.f32.mrb[7].mxu0 }
 0x10e   : > { %460 = vst [vmem:[%s1228_s7 + $0x8] sm:$0xff] %v455_v32  ;;  %v441_v36 = vadd.f32 %v440_v11, %v351_v34  ;;  %v764_v37 = vadd.f32 %v763_v35, %v762_v33 }
 0x110   : > { %v456_v38 = vmax.f32 %v441_v36, 0.0  ;;  %v765_v39 = vpop.f32.mrb[8].mxu0  ;;  %v356_v40 = vadd.f32 %v764_v37, %v702_v17 }
 0x111   : > { %v766_v41 = vpop.f32.mrb[9].mxu0 }
 0x112   : > { %461 = vst [vmem:[%s1228_s7 + $0x10] sm:$0xff] %v456_v38  ;;  %v446_v42 = vadd.f32 %v445_v13, %v356_v40  ;;  %v767_v43 = vadd.f32 %v766_v41, %v765_v39 }
 0x114   : > { %v457_v44 = vmax.f32 %v446_v42, 0.0  ;;  %v361_v45 = vadd.f32 %v767_v43, %v702_v17  ;;  %470 = sbr.rel (!%p1072_p4) target bundleno = 344 (0x158), region = 36 }
 0x116   : > { %462 = vst [vmem:[%s1228_s7 + $0x18] sm:$0xff] %v457_v44  ;;  %v451_v46 = vadd.f32 %v450_v19, %v361_v45 }
 0x118   : > { %v458_v47 = vmax.f32 %v451_v46, 0.0 }
 0x11a   : > { %463 = vst [vmem:[%s1228_s7 + $0x20] sm:$0xff] %v458_v47 }
 0x11b   : > { %s1303_s12 = smov (!%p473_p8, %s472_s12), 5 }
 0x11c   : > { %s708_s29 = sshll.u32 %s1303_s12, 7 }
 0x11d   : > { %p711_p9 = scmp.eq.s32.totalorder %s708_s29, 0 }
 0x11e   : > { %932 = sdivrem.u32 (!%p711_p9), %s1303_s12, 5 }
 0x11f   : > { %481 = sbr.rel (%p711_p9) target bundleno = 344 (0x158), region = 40 }
 0x127   : > { %s1248_s20 = spop.drf %932 }
 0x128   : > { %p712_p10 = scmp.le.s32.totalorder %s1248_s20, 0 }
 0x129   : > { %s1296_s15 = smov (!%p712_p10), %s1242_s28  ;;  %s1297_s27 = smov (!%p712_p10), %s1228_s7 }
 0x12a   : > { %653 = sbr.rel (%p712_p10) target bundleno = 315 (0x13b), region = 116  ;;  %s1257_s30 = smov (!%p712_p10), 0  }
 0x12b   : > { %s1259_s4 = smov (!%p712_p10), 0  }
 0x131 LB: >> { %v553_v48 = vld [vmem:[%s998_s27] sm:$0xff]  ;;  %v555_v49 = vld [vmem:[%s998_s27 + $0x8] sm:$0xff]  ;;  %v557_v50 = vld [vmem:[%s998_s27 + $0x10] sm:$0xff]  ;;  %s563_s5 = sadd.s32 1, %s1002_s30  ;;  %s547_s4 = sadd.s32 1, %s1006_s4   ;;  %s1006_s4 = sphi %s1259_s4, %s547_s4   ;;  %s1002_s30 = sphi %s1257_s30, %s1298_s30   ;;  %s998_s27 = sphi %s1297_s27, %s568_s27   ;;  %s994_s15 = sphi %s1296_s15, %s569_s15  }
 0x132   : >> { %554 = vst [vmem:[%s994_s15] sm:$0xff] %v553_v48  ;;  %556 = vst [vmem:[%s994_s15 + $0x8] sm:$0xff] %v555_v49  ;;  %v559_v51 = vld [vmem:[%s998_s27 + $0x18] sm:$0xff]  ;;  %v561_v52 = vld [vmem:[%s998_s27 + $0x20] sm:$0xff]  ;;  %p564_p11 = scmp.ge.s32.totalorder %s563_s5, %s1248_s20  ;;  %p546_p12 = scmp.ge.s32.totalorder %s547_s4, %s1248_s20 }
 0x133   : >> { %558 = vst [vmem:[%s994_s15 + $0x10] sm:$0xff] %v557_v50  ;;  %560 = vst [vmem:[%s994_s15 + $0x18] sm:$0xff] %v559_v51 }
 0x134   : >> { %562 = vst [vmem:[%s994_s15 + $0x20] sm:$0xff] %v561_v52  ;;  %s1305_s5 = smov (%p564_p11, %s563_s5), 0  ;;  %549 = sbr.rel (!%p546_p12) target bundleno = 305 (0x131), region = 122 }
 0x135   : >> { %s566_s6 = smul.u32 40, %s1305_s5  ;;  %s1298_s30 = smov %s1305_s5 }
 0x137   : >> { %s568_s27 = scalar_lea.vmem %s1228_s7, %s566_s6 [#allocation2]   ;;  %s569_s15 = scalar_lea.vmem %s1242_s28, %s566_s6  }
 0x13b PF: > { %934 = sdivrem.u32 %s1303_s12, 5 }
 0x13c   : > { %s713_s8 = smul.u32 40, %s1248_s20 }
 0x13e   : > { %s574_s9 = scalar_lea.vmem %s1228_s7, %s713_s8 [#allocation2]   ;;  %s576_s10 = scalar_lea.vmem %s1242_s28, %s713_s8  }
 0x144   : > { %s935_s11 = spop.drf %934 }
 0x145   : > { %p715_p13 = scmp.le.s32.totalorder %s935_s11, 0 }
 0x146   : > { %s1008_s14 = smov (!%p715_p13), %s576_s10   ;;  %s1012_s17 = smov (!%p715_p13), %s574_s9  }
 0x147   : > { %667 = sbr.rel (%p715_p13) target bundleno = 344 (0x158), region = 127  ;;  %s1016_s18 = smov (!%p715_p13), 0  }
 0x148   : > { %s1020_s21 = smov (!%p715_p13), 0  }
 0x14e LB: >> { %v586_v53 = vld [vmem:[%s1014_s17] sm:$0xff]  ;;  %s588_s22 = sadd.s32 1, %s1018_s18  ;;  %s580_s21 = sadd.s32 1, %s1022_s21   ;;  %s1022_s21 = sphi %s1020_s21, %s580_s21   ;;  %s1018_s18 = sphi %s1016_s18, %s1017_s18   ;;  %s1014_s17 = sphi %s1012_s17, %s593_s17   ;;  %s1010_s14 = sphi %s1008_s14, %s594_s14  }
 0x14f   : >> { %587 = vst [vmem:[%s1010_s14] sm:$0xff] %v586_v53  ;;  %p589_p0 = scmp.ge.s32.totalorder %s588_s22, %s935_s11  ;;  %p579_p1 = scmp.ge.s32.totalorder %s580_s21, %s935_s11 }
 0x151   : >> { %s1307_s22 = smov (%p589_p0, %s588_s22), 0  ;;  %582 = sbr.rel (!%p579_p1) target bundleno = 334 (0x14e), region = 133 }
 0x152   : >> { %s716_s23 = sshll.u32 %s1307_s22, 3  ;;  %s1017_s18 = smov %s1307_s22  }
 0x153   : >> { %s593_s17 = scalar_lea.vmem %s574_s9, %s716_s23 [#allocation2]   ;;  %s594_s14 = scalar_lea.vmem %s576_s10, %s716_s23  }
 0x158 PF: > { %p10_p2 = scmp.ge.s32.totalorder %s1062_s16, 4   ;;  %s1299_s12 = smov %s986_s13 }
 0x159   : > { %s1300_s13 = smov %s1070_s19  ;;  %s1301_s14 = smov %s1062_s16 }
 0x15a   :  { %12 = sbr.rel (!%p10_p2) target bundleno = 2 (0x2), region = 144 }

// kernel: ppo_forward.9
= control target key start
LH: loop header
LB: loop body
LE: loop exit
PB: predicated region body
PF: predicated region fallthrough
CT: control target
= control target key end

     0   :  { %s4272_s1 = inlined_call_operand.vmem [shape: f32[1152,512], index: 1, kind: input, shape index: {}]   ;;  %s4273_s0 = inlined_call_operand.vmem [shape: f32[8,1152], index: 0, kind: input, shape index: {}]   ;;  %s4274_s3 = inlined_call_operand.vmem [shape: f32[512,128], index: 3, kind: input, shape index: {}]   ;;  %s4275_s2 = inlined_call_operand.vmem [shape: f32[1,512], index: 2, kind: input, shape index: {}]   ;;  %s4276_s4 = inlined_call_operand.vmem [shape: f32[1,128], index: 4, kind: input, shape index: {}]   ;;  %s4277_s5 = inlined_call_operand.vmem [shape: f32[8,128], index: 5, kind: output, shape index: {}]  }
   0x1   :  { %v30_v0 = vld [vmem:[%s4272_s1 + $0x8] sm:$0xff]  ;;  %v32_v2 = vld [vmem:[%s4272_s1 + $0x18] sm:$0xff]  ;;  %v29_v5 = vld [vmem:[%s4272_s1] sm:$0xff] }
   0x2   :  { %v34_v1 = vld [vmem:[%s4272_s1 + $0x28] sm:$0xff]  ;;  %v36_v4 = vld [vmem:[%s4272_s1 + $0x38] sm:$0xff]  ;;  %v33_v6 = vld [vmem:[%s4272_s1 + $0x20] sm:$0xff] }
   0x3   :  { %v1624_v3 = vpack.c.bf16 %v34_v1, %v30_v0  ;;  %v1912_v7 = vpack.c.bf16 %v36_v4, %v32_v2  ;;  %v1626_v8 = vpack.c.bf16 %v33_v6, %v29_v5  ;;  %v31_v9 = vld [vmem:[%s4272_s1 + $0x10] sm:$0xff]  ;;  %v38_v11 = vld [vmem:[%s4272_s1 + $0x48] sm:$0xff]  ;;  %v40_v14 = vld [vmem:[%s4272_s1 + $0x58] sm:$0xff] }
   0x4   :  { %v35_v10 = vld [vmem:[%s4272_s1 + $0x30] sm:$0xff]  ;;  %v42_v13 = vld [vmem:[%s4272_s1 + $0x68] sm:$0xff]  ;;  %v44_v15 = vld [vmem:[%s4272_s1 + $0x78] sm:$0xff] }
   0x5   :  { %1625 = vmatprep.subr.bf16.mxu0 %v1624_v3  ;;  %v1914_v12 = vpack.c.bf16 %v35_v10, %v31_v9  ;;  %1913 = vmatprep.subr.bf16.mxu1 %v1912_v7  ;;  %v1628_v16 = vpack.c.bf16 %v42_v13, %v38_v11  ;;  %v1916_v17 = vpack.c.bf16 %v44_v15, %v40_v14  ;;  %v37_v18 = vld [vmem:[%s4272_s1 + $0x40] sm:$0xff]  ;;  %v39_v20 = vld [vmem:[%s4272_s1 + $0x50] sm:$0xff]  ;;  %v46_v23 = vld [vmem:[%s4272_s1 + $0x88] sm:$0xff] }
   0x6   :  { %1627 = vmatpush1.bf16.msra.mxu0 %v1626_v8  ;;  %v41_v19 = vld [vmem:[%s4272_s1 + $0x60] sm:$0xff]  ;;  %v43_v22 = vld [vmem:[%s4272_s1 + $0x70] sm:$0xff]  ;;  %v50_v24 = vld [vmem:[%s4272_s1 + $0xa8] sm:$0xff] }
   0x7   :  { %1915 = vmatpush1.bf16.msra.mxu1 %v1914_v12  ;;  %v1630_v21 = vpack.c.bf16 %v41_v19, %v37_v18  ;;  %1629 = vmatprep.subr.bf16.mxu0 %v1628_v16  ;;  %v1918_v25 = vpack.c.bf16 %v43_v22, %v39_v20  ;;  %v1632_v26 = vpack.c.bf16 %v50_v24, %v46_v23  ;;  %v48_v27 = vld [vmem:[%s4272_s1 + $0x98] sm:$0xff]  ;;  %v45_v29 = vld [vmem:[%s4272_s1 + $0x80] sm:$0xff]  ;;  %v47_v32 = vld [vmem:[%s4272_s1 + $0x90] sm:$0xff] }
   0x8   :  { %1917 = vmatprep.subr.bf16.mxu1 %v1916_v17  ;;  %v52_v28 = vld [vmem:[%s4272_s1 + $0xb8] sm:$0xff]  ;;  %v49_v31 = vld [vmem:[%s4272_s1 + $0xa0] sm:$0xff]  ;;  %v51_v33 = vld [vmem:[%s4272_s1 + $0xb0] sm:$0xff] }
   0x9   :  { %v1920_v30 = vpack.c.bf16 %v52_v28, %v48_v27  ;;  %v1634_v34 = vpack.c.bf16 %v49_v31, %v45_v29  ;;  %v54_v35 = vld [vmem:[%s4272_s1 + $0xc8] sm:$0xff]  ;;  %v56_v37 = vld [vmem:[%s4272_s1 + $0xd8] sm:$0xff]  ;;  %v1922_v38 = vpack.c.bf16 %v51_v33, %v47_v32  ;;  %v53_v41 = vld [vmem:[%s4272_s1 + $0xc0] sm:$0xff] }
   0xa   :  { %1631 = vmatpush1.bf16.msra.mxu0 %v1630_v21  ;;  %v58_v36 = vld [vmem:[%s4272_s1 + $0xe8] sm:$0xff]  ;;  %v60_v40 = vld [vmem:[%s4272_s1 + $0xf8] sm:$0xff]  ;;  %v57_v42 = vld [vmem:[%s4272_s1 + $0xe0] sm:$0xff] }
   0xb   :  { %1919 = vmatpush1.bf16.msra.mxu1 %v1918_v25  ;;  %1633 = vmatprep.subr.bf16.mxu0 %v1632_v26  ;;  %v1636_v39 = vpack.c.bf16 %v58_v36, %v54_v35  ;;  %v1924_v43 = vpack.c.bf16 %v60_v40, %v56_v37  ;;  %v55_v44 = vld [vmem:[%s4272_s1 + $0xd0] sm:$0xff]  ;;  %v62_v46 = vld [vmem:[%s4272_s1 + $0x108] sm:$0xff]  ;;  %v64_v48 = vld [vmem:[%s4272_s1 + $0x118] sm:$0xff]  ;;  %v1638_v50 = vpack.c.bf16 %v57_v42, %v53_v41 }
   0xc   :  { %1921 = vmatprep.subr.bf16.mxu1 %v1920_v30  ;;  %v59_v45 = vld [vmem:[%s4272_s1 + $0xf0] sm:$0xff]  ;;  %v66_v47 = vld [vmem:[%s4272_s1 + $0x128] sm:$0xff]  ;;  %v68_v49 = vld [vmem:[%s4272_s1 + $0x138] sm:$0xff] }
   0xd   :  { %v1926_v51 = vpack.c.bf16 %v59_v45, %v55_v44  ;;  %v1640_v52 = vpack.c.bf16 %v66_v47, %v62_v46  ;;  %v61_v53 = vld [vmem:[%s4272_s1 + $0x100] sm:$0xff]  ;;  %v63_v55 = vld [vmem:[%s4272_s1 + $0x110] sm:$0xff]  ;;  %v1928_v56 = vpack.c.bf16 %v68_v49, %v64_v48  ;;  %v70_v58 = vld [vmem:[%s4272_s1 + $0x148] sm:$0xff] }
   0xe   :  { %1635 = vmatpush1.bf16.msra.mxu0 %v1634_v34  ;;  %v65_v54 = vld [vmem:[%s4272_s1 + $0x120] sm:$0xff]  ;;  %v67_v57 = vld [vmem:[%s4272_s1 + $0x130] sm:$0xff]  ;;  %v74_v59 = vld [vmem:[%s4272_s1 + $0x168] sm:$0xff] }
   0xf   :  { %1923 = vmatpush1.bf16.msra.mxu1 %v1922_v38  ;;  %1637 = vmatprep.subr.bf16.mxu0 %v1636_v39  ;;  %v72_v60 = vld [vmem:[%s4272_s1 + $0x158] sm:$0xff]  ;;  %v1642_v62 = vpack.c.bf16 %v65_v54, %v61_v53  ;;  %v1930_v63 = vpack.c.bf16 %v67_v57, %v63_v55  ;;  %v1644_v0 = vpack.c.bf16 %v74_v59, %v70_v58  ;;  %v69_v1 = vld [vmem:[%s4272_s1 + $0x140] sm:$0xff]  ;;  %v71_v3 = vld [vmem:[%s4272_s1 + $0x150] sm:$0xff] }
  0x10   :  { %1925 = vmatprep.subr.bf16.mxu1 %v1924_v43  ;;  %v76_v61 = vld [vmem:[%s4272_s1 + $0x178] sm:$0xff]  ;;  %v73_v2 = vld [vmem:[%s4272_s1 + $0x160] sm:$0xff]  ;;  %v75_v5 = vld [vmem:[%s4272_s1 + $0x170] sm:$0xff] }
  0x11   :  { %v1932_v4 = vpack.c.bf16 %v76_v61, %v72_v60  ;;  %v78_v6 = vld [vmem:[%s4272_s1 + $0x188] sm:$0xff]  ;;  %v80_v8 = vld [vmem:[%s4272_s1 + $0x198] sm:$0xff]  ;;  %v1646_v10 = vpack.c.bf16 %v73_v2, %v69_v1  ;;  %v1934_v11 = vpack.c.bf16 %v75_v5, %v71_v3  ;;  %v77_v13 = vld [vmem:[%s4272_s1 + $0x180] sm:$0xff] }
  0x12   :  { %1639 = vmatpush1.bf16.msra.mxu0 %v1638_v50  ;;  %v82_v7 = vld [vmem:[%s4272_s1 + $0x1a8] sm:$0xff]  ;;  %v84_v9 = vld [vmem:[%s4272_s1 + $0x1b8] sm:$0xff]  ;;  %v81_v14 = vld [vmem:[%s4272_s1 + $0x1a0] sm:$0xff] }
  0x13   :  { %1927 = vmatpush1.bf16.msra.mxu1 %v1926_v51  ;;  %1641 = vmatprep.subr.bf16.mxu0 %v1640_v52  ;;  %v1648_v12 = vpack.c.bf16 %v82_v7, %v78_v6  ;;  %v79_v15 = vld [vmem:[%s4272_s1 + $0x190] sm:$0xff]  ;;  %v1936_v16 = vpack.c.bf16 %v84_v9, %v80_v8  ;;  %v86_v18 = vld [vmem:[%s4272_s1 + $0x1c8] sm:$0xff]  ;;  %v88_v20 = vld [vmem:[%s4272_s1 + $0x1d8] sm:$0xff]  ;;  %v1650_v22 = vpack.c.bf16 %v81_v14, %v77_v13 }
  0x14   :  { %1929 = vmatprep.subr.bf16.mxu1 %v1928_v56  ;;  %v83_v17 = vld [vmem:[%s4272_s1 + $0x1b0] sm:$0xff]  ;;  %v90_v19 = vld [vmem:[%s4272_s1 + $0x1e8] sm:$0xff]  ;;  %v92_v21 = vld [vmem:[%s4272_s1 + $0x1f8] sm:$0xff] }
  0x15   :  { %v1938_v23 = vpack.c.bf16 %v83_v17, %v79_v15  ;;  %v1652_v24 = vpack.c.bf16 %v90_v19, %v86_v18  ;;  %v85_v25 = vld [vmem:[%s4272_s1 + $0x1c0] sm:$0xff]  ;;  %v87_v27 = vld [vmem:[%s4272_s1 + $0x1d0] sm:$0xff]  ;;  %v1940_v28 = vpack.c.bf16 %v92_v21, %v88_v20  ;;  %v94_v30 = vld [vmem:[%s4272_s1 + $0x208] sm:$0xff] }
  0x16   :  { %1643 = vmatpush1.bf16.msra.mxu0 %v1642_v62  ;;  %v89_v26 = vld [vmem:[%s4272_s1 + $0x1e0] sm:$0xff]  ;;  %v91_v29 = vld [vmem:[%s4272_s1 + $0x1f0] sm:$0xff]  ;;  %v98_v31 = vld [vmem:[%s4272_s1 + $0x228] sm:$0xff] }
  0x17   :  { %1931 = vmatpush1.bf16.msra.mxu1 %v1930_v63  ;;  %1645 = vmatprep.subr.bf16.mxu0 %v1644_v0  ;;  %v96_v32 = vld [vmem:[%s4272_s1 + $0x218] sm:$0xff]  ;;  %v1654_v34 = vpack.c.bf16 %v89_v26, %v85_v25  ;;  %v1942_v35 = vpack.c.bf16 %v91_v29, %v87_v27  ;;  %v1656_v36 = vpack.c.bf16 %v98_v31, %v94_v30  ;;  %v93_v37 = vld [vmem:[%s4272_s1 + $0x200] sm:$0xff]  ;;  %v95_v39 = vld [vmem:[%s4272_s1 + $0x210] sm:$0xff] }
  0x18   :  { %1933 = vmatprep.subr.bf16.mxu1 %v1932_v4  ;;  %v100_v33 = vld [vmem:[%s4272_s1 + $0x238] sm:$0xff]  ;;  %v97_v38 = vld [vmem:[%s4272_s1 + $0x220] sm:$0xff]  ;;  %v99_v41 = vld [vmem:[%s4272_s1 + $0x230] sm:$0xff] }
  0x19   :  { %v1944_v40 = vpack.c.bf16 %v100_v33, %v96_v32  ;;  %v102_v42 = vld [vmem:[%s4272_s1 + $0x248] sm:$0xff]  ;;  %v104_v44 = vld [vmem:[%s4272_s1 + $0x258] sm:$0xff]  ;;  %v1658_v46 = vpack.c.bf16 %v97_v38, %v93_v37  ;;  %v1946_v47 = vpack.c.bf16 %v99_v41, %v95_v39  ;;  %v101_v49 = vld [vmem:[%s4272_s1 + $0x240] sm:$0xff] }
  0x1a   :  { %1647 = vmatpush1.bf16.msra.mxu0 %v1646_v10  ;;  %v106_v43 = vld [vmem:[%s4272_s1 + $0x268] sm:$0xff]  ;;  %v108_v45 = vld [vmem:[%s4272_s1 + $0x278] sm:$0xff]  ;;  %v105_v50 = vld [vmem:[%s4272_s1 + $0x260] sm:$0xff] }
  0x1b   :  { %1935 = vmatpush1.bf16.msra.mxu1 %v1934_v11  ;;  %1649 = vmatprep.subr.bf16.mxu0 %v1648_v12  ;;  %v1660_v48 = vpack.c.bf16 %v106_v43, %v102_v42  ;;  %v103_v51 = vld [vmem:[%s4272_s1 + $0x250] sm:$0xff]  ;;  %v1948_v52 = vpack.c.bf16 %v108_v45, %v104_v44  ;;  %v110_v54 = vld [vmem:[%s4272_s1 + $0x288] sm:$0xff]  ;;  %v112_v56 = vld [vmem:[%s4272_s1 + $0x298] sm:$0xff]  ;;  %v1662_v58 = vpack.c.bf16 %v105_v50, %v101_v49 }
  0x1c   :  { %1937 = vmatprep.subr.bf16.mxu1 %v1936_v16  ;;  %v107_v53 = vld [vmem:[%s4272_s1 + $0x270] sm:$0xff]  ;;  %v114_v55 = vld [vmem:[%s4272_s1 + $0x2a8] sm:$0xff]  ;;  %v116_v57 = vld [vmem:[%s4272_s1 + $0x2b8] sm:$0xff] }
  0x1d   :  { %v1950_v59 = vpack.c.bf16 %v107_v53, %v103_v51  ;;  %v1664_v60 = vpack.c.bf16 %v114_v55, %v110_v54  ;;  %v109_v61 = vld [vmem:[%s4272_s1 + $0x280] sm:$0xff]  ;;  %v111_v63 = vld [vmem:[%s4272_s1 + $0x290] sm:$0xff]  ;;  %v1952_v0 = vpack.c.bf16 %v116_v57, %v112_v56  ;;  %v118_v2 = vld [vmem:[%s4272_s1 + $0x2c8] sm:$0xff] }
  0x1e   :  { %1651 = vmatpush1.bf16.msra.mxu0 %v1650_v22  ;;  %v113_v62 = vld [vmem:[%s4272_s1 + $0x2a0] sm:$0xff]  ;;  %v115_v1 = vld [vmem:[%s4272_s1 + $0x2b0] sm:$0xff]  ;;  %v122_v3 = vld [vmem:[%s4272_s1 + $0x2e8] sm:$0xff] }
  0x1f   :  { %1939 = vmatpush1.bf16.msra.mxu1 %v1938_v23  ;;  %1653 = vmatprep.subr.bf16.mxu0 %v1652_v24  ;;  %v120_v4 = vld [vmem:[%s4272_s1 + $0x2d8] sm:$0xff]  ;;  %v1666_v6 = vpack.c.bf16 %v113_v62, %v109_v61  ;;  %v117_v7 = vld [vmem:[%s4272_s1 + $0x2c0] sm:$0xff]  ;;  %v1954_v8 = vpack.c.bf16 %v115_v1, %v111_v63  ;;  %v1668_v9 = vpack.c.bf16 %v122_v3, %v118_v2  ;;  %v119_v11 = vld [vmem:[%s4272_s1 + $0x2d0] sm:$0xff] }
  0x20   :  { %1941 = vmatprep.subr.bf16.mxu1 %v1940_v28  ;;  %v124_v5 = vld [vmem:[%s4272_s1 + $0x2f8] sm:$0xff]  ;;  %v121_v10 = vld [vmem:[%s4272_s1 + $0x2e0] sm:$0xff]  ;;  %v123_v12 = vld [vmem:[%s4272_s1 + $0x2f0] sm:$0xff] }
  0x21   :  { %v1956_v13 = vpack.c.bf16 %v124_v5, %v120_v4  ;;  %v126_v14 = vld [vmem:[%s4272_s1 + $0x308] sm:$0xff]  ;;  %v128_v17 = vld [vmem:[%s4272_s1 + $0x318] sm:$0xff]  ;;  %v1670_v19 = vpack.c.bf16 %v121_v10, %v117_v7  ;;  %v1958_v20 = vpack.c.bf16 %v123_v12, %v119_v11  ;;  %v125_v22 = vld [vmem:[%s4272_s1 + $0x300] sm:$0xff] }
  0x22   :  { %1655 = vmatpush1.bf16.msra.mxu0 %v1654_v34  ;;  %v130_v15 = vld [vmem:[%s4272_s1 + $0x328] sm:$0xff]  ;;  %v132_v18 = vld [vmem:[%s4272_s1 + $0x338] sm:$0xff]  ;;  %v129_v23 = vld [vmem:[%s4272_s1 + $0x320] sm:$0xff] }
  0x23   :  { %1943 = vmatpush1.bf16.msra.mxu1 %v1942_v35  ;;  %1657 = vmatprep.subr.bf16.mxu0 %v1656_v36  ;;  %v21_v16 = vld [vmem:[%s4273_s0 + $0x8] sm:$0xff]  ;;  %v1672_v21 = vpack.c.bf16 %v130_v15, %v126_v14  ;;  %v127_v24 = vld [vmem:[%s4272_s1 + $0x310] sm:$0xff]  ;;  %v1960_v25 = vpack.c.bf16 %v132_v18, %v128_v17  ;;  %v136_v29 = vld [vmem:[%s4272_s1 + $0x358] sm:$0xff]  ;;  %v1674_v31 = vpack.c.bf16 %v129_v23, %v125_v22 }
  0x24   :  { %1945 = vmatprep.subr.bf16.mxu1 %v1944_v40  ;;  %691 = vmatprep.mubr.f32.mxu0 %v21_v16  ;;  %v131_v26 = vld [vmem:[%s4272_s1 + $0x330] sm:$0xff]  ;;  %v134_v27 = vld [vmem:[%s4272_s1 + $0x348] sm:$0xff]  ;;  %v140_v30 = vld [vmem:[%s4272_s1 + $0x378] sm:$0xff] }
  0x25   :  { %1046 = vmatprep.mubr.f32.mxu1 %v21_v16  ;;  %v138_v28 = vld [vmem:[%s4272_s1 + $0x368] sm:$0xff]  ;;  %v1962_v32 = vpack.c.bf16 %v131_v26, %v127_v24  ;;  %v133_v34 = vld [vmem:[%s4272_s1 + $0x340] sm:$0xff]  ;;  %v135_v36 = vld [vmem:[%s4272_s1 + $0x350] sm:$0xff]  ;;  %v1964_v37 = vpack.c.bf16 %v140_v30, %v136_v29 }
  0x26   :  { %1659 = vmatpush1.bf16.msra.mxu0 %v1658_v46  ;;  %v1676_v33 = vpack.c.bf16 %v138_v28, %v134_v27  ;;  %v137_v35 = vld [vmem:[%s4272_s1 + $0x360] sm:$0xff]  ;;  %v139_v38 = vld [vmem:[%s4272_s1 + $0x370] sm:$0xff]  ;;  %v142_v39 = vld [vmem:[%s4272_s1 + $0x388] sm:$0xff] }
  0x27   :  { %1947 = vmatpush1.bf16.msra.mxu1 %v1946_v47  ;;  %1661 = vmatprep.subr.bf16.mxu0 %v1660_v48  ;;  %v146_v40 = vld [vmem:[%s4272_s1 + $0x3a8] sm:$0xff]  ;;  %v144_v41 = vld [vmem:[%s4272_s1 + $0x398] sm:$0xff]  ;;  %v1678_v43 = vpack.c.bf16 %v137_v35, %v133_v34  ;;  %v1966_v44 = vpack.c.bf16 %v139_v38, %v135_v36  ;;  %v141_v46 = vld [vmem:[%s4272_s1 + $0x380] sm:$0xff] }
  0x28   :  { %1949 = vmatprep.subr.bf16.mxu1 %v1948_v52  ;;  %v148_v42 = vld [vmem:[%s4272_s1 + $0x3b8] sm:$0xff]  ;;  %v1680_v45 = vpack.c.bf16 %v146_v40, %v142_v39  ;;  %v145_v47 = vld [vmem:[%s4272_s1 + $0x3a0] sm:$0xff]  ;;  %v143_v48 = vld [vmem:[%s4272_s1 + $0x390] sm:$0xff] }
  0x29   :  { %v1968_v49 = vpack.c.bf16 %v148_v42, %v144_v41  ;;  %v147_v50 = vld [vmem:[%s4272_s1 + $0x3b0] sm:$0xff]  ;;  %v150_v51 = vld [vmem:[%s4272_s1 + $0x3c8] sm:$0xff]  ;;  %v152_v53 = vld [vmem:[%s4272_s1 + $0x3d8] sm:$0xff]  ;;  %v1682_v55 = vpack.c.bf16 %v145_v47, %v141_v46 }
  0x2a   :  { %1663 = vmatpush1.bf16.msra.mxu0 %v1662_v58  ;;  %v154_v52 = vld [vmem:[%s4272_s1 + $0x3e8] sm:$0xff]  ;;  %v156_v54 = vld [vmem:[%s4272_s1 + $0x3f8] sm:$0xff]  ;;  %v1970_v56 = vpack.c.bf16 %v147_v50, %v143_v48  ;;  %v149_v58 = vld [vmem:[%s4272_s1 + $0x3c0] sm:$0xff] }
  0x2b   :  { %1951 = vmatpush1.bf16.msra.mxu1 %v1950_v59  ;;  %1665 = vmatprep.subr.bf16.mxu0 %v1664_v60  ;;  %v1684_v57 = vpack.c.bf16 %v154_v52, %v150_v51  ;;  %v153_v59 = vld [vmem:[%s4272_s1 + $0x3e0] sm:$0xff]  ;;  %v151_v60 = vld [vmem:[%s4272_s1 + $0x3d0] sm:$0xff]  ;;  %v1972_v61 = vpack.c.bf16 %v156_v54, %v152_v53  ;;  %v158_v63 = vld [vmem:[%s4272_s1 + $0x408] sm:$0xff] }
  0x2c   :  { %1953 = vmatprep.subr.bf16.mxu1 %v1952_v0  ;;  %v155_v62 = vld [vmem:[%s4272_s1 + $0x3f0] sm:$0xff]  ;;  %v162_v0 = vld [vmem:[%s4272_s1 + $0x428] sm:$0xff]  ;;  %v160_v1 = vld [vmem:[%s4272_s1 + $0x418] sm:$0xff]  ;;  %v1686_v3 = vpack.c.bf16 %v153_v59, %v149_v58 }
  0x2d   :  { %v164_v2 = vld [vmem:[%s4272_s1 + $0x438] sm:$0xff]  ;;  %v1974_v4 = vpack.c.bf16 %v155_v62, %v151_v60  ;;  %v1688_v5 = vpack.c.bf16 %v162_v0, %v158_v63  ;;  %v161_v7 = vld [vmem:[%s4272_s1 + $0x420] sm:$0xff]  ;;  %v163_v10 = vld [vmem:[%s4272_s1 + $0x430] sm:$0xff] }
  0x2e   :  { %1667 = vmatpush1.bf16.msra.mxu0 %v1666_v6  ;;  %v157_v6 = vld [vmem:[%s4272_s1 + $0x400] sm:$0xff]  ;;  %v166_v11 = vld [vmem:[%s4272_s1 + $0x448] sm:$0xff]  ;;  %v172_v14 = vld [vmem:[%s4272_s1 + $0x478] sm:$0xff] }
  0x2f   :  { %1955 = vmatpush1.bf16.msra.mxu1 %v1954_v8  ;;  %1669 = vmatprep.subr.bf16.mxu0 %v1668_v9  ;;  %v159_v8 = vld [vmem:[%s4272_s1 + $0x410] sm:$0xff]  ;;  %v1976_v9 = vpack.c.bf16 %v164_v2, %v160_v1  ;;  %v170_v12 = vld [vmem:[%s4272_s1 + $0x468] sm:$0xff]  ;;  %v20_v15 = vld [vmem:[%s4273_s0] sm:$0xff]  ;;  %v1690_v16 = vpack.c.bf16 %v161_v7, %v157_v6 }
  0x30   :  { %1957 = vmatprep.subr.bf16.mxu1 %v1956_v13  ;;  %v168_v13 = vld [vmem:[%s4272_s1 + $0x458] sm:$0xff]  ;;  %v1978_v17 = vpack.c.bf16 %v163_v10, %v159_v8  ;;  %v1692_v18 = vpack.c.bf16 %v170_v12, %v166_v11  ;;  %v171_v23 = vld [vmem:[%s4272_s1 + $0x470] sm:$0xff]  ;;  %v174_v24 = vld [vmem:[%s4272_s1 + $0x488] sm:$0xff] }
  0x31   :  { %v1980_v22 = vpack.c.bf16 %v172_v14, %v168_v13  ;;  %v176_v26 = vld [vmem:[%s4272_s1 + $0x498] sm:$0xff]  ;;  %v179_v35 = vld [vmem:[%s4272_s1 + $0x4b0] sm:$0xff]  ;;  %v182_v36 = vld [vmem:[%s4272_s1 + $0x4c8] sm:$0xff] }
  0x32   :  { %1671 = vmatpush1.bf16.msra.mxu0 %v1670_v19  ;;  %v165_v19 = vld [vmem:[%s4272_s1 + $0x440] sm:$0xff]  ;;  %v180_v27 = vld [vmem:[%s4272_s1 + $0x4b8] sm:$0xff]  ;;  %v187_v47 = vld [vmem:[%s4272_s1 + $0x4f0] sm:$0xff] }
  0x33   :  { %1959 = vmatpush1.bf16.msra.mxu1 %v1958_v20  ;;  %1673 = vmatprep.subr.bf16.mxu0 %v1672_v21  ;;  %v169_v20 = vld [vmem:[%s4272_s1 + $0x460] sm:$0xff]  ;;  %v167_v21 = vld [vmem:[%s4272_s1 + $0x450] sm:$0xff]  ;;  %v1984_v34 = vpack.c.bf16 %v180_v27, %v176_v26  ;;  %v184_v38 = vld [vmem:[%s4272_s1 + $0x4d8] sm:$0xff] }
  0x34   :  { %1961 = vmatprep.subr.bf16.mxu1 %v1960_v25  ;;  %v178_v25 = vld [vmem:[%s4272_s1 + $0x4a8] sm:$0xff]  ;;  %v1694_v28 = vpack.c.bf16 %v169_v20, %v165_v19  ;;  %v1982_v29 = vpack.c.bf16 %v171_v23, %v167_v21  ;;  %v188_v39 = vld [vmem:[%s4272_s1 + $0x4f8] sm:$0xff]  ;;  %v195_v59 = vld [vmem:[%s4272_s1 + $0x530] sm:$0xff] }
  0x35   :  { %v1696_v30 = vpack.c.bf16 %v178_v25, %v174_v24  ;;  %v1988_v46 = vpack.c.bf16 %v188_v39, %v184_v38  ;;  %v190_v48 = vld [vmem:[%s4272_s1 + $0x508] sm:$0xff]  ;;  %v192_v50 = vld [vmem:[%s4272_s1 + $0x518] sm:$0xff]  ;;  %v203_v7 = vld [vmem:[%s4272_s1 + $0x570] sm:$0xff] }
  0x36   :  { %1675 = vmatpush1.bf16.msra.mxu0 %v1674_v31  ;;  %v173_v31 = vld [vmem:[%s4272_s1 + $0x480] sm:$0xff]  ;;  %v196_v51 = vld [vmem:[%s4272_s1 + $0x538] sm:$0xff]  ;;  %v198_v60 = vld [vmem:[%s4272_s1 + $0x548] sm:$0xff] }
  0x37   :  { %1963 = vmatpush1.bf16.msra.mxu1 %v1962_v32  ;;  %1677 = vmatprep.subr.bf16.mxu0 %v1676_v33  ;;  %v177_v32 = vld [vmem:[%s4272_s1 + $0x4a0] sm:$0xff]  ;;  %v175_v33 = vld [vmem:[%s4272_s1 + $0x490] sm:$0xff]  ;;  %v1992_v58 = vpack.c.bf16 %v196_v51, %v192_v50  ;;  %v200_v62 = vld [vmem:[%s4272_s1 + $0x558] sm:$0xff] }
  0x38   :  { %1965 = vmatprep.subr.bf16.mxu1 %v1964_v37  ;;  %v186_v37 = vld [vmem:[%s4272_s1 + $0x4e8] sm:$0xff]  ;;  %v1698_v40 = vpack.c.bf16 %v177_v32, %v173_v31  ;;  %v1986_v41 = vpack.c.bf16 %v179_v35, %v175_v33  ;;  %v204_v63 = vld [vmem:[%s4272_s1 + $0x578] sm:$0xff]  ;;  %v205_v13 = vld [vmem:[%s4272_s1 + $0x580] sm:$0xff] }
  0x39   :  { %v1700_v42 = vpack.c.bf16 %v186_v37, %v182_v36  ;;  %v1996_v6 = vpack.c.bf16 %v204_v63, %v200_v62  ;;  %v206_v8 = vld [vmem:[%s4272_s1 + $0x588] sm:$0xff]  ;;  %v208_v10 = vld [vmem:[%s4272_s1 + $0x598] sm:$0xff]  ;;  %v219_v32 = vld [vmem:[%s4272_s1 + $0x5f0] sm:$0xff] }
  0x3a   :  { %1679 = vmatpush1.bf16.msra.mxu0 %v1678_v43  ;;  %v181_v43 = vld [vmem:[%s4272_s1 + $0x4c0] sm:$0xff]  ;;  %v212_v11 = vld [vmem:[%s4272_s1 + $0x5b8] sm:$0xff]  ;;  %v214_v20 = vld [vmem:[%s4272_s1 + $0x5c8] sm:$0xff] }
  0x3b   :  { %1967 = vmatpush1.bf16.msra.mxu1 %v1966_v44  ;;  %1681 = vmatprep.subr.bf16.mxu0 %v1680_v45  ;;  %v185_v44 = vld [vmem:[%s4272_s1 + $0x4e0] sm:$0xff]  ;;  %v183_v45 = vld [vmem:[%s4272_s1 + $0x4d0] sm:$0xff]  ;;  %v2000_v19 = vpack.c.bf16 %v212_v11, %v208_v10  ;;  %v218_v21 = vld [vmem:[%s4272_s1 + $0x5e8] sm:$0xff] }
  0x3c   :  { %1969 = vmatprep.subr.bf16.mxu1 %v1968_v49  ;;  %v194_v49 = vld [vmem:[%s4272_s1 + $0x528] sm:$0xff]  ;;  %v1702_v52 = vpack.c.bf16 %v185_v44, %v181_v43  ;;  %v1990_v53 = vpack.c.bf16 %v187_v47, %v183_v45  ;;  %v216_v23 = vld [vmem:[%s4272_s1 + $0x5d8] sm:$0xff]  ;;  %v1716_v27 = vpack.c.bf16 %v218_v21, %v214_v20  ;;  %v227_v44 = vld [vmem:[%s4272_s1 + $0x630] sm:$0xff] }
  0x3d   :  { %v1704_v54 = vpack.c.bf16 %v194_v49, %v190_v48  ;;  %v220_v24 = vld [vmem:[%s4272_s1 + $0x5f8] sm:$0xff]  ;;  %v222_v33 = vld [vmem:[%s4272_s1 + $0x608] sm:$0xff] }
  0x3e   :  { %1683 = vmatpush1.bf16.msra.mxu0 %v1682_v55  ;;  %v189_v55 = vld [vmem:[%s4272_s1 + $0x500] sm:$0xff]  ;;  %v2004_v31 = vpack.c.bf16 %v220_v24, %v216_v23  ;;  %v224_v35 = vld [vmem:[%s4272_s1 + $0x618] sm:$0xff]  ;;  %v230_v45 = vld [vmem:[%s4272_s1 + $0x648] sm:$0xff] }
  0x3f   :  { %1971 = vmatpush1.bf16.msra.mxu1 %v1970_v56  ;;  %1685 = vmatprep.subr.bf16.mxu0 %v1684_v57  ;;  %v193_v56 = vld [vmem:[%s4272_s1 + $0x520] sm:$0xff]  ;;  %v191_v57 = vld [vmem:[%s4272_s1 + $0x510] sm:$0xff]  ;;  %v228_v36 = vld [vmem:[%s4272_s1 + $0x638] sm:$0xff] }
  0x40   :  { %1973 = vmatprep.subr.bf16.mxu1 %v1972_v61  ;;  %v202_v61 = vld [vmem:[%s4272_s1 + $0x568] sm:$0xff]  ;;  %v1706_v0 = vpack.c.bf16 %v193_v56, %v189_v55  ;;  %v1994_v1 = vpack.c.bf16 %v195_v59, %v191_v57  ;;  %v2008_v43 = vpack.c.bf16 %v228_v36, %v224_v35  ;;  %v232_v47 = vld [vmem:[%s4272_s1 + $0x658] sm:$0xff]  ;;  %v235_v56 = vld [vmem:[%s4272_s1 + $0x670] sm:$0xff] }
  0x41   :  { %v1708_v2 = vpack.c.bf16 %v202_v61, %v198_v60  ;;  %v236_v48 = vld [vmem:[%s4272_s1 + $0x678] sm:$0xff]  ;;  %v238_v57 = vld [vmem:[%s4272_s1 + $0x688] sm:$0xff]  ;;  %v253_v24 = vld [vmem:[%s4272_s1 + $0x700] sm:$0xff] }
  0x42   :  { %1687 = vmatpush1.bf16.msra.mxu0 %v1686_v3  ;;  %v197_v3 = vld [vmem:[%s4272_s1 + $0x540] sm:$0xff]  ;;  %v2012_v55 = vpack.c.bf16 %v236_v48, %v232_v47  ;;  %v240_v59 = vld [vmem:[%s4272_s1 + $0x698] sm:$0xff] }
  0x43   :  { %1975 = vmatpush1.bf16.msra.mxu1 %v1974_v4  ;;  %1689 = vmatprep.subr.bf16.mxu0 %v1688_v5  ;;  %v201_v4 = vld [vmem:[%s4272_s1 + $0x560] sm:$0xff]  ;;  %v199_v5 = vld [vmem:[%s4272_s1 + $0x550] sm:$0xff]  ;;  %v244_v60 = vld [vmem:[%s4272_s1 + $0x6b8] sm:$0xff] }
  0x44   :  { %1977 = vmatprep.subr.bf16.mxu1 %v1976_v9  ;;  %v210_v9 = vld [vmem:[%s4272_s1 + $0x5a8] sm:$0xff]  ;;  %v1710_v12 = vpack.c.bf16 %v201_v4, %v197_v3  ;;  %v1998_v14 = vpack.c.bf16 %v203_v7, %v199_v5  ;;  %v2016_v3 = vpack.c.bf16 %v244_v60, %v240_v59  ;;  %v243_v4 = vld [vmem:[%s4272_s1 + $0x6b0] sm:$0xff]  ;;  %v248_v7 = vld [vmem:[%s4272_s1 + $0x6d8] sm:$0xff] }
  0x45   :  { %692 = vmatmul.mubr.f32.vlgmr.msra.gmra.mrb[0].mxu0 %v20_v15  ;;  %v246_v5 = vld [vmem:[%s4272_s1 + $0x6c8] sm:$0xff]  ;;  %v260_v20 = vld [vmem:[%s4272_s1 + $0x738] sm:$0xff]  ;;  %v261_v36 = vld [vmem:[%s4272_s1 + $0x740] sm:$0xff] }
  0x46   :  { %1691 = vmatpush1.bf16.msra.mxu0 %v1690_v16  ;;  %1047 = vmatmul.mubr.f32.vlgmr.msra.gmra.mrb[0].mxu1 %v20_v15  ;;  %v1712_v15 = vpack.c.bf16 %v210_v9, %v206_v8  ;;  %v209_v16 = vld [vmem:[%s4272_s1 + $0x5a0] sm:$0xff]  ;;  %v252_v8 = vld [vmem:[%s4272_s1 + $0x6f8] sm:$0xff] }
  0x47   :  { %1979 = vmatpush1.bf16.msra.mxu1 %v1978_v17  ;;  %1693 = vmatprep.subr.bf16.mxu0 %v1692_v18  ;;  %v207_v17 = vld [vmem:[%s4272_s1 + $0x590] sm:$0xff]  ;;  %v1714_v25 = vpack.c.bf16 %v209_v16, %v205_v13  ;;  %v249_v13 = vld [vmem:[%s4272_s1 + $0x6e0] sm:$0xff] }
  0x48   :  { %1981 = vmatprep.subr.bf16.mxu1 %v1980_v22  ;;  %v211_v18 = vld [vmem:[%s4272_s1 + $0x5b0] sm:$0xff]  ;;  %v23_v22 = vld [vmem:[%s4273_s0 + $0x18] sm:$0xff]  ;;  %v269_v48 = vld [vmem:[%s4272_s1 + $0x780] sm:$0xff] }
  0x49   :  { %762 = vmatprep.mubr.f32.mxu0 %v23_v22  ;;  %1117 = vmatprep.mubr.f32.mxu1 %v23_v22  ;;  %v2002_v26 = vpack.c.bf16 %v211_v18, %v207_v17  ;;  %v251_v16 = vld [vmem:[%s4272_s1 + $0x6f0] sm:$0xff]  ;;  %v254_v17 = vld [vmem:[%s4272_s1 + $0x708] sm:$0xff]  ;;  %v277_v60 = vld [vmem:[%s4272_s1 + $0x7c0] sm:$0xff] }
  0x4a   :  { %1695 = vmatpush1.bf16.msra.mxu0 %v1694_v28  ;;  %v213_v28 = vld [vmem:[%s4272_s1 + $0x5c0] sm:$0xff]  ;;  %v258_v18 = vld [vmem:[%s4272_s1 + $0x728] sm:$0xff] }
  0x4b   :  { %1983 = vmatpush1.bf16.msra.mxu1 %v1982_v29  ;;  %1697 = vmatprep.subr.bf16.mxu0 %v1696_v30  ;;  %v217_v29 = vld [vmem:[%s4272_s1 + $0x5e0] sm:$0xff]  ;;  %v215_v30 = vld [vmem:[%s4272_s1 + $0x5d0] sm:$0xff]  ;;  %v1736_v23 = vpack.c.bf16 %v258_v18, %v254_v17 }
  0x4c   :  { %1985 = vmatprep.subr.bf16.mxu1 %v1984_v34  ;;  %v226_v34 = vld [vmem:[%s4272_s1 + $0x628] sm:$0xff]  ;;  %v1718_v37 = vpack.c.bf16 %v217_v29, %v213_v28  ;;  %v2006_v38 = vpack.c.bf16 %v219_v32, %v215_v30  ;;  %v259_v28 = vld [vmem:[%s4272_s1 + $0x730] sm:$0xff]  ;;  %v268_v32 = vld [vmem:[%s4272_s1 + $0x778] sm:$0xff] }
  0x4d   :  { %v1720_v39 = vpack.c.bf16 %v226_v34, %v222_v33  ;;  %v262_v29 = vld [vmem:[%s4272_s1 + $0x748] sm:$0xff]  ;;  %v22_v17 = vld [vmem:[%s4273_s0 + $0x10] sm:$0xff] }
  0x4e   :  { %1699 = vmatpush1.bf16.msra.mxu0 %v1698_v40  ;;  %v221_v40 = vld [vmem:[%s4272_s1 + $0x600] sm:$0xff]  ;;  %v266_v30 = vld [vmem:[%s4272_s1 + $0x768] sm:$0xff] }
  0x4f   :  { %1987 = vmatpush1.bf16.msra.mxu1 %v1986_v41  ;;  %1701 = vmatprep.subr.bf16.mxu0 %v1700_v42  ;;  %v225_v41 = vld [vmem:[%s4272_s1 + $0x620] sm:$0xff]  ;;  %v223_v42 = vld [vmem:[%s4272_s1 + $0x610] sm:$0xff]  ;;  %v1740_v35 = vpack.c.bf16 %v266_v30, %v262_v29  ;;  %v308_v29 = vld [vmem:[%s4272_s1 + $0x8b8] sm:$0xff] }
  0x50   :  { %1989 = vmatprep.subr.bf16.mxu1 %v1988_v46  ;;  %v234_v46 = vld [vmem:[%s4272_s1 + $0x668] sm:$0xff]  ;;  %v1722_v49 = vpack.c.bf16 %v225_v41, %v221_v40  ;;  %v2010_v50 = vpack.c.bf16 %v227_v44, %v223_v42  ;;  %v267_v40 = vld [vmem:[%s4272_s1 + $0x770] sm:$0xff]  ;;  %v276_v44 = vld [vmem:[%s4272_s1 + $0x7b8] sm:$0xff] }
  0x51   :  { %v1724_v51 = vpack.c.bf16 %v234_v46, %v230_v45  ;;  %v270_v41 = vld [vmem:[%s4272_s1 + $0x788] sm:$0xff] }
  0x52   :  { %1703 = vmatpush1.bf16.msra.mxu0 %v1702_v52  ;;  %v229_v52 = vld [vmem:[%s4272_s1 + $0x640] sm:$0xff]  ;;  %v274_v42 = vld [vmem:[%s4272_s1 + $0x7a8] sm:$0xff] }
  0x53   :  { %1991 = vmatpush1.bf16.msra.mxu1 %v1990_v53  ;;  %1705 = vmatprep.subr.bf16.mxu0 %v1704_v54  ;;  %v233_v53 = vld [vmem:[%s4272_s1 + $0x660] sm:$0xff]  ;;  %v231_v54 = vld [vmem:[%s4272_s1 + $0x650] sm:$0xff]  ;;  %v1744_v47 = vpack.c.bf16 %v274_v42, %v270_v41  ;;  %v25_v30 = vld [vmem:[%s4273_s0 + $0x28] sm:$0xff] }
  0x54   :  { %1993 = vmatprep.subr.bf16.mxu1 %v1992_v58  ;;  %v242_v58 = vld [vmem:[%s4272_s1 + $0x6a8] sm:$0xff]  ;;  %v1726_v61 = vpack.c.bf16 %v233_v53, %v229_v52  ;;  %v2014_v62 = vpack.c.bf16 %v235_v56, %v231_v54  ;;  %v275_v52 = vld [vmem:[%s4272_s1 + $0x7b0] sm:$0xff]  ;;  %v284_v56 = vld [vmem:[%s4272_s1 + $0x7f8] sm:$0xff] }
  0x55   :  { %v1728_v63 = vpack.c.bf16 %v242_v58, %v238_v57  ;;  %v278_v53 = vld [vmem:[%s4272_s1 + $0x7c8] sm:$0xff]  ;;  %v312_v41 = vld [vmem:[%s4272_s1 + $0x8d8] sm:$0xff] }
  0x56   :  { %1707 = vmatpush1.bf16.msra.mxu0 %v1706_v0  ;;  %v237_v0 = vld [vmem:[%s4272_s1 + $0x680] sm:$0xff]  ;;  %v282_v54 = vld [vmem:[%s4272_s1 + $0x7e8] sm:$0xff]  ;;  %v316_v42 = vld [vmem:[%s4272_s1 + $0x8f8] sm:$0xff] }
  0x57   :  { %1995 = vmatpush1.bf16.msra.mxu1 %v1994_v1  ;;  %1709 = vmatprep.subr.bf16.mxu0 %v1708_v2  ;;  %v241_v1 = vld [vmem:[%s4272_s1 + $0x6a0] sm:$0xff]  ;;  %v239_v2 = vld [vmem:[%s4272_s1 + $0x690] sm:$0xff]  ;;  %v1748_v59 = vpack.c.bf16 %v282_v54, %v278_v53  ;;  %v320_v53 = vld [vmem:[%s4272_s1 + $0x918] sm:$0xff] }
  0x58   :  { %1997 = vmatprep.subr.bf16.mxu1 %v1996_v6  ;;  %v250_v6 = vld [vmem:[%s4272_s1 + $0x6e8] sm:$0xff]  ;;  %v1730_v9 = vpack.c.bf16 %v241_v1, %v237_v0  ;;  %v2018_v10 = vpack.c.bf16 %v243_v4, %v239_v2  ;;  %v283_v0 = vld [vmem:[%s4272_s1 + $0x7f0] sm:$0xff]  ;;  %v292_v4 = vld [vmem:[%s4272_s1 + $0x838] sm:$0xff] }
  0x59   :  { %v1732_v11 = vpack.c.bf16 %v250_v6, %v246_v5  ;;  %v286_v1 = vld [vmem:[%s4272_s1 + $0x808] sm:$0xff]  ;;  %v324_v54 = vld [vmem:[%s4272_s1 + $0x938] sm:$0xff] }
  0x5a   :  { %1711 = vmatpush1.bf16.msra.mxu0 %v1710_v12  ;;  %v245_v12 = vld [vmem:[%s4272_s1 + $0x6c0] sm:$0xff]  ;;  %v290_v2 = vld [vmem:[%s4272_s1 + $0x828] sm:$0xff] }
  0x5b   :  { %1999 = vmatpush1.bf16.msra.mxu1 %v1998_v14  ;;  %1713 = vmatprep.subr.bf16.mxu0 %v1712_v15  ;;  %v247_v14 = vld [vmem:[%s4272_s1 + $0x6d0] sm:$0xff]  ;;  %v2020_v15 = vpack.c.bf16 %v252_v8, %v248_v7  ;;  %v1734_v21 = vpack.c.bf16 %v249_v13, %v245_v12  ;;  %v1752_v7 = vpack.c.bf16 %v290_v2, %v286_v1  ;;  %v285_v8 = vld [vmem:[%s4272_s1 + $0x800] sm:$0xff]  ;;  %v294_v13 = vld [vmem:[%s4272_s1 + $0x848] sm:$0xff] }
  0x5c   :  { %2001 = vmatprep.subr.bf16.mxu1 %v2000_v19  ;;  %v256_v19 = vld [vmem:[%s4272_s1 + $0x718] sm:$0xff]  ;;  %v2022_v22 = vpack.c.bf16 %v251_v16, %v247_v14  ;;  %v291_v12 = vld [vmem:[%s4272_s1 + $0x830] sm:$0xff]  ;;  %v298_v14 = vld [vmem:[%s4272_s1 + $0x868] sm:$0xff] }
  0x5d   :  { %v300_v16 = vld [vmem:[%s4272_s1 + $0x878] sm:$0xff] }
  0x5e   :  { %1715 = vmatpush1.bf16.msra.mxu0 %v1714_v25  ;;  %v257_v25 = vld [vmem:[%s4272_s1 + $0x720] sm:$0xff]  ;;  %v328_v1 = vld [vmem:[%s4272_s1 + $0x958] sm:$0xff] }
  0x5f   :  { %2003 = vmatpush1.bf16.msra.mxu1 %v2002_v26  ;;  %1717 = vmatprep.subr.bf16.mxu0 %v1716_v27  ;;  %v255_v26 = vld [vmem:[%s4272_s1 + $0x710] sm:$0xff]  ;;  %v2024_v27 = vpack.c.bf16 %v260_v20, %v256_v19  ;;  %v1738_v33 = vpack.c.bf16 %v257_v25, %v253_v24  ;;  %v1756_v20 = vpack.c.bf16 %v298_v14, %v294_v13  ;;  %v332_v2 = vld [vmem:[%s4272_s1 + $0x978] sm:$0xff] }
  0x60   :  { %2005 = vmatprep.subr.bf16.mxu1 %v2004_v31  ;;  %v264_v31 = vld [vmem:[%s4272_s1 + $0x758] sm:$0xff]  ;;  %v2026_v34 = vpack.c.bf16 %v259_v28, %v255_v26  ;;  %v299_v25 = vld [vmem:[%s4272_s1 + $0x870] sm:$0xff]  ;;  %v302_v26 = vld [vmem:[%s4272_s1 + $0x888] sm:$0xff] }
  0x61   :  { %v304_v28 = vld [vmem:[%s4272_s1 + $0x898] sm:$0xff] }
  0x62   :  { %1719 = vmatpush1.bf16.msra.mxu0 %v1718_v37  ;;  %v265_v37 = vld [vmem:[%s4272_s1 + $0x760] sm:$0xff]  ;;  %v336_v13 = vld [vmem:[%s4272_s1 + $0x998] sm:$0xff] }
  0x63   :  { %2007 = vmatpush1.bf16.msra.mxu1 %v2006_v38  ;;  %1721 = vmatprep.subr.bf16.mxu0 %v1720_v39  ;;  %v263_v38 = vld [vmem:[%s4272_s1 + $0x750] sm:$0xff]  ;;  %v2028_v39 = vpack.c.bf16 %v268_v32, %v264_v31  ;;  %v1742_v45 = vpack.c.bf16 %v265_v37, %v261_v36  ;;  %v2048_v37 = vpack.c.bf16 %v308_v29, %v304_v28  ;;  %v340_v14 = vld [vmem:[%s4272_s1 + $0x9b8] sm:$0xff] }
  0x64   :  { %2009 = vmatprep.subr.bf16.mxu1 %v2008_v43  ;;  %v272_v43 = vld [vmem:[%s4272_s1 + $0x798] sm:$0xff]  ;;  %v2030_v46 = vpack.c.bf16 %v267_v40, %v263_v38  ;;  %v303_v36 = vld [vmem:[%s4272_s1 + $0x890] sm:$0xff]  ;;  %v314_v40 = vld [vmem:[%s4272_s1 + $0x8e8] sm:$0xff] }
  0x65   :  { %v307_v38 = vld [vmem:[%s4272_s1 + $0x8b0] sm:$0xff] }
  0x66   :  { %1723 = vmatpush1.bf16.msra.mxu0 %v1722_v49  ;;  %v273_v49 = vld [vmem:[%s4272_s1 + $0x7a0] sm:$0xff] }
  0x67   :  { %2011 = vmatpush1.bf16.msra.mxu1 %v2010_v50  ;;  %1725 = vmatprep.subr.bf16.mxu0 %v1724_v51  ;;  %v271_v50 = vld [vmem:[%s4272_s1 + $0x790] sm:$0xff]  ;;  %v2032_v51 = vpack.c.bf16 %v276_v44, %v272_v43  ;;  %v1746_v57 = vpack.c.bf16 %v273_v49, %v269_v48  ;;  %v2050_v44 = vpack.c.bf16 %v307_v38, %v303_v36  ;;  %v354_v36 = vld [vmem:[%s4272_s1 + $0xa28] sm:$0xff]  ;;  %v356_v38 = vld [vmem:[%s4272_s1 + $0xa38] sm:$0xff] }
  0x68   :  { %2013 = vmatprep.subr.bf16.mxu1 %v2012_v55  ;;  %v280_v55 = vld [vmem:[%s4272_s1 + $0x7d8] sm:$0xff]  ;;  %v2034_v58 = vpack.c.bf16 %v275_v52, %v271_v50  ;;  %v311_v48 = vld [vmem:[%s4272_s1 + $0x8d0] sm:$0xff]  ;;  %v2052_v49 = vpack.c.bf16 %v316_v42, %v312_v41  ;;  %v322_v52 = vld [vmem:[%s4272_s1 + $0x928] sm:$0xff] }
  0x69   :  { %v315_v50 = vld [vmem:[%s4272_s1 + $0x8f0] sm:$0xff]  ;;  %v349_v42 = vld [vmem:[%s4272_s1 + $0xa00] sm:$0xff] }
  0x6a   :  { %1727 = vmatpush1.bf16.msra.mxu0 %v1726_v61  ;;  %v281_v61 = vld [vmem:[%s4272_s1 + $0x7e0] sm:$0xff] }
  0x6b   :  { %2015 = vmatpush1.bf16.msra.mxu1 %v2014_v62  ;;  %1729 = vmatprep.subr.bf16.mxu0 %v1728_v63  ;;  %v279_v62 = vld [vmem:[%s4272_s1 + $0x7d0] sm:$0xff]  ;;  %v2036_v63 = vpack.c.bf16 %v284_v56, %v280_v55  ;;  %v1750_v5 = vpack.c.bf16 %v281_v61, %v277_v60  ;;  %v2054_v56 = vpack.c.bf16 %v315_v50, %v311_v48  ;;  %v362_v48 = vld [vmem:[%s4272_s1 + $0xa68] sm:$0xff]  ;;  %v364_v50 = vld [vmem:[%s4272_s1 + $0xa78] sm:$0xff] }
  0x6c   :  { %2017 = vmatprep.subr.bf16.mxu1 %v2016_v3  ;;  %v288_v3 = vld [vmem:[%s4272_s1 + $0x818] sm:$0xff]  ;;  %v2038_v6 = vpack.c.bf16 %v283_v0, %v279_v62  ;;  %v319_v60 = vld [vmem:[%s4272_s1 + $0x910] sm:$0xff]  ;;  %v2056_v61 = vpack.c.bf16 %v324_v54, %v320_v53  ;;  %v330_v0 = vld [vmem:[%s4272_s1 + $0x968] sm:$0xff] }
  0x6d   :  { %v323_v62 = vld [vmem:[%s4272_s1 + $0x930] sm:$0xff]  ;;  %v357_v54 = vld [vmem:[%s4272_s1 + $0xa40] sm:$0xff] }
  0x6e   :  { %1731 = vmatpush1.bf16.msra.mxu0 %v1730_v9  ;;  %v289_v9 = vld [vmem:[%s4272_s1 + $0x820] sm:$0xff] }
  0x6f   :  { %2019 = vmatpush1.bf16.msra.mxu1 %v2018_v10  ;;  %1733 = vmatprep.subr.bf16.mxu0 %v1732_v11  ;;  %v287_v10 = vld [vmem:[%s4272_s1 + $0x810] sm:$0xff]  ;;  %v2040_v11 = vpack.c.bf16 %v292_v4, %v288_v3  ;;  %v1754_v18 = vpack.c.bf16 %v289_v9, %v285_v8  ;;  %v2058_v4 = vpack.c.bf16 %v323_v62, %v319_v60  ;;  %v370_v60 = vld [vmem:[%s4272_s1 + $0xaa8] sm:$0xff]  ;;  %v372_v62 = vld [vmem:[%s4272_s1 + $0xab8] sm:$0xff] }
  0x70   :  { %2021 = vmatprep.subr.bf16.mxu1 %v2020_v15  ;;  %v296_v15 = vld [vmem:[%s4272_s1 + $0x858] sm:$0xff]  ;;  %v2042_v19 = vpack.c.bf16 %v291_v12, %v287_v10  ;;  %v327_v8 = vld [vmem:[%s4272_s1 + $0x950] sm:$0xff]  ;;  %v2060_v9 = vpack.c.bf16 %v332_v2, %v328_v1  ;;  %v338_v12 = vld [vmem:[%s4272_s1 + $0x9a8] sm:$0xff] }
  0x71   :  { %v2044_v24 = vpack.c.bf16 %v300_v16, %v296_v15  ;;  %v331_v10 = vld [vmem:[%s4272_s1 + $0x970] sm:$0xff]  ;;  %v365_v2 = vld [vmem:[%s4272_s1 + $0xa80] sm:$0xff] }
  0x72   :  { %1735 = vmatpush1.bf16.msra.mxu0 %v1734_v21  ;;  %v293_v21 = vld [vmem:[%s4272_s1 + $0x840] sm:$0xff]  ;;  %v2062_v16 = vpack.c.bf16 %v331_v10, %v327_v8  ;;  %v378_v8 = vld [vmem:[%s4272_s1 + $0xae8] sm:$0xff]  ;;  %v380_v10 = vld [vmem:[%s4272_s1 + $0xaf8] sm:$0xff] }
  0x73   :  { %2023 = vmatpush1.bf16.msra.mxu1 %v2022_v22  ;;  %1737 = vmatprep.subr.bf16.mxu0 %v1736_v23  ;;  %v297_v22 = vld [vmem:[%s4272_s1 + $0x860] sm:$0xff]  ;;  %v295_v23 = vld [vmem:[%s4272_s1 + $0x850] sm:$0xff] }
  0x74   :  { %2025 = vmatprep.subr.bf16.mxu1 %v2024_v27  ;;  %v306_v27 = vld [vmem:[%s4272_s1 + $0x8a8] sm:$0xff]  ;;  %v1758_v31 = vpack.c.bf16 %v297_v22, %v293_v21  ;;  %v2046_v32 = vpack.c.bf16 %v299_v25, %v295_v23  ;;  %v2064_v21 = vpack.c.bf16 %v340_v14, %v336_v13  ;;  %v339_v22 = vld [vmem:[%s4272_s1 + $0x9b0] sm:$0xff]  ;;  %v344_v25 = vld [vmem:[%s4272_s1 + $0x9d8] sm:$0xff] }
  0x75   :  { %v342_v23 = vld [vmem:[%s4272_s1 + $0x9c8] sm:$0xff]  ;;  %v373_v14 = vld [vmem:[%s4272_s1 + $0xac0] sm:$0xff] }
  0x76   :  { %1739 = vmatpush1.bf16.msra.mxu0 %v1738_v33  ;;  %v1760_v33 = vpack.c.bf16 %v306_v27, %v302_v26  ;;  %v348_v26 = vld [vmem:[%s4272_s1 + $0x9f8] sm:$0xff] }
  0x77   :  { %2027 = vmatpush1.bf16.msra.mxu1 %v2026_v34  ;;  %1741 = vmatprep.subr.bf16.mxu0 %v1740_v35  ;;  %v301_v34 = vld [vmem:[%s4272_s1 + $0x880] sm:$0xff] }
  0x78   :  { %2029 = vmatprep.subr.bf16.mxu1 %v2028_v39  ;;  %v305_v35 = vld [vmem:[%s4272_s1 + $0x8a0] sm:$0xff]  ;;  %v310_v39 = vld [vmem:[%s4272_s1 + $0x8c8] sm:$0xff] }
  0x79   :  { %v1762_v43 = vpack.c.bf16 %v305_v35, %v301_v34  ;;  %v347_v34 = vld [vmem:[%s4272_s1 + $0x9f0] sm:$0xff]  ;;  %v350_v35 = vld [vmem:[%s4272_s1 + $0xa08] sm:$0xff] }
  0x7a   :  { %1743 = vmatpush1.bf16.msra.mxu0 %v1742_v45  ;;  %v1764_v45 = vpack.c.bf16 %v314_v40, %v310_v39  ;;  %v1784_v41 = vpack.c.bf16 %v354_v36, %v350_v35 }
  0x7b   :  { %2031 = vmatpush1.bf16.msra.mxu1 %v2030_v46  ;;  %1745 = vmatprep.subr.bf16.mxu0 %v1744_v47  ;;  %v309_v46 = vld [vmem:[%s4272_s1 + $0x8c0] sm:$0xff] }
  0x7c   :  { %2033 = vmatprep.subr.bf16.mxu1 %v2032_v51  ;;  %v313_v47 = vld [vmem:[%s4272_s1 + $0x8e0] sm:$0xff]  ;;  %v318_v51 = vld [vmem:[%s4272_s1 + $0x908] sm:$0xff] }
  0x7d   :  { %v1766_v55 = vpack.c.bf16 %v313_v47, %v309_v46  ;;  %v355_v46 = vld [vmem:[%s4272_s1 + $0xa30] sm:$0xff]  ;;  %v358_v47 = vld [vmem:[%s4272_s1 + $0xa48] sm:$0xff] }
  0x7e   :  { %1747 = vmatpush1.bf16.msra.mxu0 %v1746_v57  ;;  %v1768_v57 = vpack.c.bf16 %v322_v52, %v318_v51  ;;  %v1788_v53 = vpack.c.bf16 %v362_v48, %v358_v47 }
  0x7f   :  { %2035 = vmatpush1.bf16.msra.mxu1 %v2034_v58  ;;  %1749 = vmatprep.subr.bf16.mxu0 %v1748_v59  ;;  %v317_v58 = vld [vmem:[%s4272_s1 + $0x900] sm:$0xff] }
  0x80   :  { %2037 = vmatprep.subr.bf16.mxu1 %v2036_v63  ;;  %v321_v59 = vld [vmem:[%s4272_s1 + $0x920] sm:$0xff]  ;;  %v326_v63 = vld [vmem:[%s4272_s1 + $0x948] sm:$0xff] }
  0x81   :  { %v1770_v3 = vpack.c.bf16 %v321_v59, %v317_v58  ;;  %v363_v58 = vld [vmem:[%s4272_s1 + $0xa70] sm:$0xff]  ;;  %v366_v59 = vld [vmem:[%s4272_s1 + $0xa88] sm:$0xff] }
  0x82   :  { %1751 = vmatpush1.bf16.msra.mxu0 %v1750_v5  ;;  %v1772_v5 = vpack.c.bf16 %v330_v0, %v326_v63  ;;  %v1792_v1 = vpack.c.bf16 %v370_v60, %v366_v59 }
  0x83   :  { %2039 = vmatpush1.bf16.msra.mxu1 %v2038_v6  ;;  %1753 = vmatprep.subr.bf16.mxu0 %v1752_v7  ;;  %v325_v6 = vld [vmem:[%s4272_s1 + $0x940] sm:$0xff] }
  0x84   :  { %2041 = vmatprep.subr.bf16.mxu1 %v2040_v11  ;;  %v329_v7 = vld [vmem:[%s4272_s1 + $0x960] sm:$0xff]  ;;  %v334_v11 = vld [vmem:[%s4272_s1 + $0x988] sm:$0xff] }
  0x85   :  { %763 = vmatmul.mubr.f32.vlgmr.msra.gmra.mrb[0].mxu0 %v22_v17  ;;  %v1774_v15 = vpack.c.bf16 %v329_v7, %v325_v6  ;;  %v371_v6 = vld [vmem:[%s4272_s1 + $0xab0] sm:$0xff]  ;;  %v374_v7 = vld [vmem:[%s4272_s1 + $0xac8] sm:$0xff] }
  0x86   :  { %1755 = vmatpush1.bf16.msra.mxu0 %v1754_v18  ;;  %1118 = vmatmul.mubr.f32.vlgmr.msra.gmra.mrb[0].mxu1 %v22_v17  ;;  %v1776_v17 = vpack.c.bf16 %v338_v12, %v334_v11  ;;  %v333_v18 = vld [vmem:[%s4272_s1 + $0x980] sm:$0xff]  ;;  %v1796_v13 = vpack.c.bf16 %v378_v8, %v374_v7 }
  0x87   :  { %2043 = vmatpush1.bf16.msra.mxu1 %v2042_v19  ;;  %1757 = vmatprep.subr.bf16.mxu0 %v1756_v20  ;;  %v337_v19 = vld [vmem:[%s4272_s1 + $0x9a0] sm:$0xff]  ;;  %v335_v20 = vld [vmem:[%s4272_s1 + $0x990] sm:$0xff] }
  0x88   :  { %2045 = vmatprep.subr.bf16.mxu1 %v2044_v24  ;;  %833 = vmatprep.mubr.f32.mxu0 %v25_v30  ;;  %v346_v24 = vld [vmem:[%s4272_s1 + $0x9e8] sm:$0xff]  ;;  %v1778_v27 = vpack.c.bf16 %v337_v19, %v333_v18  ;;  %v2066_v28 = vpack.c.bf16 %v339_v22, %v335_v20  ;;  %v379_v18 = vld [vmem:[%s4272_s1 + $0xaf0] sm:$0xff]  ;;  %v388_v22 = vld [vmem:[%s4272_s1 + $0xb38] sm:$0xff] }
  0x89   :  { %1188 = vmatprep.mubr.f32.mxu1 %v25_v30  ;;  %v1780_v29 = vpack.c.bf16 %v346_v24, %v342_v23  ;;  %v341_v30 = vld [vmem:[%s4272_s1 + $0x9c0] sm:$0xff]  ;;  %v382_v19 = vld [vmem:[%s4272_s1 + $0xb08] sm:$0xff] }
  0x8a   :  { %1759 = vmatpush1.bf16.msra.mxu0 %v1758_v31  ;;  %v345_v31 = vld [vmem:[%s4272_s1 + $0x9e0] sm:$0xff]  ;;  %v386_v20 = vld [vmem:[%s4272_s1 + $0xb28] sm:$0xff] }
  0x8b   :  { %2047 = vmatpush1.bf16.msra.mxu1 %v2046_v32  ;;  %1761 = vmatprep.subr.bf16.mxu0 %v1760_v33  ;;  %v343_v32 = vld [vmem:[%s4272_s1 + $0x9d0] sm:$0xff]  ;;  %v2068_v33 = vpack.c.bf16 %v348_v26, %v344_v25  ;;  %v1782_v39 = vpack.c.bf16 %v345_v31, %v341_v30  ;;  %v1800_v25 = vpack.c.bf16 %v386_v20, %v382_v19  ;;  %v381_v26 = vld [vmem:[%s4272_s1 + $0xb00] sm:$0xff]  ;;  %v390_v31 = vld [vmem:[%s4272_s1 + $0xb48] sm:$0xff] }
  0x8c   :  { %2049 = vmatprep.subr.bf16.mxu1 %v2048_v37  ;;  %v352_v37 = vld [vmem:[%s4272_s1 + $0xa18] sm:$0xff]  ;;  %v2070_v40 = vpack.c.bf16 %v347_v34, %v343_v32  ;;  %v387_v30 = vld [vmem:[%s4272_s1 + $0xb30] sm:$0xff]  ;;  %v394_v32 = vld [vmem:[%s4272_s1 + $0xb68] sm:$0xff] }
  0x8d   :  { %v396_v34 = vld [vmem:[%s4272_s1 + $0xb78] sm:$0xff]  ;;  %v24_v19 = vld [vmem:[%s4273_s0 + $0x20] sm:$0xff] }
  0x8e   :  { %1763 = vmatpush1.bf16.msra.mxu0 %v1762_v43  ;;  %v353_v43 = vld [vmem:[%s4272_s1 + $0xa20] sm:$0xff] }
  0x8f   :  { %2051 = vmatpush1.bf16.msra.mxu1 %v2050_v44  ;;  %1765 = vmatprep.subr.bf16.mxu0 %v1764_v45  ;;  %v351_v44 = vld [vmem:[%s4272_s1 + $0xa10] sm:$0xff]  ;;  %v2072_v45 = vpack.c.bf16 %v356_v38, %v352_v37  ;;  %v1786_v51 = vpack.c.bf16 %v353_v43, %v349_v42  ;;  %v1804_v37 = vpack.c.bf16 %v394_v32, %v390_v31  ;;  %v389_v38 = vld [vmem:[%s4272_s1 + $0xb40] sm:$0xff]  ;;  %v398_v43 = vld [vmem:[%s4272_s1 + $0xb88] sm:$0xff] }
  0x90   :  { %2053 = vmatprep.subr.bf16.mxu1 %v2052_v49  ;;  %v360_v49 = vld [vmem:[%s4272_s1 + $0xa58] sm:$0xff]  ;;  %v2074_v52 = vpack.c.bf16 %v355_v46, %v351_v44  ;;  %v395_v42 = vld [vmem:[%s4272_s1 + $0xb70] sm:$0xff]  ;;  %v402_v44 = vld [vmem:[%s4272_s1 + $0xba8] sm:$0xff] }
  0x91   :  { %v404_v46 = vld [vmem:[%s4272_s1 + $0xbb8] sm:$0xff] }
  0x92   :  { %1767 = vmatpush1.bf16.msra.mxu0 %v1766_v55  ;;  %v361_v55 = vld [vmem:[%s4272_s1 + $0xa60] sm:$0xff]  ;;  %v436_v31 = vld [vmem:[%s4272_s1 + $0xcb8] sm:$0xff] }
  0x93   :  { %2055 = vmatpush1.bf16.msra.mxu1 %v2054_v56  ;;  %1769 = vmatprep.subr.bf16.mxu0 %v1768_v57  ;;  %v359_v56 = vld [vmem:[%s4272_s1 + $0xa50] sm:$0xff]  ;;  %v2076_v57 = vpack.c.bf16 %v364_v50, %v360_v49  ;;  %v1790_v63 = vpack.c.bf16 %v361_v55, %v357_v54  ;;  %v1808_v49 = vpack.c.bf16 %v402_v44, %v398_v43  ;;  %v397_v50 = vld [vmem:[%s4272_s1 + $0xb80] sm:$0xff]  ;;  %v406_v55 = vld [vmem:[%s4272_s1 + $0xbc8] sm:$0xff] }
  0x94   :  { %2057 = vmatprep.subr.bf16.mxu1 %v2056_v61  ;;  %v368_v61 = vld [vmem:[%s4272_s1 + $0xa98] sm:$0xff]  ;;  %v2078_v0 = vpack.c.bf16 %v363_v58, %v359_v56  ;;  %v403_v54 = vld [vmem:[%s4272_s1 + $0xbb0] sm:$0xff]  ;;  %v410_v56 = vld [vmem:[%s4272_s1 + $0xbe8] sm:$0xff] }
  0x95   :  { %v412_v58 = vld [vmem:[%s4272_s1 + $0xbf8] sm:$0xff] }
  0x96   :  { %1771 = vmatpush1.bf16.msra.mxu0 %v1770_v3  ;;  %v369_v3 = vld [vmem:[%s4272_s1 + $0xaa0] sm:$0xff]  ;;  %v27_v32 = vld [vmem:[%s4273_s0 + $0x38] sm:$0xff] }
  0x97   :  { %2059 = vmatpush1.bf16.msra.mxu1 %v2058_v4  ;;  %1773 = vmatprep.subr.bf16.mxu0 %v1772_v5  ;;  %v367_v4 = vld [vmem:[%s4272_s1 + $0xa90] sm:$0xff]  ;;  %v2080_v5 = vpack.c.bf16 %v372_v62, %v368_v61  ;;  %v1794_v11 = vpack.c.bf16 %v369_v3, %v365_v2  ;;  %v1812_v61 = vpack.c.bf16 %v410_v56, %v406_v55  ;;  %v405_v62 = vld [vmem:[%s4272_s1 + $0xbc0] sm:$0xff]  ;;  %v414_v3 = vld [vmem:[%s4272_s1 + $0xc08] sm:$0xff] }
  0x98   :  { %2061 = vmatprep.subr.bf16.mxu1 %v2060_v9  ;;  %v376_v9 = vld [vmem:[%s4272_s1 + $0xad8] sm:$0xff]  ;;  %v2082_v12 = vpack.c.bf16 %v371_v6, %v367_v4  ;;  %v411_v2 = vld [vmem:[%s4272_s1 + $0xbf0] sm:$0xff]  ;;  %v418_v4 = vld [vmem:[%s4272_s1 + $0xc28] sm:$0xff] }
  0x99   :  { %v420_v6 = vld [vmem:[%s4272_s1 + $0xc38] sm:$0xff] }
  0x9a   :  { %1775 = vmatpush1.bf16.msra.mxu0 %v1774_v15  ;;  %v377_v15 = vld [vmem:[%s4272_s1 + $0xae0] sm:$0xff]  ;;  %v440_v43 = vld [vmem:[%s4272_s1 + $0xcd8] sm:$0xff] }
  0x9b   :  { %2063 = vmatpush1.bf16.msra.mxu1 %v2062_v16  ;;  %1777 = vmatprep.subr.bf16.mxu0 %v1776_v17  ;;  %v375_v16 = vld [vmem:[%s4272_s1 + $0xad0] sm:$0xff]  ;;  %v2084_v17 = vpack.c.bf16 %v380_v10, %v376_v9  ;;  %v1798_v23 = vpack.c.bf16 %v377_v15, %v373_v14  ;;  %v1816_v9 = vpack.c.bf16 %v418_v4, %v414_v3  ;;  %v413_v10 = vld [vmem:[%s4272_s1 + $0xc00] sm:$0xff]  ;;  %v422_v15 = vld [vmem:[%s4272_s1 + $0xc48] sm:$0xff] }
  0x9c   :  { %2065 = vmatprep.subr.bf16.mxu1 %v2064_v21  ;;  %v384_v21 = vld [vmem:[%s4272_s1 + $0xb18] sm:$0xff]  ;;  %v2086_v24 = vpack.c.bf16 %v379_v18, %v375_v16  ;;  %v419_v14 = vld [vmem:[%s4272_s1 + $0xc30] sm:$0xff]  ;;  %v426_v16 = vld [vmem:[%s4272_s1 + $0xc68] sm:$0xff] }
  0x9d   :  { %v428_v18 = vld [vmem:[%s4272_s1 + $0xc78] sm:$0xff] }
  0x9e   :  { %1779 = vmatpush1.bf16.msra.mxu0 %v1778_v27  ;;  %v385_v27 = vld [vmem:[%s4272_s1 + $0xb20] sm:$0xff]  ;;  %v444_v44 = vld [vmem:[%s4272_s1 + $0xcf8] sm:$0xff] }
  0x9f   :  { %2067 = vmatpush1.bf16.msra.mxu1 %v2066_v28  ;;  %1781 = vmatprep.subr.bf16.mxu0 %v1780_v29  ;;  %v383_v28 = vld [vmem:[%s4272_s1 + $0xb10] sm:$0xff]  ;;  %v2088_v29 = vpack.c.bf16 %v388_v22, %v384_v21  ;;  %v1802_v35 = vpack.c.bf16 %v385_v27, %v381_v26  ;;  %v1820_v22 = vpack.c.bf16 %v426_v16, %v422_v15  ;;  %v448_v55 = vld [vmem:[%s4272_s1 + $0xd18] sm:$0xff] }
  0xa0   :  { %2069 = vmatprep.subr.bf16.mxu1 %v2068_v33  ;;  %v392_v33 = vld [vmem:[%s4272_s1 + $0xb58] sm:$0xff]  ;;  %v2090_v36 = vpack.c.bf16 %v387_v30, %v383_v28  ;;  %v427_v27 = vld [vmem:[%s4272_s1 + $0xc70] sm:$0xff]  ;;  %v430_v28 = vld [vmem:[%s4272_s1 + $0xc88] sm:$0xff] }
  0xa1   :  { %v432_v30 = vld [vmem:[%s4272_s1 + $0xc98] sm:$0xff] }
  0xa2   :  { %1783 = vmatpush1.bf16.msra.mxu0 %v1782_v39  ;;  %v393_v39 = vld [vmem:[%s4272_s1 + $0xb60] sm:$0xff]  ;;  %v452_v56 = vld [vmem:[%s4272_s1 + $0xd38] sm:$0xff] }
  0xa3   :  { %2071 = vmatpush1.bf16.msra.mxu1 %v2070_v40  ;;  %1785 = vmatprep.subr.bf16.mxu0 %v1784_v41  ;;  %v391_v40 = vld [vmem:[%s4272_s1 + $0xb50] sm:$0xff]  ;;  %v2092_v41 = vpack.c.bf16 %v396_v34, %v392_v33  ;;  %v1806_v47 = vpack.c.bf16 %v393_v39, %v389_v38  ;;  %v2112_v39 = vpack.c.bf16 %v436_v31, %v432_v30  ;;  %v456_v3 = vld [vmem:[%s4272_s1 + $0xd58] sm:$0xff] }
  0xa4   :  { %2073 = vmatprep.subr.bf16.mxu1 %v2072_v45  ;;  %v400_v45 = vld [vmem:[%s4272_s1 + $0xb98] sm:$0xff]  ;;  %v2094_v48 = vpack.c.bf16 %v395_v42, %v391_v40  ;;  %v431_v38 = vld [vmem:[%s4272_s1 + $0xc90] sm:$0xff]  ;;  %v442_v42 = vld [vmem:[%s4272_s1 + $0xce8] sm:$0xff] }
  0xa5   :  { %v435_v40 = vld [vmem:[%s4272_s1 + $0xcb0] sm:$0xff]  ;;  %v460_v4 = vld [vmem:[%s4272_s1 + $0xd78] sm:$0xff] }
  0xa6   :  { %1787 = vmatpush1.bf16.msra.mxu0 %v1786_v51  ;;  %v401_v51 = vld [vmem:[%s4272_s1 + $0xba0] sm:$0xff]  ;;  %v464_v15 = vld [vmem:[%s4272_s1 + $0xd98] sm:$0xff] }
  0xa7   :  { %2075 = vmatpush1.bf16.msra.mxu1 %v2074_v52  ;;  %1789 = vmatprep.subr.bf16.mxu0 %v1788_v53  ;;  %v399_v52 = vld [vmem:[%s4272_s1 + $0xb90] sm:$0xff]  ;;  %v2096_v53 = vpack.c.bf16 %v404_v46, %v400_v45  ;;  %v1810_v59 = vpack.c.bf16 %v401_v51, %v397_v50  ;;  %v2114_v46 = vpack.c.bf16 %v435_v40, %v431_v38  ;;  %v468_v16 = vld [vmem:[%s4272_s1 + $0xdb8] sm:$0xff]  ;;  %v482_v38 = vld [vmem:[%s4272_s1 + $0xe28] sm:$0xff] }
  0xa8   :  { %2077 = vmatprep.subr.bf16.mxu1 %v2076_v57  ;;  %v408_v57 = vld [vmem:[%s4272_s1 + $0xbd8] sm:$0xff]  ;;  %v2098_v60 = vpack.c.bf16 %v403_v54, %v399_v52  ;;  %v439_v50 = vld [vmem:[%s4272_s1 + $0xcd0] sm:$0xff]  ;;  %v2116_v51 = vpack.c.bf16 %v444_v44, %v440_v43  ;;  %v450_v54 = vld [vmem:[%s4272_s1 + $0xd28] sm:$0xff] }
  0xa9   :  { %v443_v52 = vld [vmem:[%s4272_s1 + $0xcf0] sm:$0xff]  ;;  %v484_v40 = vld [vmem:[%s4272_s1 + $0xe38] sm:$0xff]  ;;  %v477_v44 = vld [vmem:[%s4272_s1 + $0xe00] sm:$0xff] }
  0xaa   :  { %1791 = vmatpush1.bf16.msra.mxu0 %v1790_v63  ;;  %v409_v63 = vld [vmem:[%s4272_s1 + $0xbe0] sm:$0xff] }
  0xab   :  { %2079 = vmatpush1.bf16.msra.mxu1 %v2078_v0  ;;  %1793 = vmatprep.subr.bf16.mxu0 %v1792_v1  ;;  %v407_v0 = vld [vmem:[%s4272_s1 + $0xbd0] sm:$0xff]  ;;  %v2100_v1 = vpack.c.bf16 %v412_v58, %v408_v57  ;;  %v1814_v7 = vpack.c.bf16 %v409_v63, %v405_v62  ;;  %v2118_v58 = vpack.c.bf16 %v443_v52, %v439_v50  ;;  %v490_v50 = vld [vmem:[%s4272_s1 + $0xe68] sm:$0xff]  ;;  %v492_v52 = vld [vmem:[%s4272_s1 + $0xe78] sm:$0xff] }
  0xac   :  { %2081 = vmatprep.subr.bf16.mxu1 %v2080_v5  ;;  %v416_v5 = vld [vmem:[%s4272_s1 + $0xc18] sm:$0xff]  ;;  %v2102_v8 = vpack.c.bf16 %v411_v2, %v407_v0  ;;  %v447_v62 = vld [vmem:[%s4272_s1 + $0xd10] sm:$0xff]  ;;  %v2120_v63 = vpack.c.bf16 %v452_v56, %v448_v55  ;;  %v458_v2 = vld [vmem:[%s4272_s1 + $0xd68] sm:$0xff] }
  0xad   :  { %v451_v0 = vld [vmem:[%s4272_s1 + $0xd30] sm:$0xff]  ;;  %v485_v56 = vld [vmem:[%s4272_s1 + $0xe40] sm:$0xff] }
  0xae   :  { %1795 = vmatpush1.bf16.msra.mxu0 %v1794_v11  ;;  %v417_v11 = vld [vmem:[%s4272_s1 + $0xc20] sm:$0xff] }
  0xaf   :  { %2083 = vmatpush1.bf16.msra.mxu1 %v2082_v12  ;;  %1797 = vmatprep.subr.bf16.mxu0 %v1796_v13  ;;  %v415_v12 = vld [vmem:[%s4272_s1 + $0xc10] sm:$0xff]  ;;  %v2104_v13 = vpack.c.bf16 %v420_v6, %v416_v5  ;;  %v1818_v20 = vpack.c.bf16 %v417_v11, %v413_v10  ;;  %v2122_v6 = vpack.c.bf16 %v451_v0, %v447_v62  ;;  %v498_v62 = vld [vmem:[%s4272_s1 + $0xea8] sm:$0xff]  ;;  %v500_v0 = vld [vmem:[%s4272_s1 + $0xeb8] sm:$0xff] }
  0xb0   :  { %2085 = vmatprep.subr.bf16.mxu1 %v2084_v17  ;;  %v424_v17 = vld [vmem:[%s4272_s1 + $0xc58] sm:$0xff]  ;;  %v2106_v21 = vpack.c.bf16 %v419_v14, %v415_v12  ;;  %v455_v10 = vld [vmem:[%s4272_s1 + $0xd50] sm:$0xff]  ;;  %v2124_v11 = vpack.c.bf16 %v460_v4, %v456_v3  ;;  %v466_v14 = vld [vmem:[%s4272_s1 + $0xda8] sm:$0xff] }
  0xb1   :  { %v2108_v26 = vpack.c.bf16 %v428_v18, %v424_v17  ;;  %v459_v12 = vld [vmem:[%s4272_s1 + $0xd70] sm:$0xff]  ;;  %v493_v4 = vld [vmem:[%s4272_s1 + $0xe80] sm:$0xff] }
  0xb2   :  { %1799 = vmatpush1.bf16.msra.mxu0 %v1798_v23  ;;  %v421_v23 = vld [vmem:[%s4272_s1 + $0xc40] sm:$0xff]  ;;  %v2126_v18 = vpack.c.bf16 %v459_v12, %v455_v10  ;;  %v506_v10 = vld [vmem:[%s4272_s1 + $0xee8] sm:$0xff]  ;;  %v508_v12 = vld [vmem:[%s4272_s1 + $0xef8] sm:$0xff] }
  0xb3   :  { %2087 = vmatpush1.bf16.msra.mxu1 %v2086_v24  ;;  %1801 = vmatprep.subr.bf16.mxu0 %v1800_v25  ;;  %v425_v24 = vld [vmem:[%s4272_s1 + $0xc60] sm:$0xff]  ;;  %v423_v25 = vld [vmem:[%s4272_s1 + $0xc50] sm:$0xff] }
  0xb4   :  { %2089 = vmatprep.subr.bf16.mxu1 %v2088_v29  ;;  %v434_v29 = vld [vmem:[%s4272_s1 + $0xca8] sm:$0xff]  ;;  %v1822_v33 = vpack.c.bf16 %v425_v24, %v421_v23  ;;  %v2110_v34 = vpack.c.bf16 %v427_v27, %v423_v25  ;;  %v2128_v23 = vpack.c.bf16 %v468_v16, %v464_v15  ;;  %v467_v24 = vld [vmem:[%s4272_s1 + $0xdb0] sm:$0xff]  ;;  %v472_v27 = vld [vmem:[%s4272_s1 + $0xdd8] sm:$0xff] }
  0xb5   :  { %v470_v25 = vld [vmem:[%s4272_s1 + $0xdc8] sm:$0xff]  ;;  %v501_v16 = vld [vmem:[%s4272_s1 + $0xec0] sm:$0xff] }
  0xb6   :  { %1803 = vmatpush1.bf16.msra.mxu0 %v1802_v35  ;;  %v1824_v35 = vpack.c.bf16 %v434_v29, %v430_v28  ;;  %v476_v28 = vld [vmem:[%s4272_s1 + $0xdf8] sm:$0xff] }
  0xb7   :  { %2091 = vmatpush1.bf16.msra.mxu1 %v2090_v36  ;;  %1805 = vmatprep.subr.bf16.mxu0 %v1804_v37  ;;  %v429_v36 = vld [vmem:[%s4272_s1 + $0xc80] sm:$0xff] }
  0xb8   :  { %2093 = vmatprep.subr.bf16.mxu1 %v2092_v41  ;;  %v433_v37 = vld [vmem:[%s4272_s1 + $0xca0] sm:$0xff]  ;;  %v438_v41 = vld [vmem:[%s4272_s1 + $0xcc8] sm:$0xff] }
  0xb9   :  { %v1826_v45 = vpack.c.bf16 %v433_v37, %v429_v36  ;;  %v475_v36 = vld [vmem:[%s4272_s1 + $0xdf0] sm:$0xff]  ;;  %v478_v37 = vld [vmem:[%s4272_s1 + $0xe08] sm:$0xff] }
  0xba   :  { %1807 = vmatpush1.bf16.msra.mxu0 %v1806_v47  ;;  %v1828_v47 = vpack.c.bf16 %v442_v42, %v438_v41  ;;  %v1848_v43 = vpack.c.bf16 %v482_v38, %v478_v37 }
  0xbb   :  { %2095 = vmatpush1.bf16.msra.mxu1 %v2094_v48  ;;  %1809 = vmatprep.subr.bf16.mxu0 %v1808_v49  ;;  %v437_v48 = vld [vmem:[%s4272_s1 + $0xcc0] sm:$0xff] }
  0xbc   :  { %2097 = vmatprep.subr.bf16.mxu1 %v2096_v53  ;;  %v441_v49 = vld [vmem:[%s4272_s1 + $0xce0] sm:$0xff]  ;;  %v446_v53 = vld [vmem:[%s4272_s1 + $0xd08] sm:$0xff] }
  0xbd   :  { %v1830_v57 = vpack.c.bf16 %v441_v49, %v437_v48  ;;  %v483_v48 = vld [vmem:[%s4272_s1 + $0xe30] sm:$0xff]  ;;  %v486_v49 = vld [vmem:[%s4272_s1 + $0xe48] sm:$0xff] }
  0xbe   :  { %1811 = vmatpush1.bf16.msra.mxu0 %v1810_v59  ;;  %v1832_v59 = vpack.c.bf16 %v450_v54, %v446_v53  ;;  %v1852_v55 = vpack.c.bf16 %v490_v50, %v486_v49 }
  0xbf   :  { %2099 = vmatpush1.bf16.msra.mxu1 %v2098_v60  ;;  %1813 = vmatprep.subr.bf16.mxu0 %v1812_v61  ;;  %v445_v60 = vld [vmem:[%s4272_s1 + $0xd00] sm:$0xff] }
  0xc0   :  { %2101 = vmatprep.subr.bf16.mxu1 %v2100_v1  ;;  %v449_v61 = vld [vmem:[%s4272_s1 + $0xd20] sm:$0xff]  ;;  %v454_v1 = vld [vmem:[%s4272_s1 + $0xd48] sm:$0xff] }
  0xc1   :  { %v1834_v5 = vpack.c.bf16 %v449_v61, %v445_v60  ;;  %v491_v60 = vld [vmem:[%s4272_s1 + $0xe70] sm:$0xff]  ;;  %v494_v61 = vld [vmem:[%s4272_s1 + $0xe88] sm:$0xff] }
  0xc2   :  { %1815 = vmatpush1.bf16.msra.mxu0 %v1814_v7  ;;  %v1836_v7 = vpack.c.bf16 %v458_v2, %v454_v1  ;;  %v1856_v3 = vpack.c.bf16 %v498_v62, %v494_v61 }
  0xc3   :  { %2103 = vmatpush1.bf16.msra.mxu1 %v2102_v8  ;;  %1817 = vmatprep.subr.bf16.mxu0 %v1816_v9  ;;  %v453_v8 = vld [vmem:[%s4272_s1 + $0xd40] sm:$0xff] }
  0xc4   :  { %2105 = vmatprep.subr.bf16.mxu1 %v2104_v13  ;;  %v457_v9 = vld [vmem:[%s4272_s1 + $0xd60] sm:$0xff]  ;;  %v462_v13 = vld [vmem:[%s4272_s1 + $0xd88] sm:$0xff] }
  0xc5   :  { %834 = vmatmul.mubr.f32.vlgmr.msra.gmra.mrb[0].mxu0 %v24_v19  ;;  %v1838_v17 = vpack.c.bf16 %v457_v9, %v453_v8  ;;  %v499_v8 = vld [vmem:[%s4272_s1 + $0xeb0] sm:$0xff]  ;;  %v502_v9 = vld [vmem:[%s4272_s1 + $0xec8] sm:$0xff] }
  0xc6   :  { %1819 = vmatpush1.bf16.msra.mxu0 %v1818_v20  ;;  %1189 = vmatmul.mubr.f32.vlgmr.msra.gmra.mrb[0].mxu1 %v24_v19  ;;  %v1840_v19 = vpack.c.bf16 %v466_v14, %v462_v13  ;;  %v461_v20 = vld [vmem:[%s4272_s1 + $0xd80] sm:$0xff]  ;;  %v1860_v15 = vpack.c.bf16 %v506_v10, %v502_v9 }
  0xc7   :  { %2107 = vmatpush1.bf16.msra.mxu1 %v2106_v21  ;;  %1821 = vmatprep.subr.bf16.mxu0 %v1820_v22  ;;  %v465_v21 = vld [vmem:[%s4272_s1 + $0xda0] sm:$0xff]  ;;  %v463_v22 = vld [vmem:[%s4272_s1 + $0xd90] sm:$0xff] }
  0xc8   :  { %2109 = vmatprep.subr.bf16.mxu1 %v2108_v26  ;;  %904 = vmatprep.mubr.f32.mxu0 %v27_v32  ;;  %v474_v26 = vld [vmem:[%s4272_s1 + $0xde8] sm:$0xff]  ;;  %v1842_v29 = vpack.c.bf16 %v465_v21, %v461_v20  ;;  %v2130_v30 = vpack.c.bf16 %v467_v24, %v463_v22  ;;  %v507_v20 = vld [vmem:[%s4272_s1 + $0xef0] sm:$0xff]  ;;  %v516_v24 = vld [vmem:[%s4272_s1 + $0xf38] sm:$0xff] }
  0xc9   :  { %1259 = vmatprep.mubr.f32.mxu1 %v27_v32  ;;  %v1844_v31 = vpack.c.bf16 %v474_v26, %v470_v25  ;;  %v469_v32 = vld [vmem:[%s4272_s1 + $0xdc0] sm:$0xff]  ;;  %v510_v21 = vld [vmem:[%s4272_s1 + $0xf08] sm:$0xff] }
  0xca   :  { %1823 = vmatpush1.bf16.msra.mxu0 %v1822_v33  ;;  %v473_v33 = vld [vmem:[%s4272_s1 + $0xde0] sm:$0xff]  ;;  %v514_v22 = vld [vmem:[%s4272_s1 + $0xf28] sm:$0xff] }
  0xcb   :  { %2111 = vmatpush1.bf16.msra.mxu1 %v2110_v34  ;;  %1825 = vmatprep.subr.bf16.mxu0 %v1824_v35  ;;  %v471_v34 = vld [vmem:[%s4272_s1 + $0xdd0] sm:$0xff]  ;;  %v2132_v35 = vpack.c.bf16 %v476_v28, %v472_v27  ;;  %v1846_v41 = vpack.c.bf16 %v473_v33, %v469_v32  ;;  %v1864_v27 = vpack.c.bf16 %v514_v22, %v510_v21  ;;  %v509_v28 = vld [vmem:[%s4272_s1 + $0xf00] sm:$0xff]  ;;  %v518_v33 = vld [vmem:[%s4272_s1 + $0xf48] sm:$0xff] }
  0xcc   :  { %2113 = vmatprep.subr.bf16.mxu1 %v2112_v39  ;;  %v480_v39 = vld [vmem:[%s4272_s1 + $0xe18] sm:$0xff]  ;;  %v2134_v42 = vpack.c.bf16 %v475_v36, %v471_v34  ;;  %v515_v32 = vld [vmem:[%s4272_s1 + $0xf30] sm:$0xff]  ;;  %v522_v34 = vld [vmem:[%s4272_s1 + $0xf68] sm:$0xff] }
  0xcd   :  { %v524_v36 = vld [vmem:[%s4272_s1 + $0xf78] sm:$0xff]  ;;  %v26_v21 = vld [vmem:[%s4273_s0 + $0x30] sm:$0xff] }
  0xce   :  { %1827 = vmatpush1.bf16.msra.mxu0 %v1826_v45  ;;  %v481_v45 = vld [vmem:[%s4272_s1 + $0xe20] sm:$0xff] }
  0xcf   :  { %2115 = vmatpush1.bf16.msra.mxu1 %v2114_v46  ;;  %1829 = vmatprep.subr.bf16.mxu0 %v1828_v47  ;;  %v479_v46 = vld [vmem:[%s4272_s1 + $0xe10] sm:$0xff]  ;;  %v2136_v47 = vpack.c.bf16 %v484_v40, %v480_v39  ;;  %v1850_v53 = vpack.c.bf16 %v481_v45, %v477_v44  ;;  %v1868_v39 = vpack.c.bf16 %v522_v34, %v518_v33  ;;  %v517_v40 = vld [vmem:[%s4272_s1 + $0xf40] sm:$0xff]  ;;  %v526_v45 = vld [vmem:[%s4272_s1 + $0xf88] sm:$0xff] }
  0xd0   :  { %2117 = vmatprep.subr.bf16.mxu1 %v2116_v51  ;;  %v488_v51 = vld [vmem:[%s4272_s1 + $0xe58] sm:$0xff]  ;;  %v2138_v54 = vpack.c.bf16 %v483_v48, %v479_v46  ;;  %v523_v44 = vld [vmem:[%s4272_s1 + $0xf70] sm:$0xff]  ;;  %v530_v46 = vld [vmem:[%s4272_s1 + $0xfa8] sm:$0xff] }
  0xd1   :  { %v532_v48 = vld [vmem:[%s4272_s1 + $0xfb8] sm:$0xff] }
  0xd2   :  { %1831 = vmatpush1.bf16.msra.mxu0 %v1830_v57  ;;  %v489_v57 = vld [vmem:[%s4272_s1 + $0xe60] sm:$0xff]  ;;  %v564_v33 = vld [vmem:[%s4272_s1 + $0x10b8] sm:$0xff] }
  0xd3   :  { %2119 = vmatpush1.bf16.msra.mxu1 %v2118_v58  ;;  %1833 = vmatprep.subr.bf16.mxu0 %v1832_v59  ;;  %v487_v58 = vld [vmem:[%s4272_s1 + $0xe50] sm:$0xff]  ;;  %v2140_v59 = vpack.c.bf16 %v492_v52, %v488_v51  ;;  %v1854_v1 = vpack.c.bf16 %v489_v57, %v485_v56  ;;  %v1872_v51 = vpack.c.bf16 %v530_v46, %v526_v45  ;;  %v525_v52 = vld [vmem:[%s4272_s1 + $0xf80] sm:$0xff]  ;;  %v534_v57 = vld [vmem:[%s4272_s1 + $0xfc8] sm:$0xff] }
  0xd4   :  { %2121 = vmatprep.subr.bf16.mxu1 %v2120_v63  ;;  %v496_v63 = vld [vmem:[%s4272_s1 + $0xe98] sm:$0xff]  ;;  %v2142_v2 = vpack.c.bf16 %v491_v60, %v487_v58  ;;  %v531_v56 = vld [vmem:[%s4272_s1 + $0xfb0] sm:$0xff]  ;;  %v538_v58 = vld [vmem:[%s4272_s1 + $0xfe8] sm:$0xff] }
  0xd5   :  { %v540_v60 = vld [vmem:[%s4272_s1 + $0xff8] sm:$0xff] }
  0xd6   :  { %1835 = vmatpush1.bf16.msra.mxu0 %v1834_v5  ;;  %v497_v5 = vld [vmem:[%s4272_s1 + $0xea0] sm:$0xff]  ;;  %v568_v45 = vld [vmem:[%s4272_s1 + $0x10d8] sm:$0xff] }
  0xd7   :  { %2123 = vmatpush1.bf16.msra.mxu1 %v2122_v6  ;;  %1837 = vmatprep.subr.bf16.mxu0 %v1836_v7  ;;  %v495_v6 = vld [vmem:[%s4272_s1 + $0xe90] sm:$0xff]  ;;  %v2144_v7 = vpack.c.bf16 %v500_v0, %v496_v63  ;;  %v1858_v13 = vpack.c.bf16 %v497_v5, %v493_v4  ;;  %v1876_v63 = vpack.c.bf16 %v538_v58, %v534_v57  ;;  %v533_v0 = vld [vmem:[%s4272_s1 + $0xfc0] sm:$0xff]  ;;  %v542_v5 = vld [vmem:[%s4272_s1 + $0x1008] sm:$0xff] }
  0xd8   :  { %2125 = vmatprep.subr.bf16.mxu1 %v2124_v11  ;;  %v504_v11 = vld [vmem:[%s4272_s1 + $0xed8] sm:$0xff]  ;;  %v2146_v14 = vpack.c.bf16 %v499_v8, %v495_v6  ;;  %v539_v4 = vld [vmem:[%s4272_s1 + $0xff0] sm:$0xff]  ;;  %v546_v6 = vld [vmem:[%s4272_s1 + $0x1028] sm:$0xff] }
  0xd9   :  { %v548_v8 = vld [vmem:[%s4272_s1 + $0x1038] sm:$0xff] }
  0xda   :  { %1839 = vmatpush1.bf16.msra.mxu0 %v1838_v17  ;;  %v505_v17 = vld [vmem:[%s4272_s1 + $0xee0] sm:$0xff]  ;;  %v572_v46 = vld [vmem:[%s4272_s1 + $0x10f8] sm:$0xff] }
  0xdb   :  { %2127 = vmatpush1.bf16.msra.mxu1 %v2126_v18  ;;  %1841 = vmatprep.subr.bf16.mxu0 %v1840_v19  ;;  %v503_v18 = vld [vmem:[%s4272_s1 + $0xed0] sm:$0xff]  ;;  %v2148_v19 = vpack.c.bf16 %v508_v12, %v504_v11  ;;  %v1862_v25 = vpack.c.bf16 %v505_v17, %v501_v16  ;;  %v1880_v11 = vpack.c.bf16 %v546_v6, %v542_v5  ;;  %v541_v12 = vld [vmem:[%s4272_s1 + $0x1000] sm:$0xff]  ;;  %v550_v17 = vld [vmem:[%s4272_s1 + $0x1048] sm:$0xff] }
  0xdc   :  { %2129 = vmatprep.subr.bf16.mxu1 %v2128_v23  ;;  %v512_v23 = vld [vmem:[%s4272_s1 + $0xf18] sm:$0xff]  ;;  %v2150_v26 = vpack.c.bf16 %v507_v20, %v503_v18  ;;  %v547_v16 = vld [vmem:[%s4272_s1 + $0x1030] sm:$0xff]  ;;  %v554_v18 = vld [vmem:[%s4272_s1 + $0x1068] sm:$0xff] }
  0xdd   :  { %v556_v20 = vld [vmem:[%s4272_s1 + $0x1078] sm:$0xff] }
  0xde   :  { %1843 = vmatpush1.bf16.msra.mxu0 %v1842_v29  ;;  %v513_v29 = vld [vmem:[%s4272_s1 + $0xf20] sm:$0xff]  ;;  %v576_v57 = vld [vmem:[%s4272_s1 + $0x1118] sm:$0xff] }
  0xdf   :  { %2131 = vmatpush1.bf16.msra.mxu1 %v2130_v30  ;;  %1845 = vmatprep.subr.bf16.mxu0 %v1844_v31  ;;  %v511_v30 = vld [vmem:[%s4272_s1 + $0xf10] sm:$0xff]  ;;  %v2152_v31 = vpack.c.bf16 %v516_v24, %v512_v23  ;;  %v1866_v37 = vpack.c.bf16 %v513_v29, %v509_v28  ;;  %v1884_v24 = vpack.c.bf16 %v554_v18, %v550_v17  ;;  %v580_v58 = vld [vmem:[%s4272_s1 + $0x1138] sm:$0xff] }
  0xe0   :  { %2133 = vmatprep.subr.bf16.mxu1 %v2132_v35  ;;  %v520_v35 = vld [vmem:[%s4272_s1 + $0xf58] sm:$0xff]  ;;  %v2154_v38 = vpack.c.bf16 %v515_v32, %v511_v30  ;;  %v555_v29 = vld [vmem:[%s4272_s1 + $0x1070] sm:$0xff]  ;;  %v558_v30 = vld [vmem:[%s4272_s1 + $0x1088] sm:$0xff] }
  0xe1   :  { %v560_v32 = vld [vmem:[%s4272_s1 + $0x1098] sm:$0xff] }
  0xe2   :  { %1847 = vmatpush1.bf16.msra.mxu0 %v1846_v41  ;;  %v521_v41 = vld [vmem:[%s4272_s1 + $0xf60] sm:$0xff]  ;;  %v584_v5 = vld [vmem:[%s4272_s1 + $0x1158] sm:$0xff] }
  0xe3   :  { %2135 = vmatpush1.bf16.msra.mxu1 %v2134_v42  ;;  %1849 = vmatprep.subr.bf16.mxu0 %v1848_v43  ;;  %v519_v42 = vld [vmem:[%s4272_s1 + $0xf50] sm:$0xff]  ;;  %v2156_v43 = vpack.c.bf16 %v524_v36, %v520_v35  ;;  %v1870_v49 = vpack.c.bf16 %v521_v41, %v517_v40  ;;  %v2176_v40 = vpack.c.bf16 %v564_v33, %v560_v32  ;;  %v588_v6 = vld [vmem:[%s4272_s1 + $0x1178] sm:$0xff] }
  0xe4   :  { %2137 = vmatprep.subr.bf16.mxu1 %v2136_v47  ;;  %v528_v47 = vld [vmem:[%s4272_s1 + $0xf98] sm:$0xff]  ;;  %v2158_v50 = vpack.c.bf16 %v523_v44, %v519_v42  ;;  %v563_v41 = vld [vmem:[%s4272_s1 + $0x10b0] sm:$0xff]  ;;  %v566_v42 = vld [vmem:[%s4272_s1 + $0x10c8] sm:$0xff]  ;;  %v2285_v44 = vmov 0.0  }
  0xe5   :  { %v592_v17 = vld [vmem:[%s4272_s1 + $0x1198] sm:$0xff] }
  0xe6   :  { %1851 = vmatpush1.bf16.msra.mxu0 %v1850_v53  ;;  %v529_v53 = vld [vmem:[%s4272_s1 + $0xfa0] sm:$0xff]  ;;  %v596_v18 = vld [vmem:[%s4272_s1 + $0x11b8] sm:$0xff] }
  0xe7   :  { %2139 = vmatpush1.bf16.msra.mxu1 %v2138_v54  ;;  %1853 = vmatprep.subr.bf16.mxu0 %v1852_v55  ;;  %v527_v54 = vld [vmem:[%s4272_s1 + $0xf90] sm:$0xff]  ;;  %v2160_v55 = vpack.c.bf16 %v532_v48, %v528_v47  ;;  %v1874_v61 = vpack.c.bf16 %v529_v53, %v525_v52  ;;  %v2180_v53 = vpack.c.bf16 %v572_v46, %v568_v45  ;;  %v1337_v46 = vld [vmem:[%s4274_s3] sm:$0xff] }
  0xe8   :  { %2141 = vmatprep.subr.bf16.mxu1 %v2140_v59  ;;  %v536_v59 = vld [vmem:[%s4272_s1 + $0xfd8] sm:$0xff]  ;;  %v2162_v62 = vpack.c.bf16 %v531_v56, %v527_v54  ;;  %v567_v52 = vld [vmem:[%s4272_s1 + $0x10d0] sm:$0xff]  ;;  %v578_v56 = vld [vmem:[%s4272_s1 + $0x1128] sm:$0xff] }
  0xe9   :  { %v571_v54 = vld [vmem:[%s4272_s1 + $0x10f0] sm:$0xff] }
  0xea   :  { %1855 = vmatpush1.bf16.msra.mxu0 %v1854_v1  ;;  %v537_v1 = vld [vmem:[%s4272_s1 + $0xfe0] sm:$0xff] }
  0xeb   :  { %2143 = vmatpush1.bf16.msra.mxu1 %v2142_v2  ;;  %1857 = vmatprep.subr.bf16.mxu0 %v1856_v3  ;;  %v535_v2 = vld [vmem:[%s4272_s1 + $0xfd0] sm:$0xff]  ;;  %v2164_v3 = vpack.c.bf16 %v540_v60, %v536_v59  ;;  %v1878_v9 = vpack.c.bf16 %v537_v1, %v533_v0  ;;  %v2182_v60 = vpack.c.bf16 %v571_v54, %v567_v52  ;;  %v1356_v52 = vld [vmem:[%s4274_s3 + $0x98] sm:$0xff] }
  0xec   :  { %2145 = vmatprep.subr.bf16.mxu1 %v2144_v7  ;;  %v544_v7 = vld [vmem:[%s4272_s1 + $0x1018] sm:$0xff]  ;;  %v2166_v10 = vpack.c.bf16 %v539_v4, %v535_v2  ;;  %v575_v0 = vld [vmem:[%s4272_s1 + $0x1110] sm:$0xff]  ;;  %v2184_v1 = vpack.c.bf16 %v580_v58, %v576_v57  ;;  %v586_v4 = vld [vmem:[%s4272_s1 + $0x1168] sm:$0xff] }
  0xed   :  { %v579_v2 = vld [vmem:[%s4272_s1 + $0x1130] sm:$0xff]  ;;  %v1388_v54 = vld [vmem:[%s4274_s3 + $0x198] sm:$0xff] }
  0xee   :  { %1859 = vmatpush1.bf16.msra.mxu0 %v1858_v13  ;;  %v545_v13 = vld [vmem:[%s4272_s1 + $0x1020] sm:$0xff] }
  0xef   :  { %2147 = vmatpush1.bf16.msra.mxu1 %v2146_v14  ;;  %1861 = vmatprep.subr.bf16.mxu0 %v1860_v15  ;;  %v543_v14 = vld [vmem:[%s4272_s1 + $0x1010] sm:$0xff]  ;;  %v2168_v15 = vpack.c.bf16 %v548_v8, %v544_v7  ;;  %v1882_v22 = vpack.c.bf16 %v545_v13, %v541_v12  ;;  %v2186_v8 = vpack.c.bf16 %v579_v2, %v575_v0  ;;  %v1357_v0 = vld [vmem:[%s4274_s3 + $0xa0] sm:$0xff] }
  0xf0   :  { %2149 = vmatprep.subr.bf16.mxu1 %v2148_v19  ;;  %v552_v19 = vld [vmem:[%s4272_s1 + $0x1058] sm:$0xff]  ;;  %v2170_v23 = vpack.c.bf16 %v547_v16, %v543_v14  ;;  %v583_v12 = vld [vmem:[%s4272_s1 + $0x1150] sm:$0xff]  ;;  %v2188_v13 = vpack.c.bf16 %v588_v6, %v584_v5  ;;  %v594_v16 = vld [vmem:[%s4272_s1 + $0x11a8] sm:$0xff] }
  0xf1   :  { %v2172_v28 = vpack.c.bf16 %v556_v20, %v552_v19  ;;  %v587_v14 = vld [vmem:[%s4272_s1 + $0x1170] sm:$0xff]  ;;  %v1389_v2 = vld [vmem:[%s4274_s3 + $0x1a0] sm:$0xff] }
  0xf2   :  { %1863 = vmatpush1.bf16.msra.mxu0 %v1862_v25  ;;  %v549_v25 = vld [vmem:[%s4272_s1 + $0x1040] sm:$0xff]  ;;  %v2190_v20 = vpack.c.bf16 %v587_v14, %v583_v12  ;;  %v1359_v12 = vld [vmem:[%s4274_s3 + $0xb0] sm:$0xff] }
  0xf3   :  { %2151 = vmatpush1.bf16.msra.mxu1 %v2150_v26  ;;  %1865 = vmatprep.subr.bf16.mxu0 %v1864_v27  ;;  %v553_v26 = vld [vmem:[%s4272_s1 + $0x1060] sm:$0xff]  ;;  %v551_v27 = vld [vmem:[%s4272_s1 + $0x1050] sm:$0xff] }
  0xf4   :  { %2153 = vmatprep.subr.bf16.mxu1 %v2152_v31  ;;  %v562_v31 = vld [vmem:[%s4272_s1 + $0x10a8] sm:$0xff]  ;;  %v1886_v34 = vpack.c.bf16 %v553_v26, %v549_v25  ;;  %v2174_v35 = vpack.c.bf16 %v555_v29, %v551_v27  ;;  %v2192_v25 = vpack.c.bf16 %v596_v18, %v592_v17  ;;  %v595_v26 = vld [vmem:[%s4272_s1 + $0x11b0] sm:$0xff]  ;;  %v600_v29 = vld [vmem:[%s4272_s1 + $0x11d8] sm:$0xff] }
  0xf5   :  { %v1888_v36 = vpack.c.bf16 %v562_v31, %v558_v30  ;;  %v598_v27 = vld [vmem:[%s4272_s1 + $0x11c8] sm:$0xff]  ;;  %v604_v30 = vld [vmem:[%s4272_s1 + $0x11f8] sm:$0xff]  ;;  %v1391_v14 = vld [vmem:[%s4274_s3 + $0x1b0] sm:$0xff] }
  0xf6   :  { %1867 = vmatpush1.bf16.msra.mxu0 %v1866_v37  ;;  %v557_v37 = vld [vmem:[%s4272_s1 + $0x1080] sm:$0xff] }
  0xf7   :  { %2155 = vmatpush1.bf16.msra.mxu1 %v2154_v38  ;;  %1869 = vmatprep.subr.bf16.mxu0 %v1868_v39  ;;  %v561_v38 = vld [vmem:[%s4272_s1 + $0x10a0] sm:$0xff]  ;;  %v559_v39 = vld [vmem:[%s4272_s1 + $0x1090] sm:$0xff] }
  0xf8   :  { %2157 = vmatprep.subr.bf16.mxu1 %v2156_v43  ;;  %v570_v43 = vld [vmem:[%s4272_s1 + $0x10e8] sm:$0xff]  ;;  %v1890_v47 = vpack.c.bf16 %v561_v38, %v557_v37  ;;  %v2178_v48 = vpack.c.bf16 %v563_v41, %v559_v39  ;;  %v2196_v37 = vpack.c.bf16 %v604_v30, %v600_v29  ;;  %v603_v38 = vld [vmem:[%s4272_s1 + $0x11f0] sm:$0xff]  ;;  %v1353_v39 = vld [vmem:[%s4274_s3 + $0x80] sm:$0xff] }
  0xf9   :  { %v1385_v41 = vld [vmem:[%s4274_s3 + $0x180] sm:$0xff] }
  0xfa   :  { %1871 = vmatpush1.bf16.msra.mxu0 %v1870_v49  ;;  %v1892_v49 = vpack.c.bf16 %v570_v43, %v566_v42  ;;  %v1386_v42 = vld [vmem:[%s4274_s3 + $0x188] sm:$0xff] }
  0xfb   :  { %2159 = vmatpush1.bf16.msra.mxu1 %v2158_v50  ;;  %1873 = vmatprep.subr.bf16.mxu0 %v1872_v51  ;;  %v565_v50 = vld [vmem:[%s4272_s1 + $0x10c0] sm:$0xff] }
  0xfc   :  { %2161 = vmatprep.subr.bf16.mxu1 %v2160_v55  ;;  %v569_v51 = vld [vmem:[%s4272_s1 + $0x10e0] sm:$0xff]  ;;  %v574_v55 = vld [vmem:[%s4272_s1 + $0x1108] sm:$0xff] }
  0xfd   :  { %v1894_v59 = vpack.c.bf16 %v569_v51, %v565_v50  ;;  %v1370_v50 = vld [vmem:[%s4274_s3 + $0x108] sm:$0xff]  ;;  %v1355_v51 = vld [vmem:[%s4274_s3 + $0x90] sm:$0xff] }
  0xfe   :  { %1875 = vmatpush1.bf16.msra.mxu0 %v1874_v61  ;;  %v1896_v61 = vpack.c.bf16 %v578_v56, %v574_v55  ;;  %v28_v55 = vld [vmem:[%s4273_s0 + $0x40] sm:$0xff]  ;;  %v2204_v58 = vpack.c.bf16 %v1356_v52, %v1355_v51  ;;  %v1398_v51 = vld [vmem:[%s4274_s3 + $0x1e8] sm:$0xff] }
  0xff   :  { %2163 = vmatpush1.bf16.msra.mxu1 %v2162_v62  ;;  %1877 = vmatprep.subr.bf16.mxu0 %v1876_v63  ;;  %v573_v62 = vld [vmem:[%s4272_s1 + $0x1100] sm:$0xff] }
 0x100   :  { %2165 = vmatprep.subr.bf16.mxu1 %v2164_v3  ;;  %v577_v63 = vld [vmem:[%s4272_s1 + $0x1120] sm:$0xff]  ;;  %v582_v3 = vld [vmem:[%s4272_s1 + $0x1148] sm:$0xff] }
 0x101   :  { %v1898_v7 = vpack.c.bf16 %v577_v63, %v573_v62  ;;  %v1372_v63 = vld [vmem:[%s4274_s3 + $0x118] sm:$0xff] }
 0x102   :  { %1879 = vmatpush1.bf16.msra.mxu0 %v1878_v9  ;;  %v1900_v9 = vpack.c.bf16 %v586_v4, %v582_v3  ;;  %v1390_v3 = vld [vmem:[%s4274_s3 + $0x1a8] sm:$0xff] }
 0x103   :  { %2167 = vmatpush1.bf16.msra.mxu1 %v2166_v10  ;;  %1881 = vmatprep.subr.bf16.mxu0 %v1880_v11  ;;  %v581_v10 = vld [vmem:[%s4272_s1 + $0x1140] sm:$0xff] }
 0x104   :  { %2169 = vmatprep.subr.bf16.mxu1 %v2168_v15  ;;  %v585_v11 = vld [vmem:[%s4272_s1 + $0x1160] sm:$0xff]  ;;  %v590_v15 = vld [vmem:[%s4272_s1 + $0x1188] sm:$0xff] }
 0x105   :  { %905 = vmatmul.mubr.f32.vlgmr.msra.gmra.mrb[0].mxu0 %v26_v21  ;;  %v1902_v19 = vpack.c.bf16 %v585_v11, %v581_v10  ;;  %v2240_v10 = vpack.c.bf16 %v1390_v3, %v1389_v2  ;;  %v1374_v11 = vld [vmem:[%s4274_s3 + $0x128] sm:$0xff]  ;;  %v1400_v2 = vld [vmem:[%s4274_s3 + $0x1f8] sm:$0xff]  ;;  %v1351_v3 = vld [vmem:[%s4274_s3 + $0x70] sm:$0xff] }
 0x106   :  { %1883 = vmatpush1.bf16.msra.mxu0 %v1882_v22  ;;  %1260 = vmatmul.mubr.f32.vlgmr.msra.gmra.mrb[0].mxu1 %v26_v21  ;;  %v1904_v21 = vpack.c.bf16 %v594_v16, %v590_v15  ;;  %v589_v22 = vld [vmem:[%s4272_s1 + $0x1180] sm:$0xff]  ;;  %v1392_v15 = vld [vmem:[%s4274_s3 + $0x1b8] sm:$0xff] }
 0x107   :  { %2171 = vmatpush1.bf16.msra.mxu1 %v2170_v23  ;;  %1885 = vmatprep.subr.bf16.mxu0 %v1884_v24  ;;  %v593_v23 = vld [vmem:[%s4272_s1 + $0x11a0] sm:$0xff]  ;;  %v591_v24 = vld [vmem:[%s4272_s1 + $0x1190] sm:$0xff] }
 0x108   :  { %2173 = vmatprep.subr.bf16.mxu1 %v2172_v28  ;;  %975 = vmatprep.mubr.f32.mxu0 %v2285_v44  ;;  %v602_v28 = vld [vmem:[%s4272_s1 + $0x11e8] sm:$0xff]  ;;  %v1906_v31 = vpack.c.bf16 %v593_v23, %v589_v22  ;;  %v2194_v32 = vpack.c.bf16 %v595_v26, %v591_v24  ;;  %v2244_v22 = vpack.c.bf16 %v1392_v15, %v1391_v14  ;;  %v1376_v23 = vld [vmem:[%s4274_s3 + $0x138] sm:$0xff]  ;;  %v1361_v24 = vld [vmem:[%s4274_s3 + $0xc0] sm:$0xff] }
 0x109   :  { %1330 = vmatprep.mubr.f32.mxu1 %v2285_v44  ;;  %v1908_v33 = vpack.c.bf16 %v602_v28, %v598_v27  ;;  %v1393_v26 = vld [vmem:[%s4274_s3 + $0x1c0] sm:$0xff]  ;;  %v1394_v27 = vld [vmem:[%s4274_s3 + $0x1c8] sm:$0xff] }
 0x10a   :  { %1887 = vmatpush1.bf16.msra.mxu0 %v1886_v34  ;;  %v597_v34 = vld [vmem:[%s4272_s1 + $0x11c0] sm:$0xff] }
 0x10b   :  { %2175 = vmatpush1.bf16.msra.mxu1 %v2174_v35  ;;  %1889 = vmatprep.subr.bf16.mxu0 %v1888_v36  ;;  %v601_v35 = vld [vmem:[%s4272_s1 + $0x11e0] sm:$0xff]  ;;  %v599_v36 = vld [vmem:[%s4272_s1 + $0x11d0] sm:$0xff] }
 0x10c   :  { %2177 = vmatprep.subr.bf16.mxu1 %v2176_v40  ;;  %v1354_v40 = vld [vmem:[%s4274_s3 + $0x88] sm:$0xff]  ;;  %v1910_v43 = vpack.c.bf16 %v601_v35, %v597_v34  ;;  %v2198_v44 = vpack.c.bf16 %v603_v38, %v599_v36  ;;  %v2248_v34 = vpack.c.bf16 %v1394_v27, %v1393_v26  ;;  %v1363_v36 = vld [vmem:[%s4274_s3 + $0xd0] sm:$0xff] }
 0x10d   :  { %v2200_v45 = vpack.c.bf16 %v1354_v40, %v1353_v39  ;;  %v1378_v35 = vld [vmem:[%s4274_s3 + $0x148] sm:$0xff]  ;;  %v1395_v38 = vld [vmem:[%s4274_s3 + $0x1d0] sm:$0xff]  ;;  %v1396_v39 = vld [vmem:[%s4274_s3 + $0x1d8] sm:$0xff] }
 0x10e   :  { %1891 = vmatpush1.bf16.msra.mxu0 %v1890_v47  ;;  %v1338_v47 = vld [vmem:[%s4274_s3 + $0x8] sm:$0xff] }
 0x10f   :  { %2179 = vmatpush1.bf16.msra.mxu1 %v2178_v48  ;;  %1893 = vmatprep.subr.bf16.mxu0 %v1892_v49  ;;  %v1369_v48 = vld [vmem:[%s4274_s3 + $0x100] sm:$0xff]  ;;  %v2232_v49 = vpack.c.bf16 %v1386_v42, %v1385_v41  ;;  %v2202_v56 = vpack.c.bf16 %v1338_v47, %v1337_v46  ;;  %v2252_v46 = vpack.c.bf16 %v1396_v39, %v1395_v38  ;;  %v1380_v47 = vld [vmem:[%s4274_s3 + $0x158] sm:$0xff] }
 0x110   :  { %2181 = vmatprep.subr.bf16.mxu1 %v2180_v53  ;;  %v1387_v53 = vld [vmem:[%s4274_s3 + $0x190] sm:$0xff]  ;;  %v2234_v57 = vpack.c.bf16 %v1370_v50, %v1369_v48  ;;  %v1365_v48 = vld [vmem:[%s4274_s3 + $0xe0] sm:$0xff] }
 0x111   :  { %v2236_v62 = vpack.c.bf16 %v1388_v54, %v1387_v53  ;;  %v1397_v50 = vld [vmem:[%s4274_s3 + $0x1e0] sm:$0xff] }
 0x112   :  { %1895 = vmatpush1.bf16.msra.mxu0 %v1894_v59  ;;  %v1339_v59 = vld [vmem:[%s4274_s3 + $0x10] sm:$0xff] }
 0x113   :  { %2183 = vmatpush1.bf16.msra.mxu1 %v2182_v60  ;;  %1897 = vmatprep.subr.bf16.mxu0 %v1896_v61  ;;  %v1340_v60 = vld [vmem:[%s4274_s3 + $0x18] sm:$0xff]  ;;  %v1371_v61 = vld [vmem:[%s4274_s3 + $0x110] sm:$0xff] }
 0x114   :  { %2185 = vmatprep.subr.bf16.mxu1 %v2184_v1  ;;  %v1358_v1 = vld [vmem:[%s4274_s3 + $0xa8] sm:$0xff]  ;;  %v2206_v4 = vpack.c.bf16 %v1340_v60, %v1339_v59  ;;  %v2238_v5 = vpack.c.bf16 %v1372_v63, %v1371_v61  ;;  %v1368_v63 = vld [vmem:[%s4274_s3 + $0xf8] sm:$0xff] }
 0x115   :  { %v2208_v6 = vpack.c.bf16 %v1358_v1, %v1357_v0  ;;  %v1382_v59 = vld [vmem:[%s4274_s3 + $0x168] sm:$0xff]  ;;  %v1399_v0 = vld [vmem:[%s4274_s3 + $0x1f0] sm:$0xff] }
 0x116   :  { %1899 = vmatpush1.bf16.msra.mxu0 %v1898_v7  ;;  %v1341_v7 = vld [vmem:[%s4274_s3 + $0x20] sm:$0xff] }
 0x117   :  { %2187 = vmatpush1.bf16.msra.mxu1 %v2186_v8  ;;  %1901 = vmatprep.subr.bf16.mxu0 %v1900_v9  ;;  %v1342_v8 = vld [vmem:[%s4274_s3 + $0x28] sm:$0xff]  ;;  %v1373_v9 = vld [vmem:[%s4274_s3 + $0x120] sm:$0xff] }
 0x118   :  { %2189 = vmatprep.subr.bf16.mxu1 %v2188_v13  ;;  %v1360_v13 = vld [vmem:[%s4274_s3 + $0xb8] sm:$0xff]  ;;  %v2210_v16 = vpack.c.bf16 %v1342_v8, %v1341_v7  ;;  %v2242_v17 = vpack.c.bf16 %v1374_v11, %v1373_v9  ;;  %v1383_v7 = vld [vmem:[%s4274_s3 + $0x170] sm:$0xff] }
 0x119   :  { %v2212_v18 = vpack.c.bf16 %v1360_v13, %v1359_v12  ;;  %v1384_v8 = vld [vmem:[%s4274_s3 + $0x178] sm:$0xff]  ;;  %v605_v13 = vld [vmem:[%s4275_s2] sm:$0xf] }
 0x11a   :  { %1903 = vmatpush1.bf16.msra.mxu0 %v1902_v19  ;;  %v1343_v19 = vld [vmem:[%s4274_s3 + $0x30] sm:$0xff]  ;;  %v2262_v9 = vpack.c.bf16 %v1384_v8, %v1383_v7 }
 0x11b   :  { %2191 = vmatpush1.bf16.msra.mxu1 %v2190_v20  ;;  %1905 = vmatprep.subr.bf16.mxu0 %v1904_v21  ;;  %v1344_v20 = vld [vmem:[%s4274_s3 + $0x38] sm:$0xff]  ;;  %v1375_v21 = vld [vmem:[%s4274_s3 + $0x130] sm:$0xff] }
 0x11c   :  { %2193 = vmatprep.subr.bf16.mxu1 %v2192_v25  ;;  %v1362_v25 = vld [vmem:[%s4274_s3 + $0xc8] sm:$0xff]  ;;  %v2214_v28 = vpack.c.bf16 %v1344_v20, %v1343_v19  ;;  %v2246_v29 = vpack.c.bf16 %v1376_v23, %v1375_v21 }
 0x11d   :  { %v2216_v30 = vpack.c.bf16 %v1362_v25, %v1361_v24 }
 0x11e   :  { %1907 = vmatpush1.bf16.msra.mxu0 %v1906_v31  ;;  %v1345_v31 = vld [vmem:[%s4274_s3 + $0x40] sm:$0xff] }
 0x11f   :  { %2195 = vmatpush1.bf16.msra.mxu1 %v2194_v32  ;;  %1909 = vmatprep.subr.bf16.mxu0 %v1908_v33  ;;  %v1346_v32 = vld [vmem:[%s4274_s3 + $0x48] sm:$0xff]  ;;  %v1377_v33 = vld [vmem:[%s4274_s3 + $0x140] sm:$0xff] }
 0x120   :  { %2197 = vmatprep.subr.bf16.mxu1 %v2196_v37  ;;  %v1364_v37 = vld [vmem:[%s4274_s3 + $0xd8] sm:$0xff]  ;;  %v2218_v40 = vpack.c.bf16 %v1346_v32, %v1345_v31  ;;  %v2250_v41 = vpack.c.bf16 %v1378_v35, %v1377_v33  ;;  %v1553_v31 = vld [vmem:[%s4276_s4] ss:$0 sm:$0xff] }
 0x121   :  { %v2220_v42 = vpack.c.bf16 %v1364_v37, %v1363_v36 }
 0x122   :  { %1911 = vmatpush1.bf16.msra.mxu0 %v1910_v43  ;;  %v1347_v43 = vld [vmem:[%s4274_s3 + $0x50] sm:$0xff] }
 0x123   :  { %2199 = vmatpush1.bf16.msra.mxu1 %v2198_v44  ;;  %2201 = vmatprep.subr.bf16.mxu0 %v2200_v45  ;;  %v1348_v44 = vld [vmem:[%s4274_s3 + $0x58] sm:$0xff]  ;;  %v1379_v45 = vld [vmem:[%s4274_s3 + $0x150] sm:$0xff] }
 0x124   :  { %2233 = vmatprep.subr.bf16.mxu1 %v2232_v49  ;;  %v1366_v49 = vld [vmem:[%s4274_s3 + $0xe8] sm:$0xff]  ;;  %v2222_v52 = vpack.c.bf16 %v1348_v44, %v1347_v43  ;;  %v2254_v53 = vpack.c.bf16 %v1380_v47, %v1379_v45 }
 0x125   :  { %976 = vmatmul.mubr.f32.vlgmr.msra.gmra.mrb[0].mxu0 %v28_v55  ;;  %v2224_v54 = vpack.c.bf16 %v1366_v49, %v1365_v48 }
 0x126   :  { %1331 = vmatmul.mubr.f32.vlgmr.msra.gmra.mrb[0].mxu1 %v28_v55  ;;  %2203 = vmatpush3.bf16.msra.mxu0 %v2202_v56  ;;  %v1349_v55 = vld [vmem:[%s4274_s3 + $0x60] sm:$0xff]  ;;  %v1350_v56 = vld [vmem:[%s4274_s3 + $0x68] sm:$0xff] }
 0x127   :  { %2235 = vmatpush3.bf16.msra.mxu1 %v2234_v57  ;;  %2205 = vmatprep.subr.bf16.mxu0 %v2204_v58  ;;  %v2256_v57 = vpack.c.bf16 %v1398_v51, %v1397_v50  ;;  %v1381_v58 = vld [vmem:[%s4274_s3 + $0x160] sm:$0xff]  ;;  %v2226_v60 = vpack.c.bf16 %v1350_v56, %v1349_v55 }
 0x128   :  { %2237 = vmatprep.subr.bf16.mxu1 %v2236_v62  ;;  %v2258_v61 = vpack.c.bf16 %v1382_v59, %v1381_v58  ;;  %v1367_v62 = vld [vmem:[%s4274_s3 + $0xf0] sm:$0xff] }
 0x129   :  { %v2228_v1 = vpack.c.bf16 %v1368_v63, %v1367_v62 }
 0x12a   :  { %2207 = vmatpush3.bf16.msra.mxu0 %v2206_v4  ;;  %v1352_v4 = vld [vmem:[%s4274_s3 + $0x78] sm:$0xff] }
 0x12b   :  { %2239 = vmatpush3.bf16.msra.mxu1 %v2238_v5  ;;  %2209 = vmatprep.subr.bf16.mxu0 %v2208_v6  ;;  %v2260_v5 = vpack.c.bf16 %v1400_v2, %v1399_v0  ;;  %v2230_v6 = vpack.c.bf16 %v1352_v4, %v1351_v3 }
 0x12c   :  { %2241 = vmatprep.subr.bf16.mxu1 %v2240_v10  ;;  %v607_v10 = vlaneseq }
 0x12e   :  { %2211 = vmatpush3.bf16.msra.mxu0 %v2210_v16  ;;  %v608_v11 = vshrl.u32 %v607_v10, 7 }
 0x12f   :  { %2243 = vmatpush3.bf16.msra.mxu1 %v2242_v17  ;;  %2213 = vmatprep.subr.bf16.mxu0 %v2212_v18 }
 0x130   :  { %2245 = vmatprep.subr.bf16.mxu1 %v2244_v22  ;;  %v613_v12 = vsub.s32 1, %v608_v11  ;;  %v609_v14 = vsub.s32 0, %v608_v11  ;;  %v621_v15 = vsub.s32 3, %v608_v11  ;;  %v617_v16 = vsub.s32 2, %v608_v11 }
 0x132   :  { %2215 = vmatpush3.bf16.msra.mxu0 %v2214_v28  ;;  %v614_v17 = vrot.slane %v605_v13, %v613_v12  ;;  %v610_v18 = vrot.slane %v605_v13, %v609_v14  ;;  %v622_v19 = vrot.slane %v605_v13, %v621_v15  ;;  %v618_v21 = vrot.slane %v605_v13, %v617_v16 }
 0x133   :  { %2247 = vmatpush3.bf16.msra.mxu1 %v2246_v29  ;;  %2217 = vmatprep.subr.bf16.mxu0 %v2216_v30 }
 0x134   :  { %2249 = vmatprep.subr.bf16.mxu1 %v2248_v34 }
 0x136   :  { %2219 = vmatpush3.bf16.msra.mxu0 %v2218_v40 }
 0x137   :  { %2251 = vmatpush3.bf16.msra.mxu1 %v2250_v41  ;;  %2221 = vmatprep.subr.bf16.mxu0 %v2220_v42 }
 0x138   :  { %2253 = vmatprep.subr.bf16.mxu1 %v2252_v46 }
 0x13a   :  { %2223 = vmatpush3.bf16.msra.mxu0 %v2222_v52 }
 0x13b   :  { %2255 = vmatpush3.bf16.msra.mxu1 %v2254_v53  ;;  %2225 = vmatprep.subr.bf16.mxu0 %v2224_v54 }
 0x13c   :  { %2257 = vmatprep.subr.bf16.mxu1 %v2256_v57 }
 0x13e   :  { %2227 = vmatpush3.bf16.msra.mxu0 %v2226_v60 }
 0x13f   :  { %2259 = vmatpush3.bf16.msra.mxu1 %v2258_v61  ;;  %2229 = vmatprep.subr.bf16.mxu0 %v2228_v1 }
 0x140   :  { %2261 = vmatprep.subr.bf16.mxu1 %v2260_v5 }
 0x142   :  { %2231 = vmatpush3.bf16.msra.mxu0 %v2230_v6 }
 0x143   :  { %2263 = vmatpush3.bf16.msra.mxu1 %v2262_v9 }
 0x1f8   :  { %v977_v20 = vpop.f32.mrb[0].mxu0 }
 0x1f9   :  { %v1332_v22 = vpop.f32.mrb[0].mxu1  ;;  %v979_v23 = vpop.f32.mrb[1].mxu0  ;;  %v2264_v26 = vadd.f32 %v977_v20, %v610_v18 }
 0x1fa   :  { %v2265_v24 = vadd.f32 %v979_v23, %v614_v17  ;;  %v1334_v25 = vpop.f32.mrb[1].mxu1  ;;  %v2266_v28 = vadd.f32 %v1332_v22, %v618_v21 }
 0x1fb   :  { %v2267_v27 = vadd.f32 %v1334_v25, %v622_v19 }
 0x1fc   :  { %1472 = vmatprep.mubr.f32.mxu0 %v2265_v24 }
 0x1fd   :  { %1542 = vmatprep.mubr.f32.mxu1 %v2267_v27  ;;  %1473 = vmatmul.mubr.f32.vlgmr.msra.gmra.mrb[2].mxu0 %v2264_v26 }
 0x1fe   :  { %1543 = vmatmul.mubr.f32.vlgmr.msra.gmra.mrb[2].mxu1 %v2266_v28 }
 0x2d0   :  { %v1586_v29 = vpop.f32.mrb[2].mxu0 }
 0x2d1   :  { %v1621_v30 = vpop.f32.mrb[2].mxu1  ;;  %v1587_v32 = vpop.f32.mrb[3].mxu0 }
 0x2d2   :  { %v1588_v33 = vadd.f32 %v1587_v32, %v1586_v29  ;;  %v1622_v34 = vpop.f32.mrb[3].mxu1 }
 0x2d3   :  { %v1623_v35 = vadd.f32 %v1622_v34, %v1621_v30 }
 0x2d4   :  { %v1475_v36 = vadd.f32 %v1588_v33, %v1553_v31 }
 0x2d6   :  { %v1545_v37 = vadd.f32 %v1623_v35, %v1475_v36 }
 0x2d8   :  { %1548 = vst [vmem:[%s4277_s5] sm:$0xff] %v1545_v37 }

</bundles_post_ra>
